<compile_context>
chip_gen: v7x
topology: tpu7x:2x2x1
jax: 0.10.0
libtpu: 0.0.40
codegen_flags: <defaults>
</compile_context>

<pallas_src>
import math
from functools import partial

import jax
import jax.numpy as jnp
from jax.experimental import pallas as pl
from jax.experimental.pallas import tpu as pltpu


MXU_DTYPE = jnp.bfloat16   # MXU operand dtype; accumulation is f32.
LN_EPS = 1e-5              # PyTorch LayerNorm default eps.


# ----------------------------- in-kernel helpers -----------------------------

def _layernorm(x, w, b, eps=LN_EPS):
    """x: (M, D) f32; w/b: (1, D) f32."""
    mu = jnp.mean(x, axis=-1, keepdims=True)
    xc = x - mu
    var = jnp.mean(xc * xc, axis=-1, keepdims=True)
    return xc * jax.lax.rsqrt(var + eps) * w + b


def _dense(x, w, b, relu=False):
    """x: (M, K) f32; w: (K, N) bf16; b: (1, N) f32.  bf16 MXU, f32 accumulate."""
    y = jnp.dot(x.astype(MXU_DTYPE), w, preferred_element_type=jnp.float32) + b
    if relu:
        y = jnp.maximum(y, 0.0)
    return y


def _proj_heads(x, w_heads, b_heads):
    """Per-head projection, heads kept on a leading axis (no lane slicing).

    x: (S, D) f32; w_heads: (H, D, Dh) bf16; b_heads: (H, 1, Dh) f32.
    Returns (H, S, Dh) f32.  The per-head matmuls are plain 2-D dots (static
    leading-axis weight indexing is free); the stack is along a new major axis.
    """
    xm = x.astype(MXU_DTYPE)
    H = w_heads.shape[0]
    hs = [jnp.dot(xm, w_heads[h], preferred_element_type=jnp.float32)
          for h in range(H)]
    return jnp.stack(hs, axis=0) + b_heads


def _mha(xq, xkv, wq, wk, wv, bq, bk, bv, wo, bo, scale, causal_bias):
    """Multi-head attention for ONE batch element, heads as a batched axis.

    xq: (Sq, D), xkv: (Sk, D) f32.
    wq/wk/wv: (H, D, Dh) bf16; bq/bk/bv: (H, 1, Dh) f32.
    wo: (H, Dh, D) bf16 (head-major rows of out_proj^T); bo: (1, D) f32.
    Scores / P·V / out-projection are single head-batched dot_generals
    (canonical 'bqd,bkd->bqk' / 'bqk,bkd->bqd' form) — no lane-offset slicing,
    no lane concatenation; per-head out-projection contributions are summed.
    """
    q = _proj_heads(xq, wq, bq)                         # (H, Sq, Dh) f32
    k = _proj_heads(xkv, wk, bk)                        # (H, Sk, Dh) f32
    v = _proj_heads(xkv, wv, bv)                        # (H, Sk, Dh) f32

    s = jnp.einsum('hqe,hke->hqk', q.astype(MXU_DTYPE), k.astype(MXU_DTYPE),
                   preferred_element_type=jnp.float32) * scale
    if causal_bias is not None:
        s = s + causal_bias                             # (Sq, Sk) bcast over H

    m = jnp.max(s, axis=-1, keepdims=True)              # softmax in f32
    p = jnp.exp(s - m)
    denom = jnp.sum(p, axis=-1, keepdims=True)
    p = p * pl.reciprocal(denom, approx=False)          # exact reciprocal

    a = jnp.einsum('hqk,hke->hqe', p.astype(MXU_DTYPE), v.astype(MXU_DTYPE),
                   preferred_element_type=jnp.float32)  # (H, Sq, Dh)
    o = jnp.einsum('hqe,hed->hqd', a.astype(MXU_DTYPE), wo,
                   preferred_element_type=jnp.float32)  # (H, Sq, D)
    return jnp.sum(o, axis=0) + bo                      # (Sq, D)


# ----------------------------- fused whole-model kernel -----------------------------

def _transformer_kernel(x_ref, y_ref, *refs, nhead, n_enc, n_dec):
    (e_wqkv, e_bqkv, e_wo, e_bo, e_ln1,
     e_ffw1, e_ffb1, e_ffw2, e_ffb2, e_ln2, e_lnf,
     d_sa_wqkv, d_sa_bqkv, d_sa_wo, d_sa_bo, d_ln1,
     d_ca_wq, d_ca_bq, d_ca_wkv, d_ca_bkv, d_ca_wo, d_ca_bo, d_ln2,
     d_ffw1, d_ffb1, d_ffw2, d_ffb2, d_ln3, d_lnf,
     out_w, out_b, o_ref) = refs

    H = nhead
    D = x_ref.shape[-1]
    Dh = D // H
    scale = 1.0 / math.sqrt(Dh)

    x = x_ref[0].astype(jnp.float32)                    # (S, D)
    y = y_ref[0].astype(jnp.float32)                    # (T, D)
    T = y.shape[0]

    # causal (target) mask built in-kernel with iota — no mask DMA.
    row = jax.lax.broadcasted_iota(jnp.int32, (T, T), 0)
    col = jax.lax.broadcasted_iota(jnp.int32, (T, T), 1)
    causal = jnp.where(col <= row, 0.0, -1e30).astype(jnp.float32)

    # ---------------- encoder stack (activations stay resident in VMEM) ----------------
    h = x
    for l in range(n_enc):                              # static unroll, L small
        w = e_wqkv[l]                                   # (3H, D, Dh) bf16
        b = e_bqkv[l]                                   # (3H, 1, Dh) f32
        a = _mha(h, h, w[:H], w[H:2 * H], w[2 * H:],
                 b[:H], b[H:2 * H], b[2 * H:],
                 e_wo[l], e_bo[l], scale, None)
        ln = e_ln1[l]
        h = _layernorm(h + a, ln[0], ln[1])             # residual + LN fused
        f = _dense(h, e_ffw1[l], e_ffb1[l], relu=True)  # FF1 + ReLU
        f = _dense(f, e_ffw2[l], e_ffb2[l])             # FF2
        ln = e_ln2[l]
        h = _layernorm(h + f, ln[0], ln[1])
    mem = _layernorm(h, e_lnf[0], e_lnf[1])             # encoder-stack final norm

    # ---------------- decoder stack ----------------
    g = y
    for l in range(n_dec):
        # masked self-attention
        w = d_sa_wqkv[l]
        b = d_sa_bqkv[l]
        a = _mha(g, g, w[:H], w[H:2 * H], w[2 * H:],
                 b[:H], b[H:2 * H], b[2 * H:],
                 d_sa_wo[l], d_sa_bo[l], scale, causal)
        ln = d_ln1[l]
        g = _layernorm(g + a, ln[0], ln[1])

        # cross-attention over encoder memory
        wkv = d_ca_wkv[l]                               # (2H, D, Dh)
        bkv = d_ca_bkv[l]                               # (2H, 1, Dh)
        c = _mha(g, mem, d_ca_wq[l], wkv[:H], wkv[H:],
                 d_ca_bq[l], bkv[:H], bkv[H:],
                 d_ca_wo[l], d_ca_bo[l], scale, None)
        ln = d_ln2[l]
        g = _layernorm(g + c, ln[0], ln[1])

        # feed-forward
        f = _dense(g, d_ffw1[l], d_ffb1[l], relu=True)
        f = _dense(f, d_ffw2[l], d_ffb2[l])
        ln = d_ln3[l]
        g = _layernorm(g + f, ln[0], ln[1])
    g = _layernorm(g, d_lnf[0], d_lnf[1])               # decoder-stack final norm

    # ---------------- output projection (vocab padded to 128 → lane-dense store) ----------------
    o_ref[0] = _dense(g, out_w[...], out_b[...]).astype(o_ref.dtype)


# ----------------------------- pallas_call wrapper -----------------------------

WEIGHT_KEYS = (
    "e_wqkv", "e_bqkv", "e_wo", "e_bo", "e_ln1",
    "e_ffw1", "e_ffb1", "e_ffw2", "e_ffb2", "e_ln2", "e_lnf",
    "d_sa_wqkv", "d_sa_bqkv", "d_sa_wo", "d_sa_bo", "d_ln1",
    "d_ca_wq", "d_ca_bq", "d_ca_wkv", "d_ca_bkv", "d_ca_wo", "d_ca_bo", "d_ln2",
    "d_ffw1", "d_ffb1", "d_ffw2", "d_ffb2", "d_ln3", "d_lnf",
    "out_w", "out_b",
)


def _replicated_spec(a):
    """Whole-array (replicated) BlockSpec for a stacked weight tensor."""
    origin = (0,) * a.ndim
    return pl.BlockSpec(a.shape, lambda n: origin)


def transformer_stack(x, y, params):
    """x: (N, S, D) src emb+PE; y: (N, T, D) tgt emb+PE.  Returns (N, T, Vp) logits."""
    N, S, D = x.shape
    T = y.shape[1]
    Vp = params["out_w"].shape[-1]
    nhead = params["e_wqkv"].shape[1] // 3
    n_enc = params["e_wqkv"].shape[0]
    n_dec = params["d_sa_wqkv"].shape[0]
    weights = [params[k] for k in WEIGHT_KEYS]
    return pl.pallas_call(
        partial(_transformer_kernel, nhead=nhead, n_enc=n_enc, n_dec=n_dec),
        grid=(N,),
        in_specs=[pl.BlockSpec((1, S, D), lambda n: (n, 0, 0)),
                  pl.BlockSpec((1, T, D), lambda n: (n, 0, 0))]
                 + [_replicated_spec(w) for w in weights],
        out_specs=pl.BlockSpec((1, T, Vp), lambda n: (n, 0, 0)),
        out_shape=jax.ShapeDtypeStruct((N, T, Vp), jnp.float32),
        compiler_params=pltpu.CompilerParams(
            dimension_semantics=("parallel",)),      # both v7x TCs get a batch element
    )(x, y, *weights)


# ----------------------------- model glue (plain JAX) -----------------------------

def make_pe(max_len, d_model):
    position = jnp.arange(max_len, dtype=jnp.float32)[:, None]
    div_term = jnp.exp(jnp.arange(0, d_model, 2, dtype=jnp.float32)
                       * (-math.log(10000.0) / d_model))
    pe = jnp.zeros((max_len, d_model), jnp.float32)
    pe = pe.at[:, 0::2].set(jnp.sin(position * div_term))
    pe = pe.at[:, 1::2].set(jnp.cos(position * div_term))
    return pe                                            # (max_len, d_model)


def transformer_forward(params, src, tgt):
    """src/tgt: (seq, batch) int32 (PyTorch seq-first).  Returns (T, N, vocab) f32."""
    D = params["src_emb"].shape[1]
    V = params["tgt_emb"].shape[0]
    sqrt_d = math.sqrt(D)
    S = src.shape[0]
    T = tgt.shape[0]
    # TODO(synk): token-embedding gather + positional-encoding add (and identity
    # dropout) stay in plain JAX — tiny data-dependent gathers with no useful
    # Pallas formulation at this size.  Internal layout is batch-first.
    x = params["src_emb"][src.T] * sqrt_d + params["pe"][None, :S, :]    # (N,S,D)
    y = params["tgt_emb"][tgt.T] * sqrt_d + params["pe"][None, :T, :]    # (N,T,D)
    logits = transformer_stack(x, y, params)                             # (N,T,Vp)
    # Slice off vocab padding and return PyTorch's (T, N, V) layout (tiny tensors).
    return logits[:, :, :V].transpose(1, 0, 2)


# ----------------------------- parameter init -----------------------------

def xavier(key, shape):
    limit = math.sqrt(6.0 / (shape[0] + shape[1]))
    return jax.random.uniform(key, shape, jnp.float32, -limit, limit)


def init_params(key, *, d_model, nhead, d_ff, n_enc, n_dec,
                src_vocab, tgt_vocab, max_len):
    D, H, F = d_model, nhead, d_ff
    Dh = D // H
    Vp = ((tgt_vocab + 127) // 128) * 128       # lane-dense vocab, padded once here

    keys = jax.random.split(key, 3 + n_enc + n_dec)
    k_src, k_tgt, k_out = keys[0], keys[1], keys[2]
    enc_keys = keys[3:3 + n_enc]
    dec_keys = keys[3 + n_enc:]

    def qkv_heads(k, n_mats):
        """(n_mats*D, D) xavier in-proj → head-major (n_mats*H, D, Dh) bf16 (x @ W^T per head)."""
        w = xavier(k, (n_mats * D, D))
        w = w.reshape(n_mats, H, Dh, D).transpose(0, 1, 3, 2)
        return w.reshape(n_mats * H, D, Dh).astype(MXU_DTYPE)

    def out_heads(k):
        """(D, D) xavier out-proj → head-major rows of W^T: (H, Dh, D) bf16."""
        return xavier(k, (D, D)).T.reshape(H, Dh, D).astype(MXU_DTYPE)

    def ln_stack(L):
        return jnp.concatenate([jnp.ones((L, 1, 1, D), jnp.float32),
                                jnp.zeros((L, 1, 1, D), jnp.float32)], axis=1)

    p = {}
    # --- encoder stack (stacked over layers on axis 0) ---
    e_wqkv, e_wo, e_w1, e_w2 = [], [], [], []
    for k in enc_keys:
        k1, k2, k3, k4 = jax.random.split(k, 4)
        e_wqkv.append(qkv_heads(k1, 3))
        e_wo.append(out_heads(k2))
        e_w1.append(xavier(k3, (F, D)).T.astype(MXU_DTYPE))
        e_w2.append(xavier(k4, (D, F)).T.astype(MXU_DTYPE))
    p["e_wqkv"] = jnp.stack(e_wqkv)                           # (Le, 3H, D, Dh) bf16
    p["e_bqkv"] = jnp.zeros((n_enc, 3 * H, 1, Dh), jnp.float32)
    p["e_wo"] = jnp.stack(e_wo)                               # (Le, H, Dh, D) bf16
    p["e_bo"] = jnp.zeros((n_enc, 1, D), jnp.float32)
    p["e_ln1"] = ln_stack(n_enc)                              # (Le, 2, 1, D)
    p["e_ffw1"] = jnp.stack(e_w1)                             # (Le, D, F) bf16
    p["e_ffb1"] = jnp.zeros((n_enc, 1, F), jnp.float32)
    p["e_ffw2"] = jnp.stack(e_w2)                             # (Le, F, D) bf16
    p["e_ffb2"] = jnp.zeros((n_enc, 1, D), jnp.float32)
    p["e_ln2"] = ln_stack(n_enc)
    p["e_lnf"] = ln_stack(1)[0]                               # (2, 1, D)

    # --- decoder stack ---
    d_sa_wqkv, d_sa_wo, d_ca_wq, d_ca_wkv, d_ca_wo, d_w1, d_w2 = ([] for _ in range(7))
    for k in dec_keys:
        k1, k2, k3, k4, k5, k6, k7 = jax.random.split(k, 7)
        d_sa_wqkv.append(qkv_heads(k1, 3))
        d_sa_wo.append(out_heads(k2))
        d_ca_wq.append(qkv_heads(k3, 1))
        d_ca_wkv.append(qkv_heads(k4, 2))
        d_ca_wo.append(out_heads(k5))
        d_w1.append(xavier(k6, (F, D)).T.astype(MXU_DTYPE))
        d_w2.append(xavier(k7, (D, F)).T.astype(MXU_DTYPE))
    p["d_sa_wqkv"] = jnp.stack(d_sa_wqkv)                     # (Ld, 3H, D, Dh)
    p["d_sa_bqkv"] = jnp.zeros((n_dec, 3 * H, 1, Dh), jnp.float32)
    p["d_sa_wo"] = jnp.stack(d_sa_wo)
    p["d_sa_bo"] = jnp.zeros((n_dec, 1, D), jnp.float32)
    p["d_ln1"] = ln_stack(n_dec)
    p["d_ca_wq"] = jnp.stack(d_ca_wq)                         # (Ld, H, D, Dh)
    p["d_ca_bq"] = jnp.zeros((n_dec, H, 1, Dh), jnp.float32)
    p["d_ca_wkv"] = jnp.stack(d_ca_wkv)                       # (Ld, 2H, D, Dh)
    p["d_ca_bkv"] = jnp.zeros((n_dec, 2 * H, 1, Dh), jnp.float32)
    p["d_ca_wo"] = jnp.stack(d_ca_wo)
    p["d_ca_bo"] = jnp.zeros((n_dec, 1, D), jnp.float32)
    p["d_ln2"] = ln_stack(n_dec)
    p["d_ffw1"] = jnp.stack(d_w1)
    p["d_ffb1"] = jnp.zeros((n_dec, 1, F), jnp.float32)
    p["d_ffw2"] = jnp.stack(d_w2)
    p["d_ffb2"] = jnp.zeros((n_dec, 1, D), jnp.float32)
    p["d_ln3"] = ln_stack(n_dec)
    p["d_lnf"] = ln_stack(1)[0]

    # --- output head: padded once here (outside jit) to a 128-lane multiple ---
    ow = xavier(k_out, (tgt_vocab, D)).T                      # (D, V)
    p["out_w"] = jnp.pad(ow, ((0, 0), (0, Vp - tgt_vocab))).astype(MXU_DTYPE)
    p["out_b"] = jnp.zeros((1, Vp), jnp.float32)

    # --- embeddings + sinusoidal positional encoding (plain JAX side) ---
    # NOTE: the reference's _reset_parameters applies xavier_uniform_ to the full
    # embedding tables, overwriting the padding_idx row, so no zero row is kept.
    p["src_emb"] = xavier(k_src, (src_vocab, D))
    p["tgt_emb"] = xavier(k_tgt, (tgt_vocab, D))
    p["pe"] = make_pe(max_len, D)
    return p


# ----------------------------- main -----------------------------

if __name__ == "__main__":
    # small, TPU-friendly config consistent with the module's forward
    d_model, nhead, d_ff = 32, 4, 64
    n_enc, n_dec = 2, 2
    src_vocab = tgt_vocab = 100
    max_len = 42
    S, T, N = 8, 8, 2          # src seq, tgt seq, batch

    key = jax.random.PRNGKey(0)
    kp, ks, kt = jax.random.split(key, 3)
    params = init_params(kp, d_model=d_model, nhead=nhead, d_ff=d_ff,
                         n_enc=n_enc, n_dec=n_dec, src_vocab=src_vocab,
                         tgt_vocab=tgt_vocab, max_len=max_len)

    src = jax.random.randint(ks, (S, N), 1, src_vocab, dtype=jnp.int32)
    tgt = jax.random.randint(kt, (T, N), 1, tgt_vocab, dtype=jnp.int32)

    fwd = jax.jit(transformer_forward)
    out = jax.block_until_ready(fwd(params, src, tgt))

    assert out.shape == (T, N, tgt_vocab), out.shape
    assert bool(jnp.all(jnp.isfinite(out)))
    print("KERNEL_OK")
</pallas_src>

<mosaic_0001>
module attributes {stable_mosaic.version = 11 : i64} {
  func.func @_transformer_kernel(%arg0: i32, %arg1: memref<1x8x32xf32, #tpu.memory_space<vmem>>, %arg2: memref<1x8x32xf32, #tpu.memory_space<vmem>>, %arg3: memref<2x12x32x8xbf16, #tpu.memory_space<vmem>>, %arg4: memref<2x12x1x8xf32, #tpu.memory_space<vmem>>, %arg5: memref<2x4x8x32xbf16, #tpu.memory_space<vmem>>, %arg6: memref<2x1x32xf32, #tpu.memory_space<vmem>>, %arg7: memref<2x2x1x32xf32, #tpu.memory_space<vmem>>, %arg8: memref<2x32x64xbf16, #tpu.memory_space<vmem>>, %arg9: memref<2x1x64xf32, #tpu.memory_space<vmem>>, %arg10: memref<2x64x32xbf16, #tpu.memory_space<vmem>>, %arg11: memref<2x1x32xf32, #tpu.memory_space<vmem>>, %arg12: memref<2x2x1x32xf32, #tpu.memory_space<vmem>>, %arg13: memref<2x1x32xf32, #tpu.memory_space<vmem>>, %arg14: memref<2x12x32x8xbf16, #tpu.memory_space<vmem>>, %arg15: memref<2x12x1x8xf32, #tpu.memory_space<vmem>>, %arg16: memref<2x4x8x32xbf16, #tpu.memory_space<vmem>>, %arg17: memref<2x1x32xf32, #tpu.memory_space<vmem>>, %arg18: memref<2x2x1x32xf32, #tpu.memory_space<vmem>>, %arg19: memref<2x4x32x8xbf16, #tpu.memory_space<vmem>>, %arg20: memref<2x4x1x8xf32, #tpu.memory_space<vmem>>, %arg21: memref<2x8x32x8xbf16, #tpu.memory_space<vmem>>, %arg22: memref<2x8x1x8xf32, #tpu.memory_space<vmem>>, %arg23: memref<2x4x8x32xbf16, #tpu.memory_space<vmem>>, %arg24: memref<2x1x32xf32, #tpu.memory_space<vmem>>, %arg25: memref<2x2x1x32xf32, #tpu.memory_space<vmem>>, %arg26: memref<2x32x64xbf16, #tpu.memory_space<vmem>>, %arg27: memref<2x1x64xf32, #tpu.memory_space<vmem>>, %arg28: memref<2x64x32xbf16, #tpu.memory_space<vmem>>, %arg29: memref<2x1x32xf32, #tpu.memory_space<vmem>>, %arg30: memref<2x2x1x32xf32, #tpu.memory_space<vmem>>, %arg31: memref<2x1x32xf32, #tpu.memory_space<vmem>>, %arg32: memref<32x128xbf16, #tpu.memory_space<vmem>>, %arg33: memref<1x128xf32, #tpu.memory_space<vmem>>, %arg34: memref<1x8x128xf32, #tpu.memory_space<vmem>>) attributes {dimension_semantics = [#tpu.dimension_semantics<parallel>], iteration_bounds = array<i64: 2>, scalar_prefetch = 0 : i64, scratch_operands = 0 : i64, tpu.core_type = #tpu.core_type<tc>, window_params = [{transform_indices = @transform_0, window_bounds = array<i64: 1, 8, 32>}, {transform_indices = @transform_1, window_bounds = array<i64: 1, 8, 32>}, {pipeline_mode = #tpu.pipeline_mode<synchronous>, transform_indices = @transform_2, window_bounds = array<i64: 2, 12, 32, 8>}, {pipeline_mode = #tpu.pipeline_mode<synchronous>, transform_indices = @transform_3, window_bounds = array<i64: 2, 12, 1, 8>}, {pipeline_mode = #tpu.pipeline_mode<synchronous>, transform_indices = @transform_4, window_bounds = array<i64: 2, 4, 8, 32>}, {pipeline_mode = #tpu.pipeline_mode<synchronous>, transform_indices = @transform_5, window_bounds = array<i64: 2, 1, 32>}, {pipeline_mode = #tpu.pipeline_mode<synchronous>, transform_indices = @transform_6, window_bounds = array<i64: 2, 2, 1, 32>}, {pipeline_mode = #tpu.pipeline_mode<synchronous>, transform_indices = @transform_7, window_bounds = array<i64: 2, 32, 64>}, {pipeline_mode = #tpu.pipeline_mode<synchronous>, transform_indices = @transform_8, window_bounds = array<i64: 2, 1, 64>}, {pipeline_mode = #tpu.pipeline_mode<synchronous>, transform_indices = @transform_9, window_bounds = array<i64: 2, 64, 32>}, {pipeline_mode = #tpu.pipeline_mode<synchronous>, transform_indices = @transform_10, window_bounds = array<i64: 2, 1, 32>}, {pipeline_mode = #tpu.pipeline_mode<synchronous>, transform_indices = @transform_11, window_bounds = array<i64: 2, 2, 1, 32>}, {pipeline_mode = #tpu.pipeline_mode<synchronous>, transform_indices = @transform_12, window_bounds = array<i64: 2, 1, 32>}, {pipeline_mode = #tpu.pipeline_mode<synchronous>, transform_indices = @transform_13, window_bounds = array<i64: 2, 12, 32, 8>}, {pipeline_mode = #tpu.pipeline_mode<synchronous>, transform_indices = @transform_14, window_bounds = array<i64: 2, 12, 1, 8>}, {pipeline_mode = #tpu.pipeline_mode<synchronous>, transform_indices = @transform_15, window_bounds = array<i64: 2, 4, 8, 32>}, {pipeline_mode = #tpu.pipeline_mode<synchronous>, transform_indices = @transform_16, window_bounds = array<i64: 2, 1, 32>}, {pipeline_mode = #tpu.pipeline_mode<synchronous>, transform_indices = @transform_17, window_bounds = array<i64: 2, 2, 1, 32>}, {pipeline_mode = #tpu.pipeline_mode<synchronous>, transform_indices = @transform_18, window_bounds = array<i64: 2, 4, 32, 8>}, {pipeline_mode = #tpu.pipeline_mode<synchronous>, transform_indices = @transform_19, window_bounds = array<i64: 2, 4, 1, 8>}, {pipeline_mode = #tpu.pipeline_mode<synchronous>, transform_indices = @transform_20, window_bounds = array<i64: 2, 8, 32, 8>}, {pipeline_mode = #tpu.pipeline_mode<synchronous>, transform_indices = @transform_21, window_bounds = array<i64: 2, 8, 1, 8>}, {pipeline_mode = #tpu.pipeline_mode<synchronous>, transform_indices = @transform_22, window_bounds = array<i64: 2, 4, 8, 32>}, {pipeline_mode = #tpu.pipeline_mode<synchronous>, transform_indices = @transform_23, window_bounds = array<i64: 2, 1, 32>}, {pipeline_mode = #tpu.pipeline_mode<synchronous>, transform_indices = @transform_24, window_bounds = array<i64: 2, 2, 1, 32>}, {pipeline_mode = #tpu.pipeline_mode<synchronous>, transform_indices = @transform_25, window_bounds = array<i64: 2, 32, 64>}, {pipeline_mode = #tpu.pipeline_mode<synchronous>, transform_indices = @transform_26, window_bounds = array<i64: 2, 1, 64>}, {pipeline_mode = #tpu.pipeline_mode<synchronous>, transform_indices = @transform_27, window_bounds = array<i64: 2, 64, 32>}, {pipeline_mode = #tpu.pipeline_mode<synchronous>, transform_indices = @transform_28, window_bounds = array<i64: 2, 1, 32>}, {pipeline_mode = #tpu.pipeline_mode<synchronous>, transform_indices = @transform_29, window_bounds = array<i64: 2, 2, 1, 32>}, {pipeline_mode = #tpu.pipeline_mode<synchronous>, transform_indices = @transform_30, window_bounds = array<i64: 2, 1, 32>}, {pipeline_mode = #tpu.pipeline_mode<synchronous>, transform_indices = @transform_31, window_bounds = array<i64: 32, 128>}, {pipeline_mode = #tpu.pipeline_mode<synchronous>, transform_indices = @transform_32, window_bounds = array<i64: 1, 128>}, {transform_indices = @transform_33, window_bounds = array<i64: 1, 8, 128>}]} {
    %c0 = arith.constant 0 : index
    %c0_0 = arith.constant 0 : index
    %c0_1 = arith.constant 0 : index
    %0 = vector.load %arg1[%c0, %c0_0, %c0_1] : memref<1x8x32xf32, #tpu.memory_space<vmem>>, vector<1x8x32xf32>
    %1 = vector.shape_cast %0 : vector<1x8x32xf32> to vector<8x32xf32>
    %c0_2 = arith.constant 0 : index
    %c0_3 = arith.constant 0 : index
    %c0_4 = arith.constant 0 : index
    %2 = vector.load %arg2[%c0_2, %c0_3, %c0_4] : memref<1x8x32xf32, #tpu.memory_space<vmem>>, vector<1x8x32xf32>
    %3 = vector.shape_cast %2 : vector<1x8x32xf32> to vector<8x32xf32>
    %4 = tpu.iota {dimensions = array<i32: 0>} : vector<8x8xi32>
    %5 = tpu.iota {dimensions = array<i32: 1>} : vector<8x8xi32>
    %6 = arith.cmpi sle, %5, %4 : vector<8x8xi32>
    %cst = arith.constant 0.000000e+00 : f32
    %cst_5 = arith.constant -1.000000e+30 : f32
    %7 = vector.broadcast %cst : f32 to vector<8x8xf32>
    %8 = vector.broadcast %cst_5 : f32 to vector<8x8xf32>
    %9 = arith.select %6, %7, %8 : vector<8x8xi1>, vector<8x8xf32>
    %c0_6 = arith.constant 0 : index
    %c0_7 = arith.constant 0 : index
    %c0_8 = arith.constant 0 : index
    %c0_9 = arith.constant 0 : index
    %10 = vector.load %arg3[%c0_6, %c0_7, %c0_8, %c0_9] : memref<2x12x32x8xbf16, #tpu.memory_space<vmem>>, vector<1x12x32x8xbf16>
    %11 = vector.shape_cast %10 : vector<1x12x32x8xbf16> to vector<12x32x8xbf16>
    %c0_10 = arith.constant 0 : index
    %c0_11 = arith.constant 0 : index
    %c0_12 = arith.constant 0 : index
    %c0_13 = arith.constant 0 : index
    %12 = vector.load %arg4[%c0_10, %c0_11, %c0_12, %c0_13] : memref<2x12x1x8xf32, #tpu.memory_space<vmem>>, vector<1x12x1x8xf32>
    %13 = vector.shape_cast %12 : vector<1x12x1x8xf32> to vector<12x1x8xf32>
    %14 = vector.extract_strided_slice %11 {offsets = [0, 0, 0], sizes = [4, 32, 8], strides = [1, 1, 1]} : vector<12x32x8xbf16> to vector<4x32x8xbf16>
    %15 = vector.extract_strided_slice %11 {offsets = [4, 0, 0], sizes = [4, 32, 8], strides = [1, 1, 1]} : vector<12x32x8xbf16> to vector<4x32x8xbf16>
    %16 = vector.extract_strided_slice %11 {offsets = [8, 0, 0], sizes = [4, 32, 8], strides = [1, 1, 1]} : vector<12x32x8xbf16> to vector<4x32x8xbf16>
    %17 = vector.extract_strided_slice %13 {offsets = [0, 0, 0], sizes = [4, 1, 8], strides = [1, 1, 1]} : vector<12x1x8xf32> to vector<4x1x8xf32>
    %18 = vector.extract_strided_slice %13 {offsets = [4, 0, 0], sizes = [4, 1, 8], strides = [1, 1, 1]} : vector<12x1x8xf32> to vector<4x1x8xf32>
    %19 = vector.extract_strided_slice %13 {offsets = [8, 0, 0], sizes = [4, 1, 8], strides = [1, 1, 1]} : vector<12x1x8xf32> to vector<4x1x8xf32>
    %c0_14 = arith.constant 0 : index
    %c0_15 = arith.constant 0 : index
    %c0_16 = arith.constant 0 : index
    %c0_17 = arith.constant 0 : index
    %20 = vector.load %arg5[%c0_14, %c0_15, %c0_16, %c0_17] : memref<2x4x8x32xbf16, #tpu.memory_space<vmem>>, vector<1x4x8x32xbf16>
    %21 = vector.shape_cast %20 : vector<1x4x8x32xbf16> to vector<4x8x32xbf16>
    %c0_18 = arith.constant 0 : index
    %c0_19 = arith.constant 0 : index
    %c0_20 = arith.constant 0 : index
    %22 = vector.load %arg6[%c0_18, %c0_19, %c0_20] : memref<2x1x32xf32, #tpu.memory_space<vmem>>, vector<1x1x32xf32>
    %23 = vector.shape_cast %22 : vector<1x1x32xf32> to vector<1x32xf32>
    %24 = arith.truncf %1 : vector<8x32xf32> to vector<8x32xbf16>
    %25 = vector.extract_strided_slice %14 {offsets = [0, 0, 0], sizes = [1, 32, 8], strides = [1, 1, 1]} : vector<4x32x8xbf16> to vector<1x32x8xbf16>
    %26 = vector.shape_cast %25 : vector<1x32x8xbf16> to vector<32x8xbf16>
    %cst_21 = arith.constant dense<0.000000e+00> : vector<8x8xf32>
    %27 = tpu.matmul %24, %26, %cst_21 {dimension_numbers = #tpu.dot_dimension_numbers<[1], [0], [0], [1], [0, 0, 1, 1], [], []>} : vector<8x32xbf16>, vector<32x8xbf16>, vector<8x8xf32> -> vector<8x8xf32>
    %28 = vector.extract_strided_slice %14 {offsets = [1, 0, 0], sizes = [1, 32, 8], strides = [1, 1, 1]} : vector<4x32x8xbf16> to vector<1x32x8xbf16>
    %29 = vector.shape_cast %28 : vector<1x32x8xbf16> to vector<32x8xbf16>
    %cst_22 = arith.constant dense<0.000000e+00> : vector<8x8xf32>
    %30 = tpu.matmul %24, %29, %cst_22 {dimension_numbers = #tpu.dot_dimension_numbers<[1], [0], [0], [1], [0, 0, 1, 1], [], []>} : vector<8x32xbf16>, vector<32x8xbf16>, vector<8x8xf32> -> vector<8x8xf32>
    %31 = vector.extract_strided_slice %14 {offsets = [2, 0, 0], sizes = [1, 32, 8], strides = [1, 1, 1]} : vector<4x32x8xbf16> to vector<1x32x8xbf16>
    %32 = vector.shape_cast %31 : vector<1x32x8xbf16> to vector<32x8xbf16>
    %cst_23 = arith.constant dense<0.000000e+00> : vector<8x8xf32>
    %33 = tpu.matmul %24, %32, %cst_23 {dimension_numbers = #tpu.dot_dimension_numbers<[1], [0], [0], [1], [0, 0, 1, 1], [], []>} : vector<8x32xbf16>, vector<32x8xbf16>, vector<8x8xf32> -> vector<8x8xf32>
    %34 = vector.extract_strided_slice %14 {offsets = [3, 0, 0], sizes = [1, 32, 8], strides = [1, 1, 1]} : vector<4x32x8xbf16> to vector<1x32x8xbf16>
    %35 = vector.shape_cast %34 : vector<1x32x8xbf16> to vector<32x8xbf16>
    %cst_24 = arith.constant dense<0.000000e+00> : vector<8x8xf32>
    %36 = tpu.matmul %24, %35, %cst_24 {dimension_numbers = #tpu.dot_dimension_numbers<[1], [0], [0], [1], [0, 0, 1, 1], [], []>} : vector<8x32xbf16>, vector<32x8xbf16>, vector<8x8xf32> -> vector<8x8xf32>
    %37 = vector.shape_cast %27 : vector<8x8xf32> to vector<1x8x8xf32>
    %38 = vector.shape_cast %30 : vector<8x8xf32> to vector<1x8x8xf32>
    %39 = vector.shape_cast %33 : vector<8x8xf32> to vector<1x8x8xf32>
    %40 = vector.shape_cast %36 : vector<8x8xf32> to vector<1x8x8xf32>
    %41 = tpu.concatenate %37, %38, %39, %40 in 0 : vector<1x8x8xf32>, vector<1x8x8xf32>, vector<1x8x8xf32>, vector<1x8x8xf32> -> vector<4x8x8xf32>
    %42 = vector.broadcast %17 : vector<4x1x8xf32> to vector<4x8x8xf32>
    %43 = arith.addf %41, %42 : vector<4x8x8xf32>
    %44 = arith.truncf %1 : vector<8x32xf32> to vector<8x32xbf16>
    %45 = vector.extract_strided_slice %15 {offsets = [0, 0, 0], sizes = [1, 32, 8], strides = [1, 1, 1]} : vector<4x32x8xbf16> to vector<1x32x8xbf16>
    %46 = vector.shape_cast %45 : vector<1x32x8xbf16> to vector<32x8xbf16>
    %cst_25 = arith.constant dense<0.000000e+00> : vector<8x8xf32>
    %47 = tpu.matmul %44, %46, %cst_25 {dimension_numbers = #tpu.dot_dimension_numbers<[1], [0], [0], [1], [0, 0, 1, 1], [], []>} : vector<8x32xbf16>, vector<32x8xbf16>, vector<8x8xf32> -> vector<8x8xf32>
    %48 = vector.extract_strided_slice %15 {offsets = [1, 0, 0], sizes = [1, 32, 8], strides = [1, 1, 1]} : vector<4x32x8xbf16> to vector<1x32x8xbf16>
    %49 = vector.shape_cast %48 : vector<1x32x8xbf16> to vector<32x8xbf16>
    %cst_26 = arith.constant dense<0.000000e+00> : vector<8x8xf32>
    %50 = tpu.matmul %44, %49, %cst_26 {dimension_numbers = #tpu.dot_dimension_numbers<[1], [0], [0], [1], [0, 0, 1, 1], [], []>} : vector<8x32xbf16>, vector<32x8xbf16>, vector<8x8xf32> -> vector<8x8xf32>
    %51 = vector.extract_strided_slice %15 {offsets = [2, 0, 0], sizes = [1, 32, 8], strides = [1, 1, 1]} : vector<4x32x8xbf16> to vector<1x32x8xbf16>
    %52 = vector.shape_cast %51 : vector<1x32x8xbf16> to vector<32x8xbf16>
    %cst_27 = arith.constant dense<0.000000e+00> : vector<8x8xf32>
    %53 = tpu.matmul %44, %52, %cst_27 {dimension_numbers = #tpu.dot_dimension_numbers<[1], [0], [0], [1], [0, 0, 1, 1], [], []>} : vector<8x32xbf16>, vector<32x8xbf16>, vector<8x8xf32> -> vector<8x8xf32>
    %54 = vector.extract_strided_slice %15 {offsets = [3, 0, 0], sizes = [1, 32, 8], strides = [1, 1, 1]} : vector<4x32x8xbf16> to vector<1x32x8xbf16>
    %55 = vector.shape_cast %54 : vector<1x32x8xbf16> to vector<32x8xbf16>
    %cst_28 = arith.constant dense<0.000000e+00> : vector<8x8xf32>
    %56 = tpu.matmul %44, %55, %cst_28 {dimension_numbers = #tpu.dot_dimension_numbers<[1], [0], [0], [1], [0, 0, 1, 1], [], []>} : vector<8x32xbf16>, vector<32x8xbf16>, vector<8x8xf32> -> vector<8x8xf32>
    %57 = vector.shape_cast %47 : vector<8x8xf32> to vector<1x8x8xf32>
    %58 = vector.shape_cast %50 : vector<8x8xf32> to vector<1x8x8xf32>
    %59 = vector.shape_cast %53 : vector<8x8xf32> to vector<1x8x8xf32>
    %60 = vector.shape_cast %56 : vector<8x8xf32> to vector<1x8x8xf32>
    %61 = tpu.concatenate %57, %58, %59, %60 in 0 : vector<1x8x8xf32>, vector<1x8x8xf32>, vector<1x8x8xf32>, vector<1x8x8xf32> -> vector<4x8x8xf32>
    %62 = vector.broadcast %18 : vector<4x1x8xf32> to vector<4x8x8xf32>
    %63 = arith.addf %61, %62 : vector<4x8x8xf32>
    %64 = arith.truncf %1 : vector<8x32xf32> to vector<8x32xbf16>
    %65 = vector.extract_strided_slice %16 {offsets = [0, 0, 0], sizes = [1, 32, 8], strides = [1, 1, 1]} : vector<4x32x8xbf16> to vector<1x32x8xbf16>
    %66 = vector.shape_cast %65 : vector<1x32x8xbf16> to vector<32x8xbf16>
    %cst_29 = arith.constant dense<0.000000e+00> : vector<8x8xf32>
    %67 = tpu.matmul %64, %66, %cst_29 {dimension_numbers = #tpu.dot_dimension_numbers<[1], [0], [0], [1], [0, 0, 1, 1], [], []>} : vector<8x32xbf16>, vector<32x8xbf16>, vector<8x8xf32> -> vector<8x8xf32>
    %68 = vector.extract_strided_slice %16 {offsets = [1, 0, 0], sizes = [1, 32, 8], strides = [1, 1, 1]} : vector<4x32x8xbf16> to vector<1x32x8xbf16>
    %69 = vector.shape_cast %68 : vector<1x32x8xbf16> to vector<32x8xbf16>
    %cst_30 = arith.constant dense<0.000000e+00> : vector<8x8xf32>
    %70 = tpu.matmul %64, %69, %cst_30 {dimension_numbers = #tpu.dot_dimension_numbers<[1], [0], [0], [1], [0, 0, 1, 1], [], []>} : vector<8x32xbf16>, vector<32x8xbf16>, vector<8x8xf32> -> vector<8x8xf32>
    %71 = vector.extract_strided_slice %16 {offsets = [2, 0, 0], sizes = [1, 32, 8], strides = [1, 1, 1]} : vector<4x32x8xbf16> to vector<1x32x8xbf16>
    %72 = vector.shape_cast %71 : vector<1x32x8xbf16> to vector<32x8xbf16>
    %cst_31 = arith.constant dense<0.000000e+00> : vector<8x8xf32>
    %73 = tpu.matmul %64, %72, %cst_31 {dimension_numbers = #tpu.dot_dimension_numbers<[1], [0], [0], [1], [0, 0, 1, 1], [], []>} : vector<8x32xbf16>, vector<32x8xbf16>, vector<8x8xf32> -> vector<8x8xf32>
    %74 = vector.extract_strided_slice %16 {offsets = [3, 0, 0], sizes = [1, 32, 8], strides = [1, 1, 1]} : vector<4x32x8xbf16> to vector<1x32x8xbf16>
    %75 = vector.shape_cast %74 : vector<1x32x8xbf16> to vector<32x8xbf16>
    %cst_32 = arith.constant dense<0.000000e+00> : vector<8x8xf32>
    %76 = tpu.matmul %64, %75, %cst_32 {dimension_numbers = #tpu.dot_dimension_numbers<[1], [0], [0], [1], [0, 0, 1, 1], [], []>} : vector<8x32xbf16>, vector<32x8xbf16>, vector<8x8xf32> -> vector<8x8xf32>
    %77 = vector.shape_cast %67 : vector<8x8xf32> to vector<1x8x8xf32>
    %78 = vector.shape_cast %70 : vector<8x8xf32> to vector<1x8x8xf32>
    %79 = vector.shape_cast %73 : vector<8x8xf32> to vector<1x8x8xf32>
    %80 = vector.shape_cast %76 : vector<8x8xf32> to vector<1x8x8xf32>
    %81 = tpu.concatenate %77, %78, %79, %80 in 0 : vector<1x8x8xf32>, vector<1x8x8xf32>, vector<1x8x8xf32>, vector<1x8x8xf32> -> vector<4x8x8xf32>
    %82 = vector.broadcast %19 : vector<4x1x8xf32> to vector<4x8x8xf32>
    %83 = arith.addf %81, %82 : vector<4x8x8xf32>
    %84 = arith.truncf %43 : vector<4x8x8xf32> to vector<4x8x8xbf16>
    %85 = arith.truncf %63 : vector<4x8x8xf32> to vector<4x8x8xbf16>
    "tpu.trace_start"() <{level = 10 : i32, message = "hqe,hke->hqk"}> : () -> ()
    %cst_33 = arith.constant dense<0.000000e+00> : vector<4x8x8xf32>
    %86 = tpu.matmul %84, %85, %cst_33 {dimension_numbers = #tpu.dot_dimension_numbers<[2], [2], [1], [1], [0, 0, 0, 1, 1, 1], [0], [0]>} : vector<4x8x8xbf16>, vector<4x8x8xbf16>, vector<4x8x8xf32> -> vector<4x8x8xf32>
    "tpu.trace_stop"() : () -> ()
    %cst_34 = arith.constant 0.353553385 : f32
    %87 = vector.broadcast %cst_34 : f32 to vector<4x8x8xf32>
    %88 = arith.mulf %86, %87 : vector<4x8x8xf32>
    %cst_35 = arith.constant dense<0xFF800000> : vector<4x8xf32>
    %89 = vector.multi_reduction <maximumf>, %88, %cst_35 [2] : vector<4x8x8xf32> to vector<4x8xf32>
    %90 = vector.shape_cast %89 : vector<4x8xf32> to vector<4x8x1xf32>
    %91 = vector.broadcast %90 : vector<4x8x1xf32> to vector<4x8x8xf32>
    %92 = arith.subf %88, %91 : vector<4x8x8xf32>
    %93 = math.exp %92 : vector<4x8x8xf32>
    %cst_36 = arith.constant dense<0.000000e+00> : vector<4x8xf32>
    %94 = vector.multi_reduction <add>, %93, %cst_36 [2] : vector<4x8x8xf32> to vector<4x8xf32>
    %95 = vector.shape_cast %94 : vector<4x8xf32> to vector<4x8x1xf32>
    %96 = tpu.reciprocal %95 : vector<4x8x1xf32> -> vector<4x8x1xf32>
    %97 = vector.broadcast %96 : vector<4x8x1xf32> to vector<4x8x8xf32>
    %98 = arith.mulf %93, %97 : vector<4x8x8xf32>
    %99 = arith.truncf %98 : vector<4x8x8xf32> to vector<4x8x8xbf16>
    %100 = arith.truncf %83 : vector<4x8x8xf32> to vector<4x8x8xbf16>
    "tpu.trace_start"() <{level = 10 : i32, message = "hqk,hke->hqe"}> : () -> ()
    %cst_37 = arith.constant dense<0.000000e+00> : vector<4x8x8xf32>
    %101 = tpu.matmul %99, %100, %cst_37 {dimension_numbers = #tpu.dot_dimension_numbers<[2], [1], [1], [2], [0, 0, 0, 1, 1, 2], [0], [0]>} : vector<4x8x8xbf16>, vector<4x8x8xbf16>, vector<4x8x8xf32> -> vector<4x8x8xf32>
    "tpu.trace_stop"() : () -> ()
    %102 = arith.truncf %101 : vector<4x8x8xf32> to vector<4x8x8xbf16>
    "tpu.trace_start"() <{level = 10 : i32, message = "hqe,hed->hqd"}> : () -> ()
    %cst_38 = arith.constant dense<0.000000e+00> : vector<4x8x32xf32>
    %103 = tpu.matmul %102, %21, %cst_38 {dimension_numbers = #tpu.dot_dimension_numbers<[2], [1], [1], [2], [0, 0, 0, 1, 1, 2], [0], [0]>} : vector<4x8x8xbf16>, vector<4x8x32xbf16>, vector<4x8x32xf32> -> vector<4x8x32xf32>
    "tpu.trace_stop"() : () -> ()
    %cst_39 = arith.constant dense<0.000000e+00> : vector<8x32xf32>
    %104 = vector.multi_reduction <add>, %103, %cst_39 [0] : vector<4x8x32xf32> to vector<8x32xf32>
    %105 = vector.broadcast %23 : vector<1x32xf32> to vector<8x32xf32>
    %106 = arith.addf %104, %105 : vector<8x32xf32>
    %c0_40 = arith.constant 0 : index
    %c0_41 = arith.constant 0 : index
    %c0_42 = arith.constant 0 : index
    %c0_43 = arith.constant 0 : index
    %107 = vector.load %arg7[%c0_40, %c0_41, %c0_42, %c0_43] : memref<2x2x1x32xf32, #tpu.memory_space<vmem>>, vector<1x2x1x32xf32>
    %108 = vector.shape_cast %107 : vector<1x2x1x32xf32> to vector<2x1x32xf32>
    %109 = arith.addf %1, %106 : vector<8x32xf32>
    %110 = vector.extract_strided_slice %108 {offsets = [0, 0, 0], sizes = [1, 1, 32], strides = [1, 1, 1]} : vector<2x1x32xf32> to vector<1x1x32xf32>
    %111 = vector.shape_cast %110 : vector<1x1x32xf32> to vector<1x32xf32>
    %112 = vector.extract_strided_slice %108 {offsets = [1, 0, 0], sizes = [1, 1, 32], strides = [1, 1, 1]} : vector<2x1x32xf32> to vector<1x1x32xf32>
    %113 = vector.shape_cast %112 : vector<1x1x32xf32> to vector<1x32xf32>
    %cst_44 = arith.constant dense<0.000000e+00> : vector<8xf32>
    %114 = vector.multi_reduction <add>, %109, %cst_44 [1] : vector<8x32xf32> to vector<8xf32>
    %115 = vector.shape_cast %114 : vector<8xf32> to vector<8x1xf32>
    %cst_45 = arith.constant 3.200000e+01 : f32
    %116 = vector.broadcast %cst_45 : f32 to vector<8x1xf32>
    %117 = arith.divf %115, %116 : vector<8x1xf32>
    %118 = vector.broadcast %117 : vector<8x1xf32> to vector<8x32xf32>
    %119 = arith.subf %109, %118 : vector<8x32xf32>
    %120 = arith.mulf %119, %119 : vector<8x32xf32>
    %cst_46 = arith.constant dense<0.000000e+00> : vector<8xf32>
    %121 = vector.multi_reduction <add>, %120, %cst_46 [1] : vector<8x32xf32> to vector<8xf32>
    %122 = vector.shape_cast %121 : vector<8xf32> to vector<8x1xf32>
    %cst_47 = arith.constant 3.200000e+01 : f32
    %123 = vector.broadcast %cst_47 : f32 to vector<8x1xf32>
    %124 = arith.divf %122, %123 : vector<8x1xf32>
    %cst_48 = arith.constant 9.99999974E-6 : f32
    %125 = vector.broadcast %cst_48 : f32 to vector<8x1xf32>
    %126 = arith.addf %124, %125 : vector<8x1xf32>
    %127 = math.rsqrt %126 : vector<8x1xf32>
    %128 = vector.broadcast %127 : vector<8x1xf32> to vector<8x32xf32>
    %129 = arith.mulf %119, %128 : vector<8x32xf32>
    %130 = vector.broadcast %111 : vector<1x32xf32> to vector<8x32xf32>
    %131 = arith.mulf %129, %130 : vector<8x32xf32>
    %132 = vector.broadcast %113 : vector<1x32xf32> to vector<8x32xf32>
    %133 = arith.addf %131, %132 : vector<8x32xf32>
    %c0_49 = arith.constant 0 : index
    %c0_50 = arith.constant 0 : index
    %c0_51 = arith.constant 0 : index
    %134 = vector.load %arg8[%c0_49, %c0_50, %c0_51] : memref<2x32x64xbf16, #tpu.memory_space<vmem>>, vector<1x32x64xbf16>
    %135 = vector.shape_cast %134 : vector<1x32x64xbf16> to vector<32x64xbf16>
    %c0_52 = arith.constant 0 : index
    %c0_53 = arith.constant 0 : index
    %c0_54 = arith.constant 0 : index
    %136 = vector.load %arg9[%c0_52, %c0_53, %c0_54] : memref<2x1x64xf32, #tpu.memory_space<vmem>>, vector<1x1x64xf32>
    %137 = vector.shape_cast %136 : vector<1x1x64xf32> to vector<1x64xf32>
    %138 = arith.truncf %133 : vector<8x32xf32> to vector<8x32xbf16>
    %cst_55 = arith.constant dense<0.000000e+00> : vector<8x64xf32>
    %139 = tpu.matmul %138, %135, %cst_55 {dimension_numbers = #tpu.dot_dimension_numbers<[1], [0], [0], [1], [0, 0, 1, 1], [], []>} : vector<8x32xbf16>, vector<32x64xbf16>, vector<8x64xf32> -> vector<8x64xf32>
    %140 = vector.broadcast %137 : vector<1x64xf32> to vector<8x64xf32>
    %141 = arith.addf %139, %140 : vector<8x64xf32>
    %cst_56 = arith.constant 0.000000e+00 : f32
    %142 = vector.broadcast %cst_56 : f32 to vector<8x64xf32>
    %143 = arith.maximumf %141, %142 : vector<8x64xf32>
    %c0_57 = arith.constant 0 : index
    %c0_58 = arith.constant 0 : index
    %c0_59 = arith.constant 0 : index
    %144 = vector.load %arg10[%c0_57, %c0_58, %c0_59] : memref<2x64x32xbf16, #tpu.memory_space<vmem>>, vector<1x64x32xbf16>
    %145 = vector.shape_cast %144 : vector<1x64x32xbf16> to vector<64x32xbf16>
    %c0_60 = arith.constant 0 : index
    %c0_61 = arith.constant 0 : index
    %c0_62 = arith.constant 0 : index
    %146 = vector.load %arg11[%c0_60, %c0_61, %c0_62] : memref<2x1x32xf32, #tpu.memory_space<vmem>>, vector<1x1x32xf32>
    %147 = vector.shape_cast %146 : vector<1x1x32xf32> to vector<1x32xf32>
    %148 = arith.truncf %143 : vector<8x64xf32> to vector<8x64xbf16>
    %cst_63 = arith.constant dense<0.000000e+00> : vector<8x32xf32>
    %149 = tpu.matmul %148, %145, %cst_63 {dimension_numbers = #tpu.dot_dimension_numbers<[1], [0], [0], [1], [0, 0, 1, 1], [], []>} : vector<8x64xbf16>, vector<64x32xbf16>, vector<8x32xf32> -> vector<8x32xf32>
    %150 = vector.broadcast %147 : vector<1x32xf32> to vector<8x32xf32>
    %151 = arith.addf %149, %150 : vector<8x32xf32>
    %c0_64 = arith.constant 0 : index
    %c0_65 = arith.constant 0 : index
    %c0_66 = arith.constant 0 : index
    %c0_67 = arith.constant 0 : index
    %152 = vector.load %arg12[%c0_64, %c0_65, %c0_66, %c0_67] : memref<2x2x1x32xf32, #tpu.memory_space<vmem>>, vector<1x2x1x32xf32>
    %153 = vector.shape_cast %152 : vector<1x2x1x32xf32> to vector<2x1x32xf32>
    %154 = arith.addf %133, %151 : vector<8x32xf32>
    %155 = vector.extract_strided_slice %153 {offsets = [0, 0, 0], sizes = [1, 1, 32], strides = [1, 1, 1]} : vector<2x1x32xf32> to vector<1x1x32xf32>
    %156 = vector.shape_cast %155 : vector<1x1x32xf32> to vector<1x32xf32>
    %157 = vector.extract_strided_slice %153 {offsets = [1, 0, 0], sizes = [1, 1, 32], strides = [1, 1, 1]} : vector<2x1x32xf32> to vector<1x1x32xf32>
    %158 = vector.shape_cast %157 : vector<1x1x32xf32> to vector<1x32xf32>
    %cst_68 = arith.constant dense<0.000000e+00> : vector<8xf32>
    %159 = vector.multi_reduction <add>, %154, %cst_68 [1] : vector<8x32xf32> to vector<8xf32>
    %160 = vector.shape_cast %159 : vector<8xf32> to vector<8x1xf32>
    %cst_69 = arith.constant 3.200000e+01 : f32
    %161 = vector.broadcast %cst_69 : f32 to vector<8x1xf32>
    %162 = arith.divf %160, %161 : vector<8x1xf32>
    %163 = vector.broadcast %162 : vector<8x1xf32> to vector<8x32xf32>
    %164 = arith.subf %154, %163 : vector<8x32xf32>
    %165 = arith.mulf %164, %164 : vector<8x32xf32>
    %cst_70 = arith.constant dense<0.000000e+00> : vector<8xf32>
    %166 = vector.multi_reduction <add>, %165, %cst_70 [1] : vector<8x32xf32> to vector<8xf32>
    %167 = vector.shape_cast %166 : vector<8xf32> to vector<8x1xf32>
    %cst_71 = arith.constant 3.200000e+01 : f32
    %168 = vector.broadcast %cst_71 : f32 to vector<8x1xf32>
    %169 = arith.divf %167, %168 : vector<8x1xf32>
    %cst_72 = arith.constant 9.99999974E-6 : f32
    %170 = vector.broadcast %cst_72 : f32 to vector<8x1xf32>
    %171 = arith.addf %169, %170 : vector<8x1xf32>
    %172 = math.rsqrt %171 : vector<8x1xf32>
    %173 = vector.broadcast %172 : vector<8x1xf32> to vector<8x32xf32>
    %174 = arith.mulf %164, %173 : vector<8x32xf32>
    %175 = vector.broadcast %156 : vector<1x32xf32> to vector<8x32xf32>
    %176 = arith.mulf %174, %175 : vector<8x32xf32>
    %177 = vector.broadcast %158 : vector<1x32xf32> to vector<8x32xf32>
    %178 = arith.addf %176, %177 : vector<8x32xf32>
    %c1 = arith.constant 1 : index
    %c0_73 = arith.constant 0 : index
    %c0_74 = arith.constant 0 : index
    %c0_75 = arith.constant 0 : index
    %179 = vector.load %arg3[%c1, %c0_73, %c0_74, %c0_75] : memref<2x12x32x8xbf16, #tpu.memory_space<vmem>>, vector<1x12x32x8xbf16>
    %180 = vector.shape_cast %179 : vector<1x12x32x8xbf16> to vector<12x32x8xbf16>
    %c1_76 = arith.constant 1 : index
    %c0_77 = arith.constant 0 : index
    %c0_78 = arith.constant 0 : index
    %c0_79 = arith.constant 0 : index
    %181 = vector.load %arg4[%c1_76, %c0_77, %c0_78, %c0_79] : memref<2x12x1x8xf32, #tpu.memory_space<vmem>>, vector<1x12x1x8xf32>
    %182 = vector.shape_cast %181 : vector<1x12x1x8xf32> to vector<12x1x8xf32>
    %183 = vector.extract_strided_slice %180 {offsets = [0, 0, 0], sizes = [4, 32, 8], strides = [1, 1, 1]} : vector<12x32x8xbf16> to vector<4x32x8xbf16>
    %184 = vector.extract_strided_slice %180 {offsets = [4, 0, 0], sizes = [4, 32, 8], strides = [1, 1, 1]} : vector<12x32x8xbf16> to vector<4x32x8xbf16>
    %185 = vector.extract_strided_slice %180 {offsets = [8, 0, 0], sizes = [4, 32, 8], strides = [1, 1, 1]} : vector<12x32x8xbf16> to vector<4x32x8xbf16>
    %186 = vector.extract_strided_slice %182 {offsets = [0, 0, 0], sizes = [4, 1, 8], strides = [1, 1, 1]} : vector<12x1x8xf32> to vector<4x1x8xf32>
    %187 = vector.extract_strided_slice %182 {offsets = [4, 0, 0], sizes = [4, 1, 8], strides = [1, 1, 1]} : vector<12x1x8xf32> to vector<4x1x8xf32>
    %188 = vector.extract_strided_slice %182 {offsets = [8, 0, 0], sizes = [4, 1, 8], strides = [1, 1, 1]} : vector<12x1x8xf32> to vector<4x1x8xf32>
    %c1_80 = arith.constant 1 : index
    %c0_81 = arith.constant 0 : index
    %c0_82 = arith.constant 0 : index
    %c0_83 = arith.constant 0 : index
    %189 = vector.load %arg5[%c1_80, %c0_81, %c0_82, %c0_83] : memref<2x4x8x32xbf16, #tpu.memory_space<vmem>>, vector<1x4x8x32xbf16>
    %190 = vector.shape_cast %189 : vector<1x4x8x32xbf16> to vector<4x8x32xbf16>
    %c1_84 = arith.constant 1 : index
    %c0_85 = arith.constant 0 : index
    %c0_86 = arith.constant 0 : index
    %191 = vector.load %arg6[%c1_84, %c0_85, %c0_86] : memref<2x1x32xf32, #tpu.memory_space<vmem>>, vector<1x1x32xf32>
    %192 = vector.shape_cast %191 : vector<1x1x32xf32> to vector<1x32xf32>
    %193 = arith.truncf %178 : vector<8x32xf32> to vector<8x32xbf16>
    %194 = vector.extract_strided_slice %183 {offsets = [0, 0, 0], sizes = [1, 32, 8], strides = [1, 1, 1]} : vector<4x32x8xbf16> to vector<1x32x8xbf16>
    %195 = vector.shape_cast %194 : vector<1x32x8xbf16> to vector<32x8xbf16>
    %cst_87 = arith.constant dense<0.000000e+00> : vector<8x8xf32>
    %196 = tpu.matmul %193, %195, %cst_87 {dimension_numbers = #tpu.dot_dimension_numbers<[1], [0], [0], [1], [0, 0, 1, 1], [], []>} : vector<8x32xbf16>, vector<32x8xbf16>, vector<8x8xf32> -> vector<8x8xf32>
    %197 = vector.extract_strided_slice %183 {offsets = [1, 0, 0], sizes = [1, 32, 8], strides = [1, 1, 1]} : vector<4x32x8xbf16> to vector<1x32x8xbf16>
    %198 = vector.shape_cast %197 : vector<1x32x8xbf16> to vector<32x8xbf16>
    %cst_88 = arith.constant dense<0.000000e+00> : vector<8x8xf32>
    %199 = tpu.matmul %193, %198, %cst_88 {dimension_numbers = #tpu.dot_dimension_numbers<[1], [0], [0], [1], [0, 0, 1, 1], [], []>} : vector<8x32xbf16>, vector<32x8xbf16>, vector<8x8xf32> -> vector<8x8xf32>
    %200 = vector.extract_strided_slice %183 {offsets = [2, 0, 0], sizes = [1, 32, 8], strides = [1, 1, 1]} : vector<4x32x8xbf16> to vector<1x32x8xbf16>
    %201 = vector.shape_cast %200 : vector<1x32x8xbf16> to vector<32x8xbf16>
    %cst_89 = arith.constant dense<0.000000e+00> : vector<8x8xf32>
    %202 = tpu.matmul %193, %201, %cst_89 {dimension_numbers = #tpu.dot_dimension_numbers<[1], [0], [0], [1], [0, 0, 1, 1], [], []>} : vector<8x32xbf16>, vector<32x8xbf16>, vector<8x8xf32> -> vector<8x8xf32>
    %203 = vector.extract_strided_slice %183 {offsets = [3, 0, 0], sizes = [1, 32, 8], strides = [1, 1, 1]} : vector<4x32x8xbf16> to vector<1x32x8xbf16>
    %204 = vector.shape_cast %203 : vector<1x32x8xbf16> to vector<32x8xbf16>
    %cst_90 = arith.constant dense<0.000000e+00> : vector<8x8xf32>
    %205 = tpu.matmul %193, %204, %cst_90 {dimension_numbers = #tpu.dot_dimension_numbers<[1], [0], [0], [1], [0, 0, 1, 1], [], []>} : vector<8x32xbf16>, vector<32x8xbf16>, vector<8x8xf32> -> vector<8x8xf32>
    %206 = vector.shape_cast %196 : vector<8x8xf32> to vector<1x8x8xf32>
    %207 = vector.shape_cast %199 : vector<8x8xf32> to vector<1x8x8xf32>
    %208 = vector.shape_cast %202 : vector<8x8xf32> to vector<1x8x8xf32>
    %209 = vector.shape_cast %205 : vector<8x8xf32> to vector<1x8x8xf32>
    %210 = tpu.concatenate %206, %207, %208, %209 in 0 : vector<1x8x8xf32>, vector<1x8x8xf32>, vector<1x8x8xf32>, vector<1x8x8xf32> -> vector<4x8x8xf32>
    %211 = vector.broadcast %186 : vector<4x1x8xf32> to vector<4x8x8xf32>
    %212 = arith.addf %210, %211 : vector<4x8x8xf32>
    %213 = arith.truncf %178 : vector<8x32xf32> to vector<8x32xbf16>
    %214 = vector.extract_strided_slice %184 {offsets = [0, 0, 0], sizes = [1, 32, 8], strides = [1, 1, 1]} : vector<4x32x8xbf16> to vector<1x32x8xbf16>
    %215 = vector.shape_cast %214 : vector<1x32x8xbf16> to vector<32x8xbf16>
    %cst_91 = arith.constant dense<0.000000e+00> : vector<8x8xf32>
    %216 = tpu.matmul %213, %215, %cst_91 {dimension_numbers = #tpu.dot_dimension_numbers<[1], [0], [0], [1], [0, 0, 1, 1], [], []>} : vector<8x32xbf16>, vector<32x8xbf16>, vector<8x8xf32> -> vector<8x8xf32>
    %217 = vector.extract_strided_slice %184 {offsets = [1, 0, 0], sizes = [1, 32, 8], strides = [1, 1, 1]} : vector<4x32x8xbf16> to vector<1x32x8xbf16>
    %218 = vector.shape_cast %217 : vector<1x32x8xbf16> to vector<32x8xbf16>
    %cst_92 = arith.constant dense<0.000000e+00> : vector<8x8xf32>
    %219 = tpu.matmul %213, %218, %cst_92 {dimension_numbers = #tpu.dot_dimension_numbers<[1], [0], [0], [1], [0, 0, 1, 1], [], []>} : vector<8x32xbf16>, vector<32x8xbf16>, vector<8x8xf32> -> vector<8x8xf32>
    %220 = vector.extract_strided_slice %184 {offsets = [2, 0, 0], sizes = [1, 32, 8], strides = [1, 1, 1]} : vector<4x32x8xbf16> to vector<1x32x8xbf16>
    %221 = vector.shape_cast %220 : vector<1x32x8xbf16> to vector<32x8xbf16>
    %cst_93 = arith.constant dense<0.000000e+00> : vector<8x8xf32>
    %222 = tpu.matmul %213, %221, %cst_93 {dimension_numbers = #tpu.dot_dimension_numbers<[1], [0], [0], [1], [0, 0, 1, 1], [], []>} : vector<8x32xbf16>, vector<32x8xbf16>, vector<8x8xf32> -> vector<8x8xf32>
    %223 = vector.extract_strided_slice %184 {offsets = [3, 0, 0], sizes = [1, 32, 8], strides = [1, 1, 1]} : vector<4x32x8xbf16> to vector<1x32x8xbf16>
    %224 = vector.shape_cast %223 : vector<1x32x8xbf16> to vector<32x8xbf16>
    %cst_94 = arith.constant dense<0.000000e+00> : vector<8x8xf32>
    %225 = tpu.matmul %213, %224, %cst_94 {dimension_numbers = #tpu.dot_dimension_numbers<[1], [0], [0], [1], [0, 0, 1, 1], [], []>} : vector<8x32xbf16>, vector<32x8xbf16>, vector<8x8xf32> -> vector<8x8xf32>
    %226 = vector.shape_cast %216 : vector<8x8xf32> to vector<1x8x8xf32>
    %227 = vector.shape_cast %219 : vector<8x8xf32> to vector<1x8x8xf32>
    %228 = vector.shape_cast %222 : vector<8x8xf32> to vector<1x8x8xf32>
    %229 = vector.shape_cast %225 : vector<8x8xf32> to vector<1x8x8xf32>
    %230 = tpu.concatenate %226, %227, %228, %229 in 0 : vector<1x8x8xf32>, vector<1x8x8xf32>, vector<1x8x8xf32>, vector<1x8x8xf32> -> vector<4x8x8xf32>
    %231 = vector.broadcast %187 : vector<4x1x8xf32> to vector<4x8x8xf32>
    %232 = arith.addf %230, %231 : vector<4x8x8xf32>
    %233 = arith.truncf %178 : vector<8x32xf32> to vector<8x32xbf16>
    %234 = vector.extract_strided_slice %185 {offsets = [0, 0, 0], sizes = [1, 32, 8], strides = [1, 1, 1]} : vector<4x32x8xbf16> to vector<1x32x8xbf16>
    %235 = vector.shape_cast %234 : vector<1x32x8xbf16> to vector<32x8xbf16>
    %cst_95 = arith.constant dense<0.000000e+00> : vector<8x8xf32>
    %236 = tpu.matmul %233, %235, %cst_95 {dimension_numbers = #tpu.dot_dimension_numbers<[1], [0], [0], [1], [0, 0, 1, 1], [], []>} : vector<8x32xbf16>, vector<32x8xbf16>, vector<8x8xf32> -> vector<8x8xf32>
    %237 = vector.extract_strided_slice %185 {offsets = [1, 0, 0], sizes = [1, 32, 8], strides = [1, 1, 1]} : vector<4x32x8xbf16> to vector<1x32x8xbf16>
    %238 = vector.shape_cast %237 : vector<1x32x8xbf16> to vector<32x8xbf16>
    %cst_96 = arith.constant dense<0.000000e+00> : vector<8x8xf32>
    %239 = tpu.matmul %233, %238, %cst_96 {dimension_numbers = #tpu.dot_dimension_numbers<[1], [0], [0], [1], [0, 0, 1, 1], [], []>} : vector<8x32xbf16>, vector<32x8xbf16>, vector<8x8xf32> -> vector<8x8xf32>
    %240 = vector.extract_strided_slice %185 {offsets = [2, 0, 0], sizes = [1, 32, 8], strides = [1, 1, 1]} : vector<4x32x8xbf16> to vector<1x32x8xbf16>
    %241 = vector.shape_cast %240 : vector<1x32x8xbf16> to vector<32x8xbf16>
    %cst_97 = arith.constant dense<0.000000e+00> : vector<8x8xf32>
    %242 = tpu.matmul %233, %241, %cst_97 {dimension_numbers = #tpu.dot_dimension_numbers<[1], [0], [0], [1], [0, 0, 1, 1], [], []>} : vector<8x32xbf16>, vector<32x8xbf16>, vector<8x8xf32> -> vector<8x8xf32>
    %243 = vector.extract_strided_slice %185 {offsets = [3, 0, 0], sizes = [1, 32, 8], strides = [1, 1, 1]} : vector<4x32x8xbf16> to vector<1x32x8xbf16>
    %244 = vector.shape_cast %243 : vector<1x32x8xbf16> to vector<32x8xbf16>
    %cst_98 = arith.constant dense<0.000000e+00> : vector<8x8xf32>
    %245 = tpu.matmul %233, %244, %cst_98 {dimension_numbers = #tpu.dot_dimension_numbers<[1], [0], [0], [1], [0, 0, 1, 1], [], []>} : vector<8x32xbf16>, vector<32x8xbf16>, vector<8x8xf32> -> vector<8x8xf32>
    %246 = vector.shape_cast %236 : vector<8x8xf32> to vector<1x8x8xf32>
    %247 = vector.shape_cast %239 : vector<8x8xf32> to vector<1x8x8xf32>
    %248 = vector.shape_cast %242 : vector<8x8xf32> to vector<1x8x8xf32>
    %249 = vector.shape_cast %245 : vector<8x8xf32> to vector<1x8x8xf32>
    %250 = tpu.concatenate %246, %247, %248, %249 in 0 : vector<1x8x8xf32>, vector<1x8x8xf32>, vector<1x8x8xf32>, vector<1x8x8xf32> -> vector<4x8x8xf32>
    %251 = vector.broadcast %188 : vector<4x1x8xf32> to vector<4x8x8xf32>
    %252 = arith.addf %250, %251 : vector<4x8x8xf32>
    %253 = arith.truncf %212 : vector<4x8x8xf32> to vector<4x8x8xbf16>
    %254 = arith.truncf %232 : vector<4x8x8xf32> to vector<4x8x8xbf16>
    "tpu.trace_start"() <{level = 10 : i32, message = "hqe,hke->hqk"}> : () -> ()
    %cst_99 = arith.constant dense<0.000000e+00> : vector<4x8x8xf32>
    %255 = tpu.matmul %253, %254, %cst_99 {dimension_numbers = #tpu.dot_dimension_numbers<[2], [2], [1], [1], [0, 0, 0, 1, 1, 1], [0], [0]>} : vector<4x8x8xbf16>, vector<4x8x8xbf16>, vector<4x8x8xf32> -> vector<4x8x8xf32>
    "tpu.trace_stop"() : () -> ()
    %cst_100 = arith.constant 0.353553385 : f32
    %256 = vector.broadcast %cst_100 : f32 to vector<4x8x8xf32>
    %257 = arith.mulf %255, %256 : vector<4x8x8xf32>
    %cst_101 = arith.constant dense<0xFF800000> : vector<4x8xf32>
    %258 = vector.multi_reduction <maximumf>, %257, %cst_101 [2] : vector<4x8x8xf32> to vector<4x8xf32>
    %259 = vector.shape_cast %258 : vector<4x8xf32> to vector<4x8x1xf32>
    %260 = vector.broadcast %259 : vector<4x8x1xf32> to vector<4x8x8xf32>
    %261 = arith.subf %257, %260 : vector<4x8x8xf32>
    %262 = math.exp %261 : vector<4x8x8xf32>
    %cst_102 = arith.constant dense<0.000000e+00> : vector<4x8xf32>
    %263 = vector.multi_reduction <add>, %262, %cst_102 [2] : vector<4x8x8xf32> to vector<4x8xf32>
    %264 = vector.shape_cast %263 : vector<4x8xf32> to vector<4x8x1xf32>
    %265 = tpu.reciprocal %264 : vector<4x8x1xf32> -> vector<4x8x1xf32>
    %266 = vector.broadcast %265 : vector<4x8x1xf32> to vector<4x8x8xf32>
    %267 = arith.mulf %262, %266 : vector<4x8x8xf32>
    %268 = arith.truncf %267 : vector<4x8x8xf32> to vector<4x8x8xbf16>
    %269 = arith.truncf %252 : vector<4x8x8xf32> to vector<4x8x8xbf16>
    "tpu.trace_start"() <{level = 10 : i32, message = "hqk,hke->hqe"}> : () -> ()
    %cst_103 = arith.constant dense<0.000000e+00> : vector<4x8x8xf32>
    %270 = tpu.matmul %268, %269, %cst_103 {dimension_numbers = #tpu.dot_dimension_numbers<[2], [1], [1], [2], [0, 0, 0, 1, 1, 2], [0], [0]>} : vector<4x8x8xbf16>, vector<4x8x8xbf16>, vector<4x8x8xf32> -> vector<4x8x8xf32>
    "tpu.trace_stop"() : () -> ()
    %271 = arith.truncf %270 : vector<4x8x8xf32> to vector<4x8x8xbf16>
    "tpu.trace_start"() <{level = 10 : i32, message = "hqe,hed->hqd"}> : () -> ()
    %cst_104 = arith.constant dense<0.000000e+00> : vector<4x8x32xf32>
    %272 = tpu.matmul %271, %190, %cst_104 {dimension_numbers = #tpu.dot_dimension_numbers<[2], [1], [1], [2], [0, 0, 0, 1, 1, 2], [0], [0]>} : vector<4x8x8xbf16>, vector<4x8x32xbf16>, vector<4x8x32xf32> -> vector<4x8x32xf32>
    "tpu.trace_stop"() : () -> ()
    %cst_105 = arith.constant dense<0.000000e+00> : vector<8x32xf32>
    %273 = vector.multi_reduction <add>, %272, %cst_105 [0] : vector<4x8x32xf32> to vector<8x32xf32>
    %274 = vector.broadcast %192 : vector<1x32xf32> to vector<8x32xf32>
    %275 = arith.addf %273, %274 : vector<8x32xf32>
    %c1_106 = arith.constant 1 : index
    %c0_107 = arith.constant 0 : index
    %c0_108 = arith.constant 0 : index
    %c0_109 = arith.constant 0 : index
    %276 = vector.load %arg7[%c1_106, %c0_107, %c0_108, %c0_109] : memref<2x2x1x32xf32, #tpu.memory_space<vmem>>, vector<1x2x1x32xf32>
    %277 = vector.shape_cast %276 : vector<1x2x1x32xf32> to vector<2x1x32xf32>
    %278 = arith.addf %178, %275 : vector<8x32xf32>
    %279 = vector.extract_strided_slice %277 {offsets = [0, 0, 0], sizes = [1, 1, 32], strides = [1, 1, 1]} : vector<2x1x32xf32> to vector<1x1x32xf32>
    %280 = vector.shape_cast %279 : vector<1x1x32xf32> to vector<1x32xf32>
    %281 = vector.extract_strided_slice %277 {offsets = [1, 0, 0], sizes = [1, 1, 32], strides = [1, 1, 1]} : vector<2x1x32xf32> to vector<1x1x32xf32>
    %282 = vector.shape_cast %281 : vector<1x1x32xf32> to vector<1x32xf32>
    %cst_110 = arith.constant dense<0.000000e+00> : vector<8xf32>
    %283 = vector.multi_reduction <add>, %278, %cst_110 [1] : vector<8x32xf32> to vector<8xf32>
    %284 = vector.shape_cast %283 : vector<8xf32> to vector<8x1xf32>
    %cst_111 = arith.constant 3.200000e+01 : f32
    %285 = vector.broadcast %cst_111 : f32 to vector<8x1xf32>
    %286 = arith.divf %284, %285 : vector<8x1xf32>
    %287 = vector.broadcast %286 : vector<8x1xf32> to vector<8x32xf32>
    %288 = arith.subf %278, %287 : vector<8x32xf32>
    %289 = arith.mulf %288, %288 : vector<8x32xf32>
    %cst_112 = arith.constant dense<0.000000e+00> : vector<8xf32>
    %290 = vector.multi_reduction <add>, %289, %cst_112 [1] : vector<8x32xf32> to vector<8xf32>
    %291 = vector.shape_cast %290 : vector<8xf32> to vector<8x1xf32>
    %cst_113 = arith.constant 3.200000e+01 : f32
    %292 = vector.broadcast %cst_113 : f32 to vector<8x1xf32>
    %293 = arith.divf %291, %292 : vector<8x1xf32>
    %cst_114 = arith.constant 9.99999974E-6 : f32
    %294 = vector.broadcast %cst_114 : f32 to vector<8x1xf32>
    %295 = arith.addf %293, %294 : vector<8x1xf32>
    %296 = math.rsqrt %295 : vector<8x1xf32>
    %297 = vector.broadcast %296 : vector<8x1xf32> to vector<8x32xf32>
    %298 = arith.mulf %288, %297 : vector<8x32xf32>
    %299 = vector.broadcast %280 : vector<1x32xf32> to vector<8x32xf32>
    %300 = arith.mulf %298, %299 : vector<8x32xf32>
    %301 = vector.broadcast %282 : vector<1x32xf32> to vector<8x32xf32>
    %302 = arith.addf %300, %301 : vector<8x32xf32>
    %c1_115 = arith.constant 1 : index
    %c0_116 = arith.constant 0 : index
    %c0_117 = arith.constant 0 : index
    %303 = vector.load %arg8[%c1_115, %c0_116, %c0_117] : memref<2x32x64xbf16, #tpu.memory_space<vmem>>, vector<1x32x64xbf16>
    %304 = vector.shape_cast %303 : vector<1x32x64xbf16> to vector<32x64xbf16>
    %c1_118 = arith.constant 1 : index
    %c0_119 = arith.constant 0 : index
    %c0_120 = arith.constant 0 : index
    %305 = vector.load %arg9[%c1_118, %c0_119, %c0_120] : memref<2x1x64xf32, #tpu.memory_space<vmem>>, vector<1x1x64xf32>
    %306 = vector.shape_cast %305 : vector<1x1x64xf32> to vector<1x64xf32>
    %307 = arith.truncf %302 : vector<8x32xf32> to vector<8x32xbf16>
    %cst_121 = arith.constant dense<0.000000e+00> : vector<8x64xf32>
    %308 = tpu.matmul %307, %304, %cst_121 {dimension_numbers = #tpu.dot_dimension_numbers<[1], [0], [0], [1], [0, 0, 1, 1], [], []>} : vector<8x32xbf16>, vector<32x64xbf16>, vector<8x64xf32> -> vector<8x64xf32>
    %309 = vector.broadcast %306 : vector<1x64xf32> to vector<8x64xf32>
    %310 = arith.addf %308, %309 : vector<8x64xf32>
    %cst_122 = arith.constant 0.000000e+00 : f32
    %311 = vector.broadcast %cst_122 : f32 to vector<8x64xf32>
    %312 = arith.maximumf %310, %311 : vector<8x64xf32>
    %c1_123 = arith.constant 1 : index
    %c0_124 = arith.constant 0 : index
    %c0_125 = arith.constant 0 : index
    %313 = vector.load %arg10[%c1_123, %c0_124, %c0_125] : memref<2x64x32xbf16, #tpu.memory_space<vmem>>, vector<1x64x32xbf16>
    %314 = vector.shape_cast %313 : vector<1x64x32xbf16> to vector<64x32xbf16>
    %c1_126 = arith.constant 1 : index
    %c0_127 = arith.constant 0 : index
    %c0_128 = arith.constant 0 : index
    %315 = vector.load %arg11[%c1_126, %c0_127, %c0_128] : memref<2x1x32xf32, #tpu.memory_space<vmem>>, vector<1x1x32xf32>
    %316 = vector.shape_cast %315 : vector<1x1x32xf32> to vector<1x32xf32>
    %317 = arith.truncf %312 : vector<8x64xf32> to vector<8x64xbf16>
    %cst_129 = arith.constant dense<0.000000e+00> : vector<8x32xf32>
    %318 = tpu.matmul %317, %314, %cst_129 {dimension_numbers = #tpu.dot_dimension_numbers<[1], [0], [0], [1], [0, 0, 1, 1], [], []>} : vector<8x64xbf16>, vector<64x32xbf16>, vector<8x32xf32> -> vector<8x32xf32>
    %319 = vector.broadcast %316 : vector<1x32xf32> to vector<8x32xf32>
    %320 = arith.addf %318, %319 : vector<8x32xf32>
    %c1_130 = arith.constant 1 : index
    %c0_131 = arith.constant 0 : index
    %c0_132 = arith.constant 0 : index
    %c0_133 = arith.constant 0 : index
    %321 = vector.load %arg12[%c1_130, %c0_131, %c0_132, %c0_133] : memref<2x2x1x32xf32, #tpu.memory_space<vmem>>, vector<1x2x1x32xf32>
    %322 = vector.shape_cast %321 : vector<1x2x1x32xf32> to vector<2x1x32xf32>
    %323 = arith.addf %302, %320 : vector<8x32xf32>
    %324 = vector.extract_strided_slice %322 {offsets = [0, 0, 0], sizes = [1, 1, 32], strides = [1, 1, 1]} : vector<2x1x32xf32> to vector<1x1x32xf32>
    %325 = vector.shape_cast %324 : vector<1x1x32xf32> to vector<1x32xf32>
    %326 = vector.extract_strided_slice %322 {offsets = [1, 0, 0], sizes = [1, 1, 32], strides = [1, 1, 1]} : vector<2x1x32xf32> to vector<1x1x32xf32>
    %327 = vector.shape_cast %326 : vector<1x1x32xf32> to vector<1x32xf32>
    %cst_134 = arith.constant dense<0.000000e+00> : vector<8xf32>
    %328 = vector.multi_reduction <add>, %323, %cst_134 [1] : vector<8x32xf32> to vector<8xf32>
    %329 = vector.shape_cast %328 : vector<8xf32> to vector<8x1xf32>
    %cst_135 = arith.constant 3.200000e+01 : f32
    %330 = vector.broadcast %cst_135 : f32 to vector<8x1xf32>
    %331 = arith.divf %329, %330 : vector<8x1xf32>
    %332 = vector.broadcast %331 : vector<8x1xf32> to vector<8x32xf32>
    %333 = arith.subf %323, %332 : vector<8x32xf32>
    %334 = arith.mulf %333, %333 : vector<8x32xf32>
    %cst_136 = arith.constant dense<0.000000e+00> : vector<8xf32>
    %335 = vector.multi_reduction <add>, %334, %cst_136 [1] : vector<8x32xf32> to vector<8xf32>
    %336 = vector.shape_cast %335 : vector<8xf32> to vector<8x1xf32>
    %cst_137 = arith.constant 3.200000e+01 : f32
    %337 = vector.broadcast %cst_137 : f32 to vector<8x1xf32>
    %338 = arith.divf %336, %337 : vector<8x1xf32>
    %cst_138 = arith.constant 9.99999974E-6 : f32
    %339 = vector.broadcast %cst_138 : f32 to vector<8x1xf32>
    %340 = arith.addf %338, %339 : vector<8x1xf32>
    %341 = math.rsqrt %340 : vector<8x1xf32>
    %342 = vector.broadcast %341 : vector<8x1xf32> to vector<8x32xf32>
    %343 = arith.mulf %333, %342 : vector<8x32xf32>
    %344 = vector.broadcast %325 : vector<1x32xf32> to vector<8x32xf32>
    %345 = arith.mulf %343, %344 : vector<8x32xf32>
    %346 = vector.broadcast %327 : vector<1x32xf32> to vector<8x32xf32>
    %347 = arith.addf %345, %346 : vector<8x32xf32>
    %c0_139 = arith.constant 0 : index
    %c0_140 = arith.constant 0 : index
    %c0_141 = arith.constant 0 : index
    %348 = vector.load %arg13[%c0_139, %c0_140, %c0_141] : memref<2x1x32xf32, #tpu.memory_space<vmem>>, vector<1x1x32xf32>
    %349 = vector.shape_cast %348 : vector<1x1x32xf32> to vector<1x32xf32>
    %c1_142 = arith.constant 1 : index
    %c0_143 = arith.constant 0 : index
    %c0_144 = arith.constant 0 : index
    %350 = vector.load %arg13[%c1_142, %c0_143, %c0_144] : memref<2x1x32xf32, #tpu.memory_space<vmem>>, vector<1x1x32xf32>
    %351 = vector.shape_cast %350 : vector<1x1x32xf32> to vector<1x32xf32>
    %cst_145 = arith.constant dense<0.000000e+00> : vector<8xf32>
    %352 = vector.multi_reduction <add>, %347, %cst_145 [1] : vector<8x32xf32> to vector<8xf32>
    %353 = vector.shape_cast %352 : vector<8xf32> to vector<8x1xf32>
    %cst_146 = arith.constant 3.200000e+01 : f32
    %354 = vector.broadcast %cst_146 : f32 to vector<8x1xf32>
    %355 = arith.divf %353, %354 : vector<8x1xf32>
    %356 = vector.broadcast %355 : vector<8x1xf32> to vector<8x32xf32>
    %357 = arith.subf %347, %356 : vector<8x32xf32>
    %358 = arith.mulf %357, %357 : vector<8x32xf32>
    %cst_147 = arith.constant dense<0.000000e+00> : vector<8xf32>
    %359 = vector.multi_reduction <add>, %358, %cst_147 [1] : vector<8x32xf32> to vector<8xf32>
    %360 = vector.shape_cast %359 : vector<8xf32> to vector<8x1xf32>
    %cst_148 = arith.constant 3.200000e+01 : f32
    %361 = vector.broadcast %cst_148 : f32 to vector<8x1xf32>
    %362 = arith.divf %360, %361 : vector<8x1xf32>
    %cst_149 = arith.constant 9.99999974E-6 : f32
    %363 = vector.broadcast %cst_149 : f32 to vector<8x1xf32>
    %364 = arith.addf %362, %363 : vector<8x1xf32>
    %365 = math.rsqrt %364 : vector<8x1xf32>
    %366 = vector.broadcast %365 : vector<8x1xf32> to vector<8x32xf32>
    %367 = arith.mulf %357, %366 : vector<8x32xf32>
    %368 = vector.broadcast %349 : vector<1x32xf32> to vector<8x32xf32>
    %369 = arith.mulf %367, %368 : vector<8x32xf32>
    %370 = vector.broadcast %351 : vector<1x32xf32> to vector<8x32xf32>
    %371 = arith.addf %369, %370 : vector<8x32xf32>
    %c0_150 = arith.constant 0 : index
    %c0_151 = arith.constant 0 : index
    %c0_152 = arith.constant 0 : index
    %c0_153 = arith.constant 0 : index
    %372 = vector.load %arg14[%c0_150, %c0_151, %c0_152, %c0_153] : memref<2x12x32x8xbf16, #tpu.memory_space<vmem>>, vector<1x12x32x8xbf16>
    %373 = vector.shape_cast %372 : vector<1x12x32x8xbf16> to vector<12x32x8xbf16>
    %c0_154 = arith.constant 0 : index
    %c0_155 = arith.constant 0 : index
    %c0_156 = arith.constant 0 : index
    %c0_157 = arith.constant 0 : index
    %374 = vector.load %arg15[%c0_154, %c0_155, %c0_156, %c0_157] : memref<2x12x1x8xf32, #tpu.memory_space<vmem>>, vector<1x12x1x8xf32>
    %375 = vector.shape_cast %374 : vector<1x12x1x8xf32> to vector<12x1x8xf32>
    %376 = vector.extract_strided_slice %373 {offsets = [0, 0, 0], sizes = [4, 32, 8], strides = [1, 1, 1]} : vector<12x32x8xbf16> to vector<4x32x8xbf16>
    %377 = vector.extract_strided_slice %373 {offsets = [4, 0, 0], sizes = [4, 32, 8], strides = [1, 1, 1]} : vector<12x32x8xbf16> to vector<4x32x8xbf16>
    %378 = vector.extract_strided_slice %373 {offsets = [8, 0, 0], sizes = [4, 32, 8], strides = [1, 1, 1]} : vector<12x32x8xbf16> to vector<4x32x8xbf16>
    %379 = vector.extract_strided_slice %375 {offsets = [0, 0, 0], sizes = [4, 1, 8], strides = [1, 1, 1]} : vector<12x1x8xf32> to vector<4x1x8xf32>
    %380 = vector.extract_strided_slice %375 {offsets = [4, 0, 0], sizes = [4, 1, 8], strides = [1, 1, 1]} : vector<12x1x8xf32> to vector<4x1x8xf32>
    %381 = vector.extract_strided_slice %375 {offsets = [8, 0, 0], sizes = [4, 1, 8], strides = [1, 1, 1]} : vector<12x1x8xf32> to vector<4x1x8xf32>
    %c0_158 = arith.constant 0 : index
    %c0_159 = arith.constant 0 : index
    %c0_160 = arith.constant 0 : index
    %c0_161 = arith.constant 0 : index
    %382 = vector.load %arg16[%c0_158, %c0_159, %c0_160, %c0_161] : memref<2x4x8x32xbf16, #tpu.memory_space<vmem>>, vector<1x4x8x32xbf16>
    %383 = vector.shape_cast %382 : vector<1x4x8x32xbf16> to vector<4x8x32xbf16>
    %c0_162 = arith.constant 0 : index
    %c0_163 = arith.constant 0 : index
    %c0_164 = arith.constant 0 : index
    %384 = vector.load %arg17[%c0_162, %c0_163, %c0_164] : memref<2x1x32xf32, #tpu.memory_space<vmem>>, vector<1x1x32xf32>
    %385 = vector.shape_cast %384 : vector<1x1x32xf32> to vector<1x32xf32>
    %386 = arith.truncf %3 : vector<8x32xf32> to vector<8x32xbf16>
    %387 = vector.extract_strided_slice %376 {offsets = [0, 0, 0], sizes = [1, 32, 8], strides = [1, 1, 1]} : vector<4x32x8xbf16> to vector<1x32x8xbf16>
    %388 = vector.shape_cast %387 : vector<1x32x8xbf16> to vector<32x8xbf16>
    %cst_165 = arith.constant dense<0.000000e+00> : vector<8x8xf32>
    %389 = tpu.matmul %386, %388, %cst_165 {dimension_numbers = #tpu.dot_dimension_numbers<[1], [0], [0], [1], [0, 0, 1, 1], [], []>} : vector<8x32xbf16>, vector<32x8xbf16>, vector<8x8xf32> -> vector<8x8xf32>
    %390 = vector.extract_strided_slice %376 {offsets = [1, 0, 0], sizes = [1, 32, 8], strides = [1, 1, 1]} : vector<4x32x8xbf16> to vector<1x32x8xbf16>
    %391 = vector.shape_cast %390 : vector<1x32x8xbf16> to vector<32x8xbf16>
    %cst_166 = arith.constant dense<0.000000e+00> : vector<8x8xf32>
    %392 = tpu.matmul %386, %391, %cst_166 {dimension_numbers = #tpu.dot_dimension_numbers<[1], [0], [0], [1], [0, 0, 1, 1], [], []>} : vector<8x32xbf16>, vector<32x8xbf16>, vector<8x8xf32> -> vector<8x8xf32>
    %393 = vector.extract_strided_slice %376 {offsets = [2, 0, 0], sizes = [1, 32, 8], strides = [1, 1, 1]} : vector<4x32x8xbf16> to vector<1x32x8xbf16>
    %394 = vector.shape_cast %393 : vector<1x32x8xbf16> to vector<32x8xbf16>
    %cst_167 = arith.constant dense<0.000000e+00> : vector<8x8xf32>
    %395 = tpu.matmul %386, %394, %cst_167 {dimension_numbers = #tpu.dot_dimension_numbers<[1], [0], [0], [1], [0, 0, 1, 1], [], []>} : vector<8x32xbf16>, vector<32x8xbf16>, vector<8x8xf32> -> vector<8x8xf32>
    %396 = vector.extract_strided_slice %376 {offsets = [3, 0, 0], sizes = [1, 32, 8], strides = [1, 1, 1]} : vector<4x32x8xbf16> to vector<1x32x8xbf16>
    %397 = vector.shape_cast %396 : vector<1x32x8xbf16> to vector<32x8xbf16>
    %cst_168 = arith.constant dense<0.000000e+00> : vector<8x8xf32>
    %398 = tpu.matmul %386, %397, %cst_168 {dimension_numbers = #tpu.dot_dimension_numbers<[1], [0], [0], [1], [0, 0, 1, 1], [], []>} : vector<8x32xbf16>, vector<32x8xbf16>, vector<8x8xf32> -> vector<8x8xf32>
    %399 = vector.shape_cast %389 : vector<8x8xf32> to vector<1x8x8xf32>
    %400 = vector.shape_cast %392 : vector<8x8xf32> to vector<1x8x8xf32>
    %401 = vector.shape_cast %395 : vector<8x8xf32> to vector<1x8x8xf32>
    %402 = vector.shape_cast %398 : vector<8x8xf32> to vector<1x8x8xf32>
    %403 = tpu.concatenate %399, %400, %401, %402 in 0 : vector<1x8x8xf32>, vector<1x8x8xf32>, vector<1x8x8xf32>, vector<1x8x8xf32> -> vector<4x8x8xf32>
    %404 = vector.broadcast %379 : vector<4x1x8xf32> to vector<4x8x8xf32>
    %405 = arith.addf %403, %404 : vector<4x8x8xf32>
    %406 = arith.truncf %3 : vector<8x32xf32> to vector<8x32xbf16>
    %407 = vector.extract_strided_slice %377 {offsets = [0, 0, 0], sizes = [1, 32, 8], strides = [1, 1, 1]} : vector<4x32x8xbf16> to vector<1x32x8xbf16>
    %408 = vector.shape_cast %407 : vector<1x32x8xbf16> to vector<32x8xbf16>
    %cst_169 = arith.constant dense<0.000000e+00> : vector<8x8xf32>
    %409 = tpu.matmul %406, %408, %cst_169 {dimension_numbers = #tpu.dot_dimension_numbers<[1], [0], [0], [1], [0, 0, 1, 1], [], []>} : vector<8x32xbf16>, vector<32x8xbf16>, vector<8x8xf32> -> vector<8x8xf32>
    %410 = vector.extract_strided_slice %377 {offsets = [1, 0, 0], sizes = [1, 32, 8], strides = [1, 1, 1]} : vector<4x32x8xbf16> to vector<1x32x8xbf16>
    %411 = vector.shape_cast %410 : vector<1x32x8xbf16> to vector<32x8xbf16>
    %cst_170 = arith.constant dense<0.000000e+00> : vector<8x8xf32>
    %412 = tpu.matmul %406, %411, %cst_170 {dimension_numbers = #tpu.dot_dimension_numbers<[1], [0], [0], [1], [0, 0, 1, 1], [], []>} : vector<8x32xbf16>, vector<32x8xbf16>, vector<8x8xf32> -> vector<8x8xf32>
    %413 = vector.extract_strided_slice %377 {offsets = [2, 0, 0], sizes = [1, 32, 8], strides = [1, 1, 1]} : vector<4x32x8xbf16> to vector<1x32x8xbf16>
    %414 = vector.shape_cast %413 : vector<1x32x8xbf16> to vector<32x8xbf16>
    %cst_171 = arith.constant dense<0.000000e+00> : vector<8x8xf32>
    %415 = tpu.matmul %406, %414, %cst_171 {dimension_numbers = #tpu.dot_dimension_numbers<[1], [0], [0], [1], [0, 0, 1, 1], [], []>} : vector<8x32xbf16>, vector<32x8xbf16>, vector<8x8xf32> -> vector<8x8xf32>
    %416 = vector.extract_strided_slice %377 {offsets = [3, 0, 0], sizes = [1, 32, 8], strides = [1, 1, 1]} : vector<4x32x8xbf16> to vector<1x32x8xbf16>
    %417 = vector.shape_cast %416 : vector<1x32x8xbf16> to vector<32x8xbf16>
    %cst_172 = arith.constant dense<0.000000e+00> : vector<8x8xf32>
    %418 = tpu.matmul %406, %417, %cst_172 {dimension_numbers = #tpu.dot_dimension_numbers<[1], [0], [0], [1], [0, 0, 1, 1], [], []>} : vector<8x32xbf16>, vector<32x8xbf16>, vector<8x8xf32> -> vector<8x8xf32>
    %419 = vector.shape_cast %409 : vector<8x8xf32> to vector<1x8x8xf32>
    %420 = vector.shape_cast %412 : vector<8x8xf32> to vector<1x8x8xf32>
    %421 = vector.shape_cast %415 : vector<8x8xf32> to vector<1x8x8xf32>
    %422 = vector.shape_cast %418 : vector<8x8xf32> to vector<1x8x8xf32>
    %423 = tpu.concatenate %419, %420, %421, %422 in 0 : vector<1x8x8xf32>, vector<1x8x8xf32>, vector<1x8x8xf32>, vector<1x8x8xf32> -> vector<4x8x8xf32>
    %424 = vector.broadcast %380 : vector<4x1x8xf32> to vector<4x8x8xf32>
    %425 = arith.addf %423, %424 : vector<4x8x8xf32>
    %426 = arith.truncf %3 : vector<8x32xf32> to vector<8x32xbf16>
    %427 = vector.extract_strided_slice %378 {offsets = [0, 0, 0], sizes = [1, 32, 8], strides = [1, 1, 1]} : vector<4x32x8xbf16> to vector<1x32x8xbf16>
    %428 = vector.shape_cast %427 : vector<1x32x8xbf16> to vector<32x8xbf16>
    %cst_173 = arith.constant dense<0.000000e+00> : vector<8x8xf32>
    %429 = tpu.matmul %426, %428, %cst_173 {dimension_numbers = #tpu.dot_dimension_numbers<[1], [0], [0], [1], [0, 0, 1, 1], [], []>} : vector<8x32xbf16>, vector<32x8xbf16>, vector<8x8xf32> -> vector<8x8xf32>
    %430 = vector.extract_strided_slice %378 {offsets = [1, 0, 0], sizes = [1, 32, 8], strides = [1, 1, 1]} : vector<4x32x8xbf16> to vector<1x32x8xbf16>
    %431 = vector.shape_cast %430 : vector<1x32x8xbf16> to vector<32x8xbf16>
    %cst_174 = arith.constant dense<0.000000e+00> : vector<8x8xf32>
    %432 = tpu.matmul %426, %431, %cst_174 {dimension_numbers = #tpu.dot_dimension_numbers<[1], [0], [0], [1], [0, 0, 1, 1], [], []>} : vector<8x32xbf16>, vector<32x8xbf16>, vector<8x8xf32> -> vector<8x8xf32>
    %433 = vector.extract_strided_slice %378 {offsets = [2, 0, 0], sizes = [1, 32, 8], strides = [1, 1, 1]} : vector<4x32x8xbf16> to vector<1x32x8xbf16>
    %434 = vector.shape_cast %433 : vector<1x32x8xbf16> to vector<32x8xbf16>
    %cst_175 = arith.constant dense<0.000000e+00> : vector<8x8xf32>
    %435 = tpu.matmul %426, %434, %cst_175 {dimension_numbers = #tpu.dot_dimension_numbers<[1], [0], [0], [1], [0, 0, 1, 1], [], []>} : vector<8x32xbf16>, vector<32x8xbf16>, vector<8x8xf32> -> vector<8x8xf32>
    %436 = vector.extract_strided_slice %378 {offsets = [3, 0, 0], sizes = [1, 32, 8], strides = [1, 1, 1]} : vector<4x32x8xbf16> to vector<1x32x8xbf16>
    %437 = vector.shape_cast %436 : vector<1x32x8xbf16> to vector<32x8xbf16>
    %cst_176 = arith.constant dense<0.000000e+00> : vector<8x8xf32>
    %438 = tpu.matmul %426, %437, %cst_176 {dimension_numbers = #tpu.dot_dimension_numbers<[1], [0], [0], [1], [0, 0, 1, 1], [], []>} : vector<8x32xbf16>, vector<32x8xbf16>, vector<8x8xf32> -> vector<8x8xf32>
    %439 = vector.shape_cast %429 : vector<8x8xf32> to vector<1x8x8xf32>
    %440 = vector.shape_cast %432 : vector<8x8xf32> to vector<1x8x8xf32>
    %441 = vector.shape_cast %435 : vector<8x8xf32> to vector<1x8x8xf32>
    %442 = vector.shape_cast %438 : vector<8x8xf32> to vector<1x8x8xf32>
    %443 = tpu.concatenate %439, %440, %441, %442 in 0 : vector<1x8x8xf32>, vector<1x8x8xf32>, vector<1x8x8xf32>, vector<1x8x8xf32> -> vector<4x8x8xf32>
    %444 = vector.broadcast %381 : vector<4x1x8xf32> to vector<4x8x8xf32>
    %445 = arith.addf %443, %444 : vector<4x8x8xf32>
    %446 = arith.truncf %405 : vector<4x8x8xf32> to vector<4x8x8xbf16>
    %447 = arith.truncf %425 : vector<4x8x8xf32> to vector<4x8x8xbf16>
    "tpu.trace_start"() <{level = 10 : i32, message = "hqe,hke->hqk"}> : () -> ()
    %cst_177 = arith.constant dense<0.000000e+00> : vector<4x8x8xf32>
    %448 = tpu.matmul %446, %447, %cst_177 {dimension_numbers = #tpu.dot_dimension_numbers<[2], [2], [1], [1], [0, 0, 0, 1, 1, 1], [0], [0]>} : vector<4x8x8xbf16>, vector<4x8x8xbf16>, vector<4x8x8xf32> -> vector<4x8x8xf32>
    "tpu.trace_stop"() : () -> ()
    %cst_178 = arith.constant 0.353553385 : f32
    %449 = vector.broadcast %cst_178 : f32 to vector<4x8x8xf32>
    %450 = arith.mulf %448, %449 : vector<4x8x8xf32>
    %451 = vector.shape_cast %9 : vector<8x8xf32> to vector<1x8x8xf32>
    %452 = vector.broadcast %451 : vector<1x8x8xf32> to vector<4x8x8xf32>
    %453 = arith.addf %450, %452 : vector<4x8x8xf32>
    %cst_179 = arith.constant dense<0xFF800000> : vector<4x8xf32>
    %454 = vector.multi_reduction <maximumf>, %453, %cst_179 [2] : vector<4x8x8xf32> to vector<4x8xf32>
    %455 = vector.shape_cast %454 : vector<4x8xf32> to vector<4x8x1xf32>
    %456 = vector.broadcast %455 : vector<4x8x1xf32> to vector<4x8x8xf32>
    %457 = arith.subf %453, %456 : vector<4x8x8xf32>
    %458 = math.exp %457 : vector<4x8x8xf32>
    %cst_180 = arith.constant dense<0.000000e+00> : vector<4x8xf32>
    %459 = vector.multi_reduction <add>, %458, %cst_180 [2] : vector<4x8x8xf32> to vector<4x8xf32>
    %460 = vector.shape_cast %459 : vector<4x8xf32> to vector<4x8x1xf32>
    %461 = tpu.reciprocal %460 : vector<4x8x1xf32> -> vector<4x8x1xf32>
    %462 = vector.broadcast %461 : vector<4x8x1xf32> to vector<4x8x8xf32>
    %463 = arith.mulf %458, %462 : vector<4x8x8xf32>
    %464 = arith.truncf %463 : vector<4x8x8xf32> to vector<4x8x8xbf16>
    %465 = arith.truncf %445 : vector<4x8x8xf32> to vector<4x8x8xbf16>
    "tpu.trace_start"() <{level = 10 : i32, message = "hqk,hke->hqe"}> : () -> ()
    %cst_181 = arith.constant dense<0.000000e+00> : vector<4x8x8xf32>
    %466 = tpu.matmul %464, %465, %cst_181 {dimension_numbers = #tpu.dot_dimension_numbers<[2], [1], [1], [2], [0, 0, 0, 1, 1, 2], [0], [0]>} : vector<4x8x8xbf16>, vector<4x8x8xbf16>, vector<4x8x8xf32> -> vector<4x8x8xf32>
    "tpu.trace_stop"() : () -> ()
    %467 = arith.truncf %466 : vector<4x8x8xf32> to vector<4x8x8xbf16>
    "tpu.trace_start"() <{level = 10 : i32, message = "hqe,hed->hqd"}> : () -> ()
    %cst_182 = arith.constant dense<0.000000e+00> : vector<4x8x32xf32>
    %468 = tpu.matmul %467, %383, %cst_182 {dimension_numbers = #tpu.dot_dimension_numbers<[2], [1], [1], [2], [0, 0, 0, 1, 1, 2], [0], [0]>} : vector<4x8x8xbf16>, vector<4x8x32xbf16>, vector<4x8x32xf32> -> vector<4x8x32xf32>
    "tpu.trace_stop"() : () -> ()
    %cst_183 = arith.constant dense<0.000000e+00> : vector<8x32xf32>
    %469 = vector.multi_reduction <add>, %468, %cst_183 [0] : vector<4x8x32xf32> to vector<8x32xf32>
    %470 = vector.broadcast %385 : vector<1x32xf32> to vector<8x32xf32>
    %471 = arith.addf %469, %470 : vector<8x32xf32>
    %c0_184 = arith.constant 0 : index
    %c0_185 = arith.constant 0 : index
    %c0_186 = arith.constant 0 : index
    %c0_187 = arith.constant 0 : index
    %472 = vector.load %arg18[%c0_184, %c0_185, %c0_186, %c0_187] : memref<2x2x1x32xf32, #tpu.memory_space<vmem>>, vector<1x2x1x32xf32>
    %473 = vector.shape_cast %472 : vector<1x2x1x32xf32> to vector<2x1x32xf32>
    %474 = arith.addf %3, %471 : vector<8x32xf32>
    %475 = vector.extract_strided_slice %473 {offsets = [0, 0, 0], sizes = [1, 1, 32], strides = [1, 1, 1]} : vector<2x1x32xf32> to vector<1x1x32xf32>
    %476 = vector.shape_cast %475 : vector<1x1x32xf32> to vector<1x32xf32>
    %477 = vector.extract_strided_slice %473 {offsets = [1, 0, 0], sizes = [1, 1, 32], strides = [1, 1, 1]} : vector<2x1x32xf32> to vector<1x1x32xf32>
    %478 = vector.shape_cast %477 : vector<1x1x32xf32> to vector<1x32xf32>
    %cst_188 = arith.constant dense<0.000000e+00> : vector<8xf32>
    %479 = vector.multi_reduction <add>, %474, %cst_188 [1] : vector<8x32xf32> to vector<8xf32>
    %480 = vector.shape_cast %479 : vector<8xf32> to vector<8x1xf32>
    %cst_189 = arith.constant 3.200000e+01 : f32
    %481 = vector.broadcast %cst_189 : f32 to vector<8x1xf32>
    %482 = arith.divf %480, %481 : vector<8x1xf32>
    %483 = vector.broadcast %482 : vector<8x1xf32> to vector<8x32xf32>
    %484 = arith.subf %474, %483 : vector<8x32xf32>
    %485 = arith.mulf %484, %484 : vector<8x32xf32>
    %cst_190 = arith.constant dense<0.000000e+00> : vector<8xf32>
    %486 = vector.multi_reduction <add>, %485, %cst_190 [1] : vector<8x32xf32> to vector<8xf32>
    %487 = vector.shape_cast %486 : vector<8xf32> to vector<8x1xf32>
    %cst_191 = arith.constant 3.200000e+01 : f32
    %488 = vector.broadcast %cst_191 : f32 to vector<8x1xf32>
    %489 = arith.divf %487, %488 : vector<8x1xf32>
    %cst_192 = arith.constant 9.99999974E-6 : f32
    %490 = vector.broadcast %cst_192 : f32 to vector<8x1xf32>
    %491 = arith.addf %489, %490 : vector<8x1xf32>
    %492 = math.rsqrt %491 : vector<8x1xf32>
    %493 = vector.broadcast %492 : vector<8x1xf32> to vector<8x32xf32>
    %494 = arith.mulf %484, %493 : vector<8x32xf32>
    %495 = vector.broadcast %476 : vector<1x32xf32> to vector<8x32xf32>
    %496 = arith.mulf %494, %495 : vector<8x32xf32>
    %497 = vector.broadcast %478 : vector<1x32xf32> to vector<8x32xf32>
    %498 = arith.addf %496, %497 : vector<8x32xf32>
    %c0_193 = arith.constant 0 : index
    %c0_194 = arith.constant 0 : index
    %c0_195 = arith.constant 0 : index
    %c0_196 = arith.constant 0 : index
    %499 = vector.load %arg21[%c0_193, %c0_194, %c0_195, %c0_196] : memref<2x8x32x8xbf16, #tpu.memory_space<vmem>>, vector<1x8x32x8xbf16>
    %500 = vector.shape_cast %499 : vector<1x8x32x8xbf16> to vector<8x32x8xbf16>
    %c0_197 = arith.constant 0 : index
    %c0_198 = arith.constant 0 : index
    %c0_199 = arith.constant 0 : index
    %c0_200 = arith.constant 0 : index
    %501 = vector.load %arg22[%c0_197, %c0_198, %c0_199, %c0_200] : memref<2x8x1x8xf32, #tpu.memory_space<vmem>>, vector<1x8x1x8xf32>
    %502 = vector.shape_cast %501 : vector<1x8x1x8xf32> to vector<8x1x8xf32>
    %c0_201 = arith.constant 0 : index
    %c0_202 = arith.constant 0 : index
    %c0_203 = arith.constant 0 : index
    %c0_204 = arith.constant 0 : index
    %503 = vector.load %arg19[%c0_201, %c0_202, %c0_203, %c0_204] : memref<2x4x32x8xbf16, #tpu.memory_space<vmem>>, vector<1x4x32x8xbf16>
    %504 = vector.shape_cast %503 : vector<1x4x32x8xbf16> to vector<4x32x8xbf16>
    %505 = vector.extract_strided_slice %500 {offsets = [0, 0, 0], sizes = [4, 32, 8], strides = [1, 1, 1]} : vector<8x32x8xbf16> to vector<4x32x8xbf16>
    %506 = vector.extract_strided_slice %500 {offsets = [4, 0, 0], sizes = [4, 32, 8], strides = [1, 1, 1]} : vector<8x32x8xbf16> to vector<4x32x8xbf16>
    %c0_205 = arith.constant 0 : index
    %c0_206 = arith.constant 0 : index
    %c0_207 = arith.constant 0 : index
    %c0_208 = arith.constant 0 : index
    %507 = vector.load %arg20[%c0_205, %c0_206, %c0_207, %c0_208] : memref<2x4x1x8xf32, #tpu.memory_space<vmem>>, vector<1x4x1x8xf32>
    %508 = vector.shape_cast %507 : vector<1x4x1x8xf32> to vector<4x1x8xf32>
    %509 = vector.extract_strided_slice %502 {offsets = [0, 0, 0], sizes = [4, 1, 8], strides = [1, 1, 1]} : vector<8x1x8xf32> to vector<4x1x8xf32>
    %510 = vector.extract_strided_slice %502 {offsets = [4, 0, 0], sizes = [4, 1, 8], strides = [1, 1, 1]} : vector<8x1x8xf32> to vector<4x1x8xf32>
    %c0_209 = arith.constant 0 : index
    %c0_210 = arith.constant 0 : index
    %c0_211 = arith.constant 0 : index
    %c0_212 = arith.constant 0 : index
    %511 = vector.load %arg23[%c0_209, %c0_210, %c0_211, %c0_212] : memref<2x4x8x32xbf16, #tpu.memory_space<vmem>>, vector<1x4x8x32xbf16>
    %512 = vector.shape_cast %511 : vector<1x4x8x32xbf16> to vector<4x8x32xbf16>
    %c0_213 = arith.constant 0 : index
    %c0_214 = arith.constant 0 : index
    %c0_215 = arith.constant 0 : index
    %513 = vector.load %arg24[%c0_213, %c0_214, %c0_215] : memref<2x1x32xf32, #tpu.memory_space<vmem>>, vector<1x1x32xf32>
    %514 = vector.shape_cast %513 : vector<1x1x32xf32> to vector<1x32xf32>
    %515 = arith.truncf %498 : vector<8x32xf32> to vector<8x32xbf16>
    %516 = vector.extract_strided_slice %504 {offsets = [0, 0, 0], sizes = [1, 32, 8], strides = [1, 1, 1]} : vector<4x32x8xbf16> to vector<1x32x8xbf16>
    %517 = vector.shape_cast %516 : vector<1x32x8xbf16> to vector<32x8xbf16>
    %cst_216 = arith.constant dense<0.000000e+00> : vector<8x8xf32>
    %518 = tpu.matmul %515, %517, %cst_216 {dimension_numbers = #tpu.dot_dimension_numbers<[1], [0], [0], [1], [0, 0, 1, 1], [], []>} : vector<8x32xbf16>, vector<32x8xbf16>, vector<8x8xf32> -> vector<8x8xf32>
    %519 = vector.extract_strided_slice %504 {offsets = [1, 0, 0], sizes = [1, 32, 8], strides = [1, 1, 1]} : vector<4x32x8xbf16> to vector<1x32x8xbf16>
    %520 = vector.shape_cast %519 : vector<1x32x8xbf16> to vector<32x8xbf16>
    %cst_217 = arith.constant dense<0.000000e+00> : vector<8x8xf32>
    %521 = tpu.matmul %515, %520, %cst_217 {dimension_numbers = #tpu.dot_dimension_numbers<[1], [0], [0], [1], [0, 0, 1, 1], [], []>} : vector<8x32xbf16>, vector<32x8xbf16>, vector<8x8xf32> -> vector<8x8xf32>
    %522 = vector.extract_strided_slice %504 {offsets = [2, 0, 0], sizes = [1, 32, 8], strides = [1, 1, 1]} : vector<4x32x8xbf16> to vector<1x32x8xbf16>
    %523 = vector.shape_cast %522 : vector<1x32x8xbf16> to vector<32x8xbf16>
    %cst_218 = arith.constant dense<0.000000e+00> : vector<8x8xf32>
    %524 = tpu.matmul %515, %523, %cst_218 {dimension_numbers = #tpu.dot_dimension_numbers<[1], [0], [0], [1], [0, 0, 1, 1], [], []>} : vector<8x32xbf16>, vector<32x8xbf16>, vector<8x8xf32> -> vector<8x8xf32>
    %525 = vector.extract_strided_slice %504 {offsets = [3, 0, 0], sizes = [1, 32, 8], strides = [1, 1, 1]} : vector<4x32x8xbf16> to vector<1x32x8xbf16>
    %526 = vector.shape_cast %525 : vector<1x32x8xbf16> to vector<32x8xbf16>
    %cst_219 = arith.constant dense<0.000000e+00> : vector<8x8xf32>
    %527 = tpu.matmul %515, %526, %cst_219 {dimension_numbers = #tpu.dot_dimension_numbers<[1], [0], [0], [1], [0, 0, 1, 1], [], []>} : vector<8x32xbf16>, vector<32x8xbf16>, vector<8x8xf32> -> vector<8x8xf32>
    %528 = vector.shape_cast %518 : vector<8x8xf32> to vector<1x8x8xf32>
    %529 = vector.shape_cast %521 : vector<8x8xf32> to vector<1x8x8xf32>
    %530 = vector.shape_cast %524 : vector<8x8xf32> to vector<1x8x8xf32>
    %531 = vector.shape_cast %527 : vector<8x8xf32> to vector<1x8x8xf32>
    %532 = tpu.concatenate %528, %529, %530, %531 in 0 : vector<1x8x8xf32>, vector<1x8x8xf32>, vector<1x8x8xf32>, vector<1x8x8xf32> -> vector<4x8x8xf32>
    %533 = vector.broadcast %508 : vector<4x1x8xf32> to vector<4x8x8xf32>
    %534 = arith.addf %532, %533 : vector<4x8x8xf32>
    %535 = arith.truncf %371 : vector<8x32xf32> to vector<8x32xbf16>
    %536 = vector.extract_strided_slice %505 {offsets = [0, 0, 0], sizes = [1, 32, 8], strides = [1, 1, 1]} : vector<4x32x8xbf16> to vector<1x32x8xbf16>
    %537 = vector.shape_cast %536 : vector<1x32x8xbf16> to vector<32x8xbf16>
    %cst_220 = arith.constant dense<0.000000e+00> : vector<8x8xf32>
    %538 = tpu.matmul %535, %537, %cst_220 {dimension_numbers = #tpu.dot_dimension_numbers<[1], [0], [0], [1], [0, 0, 1, 1], [], []>} : vector<8x32xbf16>, vector<32x8xbf16>, vector<8x8xf32> -> vector<8x8xf32>
    %539 = vector.extract_strided_slice %505 {offsets = [1, 0, 0], sizes = [1, 32, 8], strides = [1, 1, 1]} : vector<4x32x8xbf16> to vector<1x32x8xbf16>
    %540 = vector.shape_cast %539 : vector<1x32x8xbf16> to vector<32x8xbf16>
    %cst_221 = arith.constant dense<0.000000e+00> : vector<8x8xf32>
    %541 = tpu.matmul %535, %540, %cst_221 {dimension_numbers = #tpu.dot_dimension_numbers<[1], [0], [0], [1], [0, 0, 1, 1], [], []>} : vector<8x32xbf16>, vector<32x8xbf16>, vector<8x8xf32> -> vector<8x8xf32>
    %542 = vector.extract_strided_slice %505 {offsets = [2, 0, 0], sizes = [1, 32, 8], strides = [1, 1, 1]} : vector<4x32x8xbf16> to vector<1x32x8xbf16>
    %543 = vector.shape_cast %542 : vector<1x32x8xbf16> to vector<32x8xbf16>
    %cst_222 = arith.constant dense<0.000000e+00> : vector<8x8xf32>
    %544 = tpu.matmul %535, %543, %cst_222 {dimension_numbers = #tpu.dot_dimension_numbers<[1], [0], [0], [1], [0, 0, 1, 1], [], []>} : vector<8x32xbf16>, vector<32x8xbf16>, vector<8x8xf32> -> vector<8x8xf32>
    %545 = vector.extract_strided_slice %505 {offsets = [3, 0, 0], sizes = [1, 32, 8], strides = [1, 1, 1]} : vector<4x32x8xbf16> to vector<1x32x8xbf16>
    %546 = vector.shape_cast %545 : vector<1x32x8xbf16> to vector<32x8xbf16>
    %cst_223 = arith.constant dense<0.000000e+00> : vector<8x8xf32>
    %547 = tpu.matmul %535, %546, %cst_223 {dimension_numbers = #tpu.dot_dimension_numbers<[1], [0], [0], [1], [0, 0, 1, 1], [], []>} : vector<8x32xbf16>, vector<32x8xbf16>, vector<8x8xf32> -> vector<8x8xf32>
    %548 = vector.shape_cast %538 : vector<8x8xf32> to vector<1x8x8xf32>
    %549 = vector.shape_cast %541 : vector<8x8xf32> to vector<1x8x8xf32>
    %550 = vector.shape_cast %544 : vector<8x8xf32> to vector<1x8x8xf32>
    %551 = vector.shape_cast %547 : vector<8x8xf32> to vector<1x8x8xf32>
    %552 = tpu.concatenate %548, %549, %550, %551 in 0 : vector<1x8x8xf32>, vector<1x8x8xf32>, vector<1x8x8xf32>, vector<1x8x8xf32> -> vector<4x8x8xf32>
    %553 = vector.broadcast %509 : vector<4x1x8xf32> to vector<4x8x8xf32>
    %554 = arith.addf %552, %553 : vector<4x8x8xf32>
    %555 = arith.truncf %371 : vector<8x32xf32> to vector<8x32xbf16>
    %556 = vector.extract_strided_slice %506 {offsets = [0, 0, 0], sizes = [1, 32, 8], strides = [1, 1, 1]} : vector<4x32x8xbf16> to vector<1x32x8xbf16>
    %557 = vector.shape_cast %556 : vector<1x32x8xbf16> to vector<32x8xbf16>
    %cst_224 = arith.constant dense<0.000000e+00> : vector<8x8xf32>
    %558 = tpu.matmul %555, %557, %cst_224 {dimension_numbers = #tpu.dot_dimension_numbers<[1], [0], [0], [1], [0, 0, 1, 1], [], []>} : vector<8x32xbf16>, vector<32x8xbf16>, vector<8x8xf32> -> vector<8x8xf32>
    %559 = vector.extract_strided_slice %506 {offsets = [1, 0, 0], sizes = [1, 32, 8], strides = [1, 1, 1]} : vector<4x32x8xbf16> to vector<1x32x8xbf16>
    %560 = vector.shape_cast %559 : vector<1x32x8xbf16> to vector<32x8xbf16>
    %cst_225 = arith.constant dense<0.000000e+00> : vector<8x8xf32>
    %561 = tpu.matmul %555, %560, %cst_225 {dimension_numbers = #tpu.dot_dimension_numbers<[1], [0], [0], [1], [0, 0, 1, 1], [], []>} : vector<8x32xbf16>, vector<32x8xbf16>, vector<8x8xf32> -> vector<8x8xf32>
    %562 = vector.extract_strided_slice %506 {offsets = [2, 0, 0], sizes = [1, 32, 8], strides = [1, 1, 1]} : vector<4x32x8xbf16> to vector<1x32x8xbf16>
    %563 = vector.shape_cast %562 : vector<1x32x8xbf16> to vector<32x8xbf16>
    %cst_226 = arith.constant dense<0.000000e+00> : vector<8x8xf32>
    %564 = tpu.matmul %555, %563, %cst_226 {dimension_numbers = #tpu.dot_dimension_numbers<[1], [0], [0], [1], [0, 0, 1, 1], [], []>} : vector<8x32xbf16>, vector<32x8xbf16>, vector<8x8xf32> -> vector<8x8xf32>
    %565 = vector.extract_strided_slice %506 {offsets = [3, 0, 0], sizes = [1, 32, 8], strides = [1, 1, 1]} : vector<4x32x8xbf16> to vector<1x32x8xbf16>
    %566 = vector.shape_cast %565 : vector<1x32x8xbf16> to vector<32x8xbf16>
    %cst_227 = arith.constant dense<0.000000e+00> : vector<8x8xf32>
    %567 = tpu.matmul %555, %566, %cst_227 {dimension_numbers = #tpu.dot_dimension_numbers<[1], [0], [0], [1], [0, 0, 1, 1], [], []>} : vector<8x32xbf16>, vector<32x8xbf16>, vector<8x8xf32> -> vector<8x8xf32>
    %568 = vector.shape_cast %558 : vector<8x8xf32> to vector<1x8x8xf32>
    %569 = vector.shape_cast %561 : vector<8x8xf32> to vector<1x8x8xf32>
    %570 = vector.shape_cast %564 : vector<8x8xf32> to vector<1x8x8xf32>
    %571 = vector.shape_cast %567 : vector<8x8xf32> to vector<1x8x8xf32>
    %572 = tpu.concatenate %568, %569, %570, %571 in 0 : vector<1x8x8xf32>, vector<1x8x8xf32>, vector<1x8x8xf32>, vector<1x8x8xf32> -> vector<4x8x8xf32>
    %573 = vector.broadcast %510 : vector<4x1x8xf32> to vector<4x8x8xf32>
    %574 = arith.addf %572, %573 : vector<4x8x8xf32>
    %575 = arith.truncf %534 : vector<4x8x8xf32> to vector<4x8x8xbf16>
    %576 = arith.truncf %554 : vector<4x8x8xf32> to vector<4x8x8xbf16>
    "tpu.trace_start"() <{level = 10 : i32, message = "hqe,hke->hqk"}> : () -> ()
    %cst_228 = arith.constant dense<0.000000e+00> : vector<4x8x8xf32>
    %577 = tpu.matmul %575, %576, %cst_228 {dimension_numbers = #tpu.dot_dimension_numbers<[2], [2], [1], [1], [0, 0, 0, 1, 1, 1], [0], [0]>} : vector<4x8x8xbf16>, vector<4x8x8xbf16>, vector<4x8x8xf32> -> vector<4x8x8xf32>
    "tpu.trace_stop"() : () -> ()
    %cst_229 = arith.constant 0.353553385 : f32
    %578 = vector.broadcast %cst_229 : f32 to vector<4x8x8xf32>
    %579 = arith.mulf %577, %578 : vector<4x8x8xf32>
    %cst_230 = arith.constant dense<0xFF800000> : vector<4x8xf32>
    %580 = vector.multi_reduction <maximumf>, %579, %cst_230 [2] : vector<4x8x8xf32> to vector<4x8xf32>
    %581 = vector.shape_cast %580 : vector<4x8xf32> to vector<4x8x1xf32>
    %582 = vector.broadcast %581 : vector<4x8x1xf32> to vector<4x8x8xf32>
    %583 = arith.subf %579, %582 : vector<4x8x8xf32>
    %584 = math.exp %583 : vector<4x8x8xf32>
    %cst_231 = arith.constant dense<0.000000e+00> : vector<4x8xf32>
    %585 = vector.multi_reduction <add>, %584, %cst_231 [2] : vector<4x8x8xf32> to vector<4x8xf32>
    %586 = vector.shape_cast %585 : vector<4x8xf32> to vector<4x8x1xf32>
    %587 = tpu.reciprocal %586 : vector<4x8x1xf32> -> vector<4x8x1xf32>
    %588 = vector.broadcast %587 : vector<4x8x1xf32> to vector<4x8x8xf32>
    %589 = arith.mulf %584, %588 : vector<4x8x8xf32>
    %590 = arith.truncf %589 : vector<4x8x8xf32> to vector<4x8x8xbf16>
    %591 = arith.truncf %574 : vector<4x8x8xf32> to vector<4x8x8xbf16>
    "tpu.trace_start"() <{level = 10 : i32, message = "hqk,hke->hqe"}> : () -> ()
    %cst_232 = arith.constant dense<0.000000e+00> : vector<4x8x8xf32>
    %592 = tpu.matmul %590, %591, %cst_232 {dimension_numbers = #tpu.dot_dimension_numbers<[2], [1], [1], [2], [0, 0, 0, 1, 1, 2], [0], [0]>} : vector<4x8x8xbf16>, vector<4x8x8xbf16>, vector<4x8x8xf32> -> vector<4x8x8xf32>
    "tpu.trace_stop"() : () -> ()
    %593 = arith.truncf %592 : vector<4x8x8xf32> to vector<4x8x8xbf16>
    "tpu.trace_start"() <{level = 10 : i32, message = "hqe,hed->hqd"}> : () -> ()
    %cst_233 = arith.constant dense<0.000000e+00> : vector<4x8x32xf32>
    %594 = tpu.matmul %593, %512, %cst_233 {dimension_numbers = #tpu.dot_dimension_numbers<[2], [1], [1], [2], [0, 0, 0, 1, 1, 2], [0], [0]>} : vector<4x8x8xbf16>, vector<4x8x32xbf16>, vector<4x8x32xf32> -> vector<4x8x32xf32>
    "tpu.trace_stop"() : () -> ()
    %cst_234 = arith.constant dense<0.000000e+00> : vector<8x32xf32>
    %595 = vector.multi_reduction <add>, %594, %cst_234 [0] : vector<4x8x32xf32> to vector<8x32xf32>
    %596 = vector.broadcast %514 : vector<1x32xf32> to vector<8x32xf32>
    %597 = arith.addf %595, %596 : vector<8x32xf32>
    %c0_235 = arith.constant 0 : index
    %c0_236 = arith.constant 0 : index
    %c0_237 = arith.constant 0 : index
    %c0_238 = arith.constant 0 : index
    %598 = vector.load %arg25[%c0_235, %c0_236, %c0_237, %c0_238] : memref<2x2x1x32xf32, #tpu.memory_space<vmem>>, vector<1x2x1x32xf32>
    %599 = vector.shape_cast %598 : vector<1x2x1x32xf32> to vector<2x1x32xf32>
    %600 = arith.addf %498, %597 : vector<8x32xf32>
    %601 = vector.extract_strided_slice %599 {offsets = [0, 0, 0], sizes = [1, 1, 32], strides = [1, 1, 1]} : vector<2x1x32xf32> to vector<1x1x32xf32>
    %602 = vector.shape_cast %601 : vector<1x1x32xf32> to vector<1x32xf32>
    %603 = vector.extract_strided_slice %599 {offsets = [1, 0, 0], sizes = [1, 1, 32], strides = [1, 1, 1]} : vector<2x1x32xf32> to vector<1x1x32xf32>
    %604 = vector.shape_cast %603 : vector<1x1x32xf32> to vector<1x32xf32>
    %cst_239 = arith.constant dense<0.000000e+00> : vector<8xf32>
    %605 = vector.multi_reduction <add>, %600, %cst_239 [1] : vector<8x32xf32> to vector<8xf32>
    %606 = vector.shape_cast %605 : vector<8xf32> to vector<8x1xf32>
    %cst_240 = arith.constant 3.200000e+01 : f32
    %607 = vector.broadcast %cst_240 : f32 to vector<8x1xf32>
    %608 = arith.divf %606, %607 : vector<8x1xf32>
    %609 = vector.broadcast %608 : vector<8x1xf32> to vector<8x32xf32>
    %610 = arith.subf %600, %609 : vector<8x32xf32>
    %611 = arith.mulf %610, %610 : vector<8x32xf32>
    %cst_241 = arith.constant dense<0.000000e+00> : vector<8xf32>
    %612 = vector.multi_reduction <add>, %611, %cst_241 [1] : vector<8x32xf32> to vector<8xf32>
    %613 = vector.shape_cast %612 : vector<8xf32> to vector<8x1xf32>
    %cst_242 = arith.constant 3.200000e+01 : f32
    %614 = vector.broadcast %cst_242 : f32 to vector<8x1xf32>
    %615 = arith.divf %613, %614 : vector<8x1xf32>
    %cst_243 = arith.constant 9.99999974E-6 : f32
    %616 = vector.broadcast %cst_243 : f32 to vector<8x1xf32>
    %617 = arith.addf %615, %616 : vector<8x1xf32>
    %618 = math.rsqrt %617 : vector<8x1xf32>
    %619 = vector.broadcast %618 : vector<8x1xf32> to vector<8x32xf32>
    %620 = arith.mulf %610, %619 : vector<8x32xf32>
    %621 = vector.broadcast %602 : vector<1x32xf32> to vector<8x32xf32>
    %622 = arith.mulf %620, %621 : vector<8x32xf32>
    %623 = vector.broadcast %604 : vector<1x32xf32> to vector<8x32xf32>
    %624 = arith.addf %622, %623 : vector<8x32xf32>
    %c0_244 = arith.constant 0 : index
    %c0_245 = arith.constant 0 : index
    %c0_246 = arith.constant 0 : index
    %625 = vector.load %arg26[%c0_244, %c0_245, %c0_246] : memref<2x32x64xbf16, #tpu.memory_space<vmem>>, vector<1x32x64xbf16>
    %626 = vector.shape_cast %625 : vector<1x32x64xbf16> to vector<32x64xbf16>
    %c0_247 = arith.constant 0 : index
    %c0_248 = arith.constant 0 : index
    %c0_249 = arith.constant 0 : index
    %627 = vector.load %arg27[%c0_247, %c0_248, %c0_249] : memref<2x1x64xf32, #tpu.memory_space<vmem>>, vector<1x1x64xf32>
    %628 = vector.shape_cast %627 : vector<1x1x64xf32> to vector<1x64xf32>
    %629 = arith.truncf %624 : vector<8x32xf32> to vector<8x32xbf16>
    %cst_250 = arith.constant dense<0.000000e+00> : vector<8x64xf32>
    %630 = tpu.matmul %629, %626, %cst_250 {dimension_numbers = #tpu.dot_dimension_numbers<[1], [0], [0], [1], [0, 0, 1, 1], [], []>} : vector<8x32xbf16>, vector<32x64xbf16>, vector<8x64xf32> -> vector<8x64xf32>
    %631 = vector.broadcast %628 : vector<1x64xf32> to vector<8x64xf32>
    %632 = arith.addf %630, %631 : vector<8x64xf32>
    %cst_251 = arith.constant 0.000000e+00 : f32
    %633 = vector.broadcast %cst_251 : f32 to vector<8x64xf32>
    %634 = arith.maximumf %632, %633 : vector<8x64xf32>
    %c0_252 = arith.constant 0 : index
    %c0_253 = arith.constant 0 : index
    %c0_254 = arith.constant 0 : index
    %635 = vector.load %arg28[%c0_252, %c0_253, %c0_254] : memref<2x64x32xbf16, #tpu.memory_space<vmem>>, vector<1x64x32xbf16>
    %636 = vector.shape_cast %635 : vector<1x64x32xbf16> to vector<64x32xbf16>
    %c0_255 = arith.constant 0 : index
    %c0_256 = arith.constant 0 : index
    %c0_257 = arith.constant 0 : index
    %637 = vector.load %arg29[%c0_255, %c0_256, %c0_257] : memref<2x1x32xf32, #tpu.memory_space<vmem>>, vector<1x1x32xf32>
    %638 = vector.shape_cast %637 : vector<1x1x32xf32> to vector<1x32xf32>
    %639 = arith.truncf %634 : vector<8x64xf32> to vector<8x64xbf16>
    %cst_258 = arith.constant dense<0.000000e+00> : vector<8x32xf32>
    %640 = tpu.matmul %639, %636, %cst_258 {dimension_numbers = #tpu.dot_dimension_numbers<[1], [0], [0], [1], [0, 0, 1, 1], [], []>} : vector<8x64xbf16>, vector<64x32xbf16>, vector<8x32xf32> -> vector<8x32xf32>
    %641 = vector.broadcast %638 : vector<1x32xf32> to vector<8x32xf32>
    %642 = arith.addf %640, %641 : vector<8x32xf32>
    %c0_259 = arith.constant 0 : index
    %c0_260 = arith.constant 0 : index
    %c0_261 = arith.constant 0 : index
    %c0_262 = arith.constant 0 : index
    %643 = vector.load %arg30[%c0_259, %c0_260, %c0_261, %c0_262] : memref<2x2x1x32xf32, #tpu.memory_space<vmem>>, vector<1x2x1x32xf32>
    %644 = vector.shape_cast %643 : vector<1x2x1x32xf32> to vector<2x1x32xf32>
    %645 = arith.addf %624, %642 : vector<8x32xf32>
    %646 = vector.extract_strided_slice %644 {offsets = [0, 0, 0], sizes = [1, 1, 32], strides = [1, 1, 1]} : vector<2x1x32xf32> to vector<1x1x32xf32>
    %647 = vector.shape_cast %646 : vector<1x1x32xf32> to vector<1x32xf32>
    %648 = vector.extract_strided_slice %644 {offsets = [1, 0, 0], sizes = [1, 1, 32], strides = [1, 1, 1]} : vector<2x1x32xf32> to vector<1x1x32xf32>
    %649 = vector.shape_cast %648 : vector<1x1x32xf32> to vector<1x32xf32>
    %cst_263 = arith.constant dense<0.000000e+00> : vector<8xf32>
    %650 = vector.multi_reduction <add>, %645, %cst_263 [1] : vector<8x32xf32> to vector<8xf32>
    %651 = vector.shape_cast %650 : vector<8xf32> to vector<8x1xf32>
    %cst_264 = arith.constant 3.200000e+01 : f32
    %652 = vector.broadcast %cst_264 : f32 to vector<8x1xf32>
    %653 = arith.divf %651, %652 : vector<8x1xf32>
    %654 = vector.broadcast %653 : vector<8x1xf32> to vector<8x32xf32>
    %655 = arith.subf %645, %654 : vector<8x32xf32>
    %656 = arith.mulf %655, %655 : vector<8x32xf32>
    %cst_265 = arith.constant dense<0.000000e+00> : vector<8xf32>
    %657 = vector.multi_reduction <add>, %656, %cst_265 [1] : vector<8x32xf32> to vector<8xf32>
    %658 = vector.shape_cast %657 : vector<8xf32> to vector<8x1xf32>
    %cst_266 = arith.constant 3.200000e+01 : f32
    %659 = vector.broadcast %cst_266 : f32 to vector<8x1xf32>
    %660 = arith.divf %658, %659 : vector<8x1xf32>
    %cst_267 = arith.constant 9.99999974E-6 : f32
    %661 = vector.broadcast %cst_267 : f32 to vector<8x1xf32>
    %662 = arith.addf %660, %661 : vector<8x1xf32>
    %663 = math.rsqrt %662 : vector<8x1xf32>
    %664 = vector.broadcast %663 : vector<8x1xf32> to vector<8x32xf32>
    %665 = arith.mulf %655, %664 : vector<8x32xf32>
    %666 = vector.broadcast %647 : vector<1x32xf32> to vector<8x32xf32>
    %667 = arith.mulf %665, %666 : vector<8x32xf32>
    %668 = vector.broadcast %649 : vector<1x32xf32> to vector<8x32xf32>
    %669 = arith.addf %667, %668 : vector<8x32xf32>
    %c1_268 = arith.constant 1 : index
    %c0_269 = arith.constant 0 : index
    %c0_270 = arith.constant 0 : index
    %c0_271 = arith.constant 0 : index
    %670 = vector.load %arg14[%c1_268, %c0_269, %c0_270, %c0_271] : memref<2x12x32x8xbf16, #tpu.memory_space<vmem>>, vector<1x12x32x8xbf16>
    %671 = vector.shape_cast %670 : vector<1x12x32x8xbf16> to vector<12x32x8xbf16>
    %c1_272 = arith.constant 1 : index
    %c0_273 = arith.constant 0 : index
    %c0_274 = arith.constant 0 : index
    %c0_275 = arith.constant 0 : index
    %672 = vector.load %arg15[%c1_272, %c0_273, %c0_274, %c0_275] : memref<2x12x1x8xf32, #tpu.memory_space<vmem>>, vector<1x12x1x8xf32>
    %673 = vector.shape_cast %672 : vector<1x12x1x8xf32> to vector<12x1x8xf32>
    %674 = vector.extract_strided_slice %671 {offsets = [0, 0, 0], sizes = [4, 32, 8], strides = [1, 1, 1]} : vector<12x32x8xbf16> to vector<4x32x8xbf16>
    %675 = vector.extract_strided_slice %671 {offsets = [4, 0, 0], sizes = [4, 32, 8], strides = [1, 1, 1]} : vector<12x32x8xbf16> to vector<4x32x8xbf16>
    %676 = vector.extract_strided_slice %671 {offsets = [8, 0, 0], sizes = [4, 32, 8], strides = [1, 1, 1]} : vector<12x32x8xbf16> to vector<4x32x8xbf16>
    %677 = vector.extract_strided_slice %673 {offsets = [0, 0, 0], sizes = [4, 1, 8], strides = [1, 1, 1]} : vector<12x1x8xf32> to vector<4x1x8xf32>
    %678 = vector.extract_strided_slice %673 {offsets = [4, 0, 0], sizes = [4, 1, 8], strides = [1, 1, 1]} : vector<12x1x8xf32> to vector<4x1x8xf32>
    %679 = vector.extract_strided_slice %673 {offsets = [8, 0, 0], sizes = [4, 1, 8], strides = [1, 1, 1]} : vector<12x1x8xf32> to vector<4x1x8xf32>
    %c1_276 = arith.constant 1 : index
    %c0_277 = arith.constant 0 : index
    %c0_278 = arith.constant 0 : index
    %c0_279 = arith.constant 0 : index
    %680 = vector.load %arg16[%c1_276, %c0_277, %c0_278, %c0_279] : memref<2x4x8x32xbf16, #tpu.memory_space<vmem>>, vector<1x4x8x32xbf16>
    %681 = vector.shape_cast %680 : vector<1x4x8x32xbf16> to vector<4x8x32xbf16>
    %c1_280 = arith.constant 1 : index
    %c0_281 = arith.constant 0 : index
    %c0_282 = arith.constant 0 : index
    %682 = vector.load %arg17[%c1_280, %c0_281, %c0_282] : memref<2x1x32xf32, #tpu.memory_space<vmem>>, vector<1x1x32xf32>
    %683 = vector.shape_cast %682 : vector<1x1x32xf32> to vector<1x32xf32>
    %684 = arith.truncf %669 : vector<8x32xf32> to vector<8x32xbf16>
    %685 = vector.extract_strided_slice %674 {offsets = [0, 0, 0], sizes = [1, 32, 8], strides = [1, 1, 1]} : vector<4x32x8xbf16> to vector<1x32x8xbf16>
    %686 = vector.shape_cast %685 : vector<1x32x8xbf16> to vector<32x8xbf16>
    %cst_283 = arith.constant dense<0.000000e+00> : vector<8x8xf32>
    %687 = tpu.matmul %684, %686, %cst_283 {dimension_numbers = #tpu.dot_dimension_numbers<[1], [0], [0], [1], [0, 0, 1, 1], [], []>} : vector<8x32xbf16>, vector<32x8xbf16>, vector<8x8xf32> -> vector<8x8xf32>
    %688 = vector.extract_strided_slice %674 {offsets = [1, 0, 0], sizes = [1, 32, 8], strides = [1, 1, 1]} : vector<4x32x8xbf16> to vector<1x32x8xbf16>
    %689 = vector.shape_cast %688 : vector<1x32x8xbf16> to vector<32x8xbf16>
    %cst_284 = arith.constant dense<0.000000e+00> : vector<8x8xf32>
    %690 = tpu.matmul %684, %689, %cst_284 {dimension_numbers = #tpu.dot_dimension_numbers<[1], [0], [0], [1], [0, 0, 1, 1], [], []>} : vector<8x32xbf16>, vector<32x8xbf16>, vector<8x8xf32> -> vector<8x8xf32>
    %691 = vector.extract_strided_slice %674 {offsets = [2, 0, 0], sizes = [1, 32, 8], strides = [1, 1, 1]} : vector<4x32x8xbf16> to vector<1x32x8xbf16>
    %692 = vector.shape_cast %691 : vector<1x32x8xbf16> to vector<32x8xbf16>
    %cst_285 = arith.constant dense<0.000000e+00> : vector<8x8xf32>
    %693 = tpu.matmul %684, %692, %cst_285 {dimension_numbers = #tpu.dot_dimension_numbers<[1], [0], [0], [1], [0, 0, 1, 1], [], []>} : vector<8x32xbf16>, vector<32x8xbf16>, vector<8x8xf32> -> vector<8x8xf32>
    %694 = vector.extract_strided_slice %674 {offsets = [3, 0, 0], sizes = [1, 32, 8], strides = [1, 1, 1]} : vector<4x32x8xbf16> to vector<1x32x8xbf16>
    %695 = vector.shape_cast %694 : vector<1x32x8xbf16> to vector<32x8xbf16>
    %cst_286 = arith.constant dense<0.000000e+00> : vector<8x8xf32>
    %696 = tpu.matmul %684, %695, %cst_286 {dimension_numbers = #tpu.dot_dimension_numbers<[1], [0], [0], [1], [0, 0, 1, 1], [], []>} : vector<8x32xbf16>, vector<32x8xbf16>, vector<8x8xf32> -> vector<8x8xf32>
    %697 = vector.shape_cast %687 : vector<8x8xf32> to vector<1x8x8xf32>
    %698 = vector.shape_cast %690 : vector<8x8xf32> to vector<1x8x8xf32>
    %699 = vector.shape_cast %693 : vector<8x8xf32> to vector<1x8x8xf32>
    %700 = vector.shape_cast %696 : vector<8x8xf32> to vector<1x8x8xf32>
    %701 = tpu.concatenate %697, %698, %699, %700 in 0 : vector<1x8x8xf32>, vector<1x8x8xf32>, vector<1x8x8xf32>, vector<1x8x8xf32> -> vector<4x8x8xf32>
    %702 = vector.broadcast %677 : vector<4x1x8xf32> to vector<4x8x8xf32>
    %703 = arith.addf %701, %702 : vector<4x8x8xf32>
    %704 = arith.truncf %669 : vector<8x32xf32> to vector<8x32xbf16>
    %705 = vector.extract_strided_slice %675 {offsets = [0, 0, 0], sizes = [1, 32, 8], strides = [1, 1, 1]} : vector<4x32x8xbf16> to vector<1x32x8xbf16>
    %706 = vector.shape_cast %705 : vector<1x32x8xbf16> to vector<32x8xbf16>
    %cst_287 = arith.constant dense<0.000000e+00> : vector<8x8xf32>
    %707 = tpu.matmul %704, %706, %cst_287 {dimension_numbers = #tpu.dot_dimension_numbers<[1], [0], [0], [1], [0, 0, 1, 1], [], []>} : vector<8x32xbf16>, vector<32x8xbf16>, vector<8x8xf32> -> vector<8x8xf32>
    %708 = vector.extract_strided_slice %675 {offsets = [1, 0, 0], sizes = [1, 32, 8], strides = [1, 1, 1]} : vector<4x32x8xbf16> to vector<1x32x8xbf16>
    %709 = vector.shape_cast %708 : vector<1x32x8xbf16> to vector<32x8xbf16>
    %cst_288 = arith.constant dense<0.000000e+00> : vector<8x8xf32>
    %710 = tpu.matmul %704, %709, %cst_288 {dimension_numbers = #tpu.dot_dimension_numbers<[1], [0], [0], [1], [0, 0, 1, 1], [], []>} : vector<8x32xbf16>, vector<32x8xbf16>, vector<8x8xf32> -> vector<8x8xf32>
    %711 = vector.extract_strided_slice %675 {offsets = [2, 0, 0], sizes = [1, 32, 8], strides = [1, 1, 1]} : vector<4x32x8xbf16> to vector<1x32x8xbf16>
    %712 = vector.shape_cast %711 : vector<1x32x8xbf16> to vector<32x8xbf16>
    %cst_289 = arith.constant dense<0.000000e+00> : vector<8x8xf32>
    %713 = tpu.matmul %704, %712, %cst_289 {dimension_numbers = #tpu.dot_dimension_numbers<[1], [0], [0], [1], [0, 0, 1, 1], [], []>} : vector<8x32xbf16>, vector<32x8xbf16>, vector<8x8xf32> -> vector<8x8xf32>
    %714 = vector.extract_strided_slice %675 {offsets = [3, 0, 0], sizes = [1, 32, 8], strides = [1, 1, 1]} : vector<4x32x8xbf16> to vector<1x32x8xbf16>
    %715 = vector.shape_cast %714 : vector<1x32x8xbf16> to vector<32x8xbf16>
    %cst_290 = arith.constant dense<0.000000e+00> : vector<8x8xf32>
    %716 = tpu.matmul %704, %715, %cst_290 {dimension_numbers = #tpu.dot_dimension_numbers<[1], [0], [0], [1], [0, 0, 1, 1], [], []>} : vector<8x32xbf16>, vector<32x8xbf16>, vector<8x8xf32> -> vector<8x8xf32>
    %717 = vector.shape_cast %707 : vector<8x8xf32> to vector<1x8x8xf32>
    %718 = vector.shape_cast %710 : vector<8x8xf32> to vector<1x8x8xf32>
    %719 = vector.shape_cast %713 : vector<8x8xf32> to vector<1x8x8xf32>
    %720 = vector.shape_cast %716 : vector<8x8xf32> to vector<1x8x8xf32>
    %721 = tpu.concatenate %717, %718, %719, %720 in 0 : vector<1x8x8xf32>, vector<1x8x8xf32>, vector<1x8x8xf32>, vector<1x8x8xf32> -> vector<4x8x8xf32>
    %722 = vector.broadcast %678 : vector<4x1x8xf32> to vector<4x8x8xf32>
    %723 = arith.addf %721, %722 : vector<4x8x8xf32>
    %724 = arith.truncf %669 : vector<8x32xf32> to vector<8x32xbf16>
    %725 = vector.extract_strided_slice %676 {offsets = [0, 0, 0], sizes = [1, 32, 8], strides = [1, 1, 1]} : vector<4x32x8xbf16> to vector<1x32x8xbf16>
    %726 = vector.shape_cast %725 : vector<1x32x8xbf16> to vector<32x8xbf16>
    %cst_291 = arith.constant dense<0.000000e+00> : vector<8x8xf32>
    %727 = tpu.matmul %724, %726, %cst_291 {dimension_numbers = #tpu.dot_dimension_numbers<[1], [0], [0], [1], [0, 0, 1, 1], [], []>} : vector<8x32xbf16>, vector<32x8xbf16>, vector<8x8xf32> -> vector<8x8xf32>
    %728 = vector.extract_strided_slice %676 {offsets = [1, 0, 0], sizes = [1, 32, 8], strides = [1, 1, 1]} : vector<4x32x8xbf16> to vector<1x32x8xbf16>
    %729 = vector.shape_cast %728 : vector<1x32x8xbf16> to vector<32x8xbf16>
    %cst_292 = arith.constant dense<0.000000e+00> : vector<8x8xf32>
    %730 = tpu.matmul %724, %729, %cst_292 {dimension_numbers = #tpu.dot_dimension_numbers<[1], [0], [0], [1], [0, 0, 1, 1], [], []>} : vector<8x32xbf16>, vector<32x8xbf16>, vector<8x8xf32> -> vector<8x8xf32>
    %731 = vector.extract_strided_slice %676 {offsets = [2, 0, 0], sizes = [1, 32, 8], strides = [1, 1, 1]} : vector<4x32x8xbf16> to vector<1x32x8xbf16>
    %732 = vector.shape_cast %731 : vector<1x32x8xbf16> to vector<32x8xbf16>
    %cst_293 = arith.constant dense<0.000000e+00> : vector<8x8xf32>
    %733 = tpu.matmul %724, %732, %cst_293 {dimension_numbers = #tpu.dot_dimension_numbers<[1], [0], [0], [1], [0, 0, 1, 1], [], []>} : vector<8x32xbf16>, vector<32x8xbf16>, vector<8x8xf32> -> vector<8x8xf32>
    %734 = vector.extract_strided_slice %676 {offsets = [3, 0, 0], sizes = [1, 32, 8], strides = [1, 1, 1]} : vector<4x32x8xbf16> to vector<1x32x8xbf16>
    %735 = vector.shape_cast %734 : vector<1x32x8xbf16> to vector<32x8xbf16>
    %cst_294 = arith.constant dense<0.000000e+00> : vector<8x8xf32>
    %736 = tpu.matmul %724, %735, %cst_294 {dimension_numbers = #tpu.dot_dimension_numbers<[1], [0], [0], [1], [0, 0, 1, 1], [], []>} : vector<8x32xbf16>, vector<32x8xbf16>, vector<8x8xf32> -> vector<8x8xf32>
    %737 = vector.shape_cast %727 : vector<8x8xf32> to vector<1x8x8xf32>
    %738 = vector.shape_cast %730 : vector<8x8xf32> to vector<1x8x8xf32>
    %739 = vector.shape_cast %733 : vector<8x8xf32> to vector<1x8x8xf32>
    %740 = vector.shape_cast %736 : vector<8x8xf32> to vector<1x8x8xf32>
    %741 = tpu.concatenate %737, %738, %739, %740 in 0 : vector<1x8x8xf32>, vector<1x8x8xf32>, vector<1x8x8xf32>, vector<1x8x8xf32> -> vector<4x8x8xf32>
    %742 = vector.broadcast %679 : vector<4x1x8xf32> to vector<4x8x8xf32>
    %743 = arith.addf %741, %742 : vector<4x8x8xf32>
    %744 = arith.truncf %703 : vector<4x8x8xf32> to vector<4x8x8xbf16>
    %745 = arith.truncf %723 : vector<4x8x8xf32> to vector<4x8x8xbf16>
    "tpu.trace_start"() <{level = 10 : i32, message = "hqe,hke->hqk"}> : () -> ()
    %cst_295 = arith.constant dense<0.000000e+00> : vector<4x8x8xf32>
    %746 = tpu.matmul %744, %745, %cst_295 {dimension_numbers = #tpu.dot_dimension_numbers<[2], [2], [1], [1], [0, 0, 0, 1, 1, 1], [0], [0]>} : vector<4x8x8xbf16>, vector<4x8x8xbf16>, vector<4x8x8xf32> -> vector<4x8x8xf32>
    "tpu.trace_stop"() : () -> ()
    %cst_296 = arith.constant 0.353553385 : f32
    %747 = vector.broadcast %cst_296 : f32 to vector<4x8x8xf32>
    %748 = arith.mulf %746, %747 : vector<4x8x8xf32>
    %749 = vector.shape_cast %9 : vector<8x8xf32> to vector<1x8x8xf32>
    %750 = vector.broadcast %749 : vector<1x8x8xf32> to vector<4x8x8xf32>
    %751 = arith.addf %748, %750 : vector<4x8x8xf32>
    %cst_297 = arith.constant dense<0xFF800000> : vector<4x8xf32>
    %752 = vector.multi_reduction <maximumf>, %751, %cst_297 [2] : vector<4x8x8xf32> to vector<4x8xf32>
    %753 = vector.shape_cast %752 : vector<4x8xf32> to vector<4x8x1xf32>
    %754 = vector.broadcast %753 : vector<4x8x1xf32> to vector<4x8x8xf32>
    %755 = arith.subf %751, %754 : vector<4x8x8xf32>
    %756 = math.exp %755 : vector<4x8x8xf32>
    %cst_298 = arith.constant dense<0.000000e+00> : vector<4x8xf32>
    %757 = vector.multi_reduction <add>, %756, %cst_298 [2] : vector<4x8x8xf32> to vector<4x8xf32>
    %758 = vector.shape_cast %757 : vector<4x8xf32> to vector<4x8x1xf32>
    %759 = tpu.reciprocal %758 : vector<4x8x1xf32> -> vector<4x8x1xf32>
    %760 = vector.broadcast %759 : vector<4x8x1xf32> to vector<4x8x8xf32>
    %761 = arith.mulf %756, %760 : vector<4x8x8xf32>
    %762 = arith.truncf %761 : vector<4x8x8xf32> to vector<4x8x8xbf16>
    %763 = arith.truncf %743 : vector<4x8x8xf32> to vector<4x8x8xbf16>
    "tpu.trace_start"() <{level = 10 : i32, message = "hqk,hke->hqe"}> : () -> ()
    %cst_299 = arith.constant dense<0.000000e+00> : vector<4x8x8xf32>
    %764 = tpu.matmul %762, %763, %cst_299 {dimension_numbers = #tpu.dot_dimension_numbers<[2], [1], [1], [2], [0, 0, 0, 1, 1, 2], [0], [0]>} : vector<4x8x8xbf16>, vector<4x8x8xbf16>, vector<4x8x8xf32> -> vector<4x8x8xf32>
    "tpu.trace_stop"() : () -> ()
    %765 = arith.truncf %764 : vector<4x8x8xf32> to vector<4x8x8xbf16>
    "tpu.trace_start"() <{level = 10 : i32, message = "hqe,hed->hqd"}> : () -> ()
    %cst_300 = arith.constant dense<0.000000e+00> : vector<4x8x32xf32>
    %766 = tpu.matmul %765, %681, %cst_300 {dimension_numbers = #tpu.dot_dimension_numbers<[2], [1], [1], [2], [0, 0, 0, 1, 1, 2], [0], [0]>} : vector<4x8x8xbf16>, vector<4x8x32xbf16>, vector<4x8x32xf32> -> vector<4x8x32xf32>
    "tpu.trace_stop"() : () -> ()
    %cst_301 = arith.constant dense<0.000000e+00> : vector<8x32xf32>
    %767 = vector.multi_reduction <add>, %766, %cst_301 [0] : vector<4x8x32xf32> to vector<8x32xf32>
    %768 = vector.broadcast %683 : vector<1x32xf32> to vector<8x32xf32>
    %769 = arith.addf %767, %768 : vector<8x32xf32>
    %c1_302 = arith.constant 1 : index
    %c0_303 = arith.constant 0 : index
    %c0_304 = arith.constant 0 : index
    %c0_305 = arith.constant 0 : index
    %770 = vector.load %arg18[%c1_302, %c0_303, %c0_304, %c0_305] : memref<2x2x1x32xf32, #tpu.memory_space<vmem>>, vector<1x2x1x32xf32>
    %771 = vector.shape_cast %770 : vector<1x2x1x32xf32> to vector<2x1x32xf32>
    %772 = arith.addf %669, %769 : vector<8x32xf32>
    %773 = vector.extract_strided_slice %771 {offsets = [0, 0, 0], sizes = [1, 1, 32], strides = [1, 1, 1]} : vector<2x1x32xf32> to vector<1x1x32xf32>
    %774 = vector.shape_cast %773 : vector<1x1x32xf32> to vector<1x32xf32>
    %775 = vector.extract_strided_slice %771 {offsets = [1, 0, 0], sizes = [1, 1, 32], strides = [1, 1, 1]} : vector<2x1x32xf32> to vector<1x1x32xf32>
    %776 = vector.shape_cast %775 : vector<1x1x32xf32> to vector<1x32xf32>
    %cst_306 = arith.constant dense<0.000000e+00> : vector<8xf32>
    %777 = vector.multi_reduction <add>, %772, %cst_306 [1] : vector<8x32xf32> to vector<8xf32>
    %778 = vector.shape_cast %777 : vector<8xf32> to vector<8x1xf32>
    %cst_307 = arith.constant 3.200000e+01 : f32
    %779 = vector.broadcast %cst_307 : f32 to vector<8x1xf32>
    %780 = arith.divf %778, %779 : vector<8x1xf32>
    %781 = vector.broadcast %780 : vector<8x1xf32> to vector<8x32xf32>
    %782 = arith.subf %772, %781 : vector<8x32xf32>
    %783 = arith.mulf %782, %782 : vector<8x32xf32>
    %cst_308 = arith.constant dense<0.000000e+00> : vector<8xf32>
    %784 = vector.multi_reduction <add>, %783, %cst_308 [1] : vector<8x32xf32> to vector<8xf32>
    %785 = vector.shape_cast %784 : vector<8xf32> to vector<8x1xf32>
    %cst_309 = arith.constant 3.200000e+01 : f32
    %786 = vector.broadcast %cst_309 : f32 to vector<8x1xf32>
    %787 = arith.divf %785, %786 : vector<8x1xf32>
    %cst_310 = arith.constant 9.99999974E-6 : f32
    %788 = vector.broadcast %cst_310 : f32 to vector<8x1xf32>
    %789 = arith.addf %787, %788 : vector<8x1xf32>
    %790 = math.rsqrt %789 : vector<8x1xf32>
    %791 = vector.broadcast %790 : vector<8x1xf32> to vector<8x32xf32>
    %792 = arith.mulf %782, %791 : vector<8x32xf32>
    %793 = vector.broadcast %774 : vector<1x32xf32> to vector<8x32xf32>
    %794 = arith.mulf %792, %793 : vector<8x32xf32>
    %795 = vector.broadcast %776 : vector<1x32xf32> to vector<8x32xf32>
    %796 = arith.addf %794, %795 : vector<8x32xf32>
    %c1_311 = arith.constant 1 : index
    %c0_312 = arith.constant 0 : index
    %c0_313 = arith.constant 0 : index
    %c0_314 = arith.constant 0 : index
    %797 = vector.load %arg21[%c1_311, %c0_312, %c0_313, %c0_314] : memref<2x8x32x8xbf16, #tpu.memory_space<vmem>>, vector<1x8x32x8xbf16>
    %798 = vector.shape_cast %797 : vector<1x8x32x8xbf16> to vector<8x32x8xbf16>
    %c1_315 = arith.constant 1 : index
    %c0_316 = arith.constant 0 : index
    %c0_317 = arith.constant 0 : index
    %c0_318 = arith.constant 0 : index
    %799 = vector.load %arg22[%c1_315, %c0_316, %c0_317, %c0_318] : memref<2x8x1x8xf32, #tpu.memory_space<vmem>>, vector<1x8x1x8xf32>
    %800 = vector.shape_cast %799 : vector<1x8x1x8xf32> to vector<8x1x8xf32>
    %c1_319 = arith.constant 1 : index
    %c0_320 = arith.constant 0 : index
    %c0_321 = arith.constant 0 : index
    %c0_322 = arith.constant 0 : index
    %801 = vector.load %arg19[%c1_319, %c0_320, %c0_321, %c0_322] : memref<2x4x32x8xbf16, #tpu.memory_space<vmem>>, vector<1x4x32x8xbf16>
    %802 = vector.shape_cast %801 : vector<1x4x32x8xbf16> to vector<4x32x8xbf16>
    %803 = vector.extract_strided_slice %798 {offsets = [0, 0, 0], sizes = [4, 32, 8], strides = [1, 1, 1]} : vector<8x32x8xbf16> to vector<4x32x8xbf16>
    %804 = vector.extract_strided_slice %798 {offsets = [4, 0, 0], sizes = [4, 32, 8], strides = [1, 1, 1]} : vector<8x32x8xbf16> to vector<4x32x8xbf16>
    %c1_323 = arith.constant 1 : index
    %c0_324 = arith.constant 0 : index
    %c0_325 = arith.constant 0 : index
    %c0_326 = arith.constant 0 : index
    %805 = vector.load %arg20[%c1_323, %c0_324, %c0_325, %c0_326] : memref<2x4x1x8xf32, #tpu.memory_space<vmem>>, vector<1x4x1x8xf32>
    %806 = vector.shape_cast %805 : vector<1x4x1x8xf32> to vector<4x1x8xf32>
    %807 = vector.extract_strided_slice %800 {offsets = [0, 0, 0], sizes = [4, 1, 8], strides = [1, 1, 1]} : vector<8x1x8xf32> to vector<4x1x8xf32>
    %808 = vector.extract_strided_slice %800 {offsets = [4, 0, 0], sizes = [4, 1, 8], strides = [1, 1, 1]} : vector<8x1x8xf32> to vector<4x1x8xf32>
    %c1_327 = arith.constant 1 : index
    %c0_328 = arith.constant 0 : index
    %c0_329 = arith.constant 0 : index
    %c0_330 = arith.constant 0 : index
    %809 = vector.load %arg23[%c1_327, %c0_328, %c0_329, %c0_330] : memref<2x4x8x32xbf16, #tpu.memory_space<vmem>>, vector<1x4x8x32xbf16>
    %810 = vector.shape_cast %809 : vector<1x4x8x32xbf16> to vector<4x8x32xbf16>
    %c1_331 = arith.constant 1 : index
    %c0_332 = arith.constant 0 : index
    %c0_333 = arith.constant 0 : index
    %811 = vector.load %arg24[%c1_331, %c0_332, %c0_333] : memref<2x1x32xf32, #tpu.memory_space<vmem>>, vector<1x1x32xf32>
    %812 = vector.shape_cast %811 : vector<1x1x32xf32> to vector<1x32xf32>
    %813 = arith.truncf %796 : vector<8x32xf32> to vector<8x32xbf16>
    %814 = vector.extract_strided_slice %802 {offsets = [0, 0, 0], sizes = [1, 32, 8], strides = [1, 1, 1]} : vector<4x32x8xbf16> to vector<1x32x8xbf16>
    %815 = vector.shape_cast %814 : vector<1x32x8xbf16> to vector<32x8xbf16>
    %cst_334 = arith.constant dense<0.000000e+00> : vector<8x8xf32>
    %816 = tpu.matmul %813, %815, %cst_334 {dimension_numbers = #tpu.dot_dimension_numbers<[1], [0], [0], [1], [0, 0, 1, 1], [], []>} : vector<8x32xbf16>, vector<32x8xbf16>, vector<8x8xf32> -> vector<8x8xf32>
    %817 = vector.extract_strided_slice %802 {offsets = [1, 0, 0], sizes = [1, 32, 8], strides = [1, 1, 1]} : vector<4x32x8xbf16> to vector<1x32x8xbf16>
    %818 = vector.shape_cast %817 : vector<1x32x8xbf16> to vector<32x8xbf16>
    %cst_335 = arith.constant dense<0.000000e+00> : vector<8x8xf32>
    %819 = tpu.matmul %813, %818, %cst_335 {dimension_numbers = #tpu.dot_dimension_numbers<[1], [0], [0], [1], [0, 0, 1, 1], [], []>} : vector<8x32xbf16>, vector<32x8xbf16>, vector<8x8xf32> -> vector<8x8xf32>
    %820 = vector.extract_strided_slice %802 {offsets = [2, 0, 0], sizes = [1, 32, 8], strides = [1, 1, 1]} : vector<4x32x8xbf16> to vector<1x32x8xbf16>
    %821 = vector.shape_cast %820 : vector<1x32x8xbf16> to vector<32x8xbf16>
    %cst_336 = arith.constant dense<0.000000e+00> : vector<8x8xf32>
    %822 = tpu.matmul %813, %821, %cst_336 {dimension_numbers = #tpu.dot_dimension_numbers<[1], [0], [0], [1], [0, 0, 1, 1], [], []>} : vector<8x32xbf16>, vector<32x8xbf16>, vector<8x8xf32> -> vector<8x8xf32>
    %823 = vector.extract_strided_slice %802 {offsets = [3, 0, 0], sizes = [1, 32, 8], strides = [1, 1, 1]} : vector<4x32x8xbf16> to vector<1x32x8xbf16>
    %824 = vector.shape_cast %823 : vector<1x32x8xbf16> to vector<32x8xbf16>
    %cst_337 = arith.constant dense<0.000000e+00> : vector<8x8xf32>
    %825 = tpu.matmul %813, %824, %cst_337 {dimension_numbers = #tpu.dot_dimension_numbers<[1], [0], [0], [1], [0, 0, 1, 1], [], []>} : vector<8x32xbf16>, vector<32x8xbf16>, vector<8x8xf32> -> vector<8x8xf32>
    %826 = vector.shape_cast %816 : vector<8x8xf32> to vector<1x8x8xf32>
    %827 = vector.shape_cast %819 : vector<8x8xf32> to vector<1x8x8xf32>
    %828 = vector.shape_cast %822 : vector<8x8xf32> to vector<1x8x8xf32>
    %829 = vector.shape_cast %825 : vector<8x8xf32> to vector<1x8x8xf32>
    %830 = tpu.concatenate %826, %827, %828, %829 in 0 : vector<1x8x8xf32>, vector<1x8x8xf32>, vector<1x8x8xf32>, vector<1x8x8xf32> -> vector<4x8x8xf32>
    %831 = vector.broadcast %806 : vector<4x1x8xf32> to vector<4x8x8xf32>
    %832 = arith.addf %830, %831 : vector<4x8x8xf32>
    %833 = arith.truncf %371 : vector<8x32xf32> to vector<8x32xbf16>
    %834 = vector.extract_strided_slice %803 {offsets = [0, 0, 0], sizes = [1, 32, 8], strides = [1, 1, 1]} : vector<4x32x8xbf16> to vector<1x32x8xbf16>
    %835 = vector.shape_cast %834 : vector<1x32x8xbf16> to vector<32x8xbf16>
    %cst_338 = arith.constant dense<0.000000e+00> : vector<8x8xf32>
    %836 = tpu.matmul %833, %835, %cst_338 {dimension_numbers = #tpu.dot_dimension_numbers<[1], [0], [0], [1], [0, 0, 1, 1], [], []>} : vector<8x32xbf16>, vector<32x8xbf16>, vector<8x8xf32> -> vector<8x8xf32>
    %837 = vector.extract_strided_slice %803 {offsets = [1, 0, 0], sizes = [1, 32, 8], strides = [1, 1, 1]} : vector<4x32x8xbf16> to vector<1x32x8xbf16>
    %838 = vector.shape_cast %837 : vector<1x32x8xbf16> to vector<32x8xbf16>
    %cst_339 = arith.constant dense<0.000000e+00> : vector<8x8xf32>
    %839 = tpu.matmul %833, %838, %cst_339 {dimension_numbers = #tpu.dot_dimension_numbers<[1], [0], [0], [1], [0, 0, 1, 1], [], []>} : vector<8x32xbf16>, vector<32x8xbf16>, vector<8x8xf32> -> vector<8x8xf32>
    %840 = vector.extract_strided_slice %803 {offsets = [2, 0, 0], sizes = [1, 32, 8], strides = [1, 1, 1]} : vector<4x32x8xbf16> to vector<1x32x8xbf16>
    %841 = vector.shape_cast %840 : vector<1x32x8xbf16> to vector<32x8xbf16>
    %cst_340 = arith.constant dense<0.000000e+00> : vector<8x8xf32>
    %842 = tpu.matmul %833, %841, %cst_340 {dimension_numbers = #tpu.dot_dimension_numbers<[1], [0], [0], [1], [0, 0, 1, 1], [], []>} : vector<8x32xbf16>, vector<32x8xbf16>, vector<8x8xf32> -> vector<8x8xf32>
    %843 = vector.extract_strided_slice %803 {offsets = [3, 0, 0], sizes = [1, 32, 8], strides = [1, 1, 1]} : vector<4x32x8xbf16> to vector<1x32x8xbf16>
    %844 = vector.shape_cast %843 : vector<1x32x8xbf16> to vector<32x8xbf16>
    %cst_341 = arith.constant dense<0.000000e+00> : vector<8x8xf32>
    %845 = tpu.matmul %833, %844, %cst_341 {dimension_numbers = #tpu.dot_dimension_numbers<[1], [0], [0], [1], [0, 0, 1, 1], [], []>} : vector<8x32xbf16>, vector<32x8xbf16>, vector<8x8xf32> -> vector<8x8xf32>
    %846 = vector.shape_cast %836 : vector<8x8xf32> to vector<1x8x8xf32>
    %847 = vector.shape_cast %839 : vector<8x8xf32> to vector<1x8x8xf32>
    %848 = vector.shape_cast %842 : vector<8x8xf32> to vector<1x8x8xf32>
    %849 = vector.shape_cast %845 : vector<8x8xf32> to vector<1x8x8xf32>
    %850 = tpu.concatenate %846, %847, %848, %849 in 0 : vector<1x8x8xf32>, vector<1x8x8xf32>, vector<1x8x8xf32>, vector<1x8x8xf32> -> vector<4x8x8xf32>
    %851 = vector.broadcast %807 : vector<4x1x8xf32> to vector<4x8x8xf32>
    %852 = arith.addf %850, %851 : vector<4x8x8xf32>
    %853 = arith.truncf %371 : vector<8x32xf32> to vector<8x32xbf16>
    %854 = vector.extract_strided_slice %804 {offsets = [0, 0, 0], sizes = [1, 32, 8], strides = [1, 1, 1]} : vector<4x32x8xbf16> to vector<1x32x8xbf16>
    %855 = vector.shape_cast %854 : vector<1x32x8xbf16> to vector<32x8xbf16>
    %cst_342 = arith.constant dense<0.000000e+00> : vector<8x8xf32>
    %856 = tpu.matmul %853, %855, %cst_342 {dimension_numbers = #tpu.dot_dimension_numbers<[1], [0], [0], [1], [0, 0, 1, 1], [], []>} : vector<8x32xbf16>, vector<32x8xbf16>, vector<8x8xf32> -> vector<8x8xf32>
    %857 = vector.extract_strided_slice %804 {offsets = [1, 0, 0], sizes = [1, 32, 8], strides = [1, 1, 1]} : vector<4x32x8xbf16> to vector<1x32x8xbf16>
    %858 = vector.shape_cast %857 : vector<1x32x8xbf16> to vector<32x8xbf16>
    %cst_343 = arith.constant dense<0.000000e+00> : vector<8x8xf32>
    %859 = tpu.matmul %853, %858, %cst_343 {dimension_numbers = #tpu.dot_dimension_numbers<[1], [0], [0], [1], [0, 0, 1, 1], [], []>} : vector<8x32xbf16>, vector<32x8xbf16>, vector<8x8xf32> -> vector<8x8xf32>
    %860 = vector.extract_strided_slice %804 {offsets = [2, 0, 0], sizes = [1, 32, 8], strides = [1, 1, 1]} : vector<4x32x8xbf16> to vector<1x32x8xbf16>
    %861 = vector.shape_cast %860 : vector<1x32x8xbf16> to vector<32x8xbf16>
    %cst_344 = arith.constant dense<0.000000e+00> : vector<8x8xf32>
    %862 = tpu.matmul %853, %861, %cst_344 {dimension_numbers = #tpu.dot_dimension_numbers<[1], [0], [0], [1], [0, 0, 1, 1], [], []>} : vector<8x32xbf16>, vector<32x8xbf16>, vector<8x8xf32> -> vector<8x8xf32>
    %863 = vector.extract_strided_slice %804 {offsets = [3, 0, 0], sizes = [1, 32, 8], strides = [1, 1, 1]} : vector<4x32x8xbf16> to vector<1x32x8xbf16>
    %864 = vector.shape_cast %863 : vector<1x32x8xbf16> to vector<32x8xbf16>
    %cst_345 = arith.constant dense<0.000000e+00> : vector<8x8xf32>
    %865 = tpu.matmul %853, %864, %cst_345 {dimension_numbers = #tpu.dot_dimension_numbers<[1], [0], [0], [1], [0, 0, 1, 1], [], []>} : vector<8x32xbf16>, vector<32x8xbf16>, vector<8x8xf32> -> vector<8x8xf32>
    %866 = vector.shape_cast %856 : vector<8x8xf32> to vector<1x8x8xf32>
    %867 = vector.shape_cast %859 : vector<8x8xf32> to vector<1x8x8xf32>
    %868 = vector.shape_cast %862 : vector<8x8xf32> to vector<1x8x8xf32>
    %869 = vector.shape_cast %865 : vector<8x8xf32> to vector<1x8x8xf32>
    %870 = tpu.concatenate %866, %867, %868, %869 in 0 : vector<1x8x8xf32>, vector<1x8x8xf32>, vector<1x8x8xf32>, vector<1x8x8xf32> -> vector<4x8x8xf32>
    %871 = vector.broadcast %808 : vector<4x1x8xf32> to vector<4x8x8xf32>
    %872 = arith.addf %870, %871 : vector<4x8x8xf32>
    %873 = arith.truncf %832 : vector<4x8x8xf32> to vector<4x8x8xbf16>
    %874 = arith.truncf %852 : vector<4x8x8xf32> to vector<4x8x8xbf16>
    "tpu.trace_start"() <{level = 10 : i32, message = "hqe,hke->hqk"}> : () -> ()
    %cst_346 = arith.constant dense<0.000000e+00> : vector<4x8x8xf32>
    %875 = tpu.matmul %873, %874, %cst_346 {dimension_numbers = #tpu.dot_dimension_numbers<[2], [2], [1], [1], [0, 0, 0, 1, 1, 1], [0], [0]>} : vector<4x8x8xbf16>, vector<4x8x8xbf16>, vector<4x8x8xf32> -> vector<4x8x8xf32>
    "tpu.trace_stop"() : () -> ()
    %cst_347 = arith.constant 0.353553385 : f32
    %876 = vector.broadcast %cst_347 : f32 to vector<4x8x8xf32>
    %877 = arith.mulf %875, %876 : vector<4x8x8xf32>
    %cst_348 = arith.constant dense<0xFF800000> : vector<4x8xf32>
    %878 = vector.multi_reduction <maximumf>, %877, %cst_348 [2] : vector<4x8x8xf32> to vector<4x8xf32>
    %879 = vector.shape_cast %878 : vector<4x8xf32> to vector<4x8x1xf32>
    %880 = vector.broadcast %879 : vector<4x8x1xf32> to vector<4x8x8xf32>
    %881 = arith.subf %877, %880 : vector<4x8x8xf32>
    %882 = math.exp %881 : vector<4x8x8xf32>
    %cst_349 = arith.constant dense<0.000000e+00> : vector<4x8xf32>
    %883 = vector.multi_reduction <add>, %882, %cst_349 [2] : vector<4x8x8xf32> to vector<4x8xf32>
    %884 = vector.shape_cast %883 : vector<4x8xf32> to vector<4x8x1xf32>
    %885 = tpu.reciprocal %884 : vector<4x8x1xf32> -> vector<4x8x1xf32>
    %886 = vector.broadcast %885 : vector<4x8x1xf32> to vector<4x8x8xf32>
    %887 = arith.mulf %882, %886 : vector<4x8x8xf32>
    %888 = arith.truncf %887 : vector<4x8x8xf32> to vector<4x8x8xbf16>
    %889 = arith.truncf %872 : vector<4x8x8xf32> to vector<4x8x8xbf16>
    "tpu.trace_start"() <{level = 10 : i32, message = "hqk,hke->hqe"}> : () -> ()
    %cst_350 = arith.constant dense<0.000000e+00> : vector<4x8x8xf32>
    %890 = tpu.matmul %888, %889, %cst_350 {dimension_numbers = #tpu.dot_dimension_numbers<[2], [1], [1], [2], [0, 0, 0, 1, 1, 2], [0], [0]>} : vector<4x8x8xbf16>, vector<4x8x8xbf16>, vector<4x8x8xf32> -> vector<4x8x8xf32>
    "tpu.trace_stop"() : () -> ()
    %891 = arith.truncf %890 : vector<4x8x8xf32> to vector<4x8x8xbf16>
    "tpu.trace_start"() <{level = 10 : i32, message = "hqe,hed->hqd"}> : () -> ()
    %cst_351 = arith.constant dense<0.000000e+00> : vector<4x8x32xf32>
    %892 = tpu.matmul %891, %810, %cst_351 {dimension_numbers = #tpu.dot_dimension_numbers<[2], [1], [1], [2], [0, 0, 0, 1, 1, 2], [0], [0]>} : vector<4x8x8xbf16>, vector<4x8x32xbf16>, vector<4x8x32xf32> -> vector<4x8x32xf32>
    "tpu.trace_stop"() : () -> ()
    %cst_352 = arith.constant dense<0.000000e+00> : vector<8x32xf32>
    %893 = vector.multi_reduction <add>, %892, %cst_352 [0] : vector<4x8x32xf32> to vector<8x32xf32>
    %894 = vector.broadcast %812 : vector<1x32xf32> to vector<8x32xf32>
    %895 = arith.addf %893, %894 : vector<8x32xf32>
    %c1_353 = arith.constant 1 : index
    %c0_354 = arith.constant 0 : index
    %c0_355 = arith.constant 0 : index
    %c0_356 = arith.constant 0 : index
    %896 = vector.load %arg25[%c1_353, %c0_354, %c0_355, %c0_356] : memref<2x2x1x32xf32, #tpu.memory_space<vmem>>, vector<1x2x1x32xf32>
    %897 = vector.shape_cast %896 : vector<1x2x1x32xf32> to vector<2x1x32xf32>
    %898 = arith.addf %796, %895 : vector<8x32xf32>
    %899 = vector.extract_strided_slice %897 {offsets = [0, 0, 0], sizes = [1, 1, 32], strides = [1, 1, 1]} : vector<2x1x32xf32> to vector<1x1x32xf32>
    %900 = vector.shape_cast %899 : vector<1x1x32xf32> to vector<1x32xf32>
    %901 = vector.extract_strided_slice %897 {offsets = [1, 0, 0], sizes = [1, 1, 32], strides = [1, 1, 1]} : vector<2x1x32xf32> to vector<1x1x32xf32>
    %902 = vector.shape_cast %901 : vector<1x1x32xf32> to vector<1x32xf32>
    %cst_357 = arith.constant dense<0.000000e+00> : vector<8xf32>
    %903 = vector.multi_reduction <add>, %898, %cst_357 [1] : vector<8x32xf32> to vector<8xf32>
    %904 = vector.shape_cast %903 : vector<8xf32> to vector<8x1xf32>
    %cst_358 = arith.constant 3.200000e+01 : f32
    %905 = vector.broadcast %cst_358 : f32 to vector<8x1xf32>
    %906 = arith.divf %904, %905 : vector<8x1xf32>
    %907 = vector.broadcast %906 : vector<8x1xf32> to vector<8x32xf32>
    %908 = arith.subf %898, %907 : vector<8x32xf32>
    %909 = arith.mulf %908, %908 : vector<8x32xf32>
    %cst_359 = arith.constant dense<0.000000e+00> : vector<8xf32>
    %910 = vector.multi_reduction <add>, %909, %cst_359 [1] : vector<8x32xf32> to vector<8xf32>
    %911 = vector.shape_cast %910 : vector<8xf32> to vector<8x1xf32>
    %cst_360 = arith.constant 3.200000e+01 : f32
    %912 = vector.broadcast %cst_360 : f32 to vector<8x1xf32>
    %913 = arith.divf %911, %912 : vector<8x1xf32>
    %cst_361 = arith.constant 9.99999974E-6 : f32
    %914 = vector.broadcast %cst_361 : f32 to vector<8x1xf32>
    %915 = arith.addf %913, %914 : vector<8x1xf32>
    %916 = math.rsqrt %915 : vector<8x1xf32>
    %917 = vector.broadcast %916 : vector<8x1xf32> to vector<8x32xf32>
    %918 = arith.mulf %908, %917 : vector<8x32xf32>
    %919 = vector.broadcast %900 : vector<1x32xf32> to vector<8x32xf32>
    %920 = arith.mulf %918, %919 : vector<8x32xf32>
    %921 = vector.broadcast %902 : vector<1x32xf32> to vector<8x32xf32>
    %922 = arith.addf %920, %921 : vector<8x32xf32>
    %c1_362 = arith.constant 1 : index
    %c0_363 = arith.constant 0 : index
    %c0_364 = arith.constant 0 : index
    %923 = vector.load %arg26[%c1_362, %c0_363, %c0_364] : memref<2x32x64xbf16, #tpu.memory_space<vmem>>, vector<1x32x64xbf16>
    %924 = vector.shape_cast %923 : vector<1x32x64xbf16> to vector<32x64xbf16>
    %c1_365 = arith.constant 1 : index
    %c0_366 = arith.constant 0 : index
    %c0_367 = arith.constant 0 : index
    %925 = vector.load %arg27[%c1_365, %c0_366, %c0_367] : memref<2x1x64xf32, #tpu.memory_space<vmem>>, vector<1x1x64xf32>
    %926 = vector.shape_cast %925 : vector<1x1x64xf32> to vector<1x64xf32>
    %927 = arith.truncf %922 : vector<8x32xf32> to vector<8x32xbf16>
    %cst_368 = arith.constant dense<0.000000e+00> : vector<8x64xf32>
    %928 = tpu.matmul %927, %924, %cst_368 {dimension_numbers = #tpu.dot_dimension_numbers<[1], [0], [0], [1], [0, 0, 1, 1], [], []>} : vector<8x32xbf16>, vector<32x64xbf16>, vector<8x64xf32> -> vector<8x64xf32>
    %929 = vector.broadcast %926 : vector<1x64xf32> to vector<8x64xf32>
    %930 = arith.addf %928, %929 : vector<8x64xf32>
    %cst_369 = arith.constant 0.000000e+00 : f32
    %931 = vector.broadcast %cst_369 : f32 to vector<8x64xf32>
    %932 = arith.maximumf %930, %931 : vector<8x64xf32>
    %c1_370 = arith.constant 1 : index
    %c0_371 = arith.constant 0 : index
    %c0_372 = arith.constant 0 : index
    %933 = vector.load %arg28[%c1_370, %c0_371, %c0_372] : memref<2x64x32xbf16, #tpu.memory_space<vmem>>, vector<1x64x32xbf16>
    %934 = vector.shape_cast %933 : vector<1x64x32xbf16> to vector<64x32xbf16>
    %c1_373 = arith.constant 1 : index
    %c0_374 = arith.constant 0 : index
    %c0_375 = arith.constant 0 : index
    %935 = vector.load %arg29[%c1_373, %c0_374, %c0_375] : memref<2x1x32xf32, #tpu.memory_space<vmem>>, vector<1x1x32xf32>
    %936 = vector.shape_cast %935 : vector<1x1x32xf32> to vector<1x32xf32>
    %937 = arith.truncf %932 : vector<8x64xf32> to vector<8x64xbf16>
    %cst_376 = arith.constant dense<0.000000e+00> : vector<8x32xf32>
    %938 = tpu.matmul %937, %934, %cst_376 {dimension_numbers = #tpu.dot_dimension_numbers<[1], [0], [0], [1], [0, 0, 1, 1], [], []>} : vector<8x64xbf16>, vector<64x32xbf16>, vector<8x32xf32> -> vector<8x32xf32>
    %939 = vector.broadcast %936 : vector<1x32xf32> to vector<8x32xf32>
    %940 = arith.addf %938, %939 : vector<8x32xf32>
    %c1_377 = arith.constant 1 : index
    %c0_378 = arith.constant 0 : index
    %c0_379 = arith.constant 0 : index
    %c0_380 = arith.constant 0 : index
    %941 = vector.load %arg30[%c1_377, %c0_378, %c0_379, %c0_380] : memref<2x2x1x32xf32, #tpu.memory_space<vmem>>, vector<1x2x1x32xf32>
    %942 = vector.shape_cast %941 : vector<1x2x1x32xf32> to vector<2x1x32xf32>
    %943 = arith.addf %922, %940 : vector<8x32xf32>
    %944 = vector.extract_strided_slice %942 {offsets = [0, 0, 0], sizes = [1, 1, 32], strides = [1, 1, 1]} : vector<2x1x32xf32> to vector<1x1x32xf32>
    %945 = vector.shape_cast %944 : vector<1x1x32xf32> to vector<1x32xf32>
    %946 = vector.extract_strided_slice %942 {offsets = [1, 0, 0], sizes = [1, 1, 32], strides = [1, 1, 1]} : vector<2x1x32xf32> to vector<1x1x32xf32>
    %947 = vector.shape_cast %946 : vector<1x1x32xf32> to vector<1x32xf32>
    %cst_381 = arith.constant dense<0.000000e+00> : vector<8xf32>
    %948 = vector.multi_reduction <add>, %943, %cst_381 [1] : vector<8x32xf32> to vector<8xf32>
    %949 = vector.shape_cast %948 : vector<8xf32> to vector<8x1xf32>
    %cst_382 = arith.constant 3.200000e+01 : f32
    %950 = vector.broadcast %cst_382 : f32 to vector<8x1xf32>
    %951 = arith.divf %949, %950 : vector<8x1xf32>
    %952 = vector.broadcast %951 : vector<8x1xf32> to vector<8x32xf32>
    %953 = arith.subf %943, %952 : vector<8x32xf32>
    %954 = arith.mulf %953, %953 : vector<8x32xf32>
    %cst_383 = arith.constant dense<0.000000e+00> : vector<8xf32>
    %955 = vector.multi_reduction <add>, %954, %cst_383 [1] : vector<8x32xf32> to vector<8xf32>
    %956 = vector.shape_cast %955 : vector<8xf32> to vector<8x1xf32>
    %cst_384 = arith.constant 3.200000e+01 : f32
    %957 = vector.broadcast %cst_384 : f32 to vector<8x1xf32>
    %958 = arith.divf %956, %957 : vector<8x1xf32>
    %cst_385 = arith.constant 9.99999974E-6 : f32
    %959 = vector.broadcast %cst_385 : f32 to vector<8x1xf32>
    %960 = arith.addf %958, %959 : vector<8x1xf32>
    %961 = math.rsqrt %960 : vector<8x1xf32>
    %962 = vector.broadcast %961 : vector<8x1xf32> to vector<8x32xf32>
    %963 = arith.mulf %953, %962 : vector<8x32xf32>
    %964 = vector.broadcast %945 : vector<1x32xf32> to vector<8x32xf32>
    %965 = arith.mulf %963, %964 : vector<8x32xf32>
    %966 = vector.broadcast %947 : vector<1x32xf32> to vector<8x32xf32>
    %967 = arith.addf %965, %966 : vector<8x32xf32>
    %c0_386 = arith.constant 0 : index
    %c0_387 = arith.constant 0 : index
    %c0_388 = arith.constant 0 : index
    %968 = vector.load %arg31[%c0_386, %c0_387, %c0_388] : memref<2x1x32xf32, #tpu.memory_space<vmem>>, vector<1x1x32xf32>
    %969 = vector.shape_cast %968 : vector<1x1x32xf32> to vector<1x32xf32>
    %c1_389 = arith.constant 1 : index
    %c0_390 = arith.constant 0 : index
    %c0_391 = arith.constant 0 : index
    %970 = vector.load %arg31[%c1_389, %c0_390, %c0_391] : memref<2x1x32xf32, #tpu.memory_space<vmem>>, vector<1x1x32xf32>
    %971 = vector.shape_cast %970 : vector<1x1x32xf32> to vector<1x32xf32>
    %cst_392 = arith.constant dense<0.000000e+00> : vector<8xf32>
    %972 = vector.multi_reduction <add>, %967, %cst_392 [1] : vector<8x32xf32> to vector<8xf32>
    %973 = vector.shape_cast %972 : vector<8xf32> to vector<8x1xf32>
    %cst_393 = arith.constant 3.200000e+01 : f32
    %974 = vector.broadcast %cst_393 : f32 to vector<8x1xf32>
    %975 = arith.divf %973, %974 : vector<8x1xf32>
    %976 = vector.broadcast %975 : vector<8x1xf32> to vector<8x32xf32>
    %977 = arith.subf %967, %976 : vector<8x32xf32>
    %978 = arith.mulf %977, %977 : vector<8x32xf32>
    %cst_394 = arith.constant dense<0.000000e+00> : vector<8xf32>
    %979 = vector.multi_reduction <add>, %978, %cst_394 [1] : vector<8x32xf32> to vector<8xf32>
    %980 = vector.shape_cast %979 : vector<8xf32> to vector<8x1xf32>
    %cst_395 = arith.constant 3.200000e+01 : f32
    %981 = vector.broadcast %cst_395 : f32 to vector<8x1xf32>
    %982 = arith.divf %980, %981 : vector<8x1xf32>
    %cst_396 = arith.constant 9.99999974E-6 : f32
    %983 = vector.broadcast %cst_396 : f32 to vector<8x1xf32>
    %984 = arith.addf %982, %983 : vector<8x1xf32>
    %985 = math.rsqrt %984 : vector<8x1xf32>
    %986 = vector.broadcast %985 : vector<8x1xf32> to vector<8x32xf32>
    %987 = arith.mulf %977, %986 : vector<8x32xf32>
    %988 = vector.broadcast %969 : vector<1x32xf32> to vector<8x32xf32>
    %989 = arith.mulf %987, %988 : vector<8x32xf32>
    %990 = vector.broadcast %971 : vector<1x32xf32> to vector<8x32xf32>
    %991 = arith.addf %989, %990 : vector<8x32xf32>
    %c0_397 = arith.constant 0 : index
    %c0_398 = arith.constant 0 : index
    %992 = vector.load %arg32[%c0_397, %c0_398] : memref<32x128xbf16, #tpu.memory_space<vmem>>, vector<32x128xbf16>
    %c0_399 = arith.constant 0 : index
    %c0_400 = arith.constant 0 : index
    %993 = vector.load %arg33[%c0_399, %c0_400] : memref<1x128xf32, #tpu.memory_space<vmem>>, vector<1x128xf32>
    %994 = arith.truncf %991 : vector<8x32xf32> to vector<8x32xbf16>
    %cst_401 = arith.constant dense<0.000000e+00> : vector<8x128xf32>
    %995 = tpu.matmul %994, %992, %cst_401 {dimension_numbers = #tpu.dot_dimension_numbers<[1], [0], [0], [1], [0, 0, 1, 1], [], []>} : vector<8x32xbf16>, vector<32x128xbf16>, vector<8x128xf32> -> vector<8x128xf32>
    %996 = vector.broadcast %993 : vector<1x128xf32> to vector<8x128xf32>
    %997 = arith.addf %995, %996 : vector<8x128xf32>
    %c0_402 = arith.constant 0 : index
    %c0_403 = arith.constant 0 : index
    %c0_404 = arith.constant 0 : index
    %998 = vector.load %arg34[%c0_402, %c0_403, %c0_404] : memref<1x8x128xf32, #tpu.memory_space<vmem>>, vector<1x8x128xf32>
    %999 = vector.shape_cast %998 : vector<1x8x128xf32> to vector<8x128xf32>
    %1000 = vector.shape_cast %997 : vector<8x128xf32> to vector<1x8x128xf32>
    tpu.vector_store %arg34[%c0_402, %c0_403, %c0_404], %1000 {strides = array<i32>} : memref<1x8x128xf32, #tpu.memory_space<vmem>>, vector<1x8x128xf32>,
    return
  }
  func.func @transform_0(%arg0: i32) -> (i32, i32, i32) {
    %c0_i32 = arith.constant 0 : i32
    %c0_i32_0 = arith.constant 0 : i32
    %c0_i32_1 = arith.constant 0 : i32
    return %arg0, %c0_i32, %c0_i32_0 : i32, i32, i32
  }
  func.func @transform_1(%arg0: i32) -> (i32, i32, i32) {
    %c0_i32 = arith.constant 0 : i32
    %c0_i32_0 = arith.constant 0 : i32
    %c0_i32_1 = arith.constant 0 : i32
    return %arg0, %c0_i32, %c0_i32_0 : i32, i32, i32
  }
  func.func @transform_2(%arg0: i32) -> (i32, i32, i32, i32) {
    %c0_i32 = arith.constant 0 : i32
    %c0_i32_0 = arith.constant 0 : i32
    %c0_i32_1 = arith.constant 0 : i32
    %c0_i32_2 = arith.constant 0 : i32
    %c0_i32_3 = arith.constant 0 : i32
    return %c0_i32, %c0_i32_0, %c0_i32_1, %c0_i32_2 : i32, i32, i32, i32
  }
  func.func @transform_3(%arg0: i32) -> (i32, i32, i32, i32) {
    %c0_i32 = arith.constant 0 : i32
    %c0_i32_0 = arith.constant 0 : i32
    %c0_i32_1 = arith.constant 0 : i32
    %c0_i32_2 = arith.constant 0 : i32
    %c0_i32_3 = arith.constant 0 : i32
    return %c0_i32, %c0_i32_0, %c0_i32_1, %c0_i32_2 : i32, i32, i32, i32
  }
  func.func @transform_4(%arg0: i32) -> (i32, i32, i32, i32) {
    %c0_i32 = arith.constant 0 : i32
    %c0_i32_0 = arith.constant 0 : i32
    %c0_i32_1 = arith.constant 0 : i32
    %c0_i32_2 = arith.constant 0 : i32
    %c0_i32_3 = arith.constant 0 : i32
    return %c0_i32, %c0_i32_0, %c0_i32_1, %c0_i32_2 : i32, i32, i32, i32
  }
  func.func @transform_5(%arg0: i32) -> (i32, i32, i32) {
    %c0_i32 = arith.constant 0 : i32
    %c0_i32_0 = arith.constant 0 : i32
    %c0_i32_1 = arith.constant 0 : i32
    %c0_i32_2 = arith.constant 0 : i32
    return %c0_i32, %c0_i32_0, %c0_i32_1 : i32, i32, i32
  }
  func.func @transform_6(%arg0: i32) -> (i32, i32, i32, i32) {
    %c0_i32 = arith.constant 0 : i32
    %c0_i32_0 = arith.constant 0 : i32
    %c0_i32_1 = arith.constant 0 : i32
    %c0_i32_2 = arith.constant 0 : i32
    %c0_i32_3 = arith.constant 0 : i32
    return %c0_i32, %c0_i32_0, %c0_i32_1, %c0_i32_2 : i32, i32, i32, i32
  }
  func.func @transform_7(%arg0: i32) -> (i32, i32, i32) {
    %c0_i32 = arith.constant 0 : i32
    %c0_i32_0 = arith.constant 0 : i32
    %c0_i32_1 = arith.constant 0 : i32
    %c0_i32_2 = arith.constant 0 : i32
    return %c0_i32, %c0_i32_0, %c0_i32_1 : i32, i32, i32
  }
  func.func @transform_8(%arg0: i32) -> (i32, i32, i32) {
    %c0_i32 = arith.constant 0 : i32
    %c0_i32_0 = arith.constant 0 : i32
    %c0_i32_1 = arith.constant 0 : i32
    %c0_i32_2 = arith.constant 0 : i32
    return %c0_i32, %c0_i32_0, %c0_i32_1 : i32, i32, i32
  }
  func.func @transform_9(%arg0: i32) -> (i32, i32, i32) {
    %c0_i32 = arith.constant 0 : i32
    %c0_i32_0 = arith.constant 0 : i32
    %c0_i32_1 = arith.constant 0 : i32
    %c0_i32_2 = arith.constant 0 : i32
    return %c0_i32, %c0_i32_0, %c0_i32_1 : i32, i32, i32
  }
  func.func @transform_10(%arg0: i32) -> (i32, i32, i32) {
    %c0_i32 = arith.constant 0 : i32
    %c0_i32_0 = arith.constant 0 : i32
    %c0_i32_1 = arith.constant 0 : i32
    %c0_i32_2 = arith.constant 0 : i32
    return %c0_i32, %c0_i32_0, %c0_i32_1 : i32, i32, i32
  }
  func.func @transform_11(%arg0: i32) -> (i32, i32, i32, i32) {
    %c0_i32 = arith.constant 0 : i32
    %c0_i32_0 = arith.constant 0 : i32
    %c0_i32_1 = arith.constant 0 : i32
    %c0_i32_2 = arith.constant 0 : i32
    %c0_i32_3 = arith.constant 0 : i32
    return %c0_i32, %c0_i32_0, %c0_i32_1, %c0_i32_2 : i32, i32, i32, i32
  }
  func.func @transform_12(%arg0: i32) -> (i32, i32, i32) {
    %c0_i32 = arith.constant 0 : i32
    %c0_i32_0 = arith.constant 0 : i32
    %c0_i32_1 = arith.constant 0 : i32
    %c0_i32_2 = arith.constant 0 : i32
    return %c0_i32, %c0_i32_0, %c0_i32_1 : i32, i32, i32
  }
  func.func @transform_13(%arg0: i32) -> (i32, i32, i32, i32) {
    %c0_i32 = arith.constant 0 : i32
    %c0_i32_0 = arith.constant 0 : i32
    %c0_i32_1 = arith.constant 0 : i32
    %c0_i32_2 = arith.constant 0 : i32
    %c0_i32_3 = arith.constant 0 : i32
    return %c0_i32, %c0_i32_0, %c0_i32_1, %c0_i32_2 : i32, i32, i32, i32
  }
  func.func @transform_14(%arg0: i32) -> (i32, i32, i32, i32) {
    %c0_i32 = arith.constant 0 : i32
    %c0_i32_0 = arith.constant 0 : i32
    %c0_i32_1 = arith.constant 0 : i32
    %c0_i32_2 = arith.constant 0 : i32
    %c0_i32_3 = arith.constant 0 : i32
    return %c0_i32, %c0_i32_0, %c0_i32_1, %c0_i32_2 : i32, i32, i32, i32
  }
  func.func @transform_15(%arg0: i32) -> (i32, i32, i32, i32) {
    %c0_i32 = arith.constant 0 : i32
    %c0_i32_0 = arith.constant 0 : i32
    %c0_i32_1 = arith.constant 0 : i32
    %c0_i32_2 = arith.constant 0 : i32
    %c0_i32_3 = arith.constant 0 : i32
    return %c0_i32, %c0_i32_0, %c0_i32_1, %c0_i32_2 : i32, i32, i32, i32
  }
  func.func @transform_16(%arg0: i32) -> (i32, i32, i32) {
    %c0_i32 = arith.constant 0 : i32
    %c0_i32_0 = arith.constant 0 : i32
    %c0_i32_1 = arith.constant 0 : i32
    %c0_i32_2 = arith.constant 0 : i32
    return %c0_i32, %c0_i32_0, %c0_i32_1 : i32, i32, i32
  }
  func.func @transform_17(%arg0: i32) -> (i32, i32, i32, i32) {
    %c0_i32 = arith.constant 0 : i32
    %c0_i32_0 = arith.constant 0 : i32
    %c0_i32_1 = arith.constant 0 : i32
    %c0_i32_2 = arith.constant 0 : i32
    %c0_i32_3 = arith.constant 0 : i32
    return %c0_i32, %c0_i32_0, %c0_i32_1, %c0_i32_2 : i32, i32, i32, i32
  }
  func.func @transform_18(%arg0: i32) -> (i32, i32, i32, i32) {
    %c0_i32 = arith.constant 0 : i32
    %c0_i32_0 = arith.constant 0 : i32
    %c0_i32_1 = arith.constant 0 : i32
    %c0_i32_2 = arith.constant 0 : i32
    %c0_i32_3 = arith.constant 0 : i32
    return %c0_i32, %c0_i32_0, %c0_i32_1, %c0_i32_2 : i32, i32, i32, i32
  }
  func.func @transform_19(%arg0: i32) -> (i32, i32, i32, i32) {
    %c0_i32 = arith.constant 0 : i32
    %c0_i32_0 = arith.constant 0 : i32
    %c0_i32_1 = arith.constant 0 : i32
    %c0_i32_2 = arith.constant 0 : i32
    %c0_i32_3 = arith.constant 0 : i32
    return %c0_i32, %c0_i32_0, %c0_i32_1, %c0_i32_2 : i32, i32, i32, i32
  }
  func.func @transform_20(%arg0: i32) -> (i32, i32, i32, i32) {
    %c0_i32 = arith.constant 0 : i32
    %c0_i32_0 = arith.constant 0 : i32
    %c0_i32_1 = arith.constant 0 : i32
    %c0_i32_2 = arith.constant 0 : i32
    %c0_i32_3 = arith.constant 0 : i32
    return %c0_i32, %c0_i32_0, %c0_i32_1, %c0_i32_2 : i32, i32, i32, i32
  }
  func.func @transform_21(%arg0: i32) -> (i32, i32, i32, i32) {
    %c0_i32 = arith.constant 0 : i32
    %c0_i32_0 = arith.constant 0 : i32
    %c0_i32_1 = arith.constant 0 : i32
    %c0_i32_2 = arith.constant 0 : i32
    %c0_i32_3 = arith.constant 0 : i32
    return %c0_i32, %c0_i32_0, %c0_i32_1, %c0_i32_2 : i32, i32, i32, i32
  }
  func.func @transform_22(%arg0: i32) -> (i32, i32, i32, i32) {
    %c0_i32 = arith.constant 0 : i32
    %c0_i32_0 = arith.constant 0 : i32
    %c0_i32_1 = arith.constant 0 : i32
    %c0_i32_2 = arith.constant 0 : i32
    %c0_i32_3 = arith.constant 0 : i32
    return %c0_i32, %c0_i32_0, %c0_i32_1, %c0_i32_2 : i32, i32, i32, i32
  }
  func.func @transform_23(%arg0: i32) -> (i32, i32, i32) {
    %c0_i32 = arith.constant 0 : i32
    %c0_i32_0 = arith.constant 0 : i32
    %c0_i32_1 = arith.constant 0 : i32
    %c0_i32_2 = arith.constant 0 : i32
    return %c0_i32, %c0_i32_0, %c0_i32_1 : i32, i32, i32
  }
  func.func @transform_24(%arg0: i32) -> (i32, i32, i32, i32) {
    %c0_i32 = arith.constant 0 : i32
    %c0_i32_0 = arith.constant 0 : i32
    %c0_i32_1 = arith.constant 0 : i32
    %c0_i32_2 = arith.constant 0 : i32
    %c0_i32_3 = arith.constant 0 : i32
    return %c0_i32, %c0_i32_0, %c0_i32_1, %c0_i32_2 : i32, i32, i32, i32
  }
  func.func @transform_25(%arg0: i32) -> (i32, i32, i32) {
    %c0_i32 = arith.constant 0 : i32
    %c0_i32_0 = arith.constant 0 : i32
    %c0_i32_1 = arith.constant 0 : i32
    %c0_i32_2 = arith.constant 0 : i32
    return %c0_i32, %c0_i32_0, %c0_i32_1 : i32, i32, i32
  }
  func.func @transform_26(%arg0: i32) -> (i32, i32, i32) {
    %c0_i32 = arith.constant 0 : i32
    %c0_i32_0 = arith.constant 0 : i32
    %c0_i32_1 = arith.constant 0 : i32
    %c0_i32_2 = arith.constant 0 : i32
    return %c0_i32, %c0_i32_0, %c0_i32_1 : i32, i32, i32
  }
  func.func @transform_27(%arg0: i32) -> (i32, i32, i32) {
    %c0_i32 = arith.constant 0 : i32
    %c0_i32_0 = arith.constant 0 : i32
    %c0_i32_1 = arith.constant 0 : i32
    %c0_i32_2 = arith.constant 0 : i32
    return %c0_i32, %c0_i32_0, %c0_i32_1 : i32, i32, i32
  }
  func.func @transform_28(%arg0: i32) -> (i32, i32, i32) {
    %c0_i32 = arith.constant 0 : i32
    %c0_i32_0 = arith.constant 0 : i32
    %c0_i32_1 = arith.constant 0 : i32
    %c0_i32_2 = arith.constant 0 : i32
    return %c0_i32, %c0_i32_0, %c0_i32_1 : i32, i32, i32
  }
  func.func @transform_29(%arg0: i32) -> (i32, i32, i32, i32) {
    %c0_i32 = arith.constant 0 : i32
    %c0_i32_0 = arith.constant 0 : i32
    %c0_i32_1 = arith.constant 0 : i32
    %c0_i32_2 = arith.constant 0 : i32
    %c0_i32_3 = arith.constant 0 : i32
    return %c0_i32, %c0_i32_0, %c0_i32_1, %c0_i32_2 : i32, i32, i32, i32
  }
  func.func @transform_30(%arg0: i32) -> (i32, i32, i32) {
    %c0_i32 = arith.constant 0 : i32
    %c0_i32_0 = arith.constant 0 : i32
    %c0_i32_1 = arith.constant 0 : i32
    %c0_i32_2 = arith.constant 0 : i32
    return %c0_i32, %c0_i32_0, %c0_i32_1 : i32, i32, i32
  }
  func.func @transform_31(%arg0: i32) -> (i32, i32) {
    %c0_i32 = arith.constant 0 : i32
    %c0_i32_0 = arith.constant 0 : i32
    %c0_i32_1 = arith.constant 0 : i32
    return %c0_i32, %c0_i32_0 : i32, i32
  }
  func.func @transform_32(%arg0: i32) -> (i32, i32) {
    %c0_i32 = arith.constant 0 : i32
    %c0_i32_0 = arith.constant 0 : i32
    %c0_i32_1 = arith.constant 0 : i32
    return %c0_i32, %c0_i32_0 : i32, i32
  }
  func.func @transform_33(%arg0: i32) -> (i32, i32, i32) {
    %c0_i32 = arith.constant 0 : i32
    %c0_i32_0 = arith.constant 0 : i32
    %c0_i32_1 = arith.constant 0 : i32
    return %arg0, %c0_i32, %c0_i32_0 : i32, i32, i32
  }
}

</mosaic_0001>

<bundles_post_ra>
// kernel: transformer_forward.1
= control target key start
LH: loop header
LB: loop body
LE: loop exit
PB: predicated region body
PF: predicated region fallthrough
CT: control target
= control target key end

     0   :  { %s13189_s6 = smov 1   ;;  %s13190_s10 = smov 2   ;;  %s14758_s0 = inlined_call_operand.smem [shape: u32[34], index: -1, kind: input, shape index: {}] }
   0x1   :  { %s13233_s5 = sld [smem:[%s14758_s0]]   ;;  %s13191_s14 = smov 3  }
   0x2   :  { %s13238_s9 = sld [smem:[%s14758_s0 + %s13189_s6]]   ;;  %s13192_s18 = smov 4  }
   0x3   :  { %s13243_s13 = sld [smem:[%s14758_s0 + %s13190_s10]]   ;;  %s13193_s22 = smov 5  }
   0x4   :  { %s13248_s17 = sld [smem:[%s14758_s0 + %s13191_s14]]   ;;  %s13194_s26 = smov 6  }
   0x5   :  { %s13253_s21 = sld [smem:[%s14758_s0 + %s13192_s18]]   ;;  %s13195_s30 = smov 7  }
   0x6   :  { %s13258_s25 = sld [smem:[%s14758_s0 + %s13193_s22]]   ;;  %s13196_s4 = smov 8  }
   0x7   :  { %14779 = sst [smem:[#allocation2_spill]] %s13233_s5  ;;  %s13197_s10 = smov 9  }
   0x8   :  { %14780 = sst [smem:[#allocation3_spill]] %s13238_s9  ;;  %s13198_s15 = smov 10  }
   0x9   :  { %14781 = sst [smem:[#allocation4_spill]] %s13243_s13  ;;  %s13199_s20 = smov 11  }
   0xa   :  { %s13263_s29 = sld [smem:[%s14758_s0 + %s13194_s26]]   ;;  %s13200_s26 = smov 12  }
   0xb   :  { %s13268_s3 = sld [smem:[%s14758_s0 + %s13195_s30]]   ;;  %s13201_s1 = smov 13  }
   0xc   :  { %s13273_s8 = sld [smem:[%s14758_s0 + %s13196_s4]]   ;;  %s13202_s7 = smov 14  }
   0xd   :  { %s13278_s14 = sld [smem:[%s14758_s0 + %s13197_s10]]   ;;  %s13204_s22 = smov 16  }
   0xe   :  { %s13283_s19 = sld [smem:[%s14758_s0 + %s13198_s15]]   ;;  %s13203_s15 = smov 15  }
   0xf   :  { %s13288_s24 = sld [smem:[%s14758_s0 + %s13199_s20]]   ;;  %s13205_s28 = smov 17  }
  0x10   :  { %s13293_s30 = sld [smem:[%s14758_s0 + %s13200_s26]]  }
  0x11   :  { %14782 = sst [smem:[#allocation5_spill]] %s13268_s3 }
  0x12   :  { %14783 = sst [smem:[#allocation6_spill]] %s13273_s8 }
  0x13   :  { %s13298_s6 = sld [smem:[%s14758_s0 + %s13201_s1]]  }
  0x14   :  { %s13303_s12 = sld [smem:[%s14758_s0 + %s13202_s7]]   ;;  %s13206_s7 = smov 18  }
  0x15   :  { %s13308_s20 = sld [smem:[%s14758_s0 + %s13203_s15]]   ;;  %s13207_s15 = smov 19  }
  0x16   :  { %14784 = sst [smem:[#allocation7_spill]] %s13293_s30 }
  0x17   :  { %s13313_s27 = sld [smem:[%s14758_s0 + %s13204_s22]]   ;;  %s13208_s22 = smov 20  }
  0x18   :  { %s13318_s4 = sld [smem:[%s14758_s0 + %s13205_s28]]   ;;  %s13209_s28 = smov 21  }
  0x19   :  { %s13323_s30 = sld [smem:[%s14758_s0 + %s13206_s7]]   ;;  %s13210_s7 = smov 22  }
  0x1b   :  { %14785 = sst [smem:[#allocation8_spill]] %s13308_s20 }
  0x1c   :  { %s13328_s20 = sld [smem:[%s14758_s0 + %s13207_s15]]   ;;  %s13211_s15 = smov 23  }
  0x1d   :  { %14786 = sst [smem:[#allocation9_spill]] %s13313_s27 }
  0x1e   :  { %14787 = sst [smem:[#allocation10_spill]] %s13318_s4 }
  0x1f   :  { %14788 = sst [smem:[#allocation11_spill]] %s13323_s30 }
  0x20   :  { %s13333_s27 = sld [smem:[%s14758_s0 + %s13208_s22]]   ;;  %s13212_s22 = smov 24  }
  0x21   :  { %s13338_s4 = sld [smem:[%s14758_s0 + %s13209_s28]]   ;;  %s13213_s28 = smov 25  }
  0x22   :  { %14789 = sst [smem:[#allocation12_spill]] %s13328_s20 }
  0x23   :  { %s13343_s30 = sld [smem:[%s14758_s0 + %s13210_s7]]   ;;  %s13214_s7 = smov 26  }
  0x24   :  { %s13348_s20 = sld [smem:[%s14758_s0 + %s13211_s15]]   ;;  %s13215_s15 = smov 27  }
  0x26   :  { %14790 = sst [smem:[#allocation13_spill]] %s13333_s27 }
  0x27   :  { %14791 = sst [smem:[#allocation14_spill]] %s13338_s4 }
  0x28   :  { %s13353_s27 = sld [smem:[%s14758_s0 + %s13212_s22]]   ;;  %s13216_s22 = smov 28  }
  0x29   :  { %14792 = sst [smem:[#allocation15_spill]] %s13343_s30 }
  0x2a   :  { %14793 = sst [smem:[#allocation16_spill]] %s13348_s20 }
  0x2b   :  { %s13358_s4 = sld [smem:[%s14758_s0 + %s13213_s28]]   ;;  %s13217_s28 = smov 29  }
  0x2c   :  { %s13363_s30 = sld [smem:[%s14758_s0 + %s13214_s7]]   ;;  %s13218_s7 = smov 30  }
  0x2d   :  { %s13368_s20 = sld [smem:[%s14758_s0 + %s13215_s15]]   ;;  %s13219_s15 = smov 31  }
  0x2e   :  { %14794 = sst [smem:[#allocation17_spill]] %s13353_s27 }
  0x2f   :  { %s13373_s27 = sld [smem:[%s14758_s0 + %s13216_s22]]   ;;  %s13220_s22 = smov 32  }
  0x31   :  { %14795 = sst [smem:[#allocation18_spill]] %s13358_s4 }
  0x32   :  { %14796 = sst [smem:[#allocation19_spill]] %s13363_s30 }
  0x33   :  { %14797 = sst [smem:[#allocation20_spill]] %s13368_s20 }
  0x34   :  { %s13378_s4 = sld [smem:[%s14758_s0 + %s13217_s28]]   ;;  %s13221_s28 = smov 33  }
  0x35   :  { %14798 = sst [smem:[#allocation21_spill]] %s13373_s27 }
  0x36   :  { %s13383_s30 = sld [smem:[%s14758_s0 + %s13218_s7]]   ;;  %s13400_s7 = smov 0  }
  0x37   :  { %s13388_s20 = sld [smem:[%s14758_s0 + %s13219_s15]]  }
  0x38   :  { %s13393_s27 = sld [smem:[%s14758_s0 + %s13220_s22]]  }
  0x3a   :  { %14799 = sst [smem:[#allocation22_spill]] %s13378_s4 }
  0x3b   :  { %s13398_s4 = sld [smem:[%s14758_s0 + %s13221_s28]]  }
  0x3c LB: > { %s14800_s13 = sld [smem:[#allocation4_spill]]  ;;  %s14801_s8 = sld [smem:[#allocation6_spill]]  ;;  %s13187_s7 = sphi %s13400_s7, %s77_s7  }
  0x3d   : > { %s14802_s3 = sld [smem:[#allocation5_spill]]  ;;  %s10676_s10 = sadd.s32 4294967295, %s13187_s7  }
  0x3e   : > { %p10680_p0 = scmp.ge.s32.totalorder %s13187_s7, 1  ;;  %p929_p1 = scmp.lt.s32.totalorder %s13187_s7, 3 }
  0x40   : > { %p930_p2 = pnand %p10680_p0, %p929_p1 }
  0x41   : > { %v13222_v1 = vmov (!%p930_p2), 0.0   ;;  %s14803_s5 = sld [smem:[#allocation2_spill]] (!%p930_p2)  ;;  %vm13223_vm0 = vmmov (!%p930_p2), 0   ;;  %p1015_p3 = scmp.lt.s32.totalorder (!%p930_p2), %s10676_s10, 1  ;;  %vm1114_vm1 = vcmask (!%p930_p2), 261120   ;;  %vm1822_vm2 = vcmask (!%p930_p2), 64512  }
  0x42   : > { %933 = sbr.rel (%p930_p2) target bundleno = 12259 (0x2fe3), region = 152  ;;  %v12890_v0 = vld [vmem:[%s14800_s13] sm:$0xff] (!%p930_p2)   ;;  %11750 = vmatprep.subr.bf16.mxu0 (!%p930_p2), %v13222_v1  ;;  %11758 = vmatprep.subr.bf16.mxu1 (!%p930_p2), %v13222_v1  ;;  %v12891_v2 = vld [vmem:[%s14800_s13 + $0x10] sm:$0xff] (!%p930_p2)   ;;  %v12892_v3 = vld [vmem:[%s14800_s13 + $0x8] sm:$0xff] (!%p930_p2)   ;;  %vm2066_vm3 = vcmask (!%p930_p2), 1043456   ;;  %vm2589_vm4 = vcmask (!%p930_p2), 523264  }
  0x43   : > { %11751 = vmatpush3.bf16.msra.mxu0 (!%p930_p2), %v12890_v0  ;;  %11754 = vmatprep.mubr.msk.bf16.mxu0 (!%p930_p2), %vm13223_vm0, %v13222_v1  ;;  %v12893_v4 = vld [vmem:[%s14800_s13 + $0x18] sm:$0xff] (!%p930_p2)   ;;  %v12894_v5 = vld [vmem:[%s14800_s13 + $0x20] sm:$0xff] (!%p930_p2)   ;;  %v12895_v6 = vld [vmem:[%s14800_s13 + $0x30] sm:$0xff] (!%p930_p2)   ;;  %s14804_s9 = sld [smem:[#allocation3_spill]] (!%p930_p2)  ;;  %s14805_s16 = sld [smem:[#allocation8_spill]] (!%p930_p2) }
  0x44   : > { %11759 = vmatpush3.bf16.msra.mxu1 (!%p930_p2), %v12891_v2  ;;  %11752 = vmatprep.subr.bf16.mxu0 (!%p930_p2), %v13222_v1  ;;  %v12896_v9 = vld [vmem:[%s14800_s13 + $0x28] sm:$0xff] (!%p930_p2)   ;;  %v12897_v10 = vld [vmem:[%s14800_s13 + $0x38] sm:$0xff] (!%p930_p2)   ;;  %v12898_v11 = vld [vmem:[%s14800_s13 + $0x40] sm:$0xff] (!%p930_p2)   ;;  %s14806_s18 = sld [smem:[#allocation9_spill]] (!%p930_p2)  ;;  %s14807_s22 = sld [smem:[#allocation11_spill]] (!%p930_p2) }
  0x45   : > { %11760 = vmatprep.subr.bf16.mxu1 (!%p930_p2), %v13222_v1  ;;  %11762 = vmatprep.mubr.msk.bf16.mxu1 (!%p930_p2), %vm13223_vm0, %v13222_v1  ;;  %v12899_v12 = vld [vmem:[%s14800_s13 + $0x50] sm:$0xff] (!%p930_p2)   ;;  %v12900_v13 = vld [vmem:[%s14800_s13 + $0x48] sm:$0xff] (!%p930_p2)   ;;  %v12901_v14 = vld [vmem:[%s14800_s13 + $0x58] sm:$0xff] (!%p930_p2)   ;;  %s14808_s23 = sld [smem:[#allocation10_spill]] (!%p930_p2)  ;;  %s14809_s26 = sld [smem:[#allocation7_spill]] (!%p930_p2) }
  0x46   : > { %v12902_v15 = vld [vmem:[%s14800_s13 + $0x60] sm:$0xff] (!%p930_p2)   ;;  %v12903_v16 = vld [vmem:[%s14800_s13 + $0x70] sm:$0xff] (!%p930_p2)   ;;  %v12904_v17 = vld [vmem:[%s14800_s13 + $0x68] sm:$0xff] (!%p930_p2)   ;;  %s14810_s28 = sld [smem:[#allocation13_spill]] (!%p930_p2)  ;;  %s14811_s1 = sld [smem:[#allocation14_spill]] (!%p930_p2) }
  0x47   : > { %11753 = vmatpush3.bf16.msra.mxu0 (!%p930_p2), %v12892_v3  ;;  %v12905_v18 = vld [vmem:[%s14800_s13 + $0x78] sm:$0xff] (!%p930_p2)   ;;  %v12906_v19 = vld [vmem:[%s14800_s13 + $0x80] sm:$0xff] (!%p930_p2)   ;;  %v12907_v20 = vld [vmem:[%s14800_s13 + $0x90] sm:$0xff] (!%p930_p2)   ;;  %s14812_s2 = sld [smem:[#allocation12_spill]] (!%p930_p2) }
  0x48   : > { %11761 = vmatpush3.bf16.msra.mxu1 (!%p930_p2), %v12893_v4  ;;  %11766 = vmatprep.subr.bf16.mxu0 (!%p930_p2), %v13222_v1  ;;  %v12908_v21 = vld [vmem:[%s14800_s13 + $0x88] sm:$0xff] (!%p930_p2)   ;;  %v12909_v22 = vld [vmem:[%s14800_s13 + $0x98] sm:$0xff] (!%p930_p2)   ;;  %v12910_v23 = vld [vmem:[%s14800_s13 + $0xa0] sm:$0xff] (!%p930_p2)  }
  0x49   : > { %s14822_s10 = smov (!%p1015_p3, %s10676_s10), 1  ;;  %11774 = vmatprep.subr.bf16.mxu1 %v13222_v1  ;;  %v12911_v24 = vld [vmem:[%s14800_s13 + $0xb0] sm:$0xff]   ;;  %v12912_v25 = vld [vmem:[%s14800_s13 + $0xa8] sm:$0xff]   ;;  %v12913_v26 = vld [vmem:[%s14800_s13 + $0xb8] sm:$0xff]  }
  0x4a   : > { %s13420_s0 = sshll.u32 %s14822_s10, 3  ;;  %v10712_v43 = vld [vmem:[%s13248_s17 + $0x4] ss:$0 sm:$0xff]  ;;  %v10713_v44 = vld [vmem:[%s13248_s17 + $0x5] ss:$0 sm:$0xff]  ;;  %s14813_s10 = sld [smem:[#allocation15_spill]] }
  0x4b   : > { %s13425_s11 = scalar_lea.vmem %s14803_s5, %s13420_s0  ;;  %v10696_v57 = vld [vmem:[%s13248_s17] ss:$0 sm:$0xff]  ;;  %v10697_v58 = vld [vmem:[%s13248_s17 + $0x1] ss:$0 sm:$0xff]  ;;  %v10714_v61 = vld [vmem:[%s13248_s17 + $0x6] ss:$0 sm:$0xff]  ;;  %s1022_s15 = scalar_lea.vmem %s14804_s9, %s13420_s0 }
  0x4c   : > { %v1028_v7 = vld [vmem:[%s13425_s11] sm:$0xff]  ;;  %s14817_s5 = sld [smem:[#allocation17_spill]]  ;;  %s14819_s9 = sld [smem:[#allocation21_spill]] }
  0x4d   : > { %v13431_v8 = vpack.c.bf16 %v1028_v7, %v1028_v7  ;;  %v10715_v62 = vld [vmem:[%s13248_s17 + $0x7] ss:$0 sm:$0xff] }
  0x4f   : > { %11755 = vmatmul.mubr.msk.bf16.vlgmr.msra.gmra.mrb[0].mxu0 %vm1114_vm1, %v13431_v8  ;;  %11763 = vmatmul.mubr.msk.bf16.vlgmr.msra.gmra.mrb[0].mxu1 %vm1114_vm1, %v13431_v8 }
  0x50   : > { %11767 = vmatpush3.bf16.msra.mxu0 %v12894_v5  ;;  %11775 = vmatpush3.bf16.msra.mxu1 %v12895_v6 }
  0x51   : > { %11768 = vmatprep.subr.bf16.mxu0 %v13222_v1  ;;  %11776 = vmatprep.subr.bf16.mxu1 %v13222_v1 }
  0x52   : > { %11770 = vmatprep.mubr.msk.bf16.mxu0 %vm13223_vm0, %v13222_v1  ;;  %11778 = vmatprep.mubr.msk.bf16.mxu1 %vm13223_vm0, %v13222_v1 }
  0x54   : > { %11769 = vmatpush3.bf16.msra.mxu0 %v12896_v9  ;;  %11777 = vmatpush3.bf16.msra.mxu1 %v12897_v10 }
  0x55   : > { %11782 = vmatprep.subr.bf16.mxu0 %v13222_v1  ;;  %11790 = vmatprep.subr.bf16.mxu1 %v13222_v1 }
  0x57   : > { %11771 = vmatmul.mubr.msk.bf16.vlgmr.msra.gmra.mrb[4].mxu0 %vm1114_vm1, %v13431_v8  ;;  %11779 = vmatmul.mubr.msk.bf16.vlgmr.msra.gmra.mrb[4].mxu1 %vm1114_vm1, %v13431_v8 }
  0x58   : > { %11783 = vmatpush3.bf16.msra.mxu0 %v12898_v11  ;;  %11791 = vmatpush3.bf16.msra.mxu1 %v12899_v12 }
  0x59   : > { %11784 = vmatprep.subr.bf16.mxu0 %v13222_v1  ;;  %11792 = vmatprep.subr.bf16.mxu1 %v13222_v1 }
  0x5a   : > { %11786 = vmatprep.mubr.msk.bf16.mxu0 %vm13223_vm0, %v13222_v1  ;;  %11794 = vmatprep.mubr.msk.bf16.mxu1 %vm13223_vm0, %v13222_v1 }
  0x5c   : > { %11785 = vmatpush3.bf16.msra.mxu0 %v12900_v13  ;;  %11793 = vmatpush3.bf16.msra.mxu1 %v12901_v14 }
  0x5d   : > { %11798 = vmatprep.subr.bf16.mxu0 %v13222_v1  ;;  %11806 = vmatprep.subr.bf16.mxu1 %v13222_v1 }
  0x5f   : > { %11787 = vmatmul.mubr.msk.bf16.vlgmr.msra.gmra.mrb[8].mxu0 %vm1114_vm1, %v13431_v8  ;;  %11795 = vmatmul.mubr.msk.bf16.vlgmr.msra.gmra.mrb[8].mxu1 %vm1114_vm1, %v13431_v8 }
  0x60   : > { %11799 = vmatpush3.bf16.msra.mxu0 %v12902_v15  ;;  %11807 = vmatpush3.bf16.msra.mxu1 %v12903_v16  ;;  %v10698_v16 = vld [vmem:[%s13248_s17 + $0x2] ss:$0 sm:$0xff] }
  0x61   : > { %11800 = vmatprep.subr.bf16.mxu0 %v13222_v1  ;;  %11808 = vmatprep.subr.bf16.mxu1 %v13222_v1 }
  0x62   : > { %11802 = vmatprep.mubr.msk.bf16.mxu0 %vm13223_vm0, %v13222_v1  ;;  %11810 = vmatprep.mubr.msk.bf16.mxu1 %vm13223_vm0, %v13222_v1 }
  0x64   : > { %11801 = vmatpush3.bf16.msra.mxu0 %v12904_v17  ;;  %11809 = vmatpush3.bf16.msra.mxu1 %v12905_v18  ;;  %v10699_v17 = vld [vmem:[%s13248_s17 + $0x3] ss:$0 sm:$0xff] }
  0x65   : > { %11814 = vmatprep.subr.bf16.mxu0 %v13222_v1  ;;  %11822 = vmatprep.subr.bf16.mxu1 %v13222_v1 }
  0x67   : > { %11803 = vmatmul.mubr.msk.bf16.vlgmr.msra.gmra.mrb[12].mxu0 %vm1114_vm1, %v13431_v8  ;;  %11811 = vmatmul.mubr.msk.bf16.vlgmr.msra.gmra.mrb[12].mxu1 %vm1114_vm1, %v13431_v8 }
  0x68   : > { %11815 = vmatpush3.bf16.msra.mxu0 %v12906_v19  ;;  %11818 = vmatprep.mubr.msk.bf16.mxu0 %vm13223_vm0, %v13222_v1 }
  0x69   : > { %11816 = vmatprep.subr.bf16.mxu0 %v13222_v1  ;;  %11826 = vmatprep.mubr.msk.bf16.mxu1 %vm13223_vm0, %v13222_v1 }
  0x6a   : > { %11823 = vmatpush3.bf16.msra.mxu1 %v12907_v20 }
  0x6b   : > { %11824 = vmatprep.subr.bf16.mxu1 %v13222_v1 }
  0x6c   : > { %11817 = vmatpush3.bf16.msra.mxu0 %v12908_v21 }
  0x6d   : > { %11830 = vmatprep.subr.bf16.mxu0 %v13222_v1 }
  0x6e   : > { %11825 = vmatpush3.bf16.msra.mxu1 %v12909_v22 }
  0x6f   : > { %11819 = vmatmul.mubr.msk.bf16.vlgmr.msra.gmra.mrb[16].mxu0 %vm1114_vm1, %v13431_v8  ;;  %11838 = vmatprep.subr.bf16.mxu1 %v13222_v1 }
  0x70   : > { %11834 = vmatprep.mubr.msk.bf16.mxu0 %vm13223_vm0, %v13222_v1  ;;  %11831 = vmatpush3.bf16.msra.mxu0 %v12910_v23 }
  0x71   : > { %11827 = vmatmul.mubr.msk.bf16.vlgmr.msra.gmra.mrb[16].mxu1 %vm1114_vm1, %v13431_v8  ;;  %11832 = vmatprep.subr.bf16.mxu0 %v13222_v1 }
  0x72   : > { %11839 = vmatpush3.bf16.msra.mxu1 %v12911_v24  ;;  %11842 = vmatprep.mubr.msk.bf16.mxu1 %vm13223_vm0, %v13222_v1  ;;  %v10728_v24 = vld [vmem:[%s13248_s17 + $0x8] ss:$0 sm:$0xff] }
  0x73   : > { %11840 = vmatprep.subr.bf16.mxu1 %v13222_v1 }
  0x74   : > { %11833 = vmatpush3.bf16.msra.mxu0 %v12912_v25 }
  0x75   : > { %11846 = vmatprep.subr.bf16.mxu0 %v13222_v1 }
  0x76   : > { %11841 = vmatpush3.bf16.msra.mxu1 %v12913_v26  ;;  %v10729_v26 = vld [vmem:[%s13248_s17 + $0x9] ss:$0 sm:$0xff] }
  0x77   : > { %11852 = vmatprep.subr.bf16.mxu1 %v13222_v1  ;;  %11835 = vmatmul.mubr.msk.bf16.vlgmr.msra.gmra.mrb[20].mxu0 %vm1114_vm1, %v13431_v8 }
  0x78   : > { %11848 = vmatprep.mubr.msk.bf16.mxu0 %vm13223_vm0, %v13222_v1 }
  0x79   : > { %11843 = vmatmul.mubr.msk.bf16.vlgmr.msra.gmra.mrb[20].mxu1 %vm1114_vm1, %v13431_v8 }
  0x7a   : > { %11854 = vmatprep.mubr.msk.bf16.mxu1 %vm13223_vm0, %v13222_v1 }
 0x122   : > { %v1152_v27 = vpop.f32.mrb[0].mxu0  ;;  %v1204_v28 = vpop.f32.mrb[0].mxu1 }
 0x123   : > { %v11756_v29 = vpop.f32.mrb[1].mxu0  ;;  %v11764_v30 = vpop.f32.mrb[1].mxu1  ;;  %v1338_v63 = vadd.f32 %v10696_v57, %v1152_v27  ;;  %v1339_v0 = vadd.f32 %v10697_v58, %v1204_v28 }
 0x124   : > { %v1155_v31 = vpop.f32.mrb[2].mxu0  ;;  %v1207_v32 = vpop.f32.mrb[2].mxu1 }
 0x125   : > { %v11757_v33 = vpop.f32.mrb[3].mxu0  ;;  %v11765_v34 = vpop.f32.mrb[3].mxu1  ;;  %v1814_v10 = vpack.c.bf16 %v1338_v63, %v1338_v63  ;;  %v1815_v11 = vpack.c.bf16 %v1339_v0, %v1339_v0 }
 0x12a   : > { %v1256_v35 = vpop.f32.mrb[4].mxu0  ;;  %v1308_v36 = vpop.f32.mrb[4].mxu1 }
 0x12b   : > { %v11772_v37 = vpop.f32.mrb[5].mxu0  ;;  %v11780_v38 = vpop.f32.mrb[5].mxu1  ;;  %v1340_v20 = vadd.f32 %v10698_v16, %v1256_v35  ;;  %v1341_v21 = vadd.f32 %v10699_v17, %v1308_v36 }
 0x12c   : > { %v1259_v39 = vpop.f32.mrb[6].mxu0  ;;  %v1311_v40 = vpop.f32.mrb[6].mxu1 }
 0x12d   : > { %v11773_v41 = vpop.f32.mrb[7].mxu0  ;;  %v11781_v42 = vpop.f32.mrb[7].mxu1  ;;  %v1816_v22 = vpack.c.bf16 %v1340_v20, %v1340_v20  ;;  %v1817_v23 = vpack.c.bf16 %v1341_v21, %v1341_v21 }
 0x132   : > { %v1388_v45 = vpop.f32.mrb[8].mxu0  ;;  %v1440_v46 = vpop.f32.mrb[8].mxu1 }
 0x133   : > { %v1574_v47 = vadd.f32 %v10712_v43, %v1388_v45  ;;  %v1575_v48 = vadd.f32 %v10713_v44, %v1440_v46  ;;  %v11788_v49 = vpop.f32.mrb[9].mxu0  ;;  %v11796_v50 = vpop.f32.mrb[9].mxu1 }
 0x134   : > { %v1391_v51 = vpop.f32.mrb[10].mxu0  ;;  %v1443_v52 = vpop.f32.mrb[10].mxu1 }
 0x135   : > { %v1818_v53 = vpack.c.bf16 %v1574_v47, %v1574_v47  ;;  %v1819_v54 = vpack.c.bf16 %v1575_v48, %v1575_v48  ;;  %v11789_v55 = vpop.f32.mrb[11].mxu0  ;;  %v11797_v56 = vpop.f32.mrb[11].mxu1 }
 0x137   : > { %v1827_v59 = vsel %vm1822_vm2, %v1818_v53, 0  ;;  %v1873_v60 = vsel %vm1822_vm2, %v1819_v54, 0 }
 0x138   : > { %11847 = vmatpush3.bf16.xpose.msra.mxu0 %v1827_v59  ;;  %11853 = vmatpush3.bf16.xpose.msra.mxu1 %v1873_v60 }
 0x139   : > { %11858 = vmatprep.subr.bf16.mxu0 %v13222_v1  ;;  %11864 = vmatprep.subr.bf16.mxu1 %v13222_v1 }
 0x13a   : > { %v1492_v2 = vpop.f32.mrb[12].mxu0  ;;  %v1544_v3 = vpop.f32.mrb[12].mxu1 }
 0x13b   : > { %v1576_v4 = vadd.f32 %v10714_v61, %v1492_v2  ;;  %v1577_v5 = vadd.f32 %v10715_v62, %v1544_v3  ;;  %v11804_v6 = vpop.f32.mrb[13].mxu0  ;;  %v11812_v7 = vpop.f32.mrb[13].mxu1 }
 0x13c   : > { %v1495_v8 = vpop.f32.mrb[14].mxu0  ;;  %v1547_v9 = vpop.f32.mrb[14].mxu1 }
 0x13d   : > { %v1820_v12 = vpack.c.bf16 %v1576_v4, %v1576_v4  ;;  %v1821_v13 = vpack.c.bf16 %v1577_v5, %v1577_v5  ;;  %v11805_v14 = vpop.f32.mrb[15].mxu0  ;;  %v11813_v15 = vpop.f32.mrb[15].mxu1 }
 0x13f   : > { %11849 = vmatmul.mubr.msk.bf16.vlgmr.msra.gmra.mrb[24].mxu0 %vm1822_vm2, %v1814_v10  ;;  %11855 = vmatmul.mubr.msk.bf16.vlgmr.msra.gmra.mrb[24].mxu1 %vm1822_vm2, %v1815_v11  ;;  %v1919_v18 = vsel %vm1822_vm2, %v1820_v12, 0  ;;  %v1965_v19 = vsel %vm1822_vm2, %v1821_v13, 0 }
 0x140   : > { %11859 = vmatpush3.bf16.xpose.msra.mxu0 %v1919_v18  ;;  %11865 = vmatpush3.bf16.xpose.msra.mxu1 %v1965_v19 }
 0x141   : > { %11860 = vmatprep.mubr.msk.bf16.mxu0 %vm13223_vm0, %v13222_v1  ;;  %11866 = vmatprep.mubr.msk.bf16.mxu1 %vm13223_vm0, %v13222_v1 }
 0x142   : > { %11870 = vmatprep.subr.bf16.mxu0 %v13222_v1  ;;  %11876 = vmatprep.subr.bf16.mxu1 %v13222_v1  ;;  %v1624_v25 = vpop.f32.mrb[16].mxu0 }
 0x143   : > { %v1810_v27 = vadd.f32 %v10728_v24, %v1624_v25  ;;  %v11820_v28 = vpop.f32.mrb[17].mxu0 }
 0x144   : > { %v1627_v29 = vpop.f32.mrb[18].mxu0  ;;  %v1676_v30 = vpop.f32.mrb[16].mxu1 }
 0x145   : > { %v2059_v31 = vpack.c.bf16 %v1810_v27, %v1810_v27  ;;  %v11821_v32 = vpop.f32.mrb[19].mxu0  ;;  %v1811_v33 = vadd.f32 %v10729_v26, %v1676_v30  ;;  %v11828_v34 = vpop.f32.mrb[17].mxu1 }
 0x146   : > { %v1679_v35 = vpop.f32.mrb[18].mxu1  ;;  %v10731_v34 = vld [vmem:[%s13248_s17 + $0xb] ss:$0 sm:$0xff] }
 0x147   : > { %11861 = vmatmul.mubr.msk.bf16.vlgmr.msra.gmra.mrb[28].mxu0 %vm1822_vm2, %v1816_v22  ;;  %11867 = vmatmul.mubr.msk.bf16.vlgmr.msra.gmra.mrb[28].mxu1 %vm1822_vm2, %v1817_v23  ;;  %v2060_v36 = vpack.c.bf16 %v1811_v33, %v1811_v33  ;;  %v11829_v37 = vpop.f32.mrb[19].mxu1  ;;  %v2068_v38 = vsel %vm2066_vm3, %v2059_v31, 0  ;;  %v10730_v31 = vld [vmem:[%s13248_s17 + $0xa] ss:$0 sm:$0xff] }
 0x148   : > { %11872 = vmatprep.mubr.msk.bf16.mxu0 %vm13223_vm0, %v13222_v1  ;;  %11878 = vmatprep.mubr.msk.bf16.mxu1 %vm13223_vm0, %v13222_v1 }
 0x149   : > { %11871 = vmatpush3.bf16.msra.mxu0 %v2068_v38  ;;  %v2114_v39 = vsel %vm2066_vm3, %v2060_v36, 0 }
 0x14a   : > { %11882 = vmatprep.subr.bf16.mxu0 %v13222_v1  ;;  %11877 = vmatpush3.bf16.msra.mxu1 %v2114_v39  ;;  %v13553_v40 = vpop.f32.mrb[20].mxu0 }
 0x14b   : > { %11888 = vmatprep.subr.bf16.mxu1 %v13222_v1  ;;  %v11836_v42 = vpop.f32.mrb[21].mxu0  ;;  %v1812_v32 = vadd.f32 %v10730_v31, %v13553_v40 }
 0x14c   : > { %v13555_v41 = vpop.f32.mrb[20].mxu1  ;;  %v1731_v44 = vpop.f32.mrb[22].mxu0 }
 0x14d   : > { %v11844_v43 = vpop.f32.mrb[21].mxu1  ;;  %v11837_v46 = vpop.f32.mrb[23].mxu0  ;;  %v2061_v36 = vpack.c.bf16 %v1812_v32, %v1812_v32  ;;  %v1813_v37 = vadd.f32 %v10731_v34, %v13555_v41  ;;  %v1096_v41 = vld [vmem:[%s13253_s21] sm:$0xf] }
 0x14e   : > { %v1783_v45 = vpop.f32.mrb[22].mxu1 }
 0x14f   : > { %v11845_v47 = vpop.f32.mrb[23].mxu1  ;;  %v2062_v44 = vpack.c.bf16 %v1813_v37, %v1813_v37  ;;  %v2160_v46 = vsel %vm2066_vm3, %v2061_v36, 0 }
 0x212   : > { %v1863_v48 = vpop.f32.mrb[24].mxu0  ;;  %v1909_v49 = vpop.f32.mrb[24].mxu1 }
 0x213   : > { %v11850_v50 = vpop.f32.mrb[25].mxu0  ;;  %v11856_v51 = vpop.f32.mrb[25].mxu1  ;;  %v2007_v52 = vmul.f32 0.35355338, %v1863_v48  ;;  %v2008_v58 = vmul.f32 0.35355338, %v1909_v49 }
 0x214   : > { %v1866_v53 = vpop.f32.mrb[26].mxu0  ;;  %v1912_v54 = vpop.f32.mrb[26].mxu1  ;;  %v2206_v49 = vsel %vm2066_vm3, %v2062_v44, 0  ;;  %v2256_v51 = vsel %vm2066_vm3, %v1096_v41, 0 }
 0x215   : > { %v11851_v55 = vpop.f32.mrb[27].mxu0  ;;  %v11857_v56 = vpop.f32.mrb[27].mxu1  ;;  %v2011_v57 = vsel %vm1822_vm2, %v2007_v52, -inf  ;;  %v2014_v59 = vsel %vm1822_vm2, %v2008_v58, -inf }
 0x216   : > { %2012 = vmax.xlane.f32.xlu0 %v2011_v57  ;;  %v1097_v55 = vld [vmem:[%s13253_s21 + $0x4] sm:$0xf]  ;;  %v1098_v57 = vld [vmem:[%s13253_s21 + $0x8] sm:$0xf] }
 0x217   : > { %v2302_v56 = vsel %vm2066_vm3, %v1097_v55, 0 }
 0x21a   : > { %v2001_v60 = vpop.f32.mrb[28].mxu1  ;;  %2015 = vmax.xlane.f32.xlu0 %v2014_v59  ;;  %v1955_v61 = vpop.f32.mrb[28].mxu0 }
 0x21b   : > { %v11862_v62 = vpop.f32.mrb[29].mxu0  ;;  %v11868_v63 = vpop.f32.mrb[29].mxu1  ;;  %v2009_v0 = vmul.f32 0.35355338, %v1955_v61  ;;  %v2010_v7 = vmul.f32 0.35355338, %v2001_v60 }
 0x21c   : > { %v1958_v2 = vpop.f32.mrb[30].mxu0  ;;  %v2004_v3 = vpop.f32.mrb[30].mxu1  ;;  %v2348_v61 = vsel %vm2066_vm3, %v1098_v57, 0  ;;  %v1099_v63 = vld [vmem:[%s13253_s21 + $0xc] sm:$0xf] }
 0x21d   : > { %v11863_v4 = vpop.f32.mrb[31].mxu0  ;;  %v11869_v5 = vpop.f32.mrb[31].mxu1  ;;  %v2017_v6 = vsel %vm1822_vm2, %v2009_v0, -inf  ;;  %v2020_v8 = vsel %vm1822_vm2, %v2010_v7, -inf }
 0x21e   : > { %2018 = vmax.xlane.f32.xlu1 %v2017_v6  ;;  %v2394_v5 = vsel %vm2066_vm3, %v1099_v63, 0 }
 0x222   : > { %2021 = vmax.xlane.f32.xlu1 %v2020_v8 }
 0x2a3   : > { %v2013_v9 = vpop.xlane.xlu0 %2012 }
 0x2a4   : > { %v2023_v10 = vsub.f32 %v2007_v52, %v2013_v9 }
 0x2a6   : > { %v2027_v11 = vmul.f32 1.442695, %v2023_v10 }
 0x2a7   : > { %v2016_v12 = vpop.xlane.xlu0 %2015 }
 0x2a8   : > { %13060 = vpow2.f32 %v2027_v11  ;;  %v2024_v13 = vsub.f32 %v2008_v58, %v2016_v12 }
 0x2aa   : > { %v2029_v14 = vmul.f32 1.442695, %v2024_v13 }
 0x2ab   : > { %v2019_v15 = vpop.xlane.xlu1 %2018 }
 0x2ac   : > { %13062 = vpow2.f32 %v2029_v14  ;;  %v2025_v16 = vsub.f32 %v2009_v0, %v2019_v15 }
 0x2ae   : > { %v2031_v17 = vmul.f32 1.442695, %v2025_v16 }
 0x2af   : > { %v2022_v18 = vpop.xlane.xlu1 %2021 }
 0x2b0   : > { %13064 = vpow2.f32 %v2031_v17  ;;  %v2026_v19 = vsub.f32 %v2010_v7, %v2022_v18 }
 0x2b2   : > { %v13061_v20 = vpop.eup %13060  ;;  %v2033_v21 = vmul.f32 1.442695, %v2026_v19 }
 0x2b3   : > { %v2035_v22 = vsel %vm1822_vm2, %v13061_v20, 0.0 }
 0x2b4   : > { %13066 = vpow2.f32 %v2033_v21  ;;  %2036 = vadd.xlane.f32.xlu0 %v2035_v22 }
 0x2b6   : > { %v13063_v23 = vpop.eup %13062 }
 0x2b7   : > { %v2038_v24 = vsel %vm1822_vm2, %v13063_v23, 0.0 }
 0x2b8   : > { %2039 = vadd.xlane.f32.xlu1 %v2038_v24 }
 0x2ba   : > { %v13065_v25 = vpop.eup %13064 }
 0x2bb   : > { %v2041_v26 = vsel %vm1822_vm2, %v13065_v25, 0.0 }
 0x2bc   : > { %2042 = vadd.xlane.f32.xlu0 %v2041_v26 }
 0x2be   : > { %v13067_v27 = vpop.eup %13066 }
 0x2bf   : > { %v2044_v28 = vsel %vm1822_vm2, %v13067_v27, 0.0 }
 0x2c0   : > { %2045 = vadd.xlane.f32.xlu1 %v2044_v28 }
 0x341   : > { %v2037_v29 = vpop.xlane.xlu0 %2036 }
 0x342   : > { %13068 = vrcp.f32 %v2037_v29 }
 0x345   : > { %v2040_v30 = vpop.xlane.xlu1 %2039 }
 0x346   : > { %13070 = vrcp.f32 %v2040_v30 }
 0x349   : > { %v2043_v33 = vpop.xlane.xlu0 %2042 }
 0x34a   : > { %13072 = vrcp.f32 %v2043_v33 }
 0x34c   : > { %v13069_v35 = vpop.eup %13068 }
 0x34d   : > { %v2051_v38 = vmul.f32 %v13069_v35, %v13061_v20  ;;  %v2046_v39 = vpop.xlane.xlu1 %2045 }
 0x34e   : > { %13074 = vrcp.f32 %v2046_v39 }
 0x34f   : > { %v2055_v42 = vpack.c.bf16 %v2051_v38, %v2051_v38  ;;  %v10744_v38 = vld [vmem:[%s13258_s25] ss:$0 sm:$0xff] }
 0x350   : > { %v13071_v43 = vpop.eup %13070 }
 0x351   : > { %v2052_v45 = vmul.f32 %v13071_v43, %v13063_v23  ;;  %11873 = vmatmul.mubr.msk.bf16.vlgmr.msra.gmra.mrb[32].mxu0 %vm1822_vm2, %v2055_v42 }
 0x352   : > { %11883 = vmatpush3.bf16.msra.mxu0 %v2160_v46  ;;  %11884 = vmatprep.mubr.msk.bf16.mxu0 %vm13223_vm0, %v13222_v1 }
 0x353   : > { %v2056_v40 = vpack.c.bf16 %v2052_v45, %v2052_v45  ;;  %11894 = vmatprep.subr.bf16.mxu0 %v13222_v1  ;;  %v13180_v45 = vld [vmem:[%s13425_s11] sm:$0xff]  ;;  %s14814_s11 = sld [smem:[#allocation16_spill]] }
 0x354   : > { %v13073_v47 = vpop.eup %13072 }
 0x355   : > { %v2053_v48 = vmul.f32 %v13073_v47, %v13065_v25  ;;  %11879 = vmatmul.mubr.msk.bf16.vlgmr.msra.gmra.mrb[32].mxu1 %vm1822_vm2, %v2056_v40 }
 0x356   : > { %11889 = vmatpush3.bf16.msra.mxu1 %v2206_v49  ;;  %11890 = vmatprep.mubr.msk.bf16.mxu1 %vm13223_vm0, %v13222_v1 }
 0x357   : > { %v2057_v50 = vpack.c.bf16 %v2053_v48, %v2053_v48  ;;  %11900 = vmatprep.subr.bf16.mxu1 %v13222_v1 }
 0x358   : > { %v13075_v52 = vpop.eup %13074 }
 0x359   : > { %v2054_v53 = vmul.f32 %v13075_v52, %v13067_v27  ;;  %11885 = vmatmul.mubr.msk.bf16.vlgmr.msra.gmra.mrb[36].mxu0 %vm1822_vm2, %v2057_v50  ;;  %v12915_v52 = vld [vmem:[%s14802_s3 + $0x8] sm:$0xff]  }
 0x35a   : > { %11895 = vmatpush3.bf16.msra.mxu0 %v2256_v51  ;;  %11896 = vmatprep.mubr.msk.bf16.mxu0 %vm13223_vm0, %v13222_v1  ;;  %v12914_v51 = vld [vmem:[%s14802_s3] sm:$0xff]  }
 0x35b   : > { %v2058_v54 = vpack.c.bf16 %v2054_v53, %v2054_v53  ;;  %11906 = vmatprep.subr.bf16.mxu0 %v13222_v1  ;;  %v12916_v53 = vld [vmem:[%s13278_s14] sm:$0xff]  }
 0x35d   : > { %11891 = vmatmul.mubr.msk.bf16.vlgmr.msra.gmra.mrb[36].mxu1 %vm1822_vm2, %v2058_v54  ;;  %v12917_v54 = vld [vmem:[%s13278_s14 + $0x8] sm:$0xff]  }
 0x35e   : > { %11902 = vmatprep.mubr.msk.bf16.mxu1 %vm13223_vm0, %v13222_v1  ;;  %11901 = vmatpush3.bf16.msra.mxu1 %v2302_v56 }
 0x35f   : > { %11912 = vmatprep.subr.bf16.mxu1 %v13222_v1 }
 0x424   : > { %v2104_v58 = vpop.f32.mrb[32].mxu0 }
 0x425   : > { %v2248_v59 = vpack.c.bf16 %v2104_v58, %v2104_v58  ;;  %v11874_v60 = vpop.f32.mrb[33].mxu0 }
 0x426   : > { %v2107_v62 = vpop.f32.mrb[34].mxu0 }
 0x427   : > { %v11875_v0 = vpop.f32.mrb[35].mxu0  ;;  %11897 = vmatmul.mubr.msk.bf16.vlgmr.msra.gmra.mrb[40].mxu0 %vm1822_vm2, %v2248_v59  ;;  %v10745_v59 = vld [vmem:[%s13263_s29] ss:$0 sm:$0xff] }
 0x428   : > { %v2150_v2 = vpop.f32.mrb[32].mxu1  ;;  %11907 = vmatpush3.bf16.msra.mxu0 %v2348_v61  ;;  %11908 = vmatprep.mubr.msk.bf16.mxu0 %vm13223_vm0, %v13222_v1  ;;  %v10746_v61 = vld [vmem:[%s13263_s29 + $0x1] ss:$0 sm:$0xff] }
 0x429   : > { %v2249_v3 = vpack.c.bf16 %v2150_v2, %v2150_v2  ;;  %v11880_v4 = vpop.f32.mrb[33].mxu1  ;;  %11918 = vmatprep.subr.bf16.mxu0 %v13222_v1  ;;  %v12918_v2 = vld [vmem:[%s13278_s14 + $0x10] sm:$0xff]  }
 0x42a   : > { %v2153_v6 = vpop.f32.mrb[34].mxu1  ;;  %v10747_v4 = vld [vmem:[%s14801_s8] ss:$0 sm:$0xff] }
 0x42b   : > { %v11881_v7 = vpop.f32.mrb[35].mxu1  ;;  %11903 = vmatmul.mubr.msk.bf16.vlgmr.msra.gmra.mrb[40].mxu1 %vm1822_vm2, %v2249_v3  ;;  %v12919_v3 = vld [vmem:[%s13278_s14 + $0x18] sm:$0xff]  }
 0x42c   : > { %v2196_v8 = vpop.f32.mrb[36].mxu0  ;;  %11913 = vmatpush3.bf16.msra.mxu1 %v2394_v5  ;;  %11914 = vmatprep.mubr.msk.bf16.mxu1 %vm13223_vm0, %v13222_v1 }
 0x42d   : > { %v2250_v9 = vpack.c.bf16 %v2196_v8, %v2196_v8  ;;  %v11886_v10 = vpop.f32.mrb[37].mxu0  ;;  %11926 = vmatprep.subr.bf16.mxu1 %v13222_v1 }
 0x42e   : > { %v2199_v11 = vpop.f32.mrb[38].mxu0 }
 0x42f   : > { %v11887_v12 = vpop.f32.mrb[39].mxu0  ;;  %11909 = vmatmul.mubr.msk.bf16.vlgmr.msra.gmra.mrb[44].mxu0 %vm1822_vm2, %v2250_v9 }
 0x430   : > { %v2242_v13 = vpop.f32.mrb[36].mxu1  ;;  %11922 = vmatprep.mubr.msk.bf16.mxu0 %vm13223_vm0, %v13222_v1  ;;  %11919 = vmatpush3.bf16.msra.mxu0 %v12914_v51  ;;  %v10751_v12 = vld [vmem:[%s13283_s19] ss:$0 sm:$0xff]  ;;  %v12936_v51 = vld [vmem:[%s14800_s13 + $0x130] sm:$0xff]  }
 0x431   : > { %v2251_v14 = vpack.c.bf16 %v2242_v13, %v2242_v13  ;;  %v11892_v15 = vpop.f32.mrb[37].mxu1  ;;  %11920 = vmatprep.subr.bf16.mxu0 %v13222_v1 }
 0x432   : > { %v2245_v16 = vpop.f32.mrb[38].mxu1 }
 0x433   : > { %v11893_v17 = vpop.f32.mrb[39].mxu1  ;;  %11915 = vmatmul.mubr.msk.bf16.vlgmr.msra.gmra.mrb[44].mxu1 %vm1822_vm2, %v2251_v14 }
 0x434   : > { %11934 = vmatprep.mubr.msk.bf16.mxu1 %vm13223_vm0, %v13222_v1  ;;  %11921 = vmatpush3.bf16.msra.mxu0 %v12915_v52  ;;  %v12937_v52 = vld [vmem:[%s14800_s13 + $0x160] sm:$0xff]  }
 0x435   : > { %11938 = vmatprep.subr.bf16.mxu0 %v13222_v1  ;;  %11927 = vmatpush3.bf16.msra.mxu1 %v12916_v53  ;;  %v12938_v53 = vld [vmem:[%s14800_s13 + $0x138] sm:$0xff]  }
 0x436   : > { %11928 = vmatprep.subr.bf16.mxu1 %v13222_v1 }
 0x439   : > { %11929 = vmatpush3.bf16.msra.mxu1 %v12917_v54  ;;  %v12939_v54 = vld [vmem:[%s14800_s13 + $0x168] sm:$0xff]  }
 0x43a   : > { %11930 = vmatprep.subr.bf16.mxu1 %v13222_v1 }
 0x43d   : > { %11931 = vmatpush3.bf16.msra.mxu1 %v12918_v2 }
 0x43e   : > { %11932 = vmatprep.subr.bf16.mxu1 %v13222_v1 }
 0x441   : > { %11933 = vmatpush3.bf16.msra.mxu1 %v12919_v3 }
 0x442   : > { %11954 = vmatprep.subr.bf16.mxu1 %v13222_v1 }
 0x4fa   : > { %v2292_v18 = vpop.f32.mrb[40].mxu0 }
 0x4fb   : > { %v11898_v19 = vpop.f32.mrb[41].mxu0  ;;  %v2436_v23 = vsel %vm1114_vm1, %v2292_v18, 0.0 }
 0x4fc   : > { %v2295_v20 = vpop.f32.mrb[42].mxu0 }
 0x4fd   : > { %v11899_v21 = vpop.f32.mrb[43].mxu0 }
 0x4fe   : > { %v2338_v22 = vpop.f32.mrb[40].mxu1 }
 0x4ff   : > { %v2437_v24 = vsel %vm1114_vm1, %v2338_v22, 0.0  ;;  %v11904_v25 = vpop.f32.mrb[41].mxu1 }
 0x500   : > { %v2438_v26 = vadd.f32 %v2437_v24, %v2436_v23  ;;  %v2341_v27 = vpop.f32.mrb[42].mxu1  ;;  %v12920_v25 = vld [vmem:[%s14800_s13 + $0xc0] sm:$0xff]  }
 0x501   : > { %v11905_v28 = vpop.f32.mrb[43].mxu1  ;;  %v12922_v27 = vld [vmem:[%s14800_s13 + $0xc8] sm:$0xff]  }
 0x502   : > { %v2384_v29 = vpop.f32.mrb[44].mxu0  ;;  %v12923_v28 = vld [vmem:[%s14800_s13 + $0xe8] sm:$0xff]  }
 0x503   : > { %v2439_v30 = vsel %vm1114_vm1, %v2384_v29, 0.0  ;;  %v11910_v31 = vpop.f32.mrb[45].mxu0 }
 0x504   : > { %v2440_v32 = vadd.f32 %v2439_v30, %v2438_v26  ;;  %v2387_v33 = vpop.f32.mrb[46].mxu0  ;;  %v12921_v26 = vld [vmem:[%s14800_s13 + $0xe0] sm:$0xff]  }
 0x505   : > { %v11911_v34 = vpop.f32.mrb[47].mxu0  ;;  %v10757_v33 = vld [vmem:[%s13288_s24] ss:$0 sm:$0xff] }
 0x506   : > { %v2430_v35 = vpop.f32.mrb[44].mxu1 }
 0x507   : > { %v2441_v36 = vsel %vm1114_vm1, %v2430_v35, 0.0  ;;  %v11916_v37 = vpop.f32.mrb[45].mxu1  ;;  %v10758_v35 = vld [vmem:[%s13288_s24 + $0x1] ss:$0 sm:$0xff] }
 0x508   : > { %v2442_v39 = vadd.f32 %v2441_v36, %v2440_v32  ;;  %v2433_v42 = vpop.f32.mrb[46].mxu1 }
 0x509   : > { %v11917_v43 = vpop.f32.mrb[47].mxu1 }
 0x50a   : > { %v2449_v44 = vadd.f32 %v10744_v38, %v2442_v39  ;;  %v12924_v38 = vld [vmem:[%s14800_s13 + $0xd0] sm:$0xff]   ;;  %v12925_v39 = vld [vmem:[%s14800_s13 + $0x100] sm:$0xff]   ;;  %v12926_v43 = vld [vmem:[%s14800_s13 + $0xd8] sm:$0xff]  }
 0x50c   : > { %v2452_v46 = vadd.f32 %v13180_v45, %v2449_v44  ;;  %v12927_v44 = vld [vmem:[%s14800_s13 + $0x108] sm:$0xff]   ;;  %v12928_v45 = vld [vmem:[%s14800_s13 + $0xf0] sm:$0xff]  }
 0x50e   : > { %v2453_v40 = vsel %vm1114_vm1, %v2452_v46, 0.0 }
 0x50f   : > { %2454 = vadd.xlane.f32.xlu0 %v2453_v40  ;;  %v12930_v40 = vld [vmem:[%s14800_s13 + $0xf8] sm:$0xff]  }
 0x59c   : > { %v2455_v47 = vpop.xlane.xlu0 %2454 }
 0x59d   : > { %v2457_v41 = vmul.f32 0.03125, %v2455_v47  ;;  %v12931_v47 = vld [vmem:[%s14800_s13 + $0x128] sm:$0xff]  }
 0x59f   : > { %v2458_v48 = vsub.f32 %v2452_v46, %v2457_v41  ;;  %v12929_v46 = vld [vmem:[%s14800_s13 + $0x120] sm:$0xff]   ;;  %v12932_v41 = vld [vmem:[%s14800_s13 + $0x110] sm:$0xff]  }
 0x5a1   : > { %v2459_v49 = vmul.f32 %v2458_v48, %v2458_v48 }
 0x5a3   : > { %v2460_v50 = vsel %vm1114_vm1, %v2459_v49, 0.0  ;;  %v12934_v49 = vld [vmem:[%s14800_s13 + $0x118] sm:$0xff]  }
 0x5a4   : > { %2461 = vadd.xlane.f32.xlu1 %v2460_v50  ;;  %v12935_v50 = vld [vmem:[%s14800_s13 + $0x148] sm:$0xff]  }
 0x631   : > { %v2462_v55 = vpop.xlane.xlu1 %2461 }
 0x632   : > { %v2463_v56 = vmul.f32 0.03125, %v2462_v55  ;;  %v12940_v55 = vld [vmem:[%s14800_s13 + $0x150] sm:$0xff]  }
 0x634   : > { %v2464_v57 = vadd.f32 1e-05, %v2463_v56  ;;  %v12941_v56 = vld [vmem:[%s14800_s13 + $0x158] sm:$0xff]  }
 0x636   : > { %13076 = vrsqrt.f32 %v2464_v57  ;;  %v12942_v57 = vld [vmem:[%s14800_s13 + $0x170] sm:$0xff]  }
 0x640   : > { %v13077_v58 = vpop.eup %13076 }
 0x641   : > { %v2466_v60 = vmul.f32 %v13077_v58, %v2458_v48  ;;  %v12933_v48 = vld [vmem:[%s14800_s13 + $0x140] sm:$0xff]   ;;  %v12943_v58 = vld [vmem:[%s14800_s13 + $0x178] sm:$0xff]   ;;  %s14820_s13 = sld [smem:[#allocation22_spill]] }
 0x643   : > { %v2473_v62 = vmul.f32 %v10745_v59, %v2466_v60 }
 0x645   : > { %v2480_v63 = vadd.f32 %v10746_v61, %v2473_v62 }
 0x647   : > { %v2486_v0 = vpack.c.bf16 %v2480_v63, %v2480_v63 }
 0x649   : > { %11923 = vmatmul.mubr.msk.bf16.vlgmr.msra.gmra.mrb[48].mxu0 %vm1114_vm1, %v2486_v0 }
 0x64a   : > { %11942 = vmatprep.mubr.msk.bf16.mxu0 %vm13223_vm0, %v13222_v1  ;;  %11939 = vmatpush3.bf16.msra.mxu0 %v12920_v25 }
 0x64b   : > { %11940 = vmatprep.subr.bf16.mxu0 %v13222_v1 }
 0x64e   : > { %11941 = vmatpush3.bf16.msra.mxu0 %v12922_v27 }
 0x64f   : > { %11946 = vmatprep.subr.bf16.mxu0 %v13222_v1 }
 0x71c   : > { %v2542_v5 = vpop.f32.mrb[48].mxu0 }
 0x71d   : > { %v2543_v6 = vadd.f32 %v10747_v4, %v2542_v5  ;;  %v11924_v7 = vpop.f32.mrb[49].mxu0  ;;  %v10852_v4 = vld [vmem:[%s13248_s17 + $0x10] ss:$0 sm:$0xff] }
 0x71e   : > { %v2545_v8 = vpop.f32.mrb[50].mxu0 }
 0x71f   : > { %v2548_v9 = vmax.f32 %v2543_v6, 0.0  ;;  %v11925_v10 = vpop.f32.mrb[51].mxu0 }
 0x721   : > { %v2558_v11 = vpack.c.bf16 %v2548_v9, %v2548_v9 }
 0x723   : > { %11935 = vmatmul.mubr.msk.bf16.vlgmr.msra.gmra.mrb[48].mxu1 %vm2589_vm4, %v2558_v11 }
 0x724   : > { %11958 = vmatprep.mubr.msk.bf16.mxu1 %vm13223_vm0, %v13222_v1  ;;  %11955 = vmatpush3.bf16.msra.mxu1 %v12921_v26 }
 0x725   : > { %11956 = vmatprep.subr.bf16.mxu1 %v13222_v1 }
 0x728   : > { %11957 = vmatpush3.bf16.msra.mxu1 %v12923_v28 }
 0x729   : > { %11970 = vmatprep.subr.bf16.mxu1 %v13222_v1 }
 0x7f6   : > { %v2627_v13 = vpop.f32.mrb[48].mxu1 }
 0x7f7   : > { %v2628_v14 = vadd.f32 %v10751_v12, %v2627_v13  ;;  %v11936_v15 = vpop.f32.mrb[49].mxu1 }
 0x7f8   : > { %v2630_v16 = vpop.f32.mrb[50].mxu1  ;;  %v10836_v15 = vld [vmem:[%s13248_s17 + $0xc] ss:$0 sm:$0xff] }
 0x7f9   : > { %v11937_v17 = vpop.f32.mrb[51].mxu1  ;;  %v2635_v18 = vadd.f32 %v2628_v14, %v2480_v63 }
 0x7fa   : > { %v10854_v17 = vld [vmem:[%s13248_s17 + $0x12] ss:$0 sm:$0xff] }
 0x7fb   : > { %v2636_v19 = vsel %vm1114_vm1, %v2635_v18, 0.0 }
 0x7fc   : > { %2637 = vadd.xlane.f32.xlu0 %v2636_v19 }
 0x889   : > { %v2638_v20 = vpop.xlane.xlu0 %2637 }
 0x88a   : > { %v2639_v21 = vmul.f32 0.03125, %v2638_v20 }
 0x88c   : > { %v2640_v22 = vsub.f32 %v2635_v18, %v2639_v21 }
 0x88e   : > { %v2641_v23 = vmul.f32 %v2640_v22, %v2640_v22 }
 0x890   : > { %v2642_v24 = vsel %vm1114_vm1, %v2641_v23, 0.0 }
 0x891   : > { %2643 = vadd.xlane.f32.xlu1 %v2642_v24 }
 0x91e   : > { %v2644_v29 = vpop.xlane.xlu1 %2643 }
 0x91f   : > { %v2645_v30 = vmul.f32 0.03125, %v2644_v29 }
 0x921   : > { %v2646_v31 = vadd.f32 1e-05, %v2645_v30  ;;  %v10838_v30 = vld [vmem:[%s13248_s17 + $0xe] ss:$0 sm:$0xff] }
 0x923   : > { %13078 = vrsqrt.f32 %v2646_v31 }
 0x92d   : > { %v13079_v32 = vpop.eup %13078 }
 0x92e   : > { %v2648_v34 = vmul.f32 %v13079_v32, %v2640_v22  ;;  %v10853_v32 = vld [vmem:[%s13248_s17 + $0x11] ss:$0 sm:$0xff] }
 0x930   : > { %v2655_v36 = vmul.f32 %v10757_v33, %v2648_v34  ;;  %v10868_v33 = vld [vmem:[%s13248_s17 + $0x14] ss:$0 sm:$0xff] }
 0x932   : > { %v13651_v37 = vadd.f32 %v10758_v35, %v2655_v36 }
 0x934   : > { %v13657_v42 = vpack.c.bf16 %v13651_v37, %v13651_v37 }
 0x936   : > { %11943 = vmatmul.mubr.msk.bf16.vlgmr.msra.gmra.mrb[52].mxu0 %vm1114_vm1, %v13657_v42  ;;  %11959 = vmatmul.mubr.msk.bf16.vlgmr.msra.gmra.mrb[52].mxu1 %vm1114_vm1, %v13657_v42 }
 0x937   : > { %11947 = vmatpush3.bf16.msra.mxu0 %v12924_v38  ;;  %11971 = vmatpush3.bf16.msra.mxu1 %v12925_v39 }
 0x938   : > { %11948 = vmatprep.subr.bf16.mxu0 %v13222_v1  ;;  %11972 = vmatprep.subr.bf16.mxu1 %v13222_v1 }
 0x939   : > { %11950 = vmatprep.mubr.msk.bf16.mxu0 %vm13223_vm0, %v13222_v1  ;;  %11974 = vmatprep.mubr.msk.bf16.mxu1 %vm13223_vm0, %v13222_v1 }
 0x93b   : > { %11949 = vmatpush3.bf16.msra.mxu0 %v12926_v43  ;;  %11973 = vmatpush3.bf16.msra.mxu1 %v12927_v44 }
 0x93c   : > { %11962 = vmatprep.subr.bf16.mxu0 %v13222_v1  ;;  %11986 = vmatprep.subr.bf16.mxu1 %v13222_v1 }
 0x93e   : > { %11951 = vmatmul.mubr.msk.bf16.vlgmr.msra.gmra.mrb[56].mxu0 %vm1114_vm1, %v13657_v42  ;;  %11975 = vmatmul.mubr.msk.bf16.vlgmr.msra.gmra.mrb[56].mxu1 %vm1114_vm1, %v13657_v42 }
 0x93f   : > { %11963 = vmatpush3.bf16.msra.mxu0 %v12928_v45  ;;  %11987 = vmatpush3.bf16.msra.mxu1 %v12929_v46 }
 0x940   : > { %11964 = vmatprep.subr.bf16.mxu0 %v13222_v1  ;;  %11988 = vmatprep.subr.bf16.mxu1 %v13222_v1 }
 0x941   : > { %11966 = vmatprep.mubr.msk.bf16.mxu0 %vm13223_vm0, %v13222_v1  ;;  %11990 = vmatprep.mubr.msk.bf16.mxu1 %vm13223_vm0, %v13222_v1 }
 0x943   : > { %11965 = vmatpush3.bf16.msra.mxu0 %v12930_v40  ;;  %11989 = vmatpush3.bf16.msra.mxu1 %v12931_v47 }
 0x944   : > { %11978 = vmatprep.subr.bf16.mxu0 %v13222_v1  ;;  %12002 = vmatprep.subr.bf16.mxu1 %v13222_v1 }
 0x946   : > { %11967 = vmatmul.mubr.msk.bf16.vlgmr.msra.gmra.mrb[60].mxu0 %vm1114_vm1, %v13657_v42  ;;  %11991 = vmatmul.mubr.msk.bf16.vlgmr.msra.gmra.mrb[60].mxu1 %vm1114_vm1, %v13657_v42 }
 0x947   : > { %11979 = vmatpush3.bf16.msra.mxu0 %v12932_v41  ;;  %12003 = vmatpush3.bf16.msra.mxu1 %v12933_v48 }
 0x948   : > { %11980 = vmatprep.subr.bf16.mxu0 %v13222_v1  ;;  %12004 = vmatprep.subr.bf16.mxu1 %v13222_v1 }
 0x949   : > { %11982 = vmatprep.mubr.msk.bf16.mxu0 %vm13223_vm0, %v13222_v1  ;;  %12006 = vmatprep.mubr.msk.bf16.mxu1 %vm13223_vm0, %v13222_v1 }
 0x94b   : > { %11981 = vmatpush3.bf16.msra.mxu0 %v12934_v49  ;;  %12005 = vmatpush3.bf16.msra.mxu1 %v12935_v50  ;;  %v10837_v49 = vld [vmem:[%s13248_s17 + $0xd] ss:$0 sm:$0xff] }
 0x94c   : > { %11994 = vmatprep.subr.bf16.mxu0 %v13222_v1  ;;  %12018 = vmatprep.subr.bf16.mxu1 %v13222_v1 }
 0x94e   : > { %11983 = vmatmul.mubr.msk.bf16.vlgmr.msra.gmra.mrb[64].mxu0 %vm1114_vm1, %v13657_v42  ;;  %12007 = vmatmul.mubr.msk.bf16.vlgmr.msra.gmra.mrb[64].mxu1 %vm1114_vm1, %v13657_v42 }
 0x94f   : > { %11995 = vmatpush3.bf16.msra.mxu0 %v12936_v51  ;;  %12019 = vmatpush3.bf16.msra.mxu1 %v12937_v52  ;;  %v10855_v52 = vld [vmem:[%s13248_s17 + $0x13] ss:$0 sm:$0xff] }
 0x950   : > { %11996 = vmatprep.subr.bf16.mxu0 %v13222_v1  ;;  %12020 = vmatprep.subr.bf16.mxu1 %v13222_v1 }
 0x951   : > { %11998 = vmatprep.mubr.msk.bf16.mxu0 %vm13223_vm0, %v13222_v1  ;;  %12022 = vmatprep.mubr.msk.bf16.mxu1 %vm13223_vm0, %v13222_v1 }
 0x953   : > { %11997 = vmatpush3.bf16.msra.mxu0 %v12938_v53  ;;  %12021 = vmatpush3.bf16.msra.mxu1 %v12939_v54 }
 0x954   : > { %12010 = vmatprep.subr.bf16.mxu0 %v13222_v1  ;;  %12034 = vmatprep.subr.bf16.mxu1 %v13222_v1 }
 0x956   : > { %11999 = vmatmul.mubr.msk.bf16.vlgmr.msra.gmra.mrb[68].mxu0 %vm1114_vm1, %v13657_v42  ;;  %12023 = vmatmul.mubr.msk.bf16.vlgmr.msra.gmra.mrb[68].mxu1 %vm1114_vm1, %v13657_v42 }
 0x957   : > { %12011 = vmatpush3.bf16.msra.mxu0 %v12940_v55  ;;  %12014 = vmatprep.mubr.msk.bf16.mxu0 %vm13223_vm0, %v13222_v1 }
 0x958   : > { %12012 = vmatprep.subr.bf16.mxu0 %v13222_v1  ;;  %12036 = vmatprep.mubr.msk.bf16.mxu1 %vm13223_vm0, %v13222_v1 }
 0x95b   : > { %12013 = vmatpush3.bf16.msra.mxu0 %v12941_v56 }
 0x95c   : > { %12026 = vmatprep.subr.bf16.mxu0 %v13222_v1 }
 0x95e   : > { %12015 = vmatmul.mubr.msk.bf16.vlgmr.msra.gmra.mrb[72].mxu0 %vm1114_vm1, %v13657_v42 }
 0x95f   : > { %12027 = vmatpush3.bf16.msra.mxu0 %v12942_v57  ;;  %12030 = vmatprep.mubr.msk.bf16.mxu0 %vm13223_vm0, %v13222_v1 }
 0x960   : > { %12028 = vmatprep.subr.bf16.mxu0 %v13222_v1 }
 0x963   : > { %12029 = vmatpush3.bf16.msra.mxu0 %v12943_v58 }
 0x964   : > { %12040 = vmatprep.subr.bf16.mxu0 %v13222_v1 }
 0x966   : > { %12031 = vmatmul.mubr.msk.bf16.vlgmr.msra.gmra.mrb[76].mxu0 %vm1114_vm1, %v13657_v42 }
 0x967   : > { %12042 = vmatprep.mubr.msk.bf16.mxu0 %vm13223_vm0, %v13222_v1 }
 0xa09   : > { %v2782_v59 = vpop.f32.mrb[52].mxu0  ;;  %v2886_v60 = vpop.f32.mrb[52].mxu1 }
 0xa0a   : > { %v11944_v61 = vpop.f32.mrb[53].mxu0  ;;  %v11960_v62 = vpop.f32.mrb[53].mxu1  ;;  %v2968_v18 = vadd.f32 %v10836_v15, %v2782_v59  ;;  %v2970_v34 = vadd.f32 %v10838_v30, %v2886_v60 }
 0xa0b   : > { %v2785_v63 = vpop.f32.mrb[54].mxu0  ;;  %v2889_v0 = vpop.f32.mrb[54].mxu1 }
 0xa0c   : > { %v11945_v2 = vpop.f32.mrb[55].mxu0  ;;  %v11961_v3 = vpop.f32.mrb[55].mxu1  ;;  %v3444_v26 = vpack.c.bf16 %v2968_v18, %v2968_v18  ;;  %v3446_v46 = vpack.c.bf16 %v2970_v34, %v2970_v34 }
 0xa0d   : > { %v10839_v2 = vld [vmem:[%s13248_s17 + $0xf] ss:$0 sm:$0xff] }
 0xa11   : > { %v2834_v5 = vpop.f32.mrb[56].mxu0  ;;  %v3018_v6 = vpop.f32.mrb[56].mxu1 }
 0xa12   : > { %v3204_v7 = vadd.f32 %v10852_v4, %v3018_v6  ;;  %v11952_v8 = vpop.f32.mrb[57].mxu0  ;;  %v11976_v9 = vpop.f32.mrb[57].mxu1  ;;  %v2969_v53 = vadd.f32 %v10837_v49, %v2834_v5  ;;  %v10869_v4 = vld [vmem:[%s13248_s17 + $0x15] ss:$0 sm:$0xff] }
 0xa13   : > { %v2837_v10 = vpop.f32.mrb[58].mxu0  ;;  %v3021_v11 = vpop.f32.mrb[58].mxu1 }
 0xa14   : > { %v3448_v12 = vpack.c.bf16 %v3204_v7, %v3204_v7  ;;  %v11953_v13 = vpop.f32.mrb[59].mxu0  ;;  %v11977_v14 = vpop.f32.mrb[59].mxu1  ;;  %v3445_v61 = vpack.c.bf16 %v2969_v53, %v2969_v53 }
 0xa16   : > { %v3456_v16 = vsel %vm1822_vm2, %v3448_v12, 0 }
 0xa17   : > { %12035 = vmatpush3.bf16.xpose.msra.mxu1 %v3456_v16 }
 0xa18   : > { %12046 = vmatprep.subr.bf16.mxu1 %v13222_v1 }
 0xa19   : > { %v2938_v19 = vpop.f32.mrb[60].mxu0  ;;  %v3122_v20 = vpop.f32.mrb[60].mxu1 }
 0xa1a   : > { %v3206_v21 = vadd.f32 %v10854_v17, %v3122_v20  ;;  %v11968_v22 = vpop.f32.mrb[61].mxu0  ;;  %v11992_v23 = vpop.f32.mrb[61].mxu1  ;;  %v2971_v5 = vadd.f32 %v10839_v2, %v2938_v19  ;;  %v10870_v2 = vld [vmem:[%s13248_s17 + $0x16] ss:$0 sm:$0xff] }
 0xa1b   : > { %v2941_v24 = vpop.f32.mrb[62].mxu0  ;;  %v3125_v25 = vpop.f32.mrb[62].mxu1 }
 0xa1c   : > { %v3450_v27 = vpack.c.bf16 %v3206_v21, %v3206_v21  ;;  %v11969_v28 = vpop.f32.mrb[63].mxu0  ;;  %v11993_v29 = vpop.f32.mrb[63].mxu1  ;;  %v3447_v10 = vpack.c.bf16 %v2971_v5, %v2971_v5 }
 0xa1e   : > { %v3548_v31 = vsel %vm1822_vm2, %v3450_v27, 0  ;;  %12037 = vmatmul.mubr.msk.bf16.vlgmr.msra.gmra.mrb[72].mxu1 %vm1822_vm2, %v3444_v26 }
 0xa1f   : > { %12047 = vmatpush3.bf16.xpose.msra.mxu1 %v3548_v31  ;;  %12048 = vmatprep.mubr.msk.bf16.mxu1 %vm13223_vm0, %v13222_v1 }
 0xa20   : > { %12058 = vmatprep.subr.bf16.mxu1 %v13222_v1 }
 0xa21   : > { %v3070_v35 = vpop.f32.mrb[64].mxu0  ;;  %v3254_v36 = vpop.f32.mrb[64].mxu1 }
 0xa22   : > { %v3205_v38 = vadd.f32 %v10853_v32, %v3070_v35  ;;  %v3440_v39 = vadd.f32 %v10868_v33, %v3254_v36  ;;  %v11984_v42 = vpop.f32.mrb[65].mxu0  ;;  %v12008_v43 = vpop.f32.mrb[65].mxu1 }
 0xa23   : > { %v3073_v44 = vpop.f32.mrb[66].mxu0  ;;  %v3257_v45 = vpop.f32.mrb[66].mxu1 }
 0xa24   : > { %v3449_v40 = vpack.c.bf16 %v3205_v38, %v3205_v38  ;;  %v3688_v47 = vpack.c.bf16 %v3440_v39, %v3440_v39  ;;  %v11985_v41 = vpop.f32.mrb[67].mxu0  ;;  %v12009_v48 = vpop.f32.mrb[67].mxu1 }
 0xa26   : > { %v3502_v50 = vsel %vm1822_vm2, %v3449_v40, 0  ;;  %v3696_v51 = vsel %vm2066_vm3, %v3688_v47, 0  ;;  %12049 = vmatmul.mubr.msk.bf16.vlgmr.msra.gmra.mrb[76].mxu1 %vm1822_vm2, %v3446_v46 }
 0xa27   : > { %12041 = vmatpush3.bf16.xpose.msra.mxu0 %v3502_v50  ;;  %12059 = vmatpush3.bf16.msra.mxu1 %v3696_v51 }
 0xa28   : > { %12052 = vmatprep.subr.bf16.mxu0 %v13222_v1  ;;  %12060 = vmatprep.mubr.msk.bf16.mxu1 %vm13223_vm0, %v13222_v1 }
 0xa29   : > { %v3174_v54 = vpop.f32.mrb[68].mxu0  ;;  %v13766_v55 = vpop.f32.mrb[68].mxu1  ;;  %12070 = vmatprep.subr.bf16.mxu1 %v13222_v1 }
 0xa2a   : > { %v3207_v56 = vadd.f32 %v10855_v52, %v3174_v54  ;;  %v12000_v57 = vpop.f32.mrb[69].mxu0  ;;  %v12024_v58 = vpop.f32.mrb[69].mxu1 }
 0xa2b   : > { %v3177_v59 = vpop.f32.mrb[70].mxu0  ;;  %v3361_v60 = vpop.f32.mrb[70].mxu1 }
 0xa2c   : > { %v3451_v62 = vpack.c.bf16 %v3207_v56, %v3207_v56  ;;  %v12001_v63 = vpop.f32.mrb[71].mxu0  ;;  %v12025_v0 = vpop.f32.mrb[71].mxu1 }
 0xa2e   : > { %v3594_v3 = vsel %vm1822_vm2, %v3451_v62, 0  ;;  %12043 = vmatmul.mubr.msk.bf16.vlgmr.msra.gmra.mrb[80].mxu0 %vm1822_vm2, %v3445_v61 }
 0xa2f   : > { %12053 = vmatpush3.bf16.xpose.msra.mxu0 %v3594_v3  ;;  %12054 = vmatprep.mubr.msk.bf16.mxu0 %vm13223_vm0, %v13222_v1  ;;  %v3442_v3 = vadd.f32 %v10870_v2, %v13766_v55 }
 0xa30   : > { %12064 = vmatprep.subr.bf16.mxu0 %v13222_v1 }
 0xa31   : > { %v3306_v6 = vpop.f32.mrb[72].mxu0 }
 0xa32   : > { %v3441_v7 = vadd.f32 %v10869_v4, %v3306_v6  ;;  %v12016_v8 = vpop.f32.mrb[73].mxu0  ;;  %v3690_v6 = vpack.c.bf16 %v3442_v3, %v3442_v3 }
 0xa33   : > { %v3309_v9 = vpop.f32.mrb[74].mxu0 }
 0xa34   : > { %v3689_v11 = vpack.c.bf16 %v3441_v7, %v3441_v7  ;;  %v12017_v12 = vpop.f32.mrb[75].mxu0  ;;  %v3788_v9 = vsel %vm2066_vm3, %v3690_v6, 0 }
 0xa35   : > { %v10871_v12 = vld [vmem:[%s13248_s17 + $0x17] ss:$0 sm:$0xff] }
 0xa36   : > { %v3742_v13 = vsel %vm2066_vm3, %v3689_v11, 0  ;;  %12055 = vmatmul.mubr.msk.bf16.vlgmr.msra.gmra.mrb[84].mxu0 %vm1822_vm2, %v3447_v10 }
 0xa37   : > { %12065 = vmatpush3.bf16.msra.mxu0 %v3742_v13  ;;  %12066 = vmatprep.mubr.msk.bf16.mxu0 %vm13223_vm0, %v13222_v1 }
 0xa38   : > { %12076 = vmatprep.subr.bf16.mxu0 %v13222_v1 }
 0xa39   : > { %v13781_v14 = vpop.f32.mrb[76].mxu0 }
 0xa3a   : > { %v12032_v15 = vpop.f32.mrb[77].mxu0 }
 0xa3b   : > { %v3413_v16 = vpop.f32.mrb[78].mxu0  ;;  %v3443_v15 = vadd.f32 %v10871_v12, %v13781_v14 }
 0xa3c   : > { %v12033_v17 = vpop.f32.mrb[79].mxu0 }
 0xaf1   : > { %v3492_v18 = vpop.f32.mrb[72].mxu1 }
 0xaf2   : > { %v3636_v19 = vmul.f32 0.35355338, %v3492_v18  ;;  %v12038_v20 = vpop.f32.mrb[73].mxu1  ;;  %v3691_v18 = vpack.c.bf16 %v3443_v15, %v3443_v15 }
 0xaf3   : > { %v3495_v21 = vpop.f32.mrb[74].mxu1 }
 0xaf4   : > { %v12039_v22 = vpop.f32.mrb[75].mxu1  ;;  %v3640_v23 = vsel %vm1822_vm2, %v3636_v19, -inf  ;;  %v3834_v21 = vsel %vm2066_vm3, %v3691_v18, 0 }
 0xaf5   : > { %3641 = vmax.xlane.f32.xlu0 %v3640_v23 }
 0xaf9   : > { %v3584_v24 = vpop.f32.mrb[76].mxu1 }
 0xafa   : > { %v3638_v25 = vmul.f32 0.35355338, %v3584_v24  ;;  %v12050_v26 = vpop.f32.mrb[77].mxu1  ;;  %v10819_v24 = vld [vmem:[%s13253_s21 + $0x10] sm:$0xf] }
 0xafb   : > { %v3587_v27 = vpop.f32.mrb[78].mxu1  ;;  %v10820_v26 = vld [vmem:[%s13253_s21 + $0x14] sm:$0xf] }
 0xafc   : > { %v12051_v28 = vpop.f32.mrb[79].mxu1  ;;  %v3646_v29 = vsel %vm1822_vm2, %v3638_v25, -inf  ;;  %v3930_v27 = vsel %vm2066_vm3, %v10820_v26, 0 }
 0xafd   : > { %3647 = vmax.xlane.f32.xlu0 %v3646_v29  ;;  %v10821_v28 = vld [vmem:[%s13253_s21 + $0x18] sm:$0xf] }
 0xb01   : > { %v3538_v30 = vpop.f32.mrb[80].mxu0 }
 0xb02   : > { %v3637_v31 = vmul.f32 0.35355338, %v3538_v30  ;;  %v12044_v32 = vpop.f32.mrb[81].mxu0 }
 0xb03   : > { %v3541_v33 = vpop.f32.mrb[82].mxu0  ;;  %v3976_v32 = vsel %vm2066_vm3, %v10821_v28, 0 }
 0xb04   : > { %v12045_v34 = vpop.f32.mrb[83].mxu0  ;;  %v3643_v35 = vsel %vm1822_vm2, %v3637_v31, -inf }
 0xb05   : > { %3644 = vmax.xlane.f32.xlu1 %v3643_v35 }
 0xb09   : > { %v3630_v36 = vpop.f32.mrb[84].mxu0 }
 0xb0a   : > { %v3639_v38 = vmul.f32 0.35355338, %v3630_v36  ;;  %v12056_v39 = vpop.f32.mrb[85].mxu0 }
 0xb0b   : > { %v3633_v42 = vpop.f32.mrb[86].mxu0 }
 0xb0c   : > { %v12057_v43 = vpop.f32.mrb[87].mxu0  ;;  %v3649_v44 = vsel %vm1822_vm2, %v3639_v38, -inf }
 0xb0d   : > { %3650 = vmax.xlane.f32.xlu1 %v3649_v44  ;;  %v10822_v43 = vld [vmem:[%s13253_s21 + $0x1c] sm:$0xf] }
 0xb82   : > { %v3642_v45 = vpop.xlane.xlu0 %3641 }
 0xb83   : > { %v3652_v46 = vsub.f32 %v3636_v19, %v3642_v45 }
 0xb85   : > { %v3656_v40 = vmul.f32 1.442695, %v3652_v46 }
 0xb87   : > { %13080 = vpow2.f32 %v3656_v40  ;;  %v4022_v40 = vsel %vm2066_vm3, %v10822_v43, 0  ;;  %v12949_v43 = vld [vmem:[%s13298_s6 + $0x18] sm:$0xff]  }
 0xb8a   : > { %v3648_v47 = vpop.xlane.xlu0 %3647 }
 0xb8b   : > { %v3654_v41 = vsub.f32 %v3638_v25, %v3648_v47  ;;  %v3884_v25 = vsel %vm2066_vm3, %v10819_v24, 0  ;;  %v12957_v24 = vld [vmem:[%s13278_s14 + $0x28] sm:$0xff]  }
 0xb8d   : > { %v3660_v48 = vmul.f32 1.442695, %v3654_v41 }
 0xb8f   : > { %13082 = vpow2.f32 %v3660_v48 }
 0xb91   : > { %v13081_v49 = vpop.eup %13080 }
 0xb92   : > { %v3645_v50 = vpop.xlane.xlu1 %3644  ;;  %v3664_v51 = vsel %vm1822_vm2, %v13081_v49, 0.0 }
 0xb93   : > { %v3653_v52 = vsub.f32 %v3637_v31, %v3645_v50  ;;  %3665 = vadd.xlane.f32.xlu0 %v3664_v51 }
 0xb95   : > { %v3658_v53 = vmul.f32 1.442695, %v3653_v52 }
 0xb97   : > { %13084 = vpow2.f32 %v3658_v53 }
 0xb99   : > { %v13083_v54 = vpop.eup %13082 }
 0xb9a   : > { %v3651_v56 = vpop.xlane.xlu1 %3650  ;;  %v3670_v57 = vsel %vm1822_vm2, %v13083_v54, 0.0 }
 0xb9b   : > { %v3655_v58 = vsub.f32 %v3639_v38, %v3651_v56  ;;  %3671 = vadd.xlane.f32.xlu0 %v3670_v57 }
 0xb9d   : > { %v3662_v59 = vmul.f32 1.442695, %v3655_v58 }
 0xb9f   : > { %13086 = vpow2.f32 %v3662_v59 }
 0xba1   : > { %v13085_v60 = vpop.eup %13084 }
 0xba2   : > { %v3667_v61 = vsel %vm1822_vm2, %v13085_v60, 0.0 }
 0xba3   : > { %3668 = vadd.xlane.f32.xlu1 %v3667_v61 }
 0xba9   : > { %v13087_v62 = vpop.eup %13086 }
 0xbaa   : > { %v3673_v63 = vsel %vm1822_vm2, %v13087_v62, 0.0 }
 0xbab   : > { %3674 = vadd.xlane.f32.xlu1 %v3673_v63 }
 0xc20   : > { %v3666_v0 = vpop.xlane.xlu0 %3665 }
 0xc21   : > { %13088 = vrcp.f32 %v3666_v0 }
 0xc28   : > { %v3672_v4 = vpop.xlane.xlu0 %3671 }
 0xc29   : > { %13090 = vrcp.f32 %v3672_v4 }
 0xc2b   : > { %v13089_v5 = vpop.eup %13088 }
 0xc2c   : > { %v3680_v7 = vmul.f32 %v13089_v5, %v13081_v49 }
 0xc2e   : > { %v3684_v8 = vpack.c.bf16 %v3680_v7, %v3680_v7 }
 0xc30   : > { %12061 = vmatmul.mubr.msk.bf16.vlgmr.msra.gmra.mrb[80].mxu1 %vm1822_vm2, %v3684_v8  ;;  %v3669_v10 = vpop.xlane.xlu1 %3668 }
 0xc31   : > { %12071 = vmatpush3.bf16.msra.mxu1 %v3788_v9  ;;  %13092 = vrcp.f32 %v3669_v10  ;;  %12072 = vmatprep.mubr.msk.bf16.mxu1 %vm13223_vm0, %v13222_v1  ;;  %v10884_v9 = vld [vmem:[%s13258_s25 + $0x1] ss:$0 sm:$0xff] }
 0xc32   : > { %12082 = vmatprep.subr.bf16.mxu1 %v13222_v1 }
 0xc33   : > { %v13091_v55 = vpop.eup %13090 }
 0xc34   : > { %v3682_v11 = vmul.f32 %v13091_v55, %v13083_v54 }
 0xc36   : > { %v3686_v13 = vpack.c.bf16 %v3682_v11, %v3682_v11 }
 0xc38   : > { %12073 = vmatmul.mubr.msk.bf16.vlgmr.msra.gmra.mrb[84].mxu1 %vm1822_vm2, %v3686_v13  ;;  %v3675_v16 = vpop.xlane.xlu1 %3674 }
 0xc39   : > { %13094 = vrcp.f32 %v3675_v16  ;;  %12084 = vmatprep.mubr.msk.bf16.mxu1 %vm13223_vm0, %v13222_v1  ;;  %12083 = vmatpush3.bf16.msra.mxu1 %v3884_v25 }
 0xc3a   : > { %12094 = vmatprep.subr.bf16.mxu1 %v13222_v1 }
 0xc3b   : > { %v13093_v17 = vpop.eup %13092 }
 0xc3c   : > { %v3681_v19 = vmul.f32 %v13093_v17, %v13085_v60 }
 0xc3e   : > { %v3685_v20 = vpack.c.bf16 %v3681_v19, %v3681_v19 }
 0xc40   : > { %12067 = vmatmul.mubr.msk.bf16.vlgmr.msra.gmra.mrb[88].mxu0 %vm1822_vm2, %v3685_v20 }
 0xc41   : > { %12077 = vmatpush3.bf16.msra.mxu0 %v3834_v21  ;;  %12078 = vmatprep.mubr.msk.bf16.mxu0 %vm13223_vm0, %v13222_v1 }
 0xc42   : > { %12088 = vmatprep.subr.bf16.mxu0 %v13222_v1 }
 0xc43   : > { %v13095_v14 = vpop.eup %13094 }
 0xc44   : > { %v3683_v22 = vmul.f32 %v13095_v14, %v13087_v62 }
 0xc46   : > { %v3687_v23 = vpack.c.bf16 %v3683_v22, %v3683_v22  ;;  %v12944_v22 = vld [vmem:[%s14802_s3 + $0x10] sm:$0xff]  }
 0xc48   : > { %12079 = vmatmul.mubr.msk.bf16.vlgmr.msra.gmra.mrb[92].mxu0 %vm1822_vm2, %v3687_v23  ;;  %v12945_v23 = vld [vmem:[%s14802_s3 + $0x18] sm:$0xff]   ;;  %s14816_s3 = sld [smem:[#allocation20_spill]] }
 0xc49   : > { %12090 = vmatprep.mubr.msk.bf16.mxu0 %vm13223_vm0, %v13222_v1  ;;  %12089 = vmatpush3.bf16.msra.mxu0 %v3930_v27 }
 0xc4a   : > { %12100 = vmatprep.subr.bf16.mxu0 %v13222_v1 }
 0xd03   : > { %v3732_v29 = vpop.f32.mrb[80].mxu1 }
 0xd04   : > { %v3876_v30 = vpack.c.bf16 %v3732_v29, %v3732_v29  ;;  %v12062_v31 = vpop.f32.mrb[81].mxu1  ;;  %v10887_v29 = vld [vmem:[%s13263_s29 + $0x2] ss:$0 sm:$0xff] }
 0xd05   : > { %v3735_v33 = vpop.f32.mrb[82].mxu1  ;;  %v10888_v31 = vld [vmem:[%s13263_s29 + $0x3] ss:$0 sm:$0xff] }
 0xd06   : > { %v12063_v34 = vpop.f32.mrb[83].mxu1  ;;  %12085 = vmatmul.mubr.msk.bf16.vlgmr.msra.gmra.mrb[88].mxu1 %vm1822_vm2, %v3876_v30 }
 0xd07   : > { %12095 = vmatpush3.bf16.msra.mxu1 %v3976_v32  ;;  %12096 = vmatprep.mubr.msk.bf16.mxu1 %vm13223_vm0, %v13222_v1  ;;  %v12946_v34 = vld [vmem:[%s13298_s6] sm:$0xff]  }
 0xd08   : > { %12106 = vmatprep.subr.bf16.mxu1 %v13222_v1 }
 0xd0b   : > { %v3824_v35 = vpop.f32.mrb[84].mxu1 }
 0xd0c   : > { %v3878_v36 = vpack.c.bf16 %v3824_v35, %v3824_v35  ;;  %v12074_v38 = vpop.f32.mrb[85].mxu1 }
 0xd0d   : > { %v3827_v39 = vpop.f32.mrb[86].mxu1  ;;  %v13864_v38 = vld [vmem:[%s1022_s15] sm:$0xff]  ;;  %s14815_s15 = sld [smem:[#allocation18_spill]] }
 0xd0e   : > { %v12075_v42 = vpop.f32.mrb[87].mxu1  ;;  %12097 = vmatmul.mubr.msk.bf16.vlgmr.msra.gmra.mrb[92].mxu1 %vm1822_vm2, %v3878_v36  ;;  %v12947_v36 = vld [vmem:[%s13298_s6 + $0x8] sm:$0xff]   ;;  %v13869_v39 = vpack.c.bf16 %v13864_v38, %v13864_v38 }
 0xd0f   : > { %12110 = vmatprep.mubr.msk.bf16.mxu1 %vm13223_vm0, %v13222_v1  ;;  %12107 = vmatpush3.bf16.msra.mxu1 %v12944_v22  ;;  %v12948_v42 = vld [vmem:[%s13298_s6 + $0x10] sm:$0xff]   ;;  %v10933_v22 = vld [vmem:[%s13303_s12 + $0x1] ss:$0 sm:$0xff] }
 0xd10   : > { %12108 = vmatprep.subr.bf16.mxu1 %v13222_v1 }
 0xd13   : > { %v3778_v44 = vpop.f32.mrb[88].mxu0  ;;  %12109 = vmatpush3.bf16.msra.mxu1 %v12945_v23 }
 0xd14   : > { %v3877_v45 = vpack.c.bf16 %v3778_v44, %v3778_v44  ;;  %v12068_v46 = vpop.f32.mrb[89].mxu0  ;;  %12126 = vmatprep.subr.bf16.mxu1 %v13222_v1  ;;  %v12950_v44 = vld [vmem:[%s13298_s6 + $0x30] sm:$0xff]  }
 0xd15   : > { %v3781_v47 = vpop.f32.mrb[90].mxu0  ;;  %v12952_v46 = vld [vmem:[%s13298_s6 + $0x50] sm:$0xff]  }
 0xd16   : > { %v12069_v41 = vpop.f32.mrb[91].mxu0  ;;  %12091 = vmatmul.mubr.msk.bf16.vlgmr.msra.gmra.mrb[96].mxu0 %vm1822_vm2, %v3877_v45  ;;  %v12951_v45 = vld [vmem:[%s13298_s6 + $0x38] sm:$0xff]   ;;  %v12954_v47 = vld [vmem:[%s13298_s6 + $0x70] sm:$0xff]  }
 0xd17   : > { %12101 = vmatpush3.bf16.msra.mxu0 %v4022_v40  ;;  %12102 = vmatprep.mubr.msk.bf16.mxu0 %vm13223_vm0, %v13222_v1  ;;  %v12953_v40 = vld [vmem:[%s13298_s6 + $0x58] sm:$0xff]  }
 0xd18   : > { %12114 = vmatprep.subr.bf16.mxu0 %v13222_v1  ;;  %v12955_v41 = vld [vmem:[%s13298_s6 + $0x78] sm:$0xff]  }
 0xd1b   : > { %v3870_v48 = vpop.f32.mrb[92].mxu0 }
 0xd1c   : > { %v3879_v49 = vpack.c.bf16 %v3870_v48, %v3870_v48  ;;  %v12080_v50 = vpop.f32.mrb[93].mxu0  ;;  %v12958_v48 = vld [vmem:[%s13278_s14 + $0x30] sm:$0xff]  }
 0xd1d   : > { %v3873_v51 = vpop.f32.mrb[94].mxu0  ;;  %v12963_v50 = vld [vmem:[%s13298_s6 + $0x90] sm:$0xff]  }
 0xd1e   : > { %v12081_v52 = vpop.f32.mrb[95].mxu0  ;;  %12103 = vmatmul.mubr.msk.bf16.vlgmr.msra.gmra.mrb[100].mxu0 %vm1822_vm2, %v3879_v49  ;;  %v12959_v49 = vld [vmem:[%s13278_s14 + $0x38] sm:$0xff]  }
 0xd1f   : > { %12122 = vmatprep.mubr.msk.bf16.mxu0 %vm13223_vm0, %v13222_v1  ;;  %v12965_v51 = vld [vmem:[%s13298_s6 + $0x98] sm:$0xff]   ;;  %v12967_v52 = vld [vmem:[%s13298_s6 + $0xb0] sm:$0xff]  }
 0xdd9   : > { %v3920_v53 = vpop.f32.mrb[88].mxu1 }
 0xdda   : > { %v12086_v54 = vpop.f32.mrb[89].mxu1  ;;  %v4064_v63 = vsel %vm1114_vm1, %v3920_v53, 0.0  ;;  %v12969_v53 = vld [vmem:[%s13298_s6 + $0xb8] sm:$0xff]  }
 0xddb   : > { %v3923_v56 = vpop.f32.mrb[90].mxu1  ;;  %v10894_v54 = vld [vmem:[%s14801_s8 + $0x1] ss:$0 sm:$0xff]  ;;  %s14818_s8 = sld [smem:[#allocation19_spill]] }
 0xddc   : > { %v12087_v57 = vpop.f32.mrb[91].mxu1 }
 0xde1   : > { %v4012_v58 = vpop.f32.mrb[92].mxu1 }
 0xde2   : > { %v12098_v59 = vpop.f32.mrb[93].mxu1  ;;  %v4067_v5 = vsel %vm1114_vm1, %v4012_v58, 0.0 }
 0xde3   : > { %v4015_v60 = vpop.f32.mrb[94].mxu1 }
 0xde4   : > { %v12099_v61 = vpop.f32.mrb[95].mxu1 }
 0xde9   : > { %v3966_v62 = vpop.f32.mrb[96].mxu0 }
 0xdea   : > { %v4065_v0 = vsel %vm1114_vm1, %v3966_v62, 0.0  ;;  %v12092_v2 = vpop.f32.mrb[97].mxu0  ;;  %v12960_v62 = vld [vmem:[%s13298_s6 + $0x20] sm:$0xff]  }
 0xdeb   : > { %v4066_v3 = vadd.f32 %v4065_v0, %v4064_v63  ;;  %v3969_v4 = vpop.f32.mrb[98].mxu0  ;;  %v12961_v0 = vld [vmem:[%s13298_s6 + $0x28] sm:$0xff]  }
 0xdec   : > { %v12093_v6 = vpop.f32.mrb[99].mxu0 }
 0xded   : > { %v4068_v7 = vadd.f32 %v4067_v5, %v4066_v3  ;;  %v12962_v6 = vld [vmem:[%s13298_s6 + $0x40] sm:$0xff]  }
 0xdf1   : > { %v4058_v8 = vpop.f32.mrb[100].mxu0 }
 0xdf2   : > { %v4069_v10 = vsel %vm1114_vm1, %v4058_v8, 0.0  ;;  %v12104_v55 = vpop.f32.mrb[101].mxu0 }
 0xdf3   : > { %v4070_v11 = vadd.f32 %v4069_v10, %v4068_v7  ;;  %v4061_v12 = vpop.f32.mrb[102].mxu0  ;;  %v12964_v7 = vld [vmem:[%s13298_s6 + $0x48] sm:$0xff]  }
 0xdf4   : > { %v12105_v13 = vpop.f32.mrb[103].mxu0 }
 0xdf5   : > { %v4077_v15 = vadd.f32 %v10884_v9, %v4070_v11  ;;  %v12966_v11 = vld [vmem:[%s13298_s6 + $0x60] sm:$0xff]   ;;  %v12968_v13 = vld [vmem:[%s13298_s6 + $0x68] sm:$0xff]  }
 0xdf7   : > { %v4081_v16 = vadd.f32 %v4077_v15, %v13651_v37  ;;  %v12956_v37 = vld [vmem:[%s13278_s14 + $0x20] sm:$0xff]  }
 0xdf8   : > { %12115 = vmatpush3.bf16.msra.mxu0 %v12956_v37 }
 0xdf9   : > { %v4082_v17 = vsel %vm1114_vm1, %v4081_v16, 0.0  ;;  %12116 = vmatprep.subr.bf16.mxu0 %v13222_v1 }
 0xdfa   : > { %4083 = vadd.xlane.f32.xlu0 %v4082_v17 }
 0xdfc   : > { %12117 = vmatpush3.bf16.msra.mxu0 %v12957_v24 }
 0xdfd   : > { %12118 = vmatprep.subr.bf16.mxu0 %v13222_v1 }
 0xe00   : > { %12119 = vmatpush3.bf16.msra.mxu0 %v12958_v48 }
 0xe01   : > { %12120 = vmatprep.subr.bf16.mxu0 %v13222_v1 }
 0xe04   : > { %12121 = vmatpush3.bf16.msra.mxu0 %v12959_v49 }
 0xe05   : > { %12142 = vmatprep.subr.bf16.mxu0 %v13222_v1 }
 0xe87   : > { %v4084_v18 = vpop.xlane.xlu0 %4083 }
 0xe88   : > { %v4085_v19 = vmul.f32 0.03125, %v4084_v18  ;;  %v12970_v18 = vld [vmem:[%s13298_s6 + $0x80] sm:$0xff]  }
 0xe8a   : > { %v4086_v20 = vsub.f32 %v4081_v16, %v4085_v19  ;;  %v10949_v19 = vld [vmem:[%s13303_s12 + $0x5] ss:$0 sm:$0xff] }
 0xe8c   : > { %v4087_v21 = vmul.f32 %v4086_v20, %v4086_v20 }
 0xe8e   : > { %v4088_v14 = vsel %vm1114_vm1, %v4087_v21, 0.0 }
 0xe8f   : > { %4089 = vadd.xlane.f32.xlu1 %v4088_v14 }
 0xf1c   : > { %v4090_v25 = vpop.xlane.xlu1 %4089 }
 0xf1d   : > { %v4091_v26 = vmul.f32 0.03125, %v4090_v25 }
 0xf1f   : > { %v4092_v27 = vadd.f32 1e-05, %v4091_v26 }
 0xf21   : > { %13096 = vrsqrt.f32 %v4092_v27  ;;  %v10951_v27 = vld [vmem:[%s13303_s12 + $0x7] ss:$0 sm:$0xff] }
 0xf2b   : > { %v13097_v28 = vpop.eup %13096 }
 0xf2c   : > { %v4094_v30 = vmul.f32 %v13097_v28, %v4086_v20 }
 0xf2e   : > { %v4101_v32 = vmul.f32 %v10887_v29, %v4094_v30 }
 0xf30   : > { %v13853_v33 = vadd.f32 %v10888_v31, %v4101_v32  ;;  %v10935_v32 = vld [vmem:[%s13303_s12 + $0x3] ss:$0 sm:$0xff] }
 0xf32   : > { %v4116_v35 = vpack.c.bf16 %v13853_v33, %v13853_v33 }
 0xf34   : > { %12111 = vmatmul.mubr.msk.bf16.vlgmr.msra.gmra.mrb[96].mxu1 %vm1114_vm1, %v4116_v35 }
 0xf35   : > { %12127 = vmatpush3.bf16.msra.mxu1 %v12946_v34  ;;  %12130 = vmatprep.mubr.msk.bf16.mxu1 %vm13223_vm0, %v13222_v1 }
 0xf36   : > { %12128 = vmatprep.subr.bf16.mxu1 %v13222_v1 }
 0xf39   : > { %12129 = vmatpush3.bf16.msra.mxu1 %v12947_v36 }
 0xf3a   : > { %12134 = vmatprep.subr.bf16.mxu1 %v13222_v1 }
 0xf3c   : > { %12131 = vmatmul.mubr.msk.bf16.vlgmr.msra.gmra.mrb[100].mxu1 %vm1114_vm1, %v13869_v39 }
 0xf3d   : > { %12135 = vmatpush3.bf16.msra.mxu1 %v12948_v42  ;;  %12138 = vmatprep.mubr.msk.bf16.mxu1 %vm13223_vm0, %v13222_v1 }
 0xf3e   : > { %12136 = vmatprep.subr.bf16.mxu1 %v13222_v1 }
 0xf41   : > { %12137 = vmatpush3.bf16.msra.mxu1 %v12949_v43 }
 0xf42   : > { %12150 = vmatprep.subr.bf16.mxu1 %v13222_v1 }
 0xf44   : > { %12139 = vmatmul.mubr.msk.bf16.vlgmr.msra.gmra.mrb[104].mxu1 %vm1114_vm1, %v13869_v39 }
 0xf45   : > { %12151 = vmatpush3.bf16.msra.mxu1 %v12950_v44  ;;  %12154 = vmatprep.mubr.msk.bf16.mxu1 %vm13223_vm0, %v13222_v1 }
 0xf46   : > { %12152 = vmatprep.subr.bf16.mxu1 %v13222_v1 }
 0xf49   : > { %12153 = vmatpush3.bf16.msra.mxu1 %v12951_v45  ;;  %v12971_v45 = vld [vmem:[%s13298_s6 + $0x88] sm:$0xff]  }
 0xf4a   : > { %12166 = vmatprep.subr.bf16.mxu1 %v13222_v1 }
 0xf4c   : > { %12155 = vmatmul.mubr.msk.bf16.vlgmr.msra.gmra.mrb[108].mxu1 %vm1114_vm1, %v13869_v39 }
 0xf4d   : > { %12167 = vmatpush3.bf16.msra.mxu1 %v12952_v46  ;;  %12170 = vmatprep.mubr.msk.bf16.mxu1 %vm13223_vm0, %v13222_v1  ;;  %v12972_v46 = vld [vmem:[%s13298_s6 + $0xa0] sm:$0xff]  }
 0xf4e   : > { %12168 = vmatprep.subr.bf16.mxu1 %v13222_v1 }
 0xf51   : > { %12169 = vmatpush3.bf16.msra.mxu1 %v12953_v40  ;;  %v12973_v40 = vld [vmem:[%s13298_s6 + $0xa8] sm:$0xff]  }
 0xf52   : > { %12182 = vmatprep.subr.bf16.mxu1 %v13222_v1 }
 0xf54   : > { %12171 = vmatmul.mubr.msk.bf16.vlgmr.msra.gmra.mrb[112].mxu1 %vm1114_vm1, %v13869_v39 }
 0xf55   : > { %12183 = vmatpush3.bf16.msra.mxu1 %v12954_v47  ;;  %12186 = vmatprep.mubr.msk.bf16.mxu1 %vm13223_vm0, %v13222_v1  ;;  %v10965_v47 = vld [vmem:[%s13303_s12 + $0x9] ss:$0 sm:$0xff] }
 0xf56   : > { %12184 = vmatprep.subr.bf16.mxu1 %v13222_v1 }
 0xf59   : > { %12185 = vmatpush3.bf16.msra.mxu1 %v12955_v41 }
 0xf5a   : > { %12198 = vmatprep.subr.bf16.mxu1 %v13222_v1 }
 0xf5c   : > { %12187 = vmatmul.mubr.msk.bf16.vlgmr.msra.gmra.mrb[116].mxu1 %vm1114_vm1, %v13869_v39 }
 0xf5d   : > { %12202 = vmatprep.mubr.msk.bf16.mxu1 %vm13223_vm0, %v13222_v1  ;;  %12199 = vmatpush3.bf16.msra.mxu1 %v12963_v50 }
 0xf5e   : > { %12200 = vmatprep.subr.bf16.mxu1 %v13222_v1 }
 0xf61   : > { %12201 = vmatpush3.bf16.msra.mxu1 %v12965_v51 }
 0xf62   : > { %12214 = vmatprep.subr.bf16.mxu1 %v13222_v1 }
 0xf64   : > { %12203 = vmatmul.mubr.msk.bf16.vlgmr.msra.gmra.mrb[120].mxu1 %vm1114_vm1, %v13869_v39 }
 0xf65   : > { %12215 = vmatpush3.bf16.msra.mxu1 %v12967_v52  ;;  %12218 = vmatprep.mubr.msk.bf16.mxu1 %vm13223_vm0, %v13222_v1 }
 0xf66   : > { %12216 = vmatprep.subr.bf16.mxu1 %v13222_v1 }
 0xf69   : > { %12217 = vmatpush3.bf16.msra.mxu1 %v12969_v53 }
 0xf6a   : > { %12228 = vmatprep.subr.bf16.mxu1 %v13222_v1 }
 0xf6c   : > { %12219 = vmatmul.mubr.msk.bf16.vlgmr.msra.gmra.mrb[124].mxu1 %vm1114_vm1, %v13869_v39 }
 0xf6d   : > { %12230 = vmatprep.mubr.msk.bf16.mxu1 %vm13223_vm0, %v13222_v1 }
0x1007   : > { %v4172_v56 = vpop.f32.mrb[96].mxu1 }
0x1008   : > { %v4173_v57 = vadd.f32 %v10894_v54, %v4172_v56  ;;  %v12112_v58 = vpop.f32.mrb[97].mxu1 }
0x1009   : > { %v4175_v59 = vpop.f32.mrb[98].mxu1 }
0x100a   : > { %v4178_v60 = vmax.f32 %v4173_v57, 0.0  ;;  %v12113_v61 = vpop.f32.mrb[99].mxu1 }
0x100c   : > { %v4190_v63 = vpack.c.bf16 %v4178_v60, %v4178_v60 }
0x100e   : > { %12123 = vmatmul.mubr.msk.bf16.vlgmr.msra.gmra.mrb[104].mxu0 %vm2589_vm4, %v4190_v63 }
0x100f   : > { %12143 = vmatpush3.bf16.msra.mxu0 %v12960_v62  ;;  %12146 = vmatprep.mubr.msk.bf16.mxu0 %vm13223_vm0, %v13222_v1  ;;  %v13934_v2 = vpop.f32.mrb[100].mxu1 }
0x1010   : > { %12144 = vmatprep.subr.bf16.mxu0 %v13222_v1  ;;  %v12132_v3 = vpop.f32.mrb[101].mxu1 }
0x1011   : > { %v4443_v4 = vpop.f32.mrb[102].mxu1 }
0x1012   : > { %v12133_v5 = vpop.f32.mrb[103].mxu1  ;;  %v10948_v4 = vld [vmem:[%s13303_s12 + $0x4] ss:$0 sm:$0xff] }
0x1013   : > { %12145 = vmatpush3.bf16.msra.mxu0 %v12961_v0 }
0x1014   : > { %12158 = vmatprep.subr.bf16.mxu0 %v13222_v1 }
0x1016   : > { %12147 = vmatmul.mubr.msk.bf16.vlgmr.msra.gmra.mrb[108].mxu0 %vm1114_vm1, %v13869_v39 }
0x1017   : > { %12159 = vmatpush3.bf16.msra.mxu0 %v12962_v6  ;;  %12162 = vmatprep.mubr.msk.bf16.mxu0 %vm13223_vm0, %v13222_v1  ;;  %v4492_v8 = vpop.f32.mrb[104].mxu1 }
0x1018   : > { %12160 = vmatprep.subr.bf16.mxu0 %v13222_v1  ;;  %v12140_v9 = vpop.f32.mrb[105].mxu1  ;;  %v4627_v25 = vadd.f32 %v10933_v22, %v4492_v8  ;;  %v10934_v22 = vld [vmem:[%s13303_s12 + $0x2] ss:$0 sm:$0xff] }
0x1019   : > { %v4495_v10 = vpop.f32.mrb[106].mxu1 }
0x101a   : > { %v12141_v55 = vpop.f32.mrb[107].mxu1  ;;  %v5103_v29 = vpack.c.bf16 %v4627_v25, %v4627_v25 }
0x101b   : > { %12161 = vmatpush3.bf16.msra.mxu0 %v12964_v7  ;;  %v10932_v55 = vld [vmem:[%s13303_s12] ss:$0 sm:$0xff] }
0x101c   : > { %12174 = vmatprep.subr.bf16.mxu0 %v13222_v1 }
0x101e   : > { %12163 = vmatmul.mubr.msk.bf16.vlgmr.msra.gmra.mrb[112].mxu0 %vm1114_vm1, %v13869_v39 }
0x101f   : > { %12175 = vmatpush3.bf16.msra.mxu0 %v12966_v11  ;;  %v4596_v12 = vpop.f32.mrb[108].mxu1  ;;  %12178 = vmatprep.mubr.msk.bf16.mxu0 %vm13223_vm0, %v13222_v1 }
0x1020   : > { %12176 = vmatprep.subr.bf16.mxu0 %v13222_v1  ;;  %v12156_v15 = vpop.f32.mrb[109].mxu1  ;;  %v4629_v42 = vadd.f32 %v10935_v32, %v4596_v12  ;;  %v10950_v12 = vld [vmem:[%s13303_s12 + $0x6] ss:$0 sm:$0xff] }
0x1021   : > { %v4599_v16 = vpop.f32.mrb[110].mxu1 }
0x1022   : > { %v12157_v17 = vpop.f32.mrb[111].mxu1  ;;  %v5105_v44 = vpack.c.bf16 %v4629_v42, %v4629_v42 }
0x1023   : > { %12177 = vmatpush3.bf16.msra.mxu0 %v12968_v13  ;;  %v4626_v13 = vadd.f32 %v10932_v55, %v13934_v2 }
0x1024   : > { %12190 = vmatprep.subr.bf16.mxu0 %v13222_v1 }
0x1026   : > { %12179 = vmatmul.mubr.msk.bf16.vlgmr.msra.gmra.mrb[116].mxu0 %vm1114_vm1, %v13869_v39 }
0x1027   : > { %v4728_v20 = vpop.f32.mrb[112].mxu1  ;;  %12191 = vmatpush3.bf16.msra.mxu0 %v12970_v18  ;;  %12194 = vmatprep.mubr.msk.bf16.mxu0 %vm13223_vm0, %v13222_v1 }
0x1028   : > { %v4863_v21 = vadd.f32 %v10949_v19, %v4728_v20  ;;  %v12172_v14 = vpop.f32.mrb[113].mxu1  ;;  %12192 = vmatprep.subr.bf16.mxu0 %v13222_v1  ;;  %v5102_v19 = vpack.c.bf16 %v4626_v13, %v4626_v13 }
0x1029   : > { %v4731_v23 = vpop.f32.mrb[114].mxu1  ;;  %v1030_v14 = vlaneseq }
0x102a   : > { %v5107_v37 = vpack.c.bf16 %v4863_v21, %v4863_v21  ;;  %v12173_v24 = vpop.f32.mrb[115].mxu1 }
0x102b   : > { %12193 = vmatpush3.bf16.msra.mxu0 %v12971_v45  ;;  %v1033_v24 = vand.u32 127, %v1030_v14 }
0x102c   : > { %v5160_v26 = vsel %vm1822_vm2, %v5107_v37, 0  ;;  %12206 = vmatprep.subr.bf16.mxu0 %v13222_v1  ;;  %v1031_v37 = vshrl.u32 %v1030_v14, 7 }
0x102d   : > { %12229 = vmatpush3.bf16.xpose.msra.mxu1 %v5160_v26 }
0x102e   : > { %12240 = vmatprep.subr.bf16.mxu1 %v13222_v1  ;;  %12195 = vmatmul.mubr.msk.bf16.vlgmr.msra.gmra.mrb[120].mxu0 %vm1114_vm1, %v13869_v39  ;;  %vm1034_vm5 = vcmp.le.s32.totalorder %v1033_v24, %v1031_v37 }
0x102f   : > { %v4832_v28 = vpop.f32.mrb[116].mxu1  ;;  %12210 = vmatprep.mubr.msk.bf16.mxu0 %vm13223_vm0, %v13222_v1  ;;  %12207 = vmatpush3.bf16.msra.mxu0 %v12972_v46 }
0x1030   : > { %v4865_v30 = vadd.f32 %v10951_v27, %v4832_v28  ;;  %v12188_v31 = vpop.f32.mrb[117].mxu1  ;;  %12208 = vmatprep.subr.bf16.mxu0 %v13222_v1  ;;  %v13224_v27 = vmov -1e+30  }
0x1031   : > { %v4835_v34 = vpop.f32.mrb[118].mxu1  ;;  %v14008_v28 = vsel %vm1034_vm5, 0.0, %v13224_v27 }
0x1032   : > { %v5109_v35 = vpack.c.bf16 %v4865_v30, %v4865_v30  ;;  %v12189_v36 = vpop.f32.mrb[119].mxu1 }
0x1033   : > { %12209 = vmatpush3.bf16.msra.mxu0 %v12973_v40 }
0x1034   : > { %v5252_v43 = vsel %vm1822_vm2, %v5109_v35, 0  ;;  %12231 = vmatmul.mubr.msk.bf16.vlgmr.msra.gmra.mrb[128].mxu1 %vm1822_vm2, %v5103_v29  ;;  %12222 = vmatprep.subr.bf16.mxu0 %v13222_v1 }
0x1035   : > { %12241 = vmatpush3.bf16.xpose.msra.mxu1 %v5252_v43  ;;  %12242 = vmatprep.mubr.msk.bf16.mxu1 %vm13223_vm0, %v13222_v1 }
0x1036   : > { %12252 = vmatprep.subr.bf16.mxu1 %v13222_v1  ;;  %12211 = vmatmul.mubr.msk.bf16.vlgmr.msra.gmra.mrb[124].mxu0 %vm1114_vm1, %v13869_v39 }
0x1037   : > { %12224 = vmatprep.mubr.msk.bf16.mxu0 %vm13223_vm0, %v13222_v1  ;;  %v4964_v41 = vpop.f32.mrb[120].mxu1 }
0x1038   : > { %v5099_v48 = vadd.f32 %v10965_v47, %v4964_v41  ;;  %v12204_v49 = vpop.f32.mrb[121].mxu1  ;;  %v10964_v47 = vld [vmem:[%s13303_s12 + $0x8] ss:$0 sm:$0xff] }
0x1039   : > { %v4967_v50 = vpop.f32.mrb[122].mxu1 }
0x103a   : > { %v5351_v51 = vpack.c.bf16 %v5099_v48, %v5099_v48  ;;  %v12205_v52 = vpop.f32.mrb[123].mxu1 }
0x103c   : > { %12243 = vmatmul.mubr.msk.bf16.vlgmr.msra.gmra.mrb[132].mxu1 %vm1822_vm2, %v5105_v44  ;;  %v5404_v54 = vsel %vm2066_vm3, %v5351_v51, 0 }
0x103d   : > { %12254 = vmatprep.mubr.msk.bf16.mxu1 %vm13223_vm0, %v13222_v1  ;;  %12253 = vmatpush3.bf16.msra.mxu1 %v5404_v54 }
0x103e   : > { %12264 = vmatprep.subr.bf16.mxu1 %v13222_v1 }
0x103f   : > { %v13989_v53 = vpop.f32.mrb[124].mxu1 }
0x1040   : > { %v12220_v56 = vpop.f32.mrb[125].mxu1 }
0x1041   : > { %v5071_v57 = vpop.f32.mrb[126].mxu1 }
0x1042   : > { %v12221_v58 = vpop.f32.mrb[127].mxu1 }
0x10e1   : > { %v13993_v39 = vpop.f32.mrb[104].mxu0 }
0x10e2   : > { %v12124_v59 = vpop.f32.mrb[105].mxu0 }
0x10e3   : > { %v4261_v60 = vpop.f32.mrb[106].mxu0 }
0x10e4   : > { %v12125_v61 = vpop.f32.mrb[107].mxu0 }
0x10e9   : > { %v4544_v62 = vpop.f32.mrb[108].mxu0 }
0x10ea   : > { %v12148_v63 = vpop.f32.mrb[109].mxu0  ;;  %v4628_v2 = vadd.f32 %v10934_v22, %v4544_v62  ;;  %v10967_v22 = vld [vmem:[%s13303_s12 + $0xb] ss:$0 sm:$0xff] }
0x10eb   : > { %v4547_v0 = vpop.f32.mrb[110].mxu0 }
0x10ec   : > { %v12149_v3 = vpop.f32.mrb[111].mxu0  ;;  %v5104_v25 = vpack.c.bf16 %v4628_v2, %v4628_v2 }
0x10f1   : > { %v4676_v5 = vpop.f32.mrb[112].mxu0 }
0x10f2   : > { %v4862_v6 = vadd.f32 %v10948_v4, %v4676_v5  ;;  %v12164_v7 = vpop.f32.mrb[113].mxu0 }
0x10f3   : > { %v4679_v8 = vpop.f32.mrb[114].mxu0 }
0x10f4   : > { %v5106_v9 = vpack.c.bf16 %v4862_v6, %v4862_v6  ;;  %v12165_v10 = vpop.f32.mrb[115].mxu0 }
0x10f6   : > { %v5114_v11 = vsel %vm1822_vm2, %v5106_v9, 0 }
0x10f7   : > { %12223 = vmatpush3.bf16.xpose.msra.mxu0 %v5114_v11 }
0x10f8   : > { %12234 = vmatprep.subr.bf16.mxu0 %v13222_v1 }
0x10f9   : > { %v4780_v15 = vpop.f32.mrb[116].mxu0 }
0x10fa   : > { %v4864_v16 = vadd.f32 %v10950_v12, %v4780_v15  ;;  %v12180_v17 = vpop.f32.mrb[117].mxu0 }
0x10fb   : > { %v4783_v18 = vpop.f32.mrb[118].mxu0 }
0x10fc   : > { %v5108_v20 = vpack.c.bf16 %v4864_v16, %v4864_v16  ;;  %v12181_v21 = vpop.f32.mrb[119].mxu0 }
0x10fe   : > { %v5206_v23 = vsel %vm1822_vm2, %v5108_v20, 0  ;;  %12225 = vmatmul.mubr.msk.bf16.vlgmr.msra.gmra.mrb[128].mxu0 %vm1822_vm2, %v5102_v19 }
0x10ff   : > { %12235 = vmatpush3.bf16.xpose.msra.mxu0 %v5206_v23  ;;  %12236 = vmatprep.mubr.msk.bf16.mxu0 %vm13223_vm0, %v13222_v1  ;;  %v5101_v23 = vadd.f32 %v10967_v22, %v13989_v53 }
0x1100   : > { %12246 = vmatprep.subr.bf16.mxu0 %v13222_v1 }
0x1101   : > { %v4912_v41 = vpop.f32.mrb[120].mxu0  ;;  %v5353_v24 = vpack.c.bf16 %v5101_v23, %v5101_v23  ;;  %v10915_v23 = vld [vmem:[%s13288_s24 + $0x2] ss:$0 sm:$0xff] }
0x1102   : > { %v5098_v48 = vadd.f32 %v10964_v47, %v4912_v41  ;;  %v12196_v49 = vpop.f32.mrb[121].mxu0 }
0x1103   : > { %v4915_v50 = vpop.f32.mrb[122].mxu0  ;;  %v5496_v27 = vsel %vm2066_vm3, %v5353_v24, 0  ;;  %v4386_v49 = vld [vmem:[%s14805_s16 + $0x4] sm:$0xf] }
0x1104   : > { %v5350_v51 = vpack.c.bf16 %v5098_v48, %v5098_v48  ;;  %v12197_v52 = vpop.f32.mrb[123].mxu0  ;;  %v5592_v50 = vsel %vm2066_vm3, %v4386_v49, 0 }
0x1105   : > { %v10966_v52 = vld [vmem:[%s13303_s12 + $0xa] ss:$0 sm:$0xff] }
0x1106   : > { %12237 = vmatmul.mubr.msk.bf16.vlgmr.msra.gmra.mrb[132].mxu0 %vm1822_vm2, %v5104_v25  ;;  %v5358_v54 = vsel %vm2066_vm3, %v5350_v51, 0 }
0x1107   : > { %v5196_v26 = vpop.f32.mrb[128].mxu1  ;;  %12248 = vmatprep.mubr.msk.bf16.mxu0 %vm13223_vm0, %v13222_v1  ;;  %12247 = vmatpush3.bf16.msra.mxu0 %v5358_v54 }
0x1108   : > { %v5295_v29 = vmul.f32 0.35355338, %v5196_v26  ;;  %v12232_v30 = vpop.f32.mrb[129].mxu1  ;;  %12258 = vmatprep.subr.bf16.mxu0 %v13222_v1 }
0x1109   : > { %v5199_v31 = vpop.f32.mrb[130].mxu1  ;;  %v14019_v56 = vpop.f32.mrb[124].mxu0 }
0x110a   : > { %v5299_v32 = vadd.f32 %v5295_v29, %v14008_v28  ;;  %v12233_v34 = vpop.f32.mrb[131].mxu1  ;;  %v12212_v57 = vpop.f32.mrb[125].mxu0 }
0x110b   : > { %v5019_v58 = vpop.f32.mrb[126].mxu0 }
0x110c   : > { %v5305_v35 = vsel %vm1822_vm2, %v5299_v32, -inf  ;;  %v12213_v59 = vpop.f32.mrb[127].mxu0 }
0x110d   : > { %5306 = vmax.xlane.f32.xlu1 %v5305_v35 }
0x110f   : > { %v5288_v36 = vpop.f32.mrb[132].mxu1 }
0x1110   : > { %v5297_v42 = vmul.f32 0.35355338, %v5288_v36  ;;  %v12244_v43 = vpop.f32.mrb[133].mxu1 }
0x1111   : > { %v5291_v44 = vpop.f32.mrb[134].mxu1 }
0x1112   : > { %v5301_v45 = vadd.f32 %v5297_v42, %v14008_v28  ;;  %v12245_v46 = vpop.f32.mrb[135].mxu1 }
0x1114   : > { %v5311_v40 = vsel %vm1822_vm2, %v5301_v45, -inf }
0x1115   : > { %5312 = vmax.xlane.f32.xlu1 %v5311_v40 }
0x119a   : > { %v5307_v60 = vpop.xlane.xlu1 %5306 }
0x119b   : > { %v5315_v61 = vsub.f32 %v5299_v32, %v5307_v60 }
0x119d   : > { %v5320_v62 = vmul.f32 1.442695, %v5315_v61 }
0x119f   : > { %13098 = vpow2.f32 %v5320_v62 }
0x11a2   : > { %v5313_v63 = vpop.xlane.xlu1 %5312 }
0x11a3   : > { %v5317_v0 = vsub.f32 %v5301_v45, %v5313_v63  ;;  %v10907_v45 = vld [vmem:[%s13283_s19 + $0x1] ss:$0 sm:$0xff] }
0x11a4   : > { %v4259_v46 = vadd.f32 %v10907_v45, %v13993_v39  ;;  %v5100_v39 = vadd.f32 %v10966_v52, %v14019_v56 }
0x11a5   : > { %v5324_v3 = vmul.f32 1.442695, %v5317_v0 }
0x11a6   : > { %v4267_v41 = vadd.f32 %v4259_v46, %v13853_v33  ;;  %v5352_v58 = vpack.c.bf16 %v5100_v39, %v5100_v39 }
0x11a7   : > { %13100 = vpow2.f32 %v5324_v3 }
0x11a8   : > { %v4268_v48 = vsel %vm1114_vm1, %v4267_v41, 0.0  ;;  %v5450_v63 = vsel %vm2066_vm3, %v5352_v58, 0 }
0x11a9   : > { %v13099_v4 = vpop.eup %13098 }
0x11aa   : > { %v5329_v5 = vsel %vm1822_vm2, %v13099_v4, 0.0 }
0x11ab   : > { %5330 = vadd.xlane.f32.xlu1 %v5329_v5 }
0x11b1   : > { %v13101_v6 = vpop.eup %13100 }
0x11b2   : > { %v5335_v7 = vsel %vm1822_vm2, %v13101_v6, 0.0 }
0x11b3   : > { %5336 = vadd.xlane.f32.xlu1 %v5335_v7 }
0x11d1   : > { %v5150_v8 = vpop.f32.mrb[128].mxu0 }
0x11d2   : > { %v5294_v9 = vmul.f32 0.35355338, %v5150_v8  ;;  %v12226_v10 = vpop.f32.mrb[129].mxu0 }
0x11d3   : > { %v5153_v55 = vpop.f32.mrb[130].mxu0 }
0x11d4   : > { %v12227_v11 = vpop.f32.mrb[131].mxu0  ;;  %v5298_v12 = vadd.f32 %v5294_v9, %v14008_v28 }
0x11d6   : > { %v5302_v13 = vsel %vm1822_vm2, %v5298_v12, -inf }
0x11d7   : > { %5303 = vmax.xlane.f32.xlu0 %v5302_v13 }
0x11d9   : > { %v5242_v15 = vpop.f32.mrb[132].mxu0 }
0x11da   : > { %v5296_v16 = vmul.f32 0.35355338, %v5242_v15  ;;  %v12238_v17 = vpop.f32.mrb[133].mxu0 }
0x11db   : > { %v5245_v18 = vpop.f32.mrb[134].mxu0 }
0x11dc   : > { %v12239_v19 = vpop.f32.mrb[135].mxu0  ;;  %v5300_v20 = vadd.f32 %v5296_v16, %v14008_v28  ;;  %v4385_v18 = vld [vmem:[%s14805_s16] sm:$0xf] }
0x11dd   : > { %v5546_v19 = vsel %vm2066_vm3, %v4385_v18, 0  ;;  %v12974_v18 = vld [vmem:[%s14807_s22] sm:$0xff]  }
0x11de   : > { %v5308_v21 = vsel %vm1822_vm2, %v5300_v20, -inf }
0x11df   : > { %5309 = vmax.xlane.f32.xlu0 %v5308_v21 }
0x1238   : > { %v5331_v14 = vpop.xlane.xlu1 %5330 }
0x1239   : > { %13102 = vrcp.f32 %v5331_v14 }
0x1240   : > { %v5337_v2 = vpop.xlane.xlu1 %5336 }
0x1241   : > { %13104 = vrcp.f32 %v5337_v2 }
0x1243   : > { %v13103_v37 = vpop.eup %13102 }
0x1244   : > { %v5343_v25 = vmul.f32 %v13103_v37, %v13099_v4  ;;  %v10916_v37 = vld [vmem:[%s13288_s24 + $0x3] ss:$0 sm:$0xff] }
0x1246   : > { %v5347_v26 = vpack.c.bf16 %v5343_v25, %v5343_v25 }
0x1248   : > { %12255 = vmatmul.mubr.msk.bf16.vlgmr.msra.gmra.mrb[136].mxu1 %vm1822_vm2, %v5347_v26 }
0x1249   : > { %12265 = vmatpush3.bf16.msra.mxu1 %v5496_v27  ;;  %12266 = vmatprep.mubr.msk.bf16.mxu1 %vm13223_vm0, %v13222_v1  ;;  %v4387_v27 = vld [vmem:[%s14805_s16 + $0x8] sm:$0xf] }
0x124a   : > { %12276 = vmatprep.subr.bf16.mxu1 %v13222_v1 }
0x124b   : > { %v13105_v29 = vpop.eup %13104 }
0x124c   : > { %v5345_v30 = vmul.f32 %v13105_v29, %v13101_v6  ;;  %v4388_v6 = vld [vmem:[%s14805_s16 + $0xc] sm:$0xf] }
0x124d   : > { %v5684_v10 = vsel %vm2066_vm3, %v4388_v6, 0 }
0x124e   : > { %v5349_v53 = vpack.c.bf16 %v5345_v30, %v5345_v30 }
0x1250   : > { %12267 = vmatmul.mubr.msk.bf16.vlgmr.msra.gmra.mrb[140].mxu1 %vm1822_vm2, %v5349_v53 }
0x1251   : > { %12278 = vmatprep.mubr.msk.bf16.mxu1 %vm13223_vm0, %v13222_v1  ;;  %12277 = vmatpush3.bf16.msra.mxu1 %v5592_v50 }
0x1252   : > { %12288 = vmatprep.subr.bf16.mxu1 %v13222_v1 }
0x1264   : > { %v5304_v31 = vpop.xlane.xlu0 %5303 }
0x1265   : > { %v5314_v32 = vsub.f32 %v5298_v12, %v5304_v31  ;;  %v5638_v31 = vsel %vm2066_vm3, %v4387_v27, 0  ;;  %v10982_v27 = vld [vmem:[%s14808_s23 + $0x1] ss:$0 sm:$0xff] }
0x1267   : > { %v5318_v34 = vmul.f32 1.442695, %v5314_v32 }
0x1269   : > { %13106 = vpow2.f32 %v5318_v34 }
0x126c   : > { %v5310_v35 = vpop.xlane.xlu0 %5309 }
0x126d   : > { %v5316_v36 = vsub.f32 %v5300_v20, %v5310_v35 }
0x126f   : > { %v5322_v42 = vmul.f32 1.442695, %v5316_v36 }
0x1271   : > { %13108 = vpow2.f32 %v5322_v42 }
0x1273   : > { %v13107_v43 = vpop.eup %13106 }
0x1274   : > { %v5326_v44 = vsel %vm1822_vm2, %v13107_v43, 0.0 }
0x1275   : > { %5327 = vadd.xlane.f32.xlu0 %v5326_v44 }
0x127b   : > { %v13109_v40 = vpop.eup %13108 }
0x127c   : > { %v5332_v47 = vsel %vm1822_vm2, %v13109_v40, 0.0 }
0x127d   : > { %5333 = vadd.xlane.f32.xlu0 %v5332_v47 }
0x1281   : > { %4269 = vadd.xlane.f32.xlu0 %v4268_v48 }
0x1302   : > { %v5328_v51 = vpop.xlane.xlu0 %5327 }
0x1303   : > { %13110 = vrcp.f32 %v5328_v51 }
0x130a   : > { %v5334_v54 = vpop.xlane.xlu0 %5333 }
0x130b   : > { %13112 = vrcp.f32 %v5334_v54 }
0x130d   : > { %v13111_v57 = vpop.eup %13110 }
0x130e   : > { %v5342_v33 = vmul.f32 %v13111_v57, %v13107_v43  ;;  %v4270_v59 = vpop.xlane.xlu0 %4269 }
0x130f   : > { %v4271_v60 = vmul.f32 0.03125, %v4270_v59 }
0x1310   : > { %v5346_v61 = vpack.c.bf16 %v5342_v33, %v5342_v33 }
0x1311   : > { %v4272_v62 = vsub.f32 %v4267_v41, %v4271_v60 }
0x1312   : > { %12249 = vmatmul.mubr.msk.bf16.vlgmr.msra.gmra.mrb[136].mxu0 %vm1822_vm2, %v5346_v61 }
0x1313   : > { %12259 = vmatpush3.bf16.msra.mxu0 %v5450_v63  ;;  %v4273_v0 = vmul.f32 %v4272_v62, %v4272_v62  ;;  %12260 = vmatprep.mubr.msk.bf16.mxu0 %vm13223_vm0, %v13222_v1 }
0x1314   : > { %12270 = vmatprep.subr.bf16.mxu0 %v13222_v1 }
0x1315   : > { %v13113_v56 = vpop.eup %13112  ;;  %v4274_v3 = vsel %vm1114_vm1, %v4273_v0, 0.0 }
0x1316   : > { %v5344_v4 = vmul.f32 %v13113_v56, %v13109_v40  ;;  %4275 = vadd.xlane.f32.xlu1 %v4274_v3 }
0x1318   : > { %v5348_v5 = vpack.c.bf16 %v5344_v4, %v5344_v4 }
0x131a   : > { %12261 = vmatmul.mubr.msk.bf16.vlgmr.msra.gmra.mrb[140].mxu0 %vm1822_vm2, %v5348_v5 }
0x131b   : > { %v5440_v7 = vpop.f32.mrb[136].mxu1  ;;  %12272 = vmatprep.mubr.msk.bf16.mxu0 %vm13223_vm0, %v13222_v1  ;;  %12271 = vmatpush3.bf16.msra.mxu0 %v5546_v19  ;;  %v12975_v19 = vld [vmem:[%s14807_s22 + $0x10] sm:$0xff]  }
0x131c   : > { %v5539_v8 = vpack.c.bf16 %v5440_v7, %v5440_v7  ;;  %v12256_v9 = vpop.f32.mrb[137].mxu1  ;;  %12282 = vmatprep.subr.bf16.mxu0 %v13222_v1 }
0x131d   : > { %v5443_v55 = vpop.f32.mrb[138].mxu1 }
0x131e   : > { %v12257_v11 = vpop.f32.mrb[139].mxu1  ;;  %12279 = vmatmul.mubr.msk.bf16.vlgmr.msra.gmra.mrb[144].mxu1 %vm1822_vm2, %v5539_v8  ;;  %v10980_v8 = vld [vmem:[%s14806_s18] ss:$0 sm:$0xff] }
0x131f   : > { %12289 = vmatpush3.bf16.msra.mxu1 %v5684_v10  ;;  %12290 = vmatprep.mubr.msk.bf16.mxu1 %vm13223_vm0, %v13222_v1 }
0x1320   : > { %12302 = vmatprep.subr.bf16.mxu1 %v13222_v1 }
0x1323   : > { %v5532_v12 = vpop.f32.mrb[140].mxu1 }
0x1324   : > { %v5541_v13 = vpack.c.bf16 %v5532_v12, %v5532_v12  ;;  %v12268_v15 = vpop.f32.mrb[141].mxu1 }
0x1325   : > { %v5535_v16 = vpop.f32.mrb[142].mxu1 }
0x1326   : > { %v12269_v17 = vpop.f32.mrb[143].mxu1  ;;  %12291 = vmatmul.mubr.msk.bf16.vlgmr.msra.gmra.mrb[148].mxu1 %vm1822_vm2, %v5541_v13 }
0x1327   : > { %12306 = vmatprep.mubr.msk.bf16.mxu1 %vm13223_vm0, %v13222_v1  ;;  %12303 = vmatpush3.bf16.msra.mxu1 %v12975_v19 }
0x1328   : > { %12304 = vmatprep.subr.bf16.mxu1 %v13222_v1 }
0x13a3   : > { %v4276_v20 = vpop.xlane.xlu1 %4275 }
0x13a4   : > { %v4277_v21 = vmul.f32 0.03125, %v4276_v20  ;;  %v12976_v20 = vld [vmem:[%s14807_s22 + $0x8] sm:$0xff]  }
0x13a6   : > { %v4278_v14 = vadd.f32 1e-05, %v4277_v21  ;;  %v12977_v21 = vld [vmem:[%s14807_s22 + $0x18] sm:$0xff]  }
0x13a7   : > { %12305 = vmatpush3.bf16.msra.mxu1 %v12977_v21 }
0x13a8   : > { %13114 = vrsqrt.f32 %v4278_v14  ;;  %12318 = vmatprep.subr.bf16.mxu1 %v13222_v1 }
0x13b2   : > { %v13115_v22 = vpop.eup %13114 }
0x13b3   : > { %v4280_v2 = vmul.f32 %v13115_v22, %v4272_v62 }
0x13b5   : > { %v4287_v24 = vmul.f32 %v10915_v23, %v4280_v2 }
0x13b7   : > { %v4294_v25 = vadd.f32 %v10916_v37, %v4287_v24 }
0x13b9   : > { %v4298_v26 = vsel %vm1114_vm1, %v4294_v25, 0.0 }
0x13ba   : > { %4299 = vadd.xlane.f32.xlu1 %v4298_v26 }
0x13e5   : > { %v5394_v29 = vpop.f32.mrb[136].mxu0 }
0x13e6   : > { %v5538_v30 = vpack.c.bf16 %v5394_v29, %v5394_v29  ;;  %v12250_v53 = vpop.f32.mrb[137].mxu0 }
0x13e7   : > { %v5397_v32 = vpop.f32.mrb[138].mxu0  ;;  %v12978_v53 = vld [vmem:[%s14807_s22 + $0x20] sm:$0xff]  }
0x13e8   : > { %v12251_v34 = vpop.f32.mrb[139].mxu0  ;;  %12273 = vmatmul.mubr.msk.bf16.vlgmr.msra.gmra.mrb[144].mxu0 %vm1822_vm2, %v5538_v30 }
0x13e9   : > { %12283 = vmatpush3.bf16.msra.mxu0 %v5638_v31  ;;  %12284 = vmatprep.mubr.msk.bf16.mxu0 %vm13223_vm0, %v13222_v1  ;;  %v12979_v31 = vld [vmem:[%s14807_s22 + $0x30] sm:$0xff]  }
0x13ea   : > { %12294 = vmatprep.subr.bf16.mxu0 %v13222_v1 }
0x13ed   : > { %v5486_v35 = vpop.f32.mrb[140].mxu0 }
0x13ee   : > { %v5540_v36 = vpack.c.bf16 %v5486_v35, %v5486_v35  ;;  %v12262_v42 = vpop.f32.mrb[141].mxu0  ;;  %v12980_v35 = vld [vmem:[%s14807_s22 + $0x28] sm:$0xff]  }
0x13ef   : > { %v5489_v43 = vpop.f32.mrb[142].mxu0 }
0x13f0   : > { %v12263_v44 = vpop.f32.mrb[143].mxu0  ;;  %12285 = vmatmul.mubr.msk.bf16.vlgmr.msra.gmra.mrb[148].mxu0 %vm1822_vm2, %v5540_v36  ;;  %v12981_v36 = vld [vmem:[%s14807_s22 + $0x38] sm:$0xff]   ;;  %v10918_v43 = vld [vmem:[%s14809_s26] ss:$0 sm:$0xff] }
0x13f1   : > { %v5628_v45 = vpop.f32.mrb[144].mxu1  ;;  %12298 = vmatprep.mubr.msk.bf16.mxu0 %vm13223_vm0, %v13222_v1  ;;  %12295 = vmatpush3.bf16.msra.mxu0 %v12974_v18  ;;  %v12982_v44 = vld [vmem:[%s14810_s28] sm:$0xff]  }
0x13f2   : > { %v12280_v46 = vpop.f32.mrb[145].mxu1  ;;  %v5727_v33 = vsel %vm1114_vm1, %v5628_v45, 0.0  ;;  %12296 = vmatprep.subr.bf16.mxu0 %v13222_v1  ;;  %v12983_v45 = vld [vmem:[%s14810_s28 + $0x10] sm:$0xff]  }
0x13f3   : > { %v5631_v40 = vpop.f32.mrb[146].mxu1 }
0x13f4   : > { %v12281_v47 = vpop.f32.mrb[147].mxu1  ;;  %v10919_v40 = vld [vmem:[%s14809_s26 + $0x1] ss:$0 sm:$0xff] }
0x13f5   : > { %12297 = vmatpush3.bf16.msra.mxu0 %v12976_v20  ;;  %v12984_v47 = vld [vmem:[%s14810_s28 + $0x8] sm:$0xff]  }
0x13f6   : > { %12310 = vmatprep.subr.bf16.mxu0 %v13222_v1 }
0x13f9   : > { %v5720_v41 = vpop.f32.mrb[148].mxu1 }
0x13fa   : > { %v12292_v48 = vpop.f32.mrb[149].mxu1  ;;  %v5731_v6 = vsel %vm1114_vm1, %v5720_v41, 0.0  ;;  %v12985_v41 = vld [vmem:[%s14810_s28 + $0x18] sm:$0xff]  }
0x13fb   : > { %v5723_v49 = vpop.f32.mrb[150].mxu1 }
0x13fc   : > { %v12293_v50 = vpop.f32.mrb[151].mxu1  ;;  %v12986_v49 = vld [vmem:[%s14810_s28 + $0x20] sm:$0xff]  }
0x13fd   : > { %v12987_v50 = vld [vmem:[%s14810_s28 + $0x30] sm:$0xff]  }
0x1447   : > { %v4300_v51 = vpop.xlane.xlu1 %4299 }
0x1448   : > { %v4301_v52 = vmul.f32 0.03125, %v4300_v51 }
0x144a   : > { %v14081_v39 = vsub.f32 %v4294_v25, %v4301_v52  ;;  %v10981_v25 = vld [vmem:[%s14808_s23] ss:$0 sm:$0xff]  ;;  %v12988_v52 = vld [vmem:[%s14810_s28 + $0x28] sm:$0xff]  }
0x144c   : > { %v4303_v54 = vmul.f32 %v14081_v39, %v14081_v39 }
0x144e   : > { %v4304_v57 = vsel %vm1114_vm1, %v4303_v54, 0.0  ;;  %v12990_v54 = vld [vmem:[%s14810_s28 + $0x40] sm:$0xff]  }
0x144f   : > { %4305 = vadd.xlane.f32.xlu1 %v4304_v57  ;;  %v12991_v57 = vld [vmem:[%s14810_s28 + $0x50] sm:$0xff]  }
0x14bb   : > { %v5582_v58 = vpop.f32.mrb[144].mxu0 }
0x14bc   : > { %v5726_v59 = vsel %vm1114_vm1, %v5582_v58, 0.0  ;;  %v12274_v60 = vpop.f32.mrb[145].mxu0  ;;  %v12992_v58 = vld [vmem:[%s14810_s28 + $0x48] sm:$0xff]  }
0x14bd   : > { %v5728_v61 = vadd.f32 %v5727_v33, %v5726_v59  ;;  %v5585_v62 = vpop.f32.mrb[146].mxu0  ;;  %v12993_v33 = vld [vmem:[%s14810_s28 + $0x58] sm:$0xff]   ;;  %v12994_v59 = vld [vmem:[%s14810_s28 + $0x60] sm:$0xff]   ;;  %v12995_v60 = vld [vmem:[%s14810_s28 + $0x70] sm:$0xff]  }
0x14be   : > { %v12275_v63 = vpop.f32.mrb[147].mxu0  ;;  %v12997_v62 = vld [vmem:[%s14810_s28 + $0x78] sm:$0xff]  }
0x14c3   : > { %v5674_v0 = vpop.f32.mrb[148].mxu0 }
0x14c4   : > { %v5729_v56 = vsel %vm1114_vm1, %v5674_v0, 0.0  ;;  %v12286_v3 = vpop.f32.mrb[149].mxu0 }
0x14c5   : > { %v5730_v4 = vadd.f32 %v5729_v56, %v5728_v61  ;;  %v5677_v5 = vpop.f32.mrb[150].mxu0  ;;  %v12996_v61 = vld [vmem:[%s14810_s28 + $0x68] sm:$0xff]  }
0x14c6   : > { %v12287_v7 = vpop.f32.mrb[151].mxu0 }
0x14c7   : > { %v5732_v9 = vadd.f32 %v5731_v6, %v5730_v4 }
0x14c9   : > { %v5739_v10 = vadd.f32 %v10980_v8, %v5732_v9 }
0x14cb   : > { %v5742_v55 = vadd.f32 %v5739_v10, %v13864_v38 }
0x14cd   : > { %v5743_v11 = vsel %vm1114_vm1, %v5742_v55, 0.0 }
0x14ce   : > { %5744 = vadd.xlane.f32.xlu0 %v5743_v11 }
0x14dc   : > { %v4306_v22 = vpop.xlane.xlu1 %4305 }
0x14dd   : > { %v4307_v2 = vmul.f32 0.03125, %v4306_v22 }
0x14df   : > { %v4308_v37 = vadd.f32 1e-05, %v4307_v2 }
0x155b   : > { %v5745_v12 = vpop.xlane.xlu0 %5744 }
0x155c   : > { %v5746_v13 = vmul.f32 0.03125, %v5745_v12 }
0x155e   : > { %v5747_v15 = vsub.f32 %v5742_v55, %v5746_v13 }
0x1560   : > { %v5748_v16 = vmul.f32 %v5747_v15, %v5747_v15 }
0x1562   : > { %v5749_v17 = vsel %vm1114_vm1, %v5748_v16, 0.0  ;;  %v11011_v16 = vld [vmem:[%s14811_s1] ss:$0 sm:$0xff] }
0x1563   : > { %5750 = vadd.xlane.f32.xlu0 %v5749_v17  ;;  %v11012_v17 = vld [vmem:[%s14811_s1 + $0x1] ss:$0 sm:$0xff] }
0x15f0   : > { %v5751_v38 = vpop.xlane.xlu0 %5750 }
0x15f1   : > { %v5752_v14 = vmul.f32 0.03125, %v5751_v38 }
0x15f3   : > { %v5753_v23 = vadd.f32 1e-05, %v5752_v14 }
0x15f5   : > { %13116 = vrsqrt.f32 %v5753_v23 }
0x15f6   : > { %13118 = vrsqrt.f32 %v4308_v37 }
0x15ff   : > { %v13117_v24 = vpop.eup %13116 }
0x1600   : > { %v5755_v26 = vmul.f32 %v13117_v24, %v5747_v15  ;;  %v13119_v34 = vpop.eup %13118 }
0x1601   : > { %v4310_v42 = vmul.f32 %v13119_v34, %v14081_v39  ;;  %v12989_v39 = vld [vmem:[%s14810_s28 + $0x38] sm:$0xff]  }
0x1602   : > { %v5762_v29 = vmul.f32 %v10981_v25, %v5755_v26  ;;  %v10995_v26 = vld [vmem:[%s14812_s2] ss:$0 sm:$0xff] }
0x1603   : > { %v4317_v46 = vmul.f32 %v10918_v43, %v4310_v42 }
0x1604   : > { %v14104_v30 = vadd.f32 %v10982_v27, %v5762_v29  ;;  %v10996_v27 = vld [vmem:[%s14812_s2 + $0x1] ss:$0 sm:$0xff] }
0x1605   : > { %v4324_v48 = vadd.f32 %v10919_v40, %v4317_v46 }
0x1606   : > { %v5835_v32 = vpack.c.bf16 %v14104_v30, %v14104_v30 }
0x1607   : > { %v14139_v51 = vpack.c.bf16 %v4324_v48, %v4324_v48 }
0x1608   : > { %12299 = vmatmul.mubr.msk.bf16.vlgmr.msra.gmra.mrb[152].mxu0 %vm1114_vm1, %v5835_v32  ;;  %12307 = vmatmul.mubr.msk.bf16.vlgmr.msra.gmra.mrb[152].mxu1 %vm1114_vm1, %v5835_v32 }
0x1609   : > { %12311 = vmatpush3.bf16.msra.mxu0 %v12978_v53  ;;  %12319 = vmatpush3.bf16.msra.mxu1 %v12979_v31  ;;  %v11013_v31 = vld [vmem:[%s14811_s1 + $0x2] ss:$0 sm:$0xff] }
0x160a   : > { %12312 = vmatprep.subr.bf16.mxu0 %v13222_v1  ;;  %12320 = vmatprep.subr.bf16.mxu1 %v13222_v1 }
0x160b   : > { %12314 = vmatprep.mubr.msk.bf16.mxu0 %vm13223_vm0, %v13222_v1  ;;  %12322 = vmatprep.mubr.msk.bf16.mxu1 %vm13223_vm0, %v13222_v1 }
0x160d   : > { %12313 = vmatpush3.bf16.msra.mxu0 %v12980_v35  ;;  %12321 = vmatpush3.bf16.msra.mxu1 %v12981_v36 }
0x160e   : > { %12326 = vmatprep.subr.bf16.mxu0 %v13222_v1  ;;  %12334 = vmatprep.subr.bf16.mxu1 %v13222_v1 }
0x1610   : > { %12315 = vmatmul.mubr.msk.bf16.vlgmr.msra.gmra.mrb[156].mxu0 %vm1114_vm1, %v5835_v32  ;;  %12323 = vmatmul.mubr.msk.bf16.vlgmr.msra.gmra.mrb[156].mxu1 %vm1114_vm1, %v5835_v32  ;;  %v11014_v32 = vld [vmem:[%s14811_s1 + $0x3] ss:$0 sm:$0xff] }
0x1611   : > { %12327 = vmatpush3.bf16.msra.mxu0 %v12982_v44  ;;  %12335 = vmatpush3.bf16.msra.mxu1 %v12983_v45 }
0x1612   : > { %12328 = vmatprep.subr.bf16.mxu0 %v13222_v1  ;;  %12336 = vmatprep.subr.bf16.mxu1 %v13222_v1 }
0x1613   : > { %12330 = vmatprep.mubr.msk.bf16.mxu0 %vm13223_vm0, %v13222_v1  ;;  %12338 = vmatprep.mubr.msk.bf16.mxu1 %vm13223_vm0, %v13222_v1 }
0x1615   : > { %12329 = vmatpush3.bf16.msra.mxu0 %v12984_v47  ;;  %12337 = vmatpush3.bf16.msra.mxu1 %v12985_v41 }
0x1616   : > { %12342 = vmatprep.subr.bf16.mxu0 %v13222_v1  ;;  %12350 = vmatprep.subr.bf16.mxu1 %v13222_v1 }
0x1618   : > { %12331 = vmatmul.mubr.msk.bf16.vlgmr.msra.gmra.mrb[160].mxu0 %vm1114_vm1, %v14139_v51  ;;  %12339 = vmatmul.mubr.msk.bf16.vlgmr.msra.gmra.mrb[160].mxu1 %vm1114_vm1, %v14139_v51 }
0x1619   : > { %12343 = vmatpush3.bf16.msra.mxu0 %v12986_v49  ;;  %12351 = vmatpush3.bf16.msra.mxu1 %v12987_v50 }
0x161a   : > { %12344 = vmatprep.subr.bf16.mxu0 %v13222_v1  ;;  %12352 = vmatprep.subr.bf16.mxu1 %v13222_v1 }
0x161b   : > { %12346 = vmatprep.mubr.msk.bf16.mxu0 %vm13223_vm0, %v13222_v1  ;;  %12354 = vmatprep.mubr.msk.bf16.mxu1 %vm13223_vm0, %v13222_v1 }
0x161d   : > { %12345 = vmatpush3.bf16.msra.mxu0 %v12988_v52  ;;  %12353 = vmatpush3.bf16.msra.mxu1 %v12989_v39 }
0x161e   : > { %12358 = vmatprep.subr.bf16.mxu0 %v13222_v1  ;;  %12366 = vmatprep.subr.bf16.mxu1 %v13222_v1 }
0x1620   : > { %12347 = vmatmul.mubr.msk.bf16.vlgmr.msra.gmra.mrb[164].mxu0 %vm1114_vm1, %v14139_v51  ;;  %12355 = vmatmul.mubr.msk.bf16.vlgmr.msra.gmra.mrb[164].mxu1 %vm1114_vm1, %v14139_v51 }
0x1621   : > { %12359 = vmatpush3.bf16.msra.mxu0 %v12990_v54  ;;  %12367 = vmatpush3.bf16.msra.mxu1 %v12991_v57  ;;  %v10997_v54 = vld [vmem:[%s14812_s2 + $0x2] ss:$0 sm:$0xff]  ;;  %v10998_v57 = vld [vmem:[%s14812_s2 + $0x3] ss:$0 sm:$0xff] }
0x1622   : > { %12360 = vmatprep.subr.bf16.mxu0 %v13222_v1  ;;  %12368 = vmatprep.subr.bf16.mxu1 %v13222_v1 }
0x1623   : > { %12362 = vmatprep.mubr.msk.bf16.mxu0 %vm13223_vm0, %v13222_v1  ;;  %12370 = vmatprep.mubr.msk.bf16.mxu1 %vm13223_vm0, %v13222_v1 }
0x1625   : > { %12361 = vmatpush3.bf16.msra.mxu0 %v12992_v58  ;;  %12369 = vmatpush3.bf16.msra.mxu1 %v12993_v33 }
0x1626   : > { %12374 = vmatprep.subr.bf16.mxu0 %v13222_v1  ;;  %12382 = vmatprep.subr.bf16.mxu1 %v13222_v1 }
0x1628   : > { %12363 = vmatmul.mubr.msk.bf16.vlgmr.msra.gmra.mrb[168].mxu0 %vm1114_vm1, %v14139_v51  ;;  %12371 = vmatmul.mubr.msk.bf16.vlgmr.msra.gmra.mrb[168].mxu1 %vm1114_vm1, %v14139_v51 }
0x1629   : > { %12375 = vmatpush3.bf16.msra.mxu0 %v12994_v59  ;;  %12383 = vmatpush3.bf16.msra.mxu1 %v12995_v60  ;;  %v11027_v59 = vld [vmem:[%s14811_s1 + $0x4] ss:$0 sm:$0xff]  ;;  %v11028_v60 = vld [vmem:[%s14811_s1 + $0x5] ss:$0 sm:$0xff] }
0x162a   : > { %12376 = vmatprep.subr.bf16.mxu0 %v13222_v1  ;;  %12384 = vmatprep.subr.bf16.mxu1 %v13222_v1 }
0x162b   : > { %12378 = vmatprep.mubr.msk.bf16.mxu0 %vm13223_vm0, %v13222_v1  ;;  %12386 = vmatprep.mubr.msk.bf16.mxu1 %vm13223_vm0, %v13222_v1 }
0x162d   : > { %12377 = vmatpush3.bf16.msra.mxu0 %v12996_v61  ;;  %12385 = vmatpush3.bf16.msra.mxu1 %v12997_v62 }
0x162e   : > { %12390 = vmatprep.subr.bf16.mxu0 %v13222_v1  ;;  %12396 = vmatprep.subr.bf16.mxu1 %v13222_v1 }
0x1630   : > { %12379 = vmatmul.mubr.msk.bf16.vlgmr.msra.gmra.mrb[172].mxu0 %vm1114_vm1, %v14139_v51  ;;  %12387 = vmatmul.mubr.msk.bf16.vlgmr.msra.gmra.mrb[172].mxu1 %vm1114_vm1, %v14139_v51 }
0x1631   : > { %12392 = vmatprep.mubr.msk.bf16.mxu0 %vm13223_vm0, %v13222_v1  ;;  %12398 = vmatprep.mubr.msk.bf16.mxu1 %vm13223_vm0, %v13222_v1 }
0x16db   : > { %v5885_v63 = vpop.f32.mrb[152].mxu0  ;;  %v5937_v0 = vpop.f32.mrb[152].mxu1 }
0x16dc   : > { %v12300_v56 = vpop.f32.mrb[153].mxu0  ;;  %v12308_v3 = vpop.f32.mrb[153].mxu1  ;;  %v6071_v34 = vadd.f32 %v10995_v26, %v5885_v63  ;;  %v6072_v35 = vadd.f32 %v10996_v27, %v5937_v0 }
0x16dd   : > { %v5888_v4 = vpop.f32.mrb[154].mxu0  ;;  %v5940_v5 = vpop.f32.mrb[154].mxu1 }
0x16de   : > { %v12301_v6 = vpop.f32.mrb[155].mxu0  ;;  %v12309_v7 = vpop.f32.mrb[155].mxu1  ;;  %v6551_v41 = vpack.c.bf16 %v6071_v34, %v6071_v34  ;;  %v6552_v48 = vpack.c.bf16 %v6072_v35, %v6072_v35 }
0x16e3   : > { %v5989_v8 = vpop.f32.mrb[156].mxu0  ;;  %v6041_v9 = vpop.f32.mrb[156].mxu1 }
0x16e4   : > { %v12316_v10 = vpop.f32.mrb[157].mxu0  ;;  %v12324_v55 = vpop.f32.mrb[157].mxu1  ;;  %v6073_v61 = vadd.f32 %v10997_v54, %v5989_v8  ;;  %v6074_v62 = vadd.f32 %v10998_v57, %v6041_v9 }
0x16e5   : > { %v5992_v11 = vpop.f32.mrb[158].mxu0  ;;  %v6044_v12 = vpop.f32.mrb[158].mxu1 }
0x16e6   : > { %v12317_v13 = vpop.f32.mrb[159].mxu0  ;;  %v12325_v15 = vpop.f32.mrb[159].mxu1  ;;  %v6553_v8 = vpack.c.bf16 %v6073_v61, %v6073_v61  ;;  %v6554_v9 = vpack.c.bf16 %v6074_v62, %v6074_v62 }
0x16eb   : > { %v6125_v18 = vpop.f32.mrb[160].mxu0  ;;  %v6177_v19 = vpop.f32.mrb[160].mxu1 }
0x16ec   : > { %v6311_v20 = vadd.f32 %v11011_v16, %v6125_v18  ;;  %v6312_v21 = vadd.f32 %v11012_v17, %v6177_v19  ;;  %v12332_v38 = vpop.f32.mrb[161].mxu0  ;;  %v12340_v14 = vpop.f32.mrb[161].mxu1 }
0x16ed   : > { %v6128_v22 = vpop.f32.mrb[162].mxu0  ;;  %v6180_v23 = vpop.f32.mrb[162].mxu1 }
0x16ee   : > { %v6555_v2 = vpack.c.bf16 %v6311_v20, %v6311_v20  ;;  %v6556_v37 = vpack.c.bf16 %v6312_v21, %v6312_v21  ;;  %v12333_v24 = vpop.f32.mrb[163].mxu0  ;;  %v12341_v25 = vpop.f32.mrb[163].mxu1 }
0x16f0   : > { %v6563_v29 = vsel %vm1822_vm2, %v6555_v2, 0  ;;  %v6609_v53 = vsel %vm1822_vm2, %v6556_v37, 0 }
0x16f1   : > { %12391 = vmatpush3.bf16.xpose.msra.mxu0 %v6563_v29  ;;  %12397 = vmatpush3.bf16.xpose.msra.mxu1 %v6609_v53 }
0x16f2   : > { %12402 = vmatprep.subr.bf16.mxu0 %v13222_v1  ;;  %12408 = vmatprep.subr.bf16.mxu1 %v13222_v1 }
0x16f3   : > { %v6229_v36 = vpop.f32.mrb[164].mxu0  ;;  %v6281_v42 = vpop.f32.mrb[164].mxu1 }
0x16f4   : > { %v6313_v43 = vadd.f32 %v11013_v31, %v6229_v36  ;;  %v6314_v44 = vadd.f32 %v11014_v32, %v6281_v42  ;;  %v12348_v45 = vpop.f32.mrb[165].mxu0  ;;  %v12356_v46 = vpop.f32.mrb[165].mxu1 }
0x16f5   : > { %v6232_v40 = vpop.f32.mrb[166].mxu0  ;;  %v6284_v47 = vpop.f32.mrb[166].mxu1 }
0x16f6   : > { %v6557_v49 = vpack.c.bf16 %v6313_v43, %v6313_v43  ;;  %v6558_v50 = vpack.c.bf16 %v6314_v44, %v6314_v44  ;;  %v12349_v52 = vpop.f32.mrb[167].mxu0  ;;  %v12357_v39 = vpop.f32.mrb[167].mxu1 }
0x16f8   : > { %v6655_v58 = vsel %vm1822_vm2, %v6557_v49, 0  ;;  %v6701_v33 = vsel %vm1822_vm2, %v6558_v50, 0  ;;  %12393 = vmatmul.mubr.msk.bf16.vlgmr.msra.gmra.mrb[176].mxu0 %vm1822_vm2, %v6551_v41  ;;  %12399 = vmatmul.mubr.msk.bf16.vlgmr.msra.gmra.mrb[176].mxu1 %vm1822_vm2, %v6552_v48 }
0x16f9   : > { %12403 = vmatpush3.bf16.xpose.msra.mxu0 %v6655_v58  ;;  %12409 = vmatpush3.bf16.xpose.msra.mxu1 %v6701_v33 }
0x16fa   : > { %12404 = vmatprep.mubr.msk.bf16.mxu0 %vm13223_vm0, %v13222_v1  ;;  %12410 = vmatprep.mubr.msk.bf16.mxu1 %vm13223_vm0, %v13222_v1 }
0x16fb   : > { %v6361_v63 = vpop.f32.mrb[168].mxu0  ;;  %v6413_v0 = vpop.f32.mrb[168].mxu1  ;;  %12414 = vmatprep.subr.bf16.mxu0 %v13222_v1  ;;  %12420 = vmatprep.subr.bf16.mxu1 %v13222_v1 }
0x16fc   : > { %v6547_v56 = vadd.f32 %v11027_v59, %v6361_v63  ;;  %v6548_v3 = vadd.f32 %v11028_v60, %v6413_v0  ;;  %v12364_v4 = vpop.f32.mrb[169].mxu0  ;;  %v12372_v5 = vpop.f32.mrb[169].mxu1 }
0x16fd   : > { %v6364_v6 = vpop.f32.mrb[170].mxu0  ;;  %v6416_v7 = vpop.f32.mrb[170].mxu1 }
0x16fe   : > { %v6795_v10 = vpack.c.bf16 %v6547_v56, %v6547_v56  ;;  %v6796_v55 = vpack.c.bf16 %v6548_v3, %v6548_v3  ;;  %v12365_v11 = vpop.f32.mrb[171].mxu0  ;;  %v12373_v12 = vpop.f32.mrb[171].mxu1 }
0x1700   : > { %v6803_v13 = vsel %vm2066_vm3, %v6795_v10, 0  ;;  %v6849_v15 = vsel %vm2066_vm3, %v6796_v55, 0  ;;  %12405 = vmatmul.mubr.msk.bf16.vlgmr.msra.gmra.mrb[180].mxu0 %vm1822_vm2, %v6553_v8  ;;  %12411 = vmatmul.mubr.msk.bf16.vlgmr.msra.gmra.mrb[180].mxu1 %vm1822_vm2, %v6554_v9  ;;  %v11030_v10 = vld [vmem:[%s14811_s1 + $0x7] ss:$0 sm:$0xff]  ;;  %v11029_v55 = vld [vmem:[%s14811_s1 + $0x6] ss:$0 sm:$0xff] }
0x1701   : > { %12415 = vmatpush3.bf16.msra.mxu0 %v6803_v13  ;;  %12421 = vmatpush3.bf16.msra.mxu1 %v6849_v15 }
0x1702   : > { %12416 = vmatprep.mubr.msk.bf16.mxu0 %vm13223_vm0, %v13222_v1  ;;  %12422 = vmatprep.mubr.msk.bf16.mxu1 %vm13223_vm0, %v13222_v1 }
0x1703   : > { %v14229_v16 = vpop.f32.mrb[172].mxu0  ;;  %v14231_v17 = vpop.f32.mrb[172].mxu1  ;;  %12426 = vmatprep.subr.bf16.mxu0 %v13222_v1  ;;  %12432 = vmatprep.subr.bf16.mxu1 %v13222_v1 }
0x1704   : > { %v12380_v18 = vpop.f32.mrb[173].mxu0  ;;  %v12388_v19 = vpop.f32.mrb[173].mxu1  ;;  %v6550_v11 = vadd.f32 %v11030_v10, %v14231_v17  ;;  %v6549_v13 = vadd.f32 %v11029_v55, %v14229_v16 }
0x1705   : > { %v6468_v20 = vpop.f32.mrb[174].mxu0  ;;  %v6520_v21 = vpop.f32.mrb[174].mxu1 }
0x1706   : > { %v12381_v38 = vpop.f32.mrb[175].mxu0  ;;  %v12389_v14 = vpop.f32.mrb[175].mxu1  ;;  %v6798_v20 = vpack.c.bf16 %v6550_v11, %v6550_v11 }
0x1707   : > { %v6797_v38 = vpack.c.bf16 %v6549_v13, %v6549_v13 }
0x1709   : > { %v6895_v17 = vsel %vm2066_vm3, %v6797_v38, 0  ;;  %v11043_v38 = vld [vmem:[%s14814_s11] ss:$0 sm:$0xff] }
0x17cb   : > { %v6599_v22 = vpop.f32.mrb[176].mxu0  ;;  %v6645_v23 = vpop.f32.mrb[176].mxu1 }
0x17cc   : > { %v6743_v2 = vmul.f32 0.35355338, %v6599_v22  ;;  %v6744_v37 = vmul.f32 0.35355338, %v6645_v23  ;;  %v12394_v24 = vpop.f32.mrb[177].mxu0  ;;  %v12400_v25 = vpop.f32.mrb[177].mxu1 }
0x17cd   : > { %v6602_v26 = vpop.f32.mrb[178].mxu0  ;;  %v6648_v27 = vpop.f32.mrb[178].mxu1 }
0x17ce   : > { %v12395_v29 = vpop.f32.mrb[179].mxu0  ;;  %v12401_v53 = vpop.f32.mrb[179].mxu1  ;;  %v6750_v31 = vsel %vm1822_vm2, %v6744_v37, -inf  ;;  %v6747_v32 = vsel %vm1822_vm2, %v6743_v2, -inf  ;;  %v5830_v26 = vld [vmem:[%s14813_s10] sm:$0xf] }
0x17cf   : > { %6751 = vmax.xlane.f32.xlu1 %v6750_v31  ;;  %6748 = vmax.xlane.f32.xlu0 %v6747_v32  ;;  %v6991_v32 = vsel %vm2066_vm3, %v5830_v26, 0 }
0x17d3   : > { %v6691_v34 = vpop.f32.mrb[180].mxu0  ;;  %v6737_v35 = vpop.f32.mrb[180].mxu1 }
0x17d4   : > { %v6745_v36 = vmul.f32 0.35355338, %v6691_v34  ;;  %v6746_v42 = vmul.f32 0.35355338, %v6737_v35  ;;  %v12406_v43 = vpop.f32.mrb[181].mxu0  ;;  %v12412_v44 = vpop.f32.mrb[181].mxu1 }
0x17d5   : > { %v6694_v45 = vpop.f32.mrb[182].mxu0  ;;  %v6740_v46 = vpop.f32.mrb[182].mxu1  ;;  %v5833_v34 = vld [vmem:[%s14813_s10 + $0xc] sm:$0xf]  ;;  %v5832_v35 = vld [vmem:[%s14813_s10 + $0x8] sm:$0xf] }
0x17d6   : > { %v12407_v40 = vpop.f32.mrb[183].mxu0  ;;  %v12413_v47 = vpop.f32.mrb[183].mxu1  ;;  %v6756_v41 = vsel %vm1822_vm2, %v6746_v42, -inf  ;;  %v6753_v48 = vsel %vm1822_vm2, %v6745_v36, -inf  ;;  %v7129_v45 = vsel %vm2066_vm3, %v5833_v34, 0 }
0x17d7   : > { %6757 = vmax.xlane.f32.xlu1 %v6756_v41  ;;  %6754 = vmax.xlane.f32.xlu0 %v6753_v48  ;;  %v7083_v41 = vsel %vm2066_vm3, %v5832_v35, 0 }
0x185c   : > { %v6752_v49 = vpop.xlane.xlu1 %6751  ;;  %v6749_v50 = vpop.xlane.xlu0 %6748 }
0x185d   : > { %v6760_v52 = vsub.f32 %v6744_v37, %v6752_v49  ;;  %v6759_v39 = vsub.f32 %v6743_v2, %v6749_v50  ;;  %v6941_v2 = vsel %vm2066_vm3, %v6798_v20, 0  ;;  %v5831_v37 = vld [vmem:[%s14813_s10 + $0x4] sm:$0xf] }
0x185e   : > { %v7037_v53 = vsel %vm2066_vm3, %v5831_v37, 0 }
0x185f   : > { %v6765_v54 = vmul.f32 1.442695, %v6760_v52  ;;  %v6763_v57 = vmul.f32 1.442695, %v6759_v39 }
0x1861   : > { %13120 = vpow2.f32 %v6765_v54 }
0x1862   : > { %13122 = vpow2.f32 %v6763_v57 }
0x1864   : > { %v6758_v58 = vpop.xlane.xlu1 %6757  ;;  %v6755_v33 = vpop.xlane.xlu0 %6754 }
0x1865   : > { %v6762_v59 = vsub.f32 %v6746_v42, %v6758_v58  ;;  %v6761_v60 = vsub.f32 %v6745_v36, %v6755_v33 }
0x1867   : > { %v6769_v61 = vmul.f32 1.442695, %v6762_v59  ;;  %v6767_v62 = vmul.f32 1.442695, %v6761_v60 }
0x1869   : > { %13124 = vpow2.f32 %v6769_v61 }
0x186a   : > { %13126 = vpow2.f32 %v6767_v62 }
0x186b   : > { %v13121_v63 = vpop.eup %13120 }
0x186c   : > { %v13123_v0 = vpop.eup %13122  ;;  %v6774_v56 = vsel %vm1822_vm2, %v13121_v63, 0.0 }
0x186d   : > { %6775 = vadd.xlane.f32.xlu1 %v6774_v56  ;;  %v6771_v3 = vsel %vm1822_vm2, %v13123_v0, 0.0 }
0x186e   : > { %6772 = vadd.xlane.f32.xlu0 %v6771_v3 }
0x1873   : > { %v13125_v4 = vpop.eup %13124 }
0x1874   : > { %v13127_v5 = vpop.eup %13126  ;;  %v6780_v6 = vsel %vm1822_vm2, %v13125_v4, 0.0 }
0x1875   : > { %6781 = vadd.xlane.f32.xlu1 %v6780_v6  ;;  %v6777_v7 = vsel %vm1822_vm2, %v13127_v5, 0.0 }
0x1876   : > { %6778 = vadd.xlane.f32.xlu0 %v6777_v7 }
0x18fa   : > { %v6776_v8 = vpop.xlane.xlu1 %6775 }
0x18fb   : > { %13128 = vrcp.f32 %v6776_v8  ;;  %v6773_v9 = vpop.xlane.xlu0 %6772 }
0x18fc   : > { %13130 = vrcp.f32 %v6773_v9 }
0x1902   : > { %v6782_v12 = vpop.xlane.xlu1 %6781 }
0x1903   : > { %13132 = vrcp.f32 %v6782_v12  ;;  %v6779_v15 = vpop.xlane.xlu0 %6778 }
0x1904   : > { %13134 = vrcp.f32 %v6779_v15 }
0x1905   : > { %v13129_v18 = vpop.eup %13128 }
0x1906   : > { %v13131_v19 = vpop.eup %13130  ;;  %v6788_v21 = vmul.f32 %v13129_v18, %v13121_v63 }
0x1907   : > { %v6787_v14 = vmul.f32 %v13131_v19, %v13123_v0 }
0x1908   : > { %v6792_v22 = vpack.c.bf16 %v6788_v21, %v6788_v21 }
0x1909   : > { %v6791_v23 = vpack.c.bf16 %v6787_v14, %v6787_v14 }
0x190a   : > { %12423 = vmatmul.mubr.msk.bf16.vlgmr.msra.gmra.mrb[184].mxu1 %vm1822_vm2, %v6792_v22 }
0x190b   : > { %12417 = vmatmul.mubr.msk.bf16.vlgmr.msra.gmra.mrb[184].mxu0 %vm1822_vm2, %v6791_v23  ;;  %12433 = vmatpush3.bf16.msra.mxu1 %v6941_v2 }
0x190c   : > { %12427 = vmatpush3.bf16.msra.mxu0 %v6895_v17  ;;  %12428 = vmatprep.mubr.msk.bf16.mxu0 %vm13223_vm0, %v13222_v1 }
0x190d   : > { %v13133_v16 = vpop.eup %13132  ;;  %12434 = vmatprep.mubr.msk.bf16.mxu1 %vm13223_vm0, %v13222_v1  ;;  %12438 = vmatprep.subr.bf16.mxu0 %v13222_v1 }
0x190e   : > { %v13135_v24 = vpop.eup %13134  ;;  %v6790_v25 = vmul.f32 %v13133_v16, %v13125_v4  ;;  %12444 = vmatprep.subr.bf16.mxu1 %v13222_v1 }
0x190f   : > { %v6789_v27 = vmul.f32 %v13135_v24, %v13127_v5 }
0x1910   : > { %v6794_v29 = vpack.c.bf16 %v6790_v25, %v6790_v25 }
0x1911   : > { %v6793_v31 = vpack.c.bf16 %v6789_v27, %v6789_v27 }
0x1912   : > { %12435 = vmatmul.mubr.msk.bf16.vlgmr.msra.gmra.mrb[188].mxu1 %vm1822_vm2, %v6794_v29  ;;  %v12998_v29 = vld [vmem:[%s14815_s15] sm:$0xff]  }
0x1913   : > { %12429 = vmatmul.mubr.msk.bf16.vlgmr.msra.gmra.mrb[188].mxu0 %vm1822_vm2, %v6793_v31  ;;  %12445 = vmatpush3.bf16.msra.mxu1 %v7037_v53  ;;  %v12999_v53 = vld [vmem:[%s14815_s15 + $0x8] sm:$0xff]  }
0x1914   : > { %12439 = vmatpush3.bf16.msra.mxu0 %v6991_v32  ;;  %12440 = vmatprep.mubr.msk.bf16.mxu0 %vm13223_vm0, %v13222_v1  ;;  %v13001_v31 = vld [vmem:[%s14816_s3 + $0x8] sm:$0xff]  }
0x1915   : > { %12446 = vmatprep.mubr.msk.bf16.mxu1 %vm13223_vm0, %v13222_v1  ;;  %12450 = vmatprep.subr.bf16.mxu0 %v13222_v1 }
0x1916   : > { %12456 = vmatprep.subr.bf16.mxu1 %v13222_v1 }
0x19dd   : > { %v6885_v36 = vpop.f32.mrb[184].mxu1 }
0x19de   : > { %v6839_v42 = vpop.f32.mrb[184].mxu0  ;;  %v6984_v43 = vpack.c.bf16 %v6885_v36, %v6885_v36  ;;  %v12424_v44 = vpop.f32.mrb[185].mxu1 }
0x19df   : > { %v6983_v46 = vpack.c.bf16 %v6839_v42, %v6839_v42  ;;  %v12418_v40 = vpop.f32.mrb[185].mxu0  ;;  %v6888_v47 = vpop.f32.mrb[186].mxu1  ;;  %v11044_v42 = vld [vmem:[%s14817_s5] ss:$0 sm:$0xff]  ;;  %v11045_v44 = vld [vmem:[%s14817_s5 + $0x1] ss:$0 sm:$0xff] }
0x19e0   : > { %v6842_v48 = vpop.f32.mrb[186].mxu0  ;;  %v12425_v49 = vpop.f32.mrb[187].mxu1  ;;  %12447 = vmatmul.mubr.msk.bf16.vlgmr.msra.gmra.mrb[192].mxu1 %vm1822_vm2, %v6984_v43  ;;  %v13002_v47 = vld [vmem:[%s14816_s3 + $0x10] sm:$0xff]  }
0x19e1   : > { %v12419_v50 = vpop.f32.mrb[187].mxu0  ;;  %12441 = vmatmul.mubr.msk.bf16.vlgmr.msra.gmra.mrb[192].mxu0 %vm1822_vm2, %v6983_v46  ;;  %12457 = vmatpush3.bf16.msra.mxu1 %v7129_v45  ;;  %v11046_v48 = vld [vmem:[%s14818_s8] ss:$0 sm:$0xff] }
0x19e2   : > { %12451 = vmatpush3.bf16.msra.mxu0 %v7083_v41  ;;  %12452 = vmatprep.mubr.msk.bf16.mxu0 %vm13223_vm0, %v13222_v1  ;;  %v13003_v41 = vld [vmem:[%s14816_s3 + $0x18] sm:$0xff]  }
0x19e3   : > { %12458 = vmatprep.mubr.msk.bf16.mxu1 %vm13223_vm0, %v13222_v1  ;;  %12462 = vmatprep.subr.bf16.mxu0 %v13222_v1 }
0x19e4   : > { %12470 = vmatprep.subr.bf16.mxu1 %v13222_v1 }
0x19e5   : > { %v6977_v52 = vpop.f32.mrb[188].mxu1 }
0x19e6   : > { %v6931_v39 = vpop.f32.mrb[188].mxu0  ;;  %v6986_v54 = vpack.c.bf16 %v6977_v52, %v6977_v52  ;;  %v12436_v57 = vpop.f32.mrb[189].mxu1 }
0x19e7   : > { %v6985_v58 = vpack.c.bf16 %v6931_v39, %v6931_v39  ;;  %v12430_v33 = vpop.f32.mrb[189].mxu0  ;;  %v6980_v59 = vpop.f32.mrb[190].mxu1 }
0x19e8   : > { %v6934_v60 = vpop.f32.mrb[190].mxu0  ;;  %v12437_v61 = vpop.f32.mrb[191].mxu1  ;;  %12459 = vmatmul.mubr.msk.bf16.vlgmr.msra.gmra.mrb[196].mxu1 %vm1822_vm2, %v6986_v54  ;;  %v11050_v33 = vld [vmem:[%s14819_s9] ss:$0 sm:$0xff] }
0x19e9   : > { %v12431_v62 = vpop.f32.mrb[191].mxu0  ;;  %12453 = vmatmul.mubr.msk.bf16.vlgmr.msra.gmra.mrb[196].mxu0 %vm1822_vm2, %v6985_v58  ;;  %12478 = vmatprep.mubr.msk.bf16.mxu1 %vm13223_vm0, %v13222_v1 }
0x19ea   : > { %12466 = vmatprep.mubr.msk.bf16.mxu0 %vm13223_vm0, %v13222_v1  ;;  %12463 = vmatpush3.bf16.msra.mxu0 %v12998_v29  ;;  %v13018_v29 = vld [vmem:[%s13298_s6 + $0x118] sm:$0xff]  }
0x19eb   : > { %12464 = vmatprep.subr.bf16.mxu0 %v13222_v1 }
0x19ee   : > { %12465 = vmatpush3.bf16.msra.mxu0 %v12999_v53  ;;  %v13019_v53 = vld [vmem:[%s13298_s6 + $0x148] sm:$0xff]  }
0x19ef   : > { %12482 = vmatprep.subr.bf16.mxu0 %v13222_v1 }
0x1ab3   : > { %v7073_v63 = vpop.f32.mrb[192].mxu1 }
0x1ab4   : > { %v7027_v0 = vpop.f32.mrb[192].mxu0  ;;  %v7172_v56 = vsel %vm1114_vm1, %v7073_v63, 0.0  ;;  %v12448_v3 = vpop.f32.mrb[193].mxu1 }
0x1ab5   : > { %v7171_v4 = vsel %vm1114_vm1, %v7027_v0, 0.0  ;;  %v12442_v5 = vpop.f32.mrb[193].mxu0  ;;  %v7076_v6 = vpop.f32.mrb[194].mxu1 }
0x1ab6   : > { %v7173_v7 = vadd.f32 %v7172_v56, %v7171_v4  ;;  %v7030_v8 = vpop.f32.mrb[194].mxu0  ;;  %v12449_v9 = vpop.f32.mrb[195].mxu1 }
0x1ab7   : > { %v12443_v10 = vpop.f32.mrb[195].mxu0  ;;  %v13004_v8 = vld [vmem:[%s13298_s6 + $0xc0] sm:$0xff]  }
0x1ab8   : > { %v13005_v9 = vld [vmem:[%s13298_s6 + $0xe0] sm:$0xff]   ;;  %v13006_v10 = vld [vmem:[%s13298_s6 + $0xc8] sm:$0xff]  }
0x1abb   : > { %v7165_v55 = vpop.f32.mrb[196].mxu1 }
0x1abc   : > { %v7119_v11 = vpop.f32.mrb[196].mxu0  ;;  %v12460_v12 = vpop.f32.mrb[197].mxu1  ;;  %v7176_v14 = vsel %vm1114_vm1, %v7165_v55, 0.0  ;;  %v13007_v55 = vld [vmem:[%s13298_s6 + $0xe8] sm:$0xff]  }
0x1abd   : > { %v7174_v13 = vsel %vm1114_vm1, %v7119_v11, 0.0  ;;  %v12454_v15 = vpop.f32.mrb[197].mxu0  ;;  %v7168_v18 = vpop.f32.mrb[198].mxu1 }
0x1abe   : > { %v7175_v19 = vadd.f32 %v7174_v13, %v7173_v7  ;;  %v7122_v20 = vpop.f32.mrb[198].mxu0  ;;  %v12461_v21 = vpop.f32.mrb[199].mxu1  ;;  %v11056_v18 = vld [vmem:[%s14820_s13] ss:$0 sm:$0xff] }
0x1abf   : > { %v12455_v22 = vpop.f32.mrb[199].mxu0  ;;  %v11057_v20 = vld [vmem:[%s14820_s13 + $0x1] ss:$0 sm:$0xff] }
0x1ac0   : > { %v7177_v23 = vadd.f32 %v7176_v14, %v7175_v19  ;;  %v13008_v14 = vld [vmem:[%s13298_s6 + $0xd0] sm:$0xff]   ;;  %v13009_v22 = vld [vmem:[%s13298_s6 + $0x100] sm:$0xff]  }
0x1ac2   : > { %v7184_v2 = vadd.f32 %v11043_v38, %v7177_v23 }
0x1ac4   : > { %v7187_v17 = vadd.f32 %v7184_v2, %v14104_v30  ;;  %v13000_v30 = vld [vmem:[%s14816_s3] sm:$0xff]   ;;  %v13010_v2 = vld [vmem:[%s13298_s6 + $0xd8] sm:$0xff]  }
0x1ac5   : > { %12471 = vmatpush3.bf16.msra.mxu1 %v13000_v30  ;;  %v13020_v30 = vld [vmem:[%s13298_s6 + $0x130] sm:$0xff]  }
0x1ac6   : > { %v7188_v16 = vsel %vm1114_vm1, %v7187_v17, 0.0  ;;  %12472 = vmatprep.subr.bf16.mxu1 %v13222_v1 }
0x1ac7   : > { %7189 = vadd.xlane.f32.xlu0 %v7188_v16  ;;  %v13012_v16 = vld [vmem:[%s13298_s6 + $0xf0] sm:$0xff]  }
0x1ac9   : > { %12473 = vmatpush3.bf16.msra.mxu1 %v13001_v31  ;;  %v13021_v31 = vld [vmem:[%s13298_s6 + $0x160] sm:$0xff]  }
0x1aca   : > { %12474 = vmatprep.subr.bf16.mxu1 %v13222_v1 }
0x1acd   : > { %12475 = vmatpush3.bf16.msra.mxu1 %v13002_v47 }
0x1ace   : > { %12476 = vmatprep.subr.bf16.mxu1 %v13222_v1 }
0x1ad1   : > { %12477 = vmatpush3.bf16.msra.mxu1 %v13003_v41 }
0x1ad2   : > { %12498 = vmatprep.subr.bf16.mxu1 %v13222_v1 }
0x1b54   : > { %v7190_v37 = vpop.xlane.xlu0 %7189 }
0x1b55   : > { %v7191_v24 = vmul.f32 0.03125, %v7190_v37  ;;  %v13013_v37 = vld [vmem:[%s13298_s6 + $0x120] sm:$0xff]  }
0x1b57   : > { %v7192_v25 = vsub.f32 %v7187_v17, %v7191_v24  ;;  %v13011_v17 = vld [vmem:[%s13298_s6 + $0x108] sm:$0xff]   ;;  %v13014_v24 = vld [vmem:[%s13298_s6 + $0xf8] sm:$0xff]  }
0x1b59   : > { %v7193_v26 = vmul.f32 %v7192_v25, %v7192_v25 }
0x1b5b   : > { %v7194_v27 = vsel %vm1114_vm1, %v7193_v26, 0.0  ;;  %v13016_v26 = vld [vmem:[%s13298_s6 + $0x110] sm:$0xff]  }
0x1b5c   : > { %7195 = vadd.xlane.f32.xlu1 %v7194_v27  ;;  %v13017_v27 = vld [vmem:[%s13298_s6 + $0x140] sm:$0xff]  }
0x1be9   : > { %v7196_v32 = vpop.xlane.xlu1 %7195 }
0x1bea   : > { %v7197_v34 = vmul.f32 0.03125, %v7196_v32  ;;  %v13022_v32 = vld [vmem:[%s13298_s6 + $0x138] sm:$0xff]  }
0x1bec   : > { %v7198_v35 = vadd.f32 1e-05, %v7197_v34  ;;  %v13023_v34 = vld [vmem:[%s13298_s6 + $0x168] sm:$0xff]  }
0x1bee   : > { %13136 = vrsqrt.f32 %v7198_v35  ;;  %v13024_v35 = vld [vmem:[%s13298_s6 + $0x150] sm:$0xff]  }
0x1bf8   : > { %v13137_v36 = vpop.eup %13136 }
0x1bf9   : > { %v7200_v43 = vmul.f32 %v13137_v36, %v7192_v25  ;;  %v13015_v25 = vld [vmem:[%s13298_s6 + $0x128] sm:$0xff]   ;;  %v13025_v36 = vld [vmem:[%s13298_s6 + $0x158] sm:$0xff]  }
0x1bfb   : > { %v7207_v45 = vmul.f32 %v11044_v42, %v7200_v43  ;;  %v13026_v42 = vld [vmem:[%s13298_s6 + $0x170] sm:$0xff]   ;;  %v13027_v43 = vld [vmem:[%s13298_s6 + $0x178] sm:$0xff]  }
0x1bfd   : > { %v7214_v46 = vadd.f32 %v11045_v44, %v7207_v45 }
0x1bff   : > { %v7220_v40 = vpack.c.bf16 %v7214_v46, %v7214_v46 }
0x1c01   : > { %12467 = vmatmul.mubr.msk.bf16.vlgmr.msra.gmra.mrb[200].mxu0 %vm1114_vm1, %v7220_v40 }
0x1c02   : > { %12486 = vmatprep.mubr.msk.bf16.mxu0 %vm13223_vm0, %v13222_v1  ;;  %12483 = vmatpush3.bf16.msra.mxu0 %v13004_v8 }
0x1c03   : > { %12484 = vmatprep.subr.bf16.mxu0 %v13222_v1 }
0x1c06   : > { %12485 = vmatpush3.bf16.msra.mxu0 %v13006_v10 }
0x1c07   : > { %12490 = vmatprep.subr.bf16.mxu0 %v13222_v1 }
0x1cd4   : > { %v7276_v49 = vpop.f32.mrb[200].mxu0 }
0x1cd5   : > { %v7277_v50 = vadd.f32 %v11046_v48, %v7276_v49  ;;  %v12468_v52 = vpop.f32.mrb[201].mxu0 }
0x1cd6   : > { %v7279_v39 = vpop.f32.mrb[202].mxu0 }
0x1cd7   : > { %v7282_v54 = vmax.f32 %v7277_v50, 0.0  ;;  %v12469_v57 = vpop.f32.mrb[203].mxu0  ;;  %v11151_v50 = vld [vmem:[%s13303_s12 + $0x10] ss:$0 sm:$0xff] }
0x1cd9   : > { %v7292_v58 = vpack.c.bf16 %v7282_v54, %v7282_v54 }
0x1cdb   : > { %12479 = vmatmul.mubr.msk.bf16.vlgmr.msra.gmra.mrb[200].mxu1 %vm2589_vm4, %v7292_v58 }
0x1cdc   : > { %12502 = vmatprep.mubr.msk.bf16.mxu1 %vm13223_vm0, %v13222_v1  ;;  %12499 = vmatpush3.bf16.msra.mxu1 %v13005_v9 }
0x1cdd   : > { %12500 = vmatprep.subr.bf16.mxu1 %v13222_v1 }
0x1ce0   : > { %12501 = vmatpush3.bf16.msra.mxu1 %v13007_v55 }
0x1ce1   : > { %12514 = vmatprep.subr.bf16.mxu1 %v13222_v1 }
0x1dae   : > { %v7360_v59 = vpop.f32.mrb[200].mxu1 }
0x1daf   : > { %v7361_v60 = vadd.f32 %v11050_v33, %v7360_v59  ;;  %v12480_v61 = vpop.f32.mrb[201].mxu1 }
0x1db0   : > { %v7363_v62 = vpop.f32.mrb[202].mxu1 }
0x1db1   : > { %v12481_v63 = vpop.f32.mrb[203].mxu1  ;;  %v7368_v0 = vadd.f32 %v7361_v60, %v7214_v46 }
0x1db2   : > { %v11135_v63 = vld [vmem:[%s13303_s12 + $0xc] ss:$0 sm:$0xff] }
0x1db3   : > { %v7369_v56 = vsel %vm1114_vm1, %v7368_v0, 0.0 }
0x1db4   : > { %7370 = vadd.xlane.f32.xlu0 %v7369_v56  ;;  %v11153_v56 = vld [vmem:[%s13303_s12 + $0x12] ss:$0 sm:$0xff] }
0x1e41   : > { %v7371_v3 = vpop.xlane.xlu0 %7370 }
0x1e42   : > { %v7372_v4 = vmul.f32 0.03125, %v7371_v3 }
0x1e44   : > { %v7373_v5 = vsub.f32 %v7368_v0, %v7372_v4 }
0x1e46   : > { %v7374_v6 = vmul.f32 %v7373_v5, %v7373_v5 }
0x1e48   : > { %v7375_v7 = vsel %vm1114_vm1, %v7374_v6, 0.0 }
0x1e49   : > { %7376 = vadd.xlane.f32.xlu1 %v7375_v7 }
0x1ed6   : > { %v7377_v11 = vpop.xlane.xlu1 %7376 }
0x1ed7   : > { %v7378_v12 = vmul.f32 0.03125, %v7377_v11 }
0x1ed9   : > { %v7379_v13 = vadd.f32 1e-05, %v7378_v12 }
0x1edb   : > { %13138 = vrsqrt.f32 %v7379_v13 }
0x1ee5   : > { %v13139_v15 = vpop.eup %13138 }
0x1ee6   : > { %v7381_v19 = vmul.f32 %v13139_v15, %v7373_v5  ;;  %v11137_v15 = vld [vmem:[%s13303_s12 + $0xe] ss:$0 sm:$0xff] }
0x1ee8   : > { %v7388_v21 = vmul.f32 %v11056_v18, %v7381_v19  ;;  %v11152_v19 = vld [vmem:[%s13303_s12 + $0x11] ss:$0 sm:$0xff] }
0x1eea   : > { %v14329_v38 = vadd.f32 %v11057_v20, %v7388_v21  ;;  %v11167_v20 = vld [vmem:[%s13303_s12 + $0x14] ss:$0 sm:$0xff] }
0x1eec   : > { %v14335_v23 = vpack.c.bf16 %v14329_v38, %v14329_v38 }
0x1eee   : > { %12487 = vmatmul.mubr.msk.bf16.vlgmr.msra.gmra.mrb[204].mxu0 %vm1114_vm1, %v14335_v23  ;;  %12503 = vmatmul.mubr.msk.bf16.vlgmr.msra.gmra.mrb[204].mxu1 %vm1114_vm1, %v14335_v23 }
0x1eef   : > { %12491 = vmatpush3.bf16.msra.mxu0 %v13008_v14  ;;  %12515 = vmatpush3.bf16.msra.mxu1 %v13009_v22 }
0x1ef0   : > { %12492 = vmatprep.subr.bf16.mxu0 %v13222_v1  ;;  %12516 = vmatprep.subr.bf16.mxu1 %v13222_v1 }
0x1ef1   : > { %12494 = vmatprep.mubr.msk.bf16.mxu0 %vm13223_vm0, %v13222_v1  ;;  %12518 = vmatprep.mubr.msk.bf16.mxu1 %vm13223_vm0, %v13222_v1 }
0x1ef3   : > { %12493 = vmatpush3.bf16.msra.mxu0 %v13010_v2  ;;  %12517 = vmatpush3.bf16.msra.mxu1 %v13011_v17 }
0x1ef4   : > { %12506 = vmatprep.subr.bf16.mxu0 %v13222_v1  ;;  %12530 = vmatprep.subr.bf16.mxu1 %v13222_v1 }
0x1ef6   : > { %12495 = vmatmul.mubr.msk.bf16.vlgmr.msra.gmra.mrb[208].mxu0 %vm1114_vm1, %v14335_v23  ;;  %12519 = vmatmul.mubr.msk.bf16.vlgmr.msra.gmra.mrb[208].mxu1 %vm1114_vm1, %v14335_v23 }
0x1ef7   : > { %12507 = vmatpush3.bf16.msra.mxu0 %v13012_v16  ;;  %12531 = vmatpush3.bf16.msra.mxu1 %v13013_v37 }
0x1ef8   : > { %12508 = vmatprep.subr.bf16.mxu0 %v13222_v1  ;;  %12532 = vmatprep.subr.bf16.mxu1 %v13222_v1 }
0x1ef9   : > { %12510 = vmatprep.mubr.msk.bf16.mxu0 %vm13223_vm0, %v13222_v1  ;;  %12534 = vmatprep.mubr.msk.bf16.mxu1 %vm13223_vm0, %v13222_v1 }
0x1efb   : > { %12509 = vmatpush3.bf16.msra.mxu0 %v13014_v24  ;;  %12533 = vmatpush3.bf16.msra.mxu1 %v13015_v25 }
0x1efc   : > { %12522 = vmatprep.subr.bf16.mxu0 %v13222_v1  ;;  %12546 = vmatprep.subr.bf16.mxu1 %v13222_v1 }
0x1efe   : > { %12511 = vmatmul.mubr.msk.bf16.vlgmr.msra.gmra.mrb[212].mxu0 %vm1114_vm1, %v14335_v23  ;;  %12535 = vmatmul.mubr.msk.bf16.vlgmr.msra.gmra.mrb[212].mxu1 %vm1114_vm1, %v14335_v23 }
0x1eff   : > { %12523 = vmatpush3.bf16.msra.mxu0 %v13016_v26  ;;  %12547 = vmatpush3.bf16.msra.mxu1 %v13017_v27 }
0x1f00   : > { %12524 = vmatprep.subr.bf16.mxu0 %v13222_v1  ;;  %12548 = vmatprep.subr.bf16.mxu1 %v13222_v1 }
0x1f01   : > { %12526 = vmatprep.mubr.msk.bf16.mxu0 %vm13223_vm0, %v13222_v1  ;;  %12550 = vmatprep.mubr.msk.bf16.mxu1 %vm13223_vm0, %v13222_v1 }
0x1f03   : > { %12525 = vmatpush3.bf16.msra.mxu0 %v13018_v29  ;;  %12549 = vmatpush3.bf16.msra.mxu1 %v13019_v53 }
0x1f04   : > { %12538 = vmatprep.subr.bf16.mxu0 %v13222_v1  ;;  %12562 = vmatprep.subr.bf16.mxu1 %v13222_v1 }
0x1f06   : > { %12527 = vmatmul.mubr.msk.bf16.vlgmr.msra.gmra.mrb[216].mxu0 %vm1114_vm1, %v14335_v23  ;;  %12551 = vmatmul.mubr.msk.bf16.vlgmr.msra.gmra.mrb[216].mxu1 %vm1114_vm1, %v14335_v23 }
0x1f07   : > { %12539 = vmatpush3.bf16.msra.mxu0 %v13020_v30  ;;  %12563 = vmatpush3.bf16.msra.mxu1 %v13021_v31  ;;  %v11136_v30 = vld [vmem:[%s13303_s12 + $0xd] ss:$0 sm:$0xff] }
0x1f08   : > { %12540 = vmatprep.subr.bf16.mxu0 %v13222_v1  ;;  %12564 = vmatprep.subr.bf16.mxu1 %v13222_v1 }
0x1f09   : > { %12542 = vmatprep.mubr.msk.bf16.mxu0 %vm13223_vm0, %v13222_v1  ;;  %12566 = vmatprep.mubr.msk.bf16.mxu1 %vm13223_vm0, %v13222_v1 }
0x1f0b   : > { %12541 = vmatpush3.bf16.msra.mxu0 %v13022_v32  ;;  %12565 = vmatpush3.bf16.msra.mxu1 %v13023_v34  ;;  %v11154_v34 = vld [vmem:[%s13303_s12 + $0x13] ss:$0 sm:$0xff] }
0x1f0c   : > { %12554 = vmatprep.subr.bf16.mxu0 %v13222_v1  ;;  %12578 = vmatprep.subr.bf16.mxu1 %v13222_v1 }
0x1f0e   : > { %12543 = vmatmul.mubr.msk.bf16.vlgmr.msra.gmra.mrb[220].mxu0 %vm1114_vm1, %v14335_v23  ;;  %12567 = vmatmul.mubr.msk.bf16.vlgmr.msra.gmra.mrb[220].mxu1 %vm1114_vm1, %v14335_v23 }
0x1f0f   : > { %12555 = vmatpush3.bf16.msra.mxu0 %v13024_v35  ;;  %12558 = vmatprep.mubr.msk.bf16.mxu0 %vm13223_vm0, %v13222_v1 }
0x1f10   : > { %12556 = vmatprep.subr.bf16.mxu0 %v13222_v1  ;;  %12580 = vmatprep.mubr.msk.bf16.mxu1 %vm13223_vm0, %v13222_v1 }
0x1f13   : > { %12557 = vmatpush3.bf16.msra.mxu0 %v13025_v36 }
0x1f14   : > { %12570 = vmatprep.subr.bf16.mxu0 %v13222_v1 }
0x1f16   : > { %12559 = vmatmul.mubr.msk.bf16.vlgmr.msra.gmra.mrb[224].mxu0 %vm1114_vm1, %v14335_v23 }
0x1f17   : > { %12571 = vmatpush3.bf16.msra.mxu0 %v13026_v42  ;;  %12574 = vmatprep.mubr.msk.bf16.mxu0 %vm13223_vm0, %v13222_v1 }
0x1f18   : > { %12572 = vmatprep.subr.bf16.mxu0 %v13222_v1 }
0x1f1b   : > { %12573 = vmatpush3.bf16.msra.mxu0 %v13027_v43 }
0x1f1c   : > { %12584 = vmatprep.subr.bf16.mxu0 %v13222_v1 }
0x1f1e   : > { %12575 = vmatmul.mubr.msk.bf16.vlgmr.msra.gmra.mrb[228].mxu0 %vm1114_vm1, %v14335_v23 }
0x1f1f   : > { %12586 = vmatprep.mubr.msk.bf16.mxu0 %vm13223_vm0, %v13222_v1 }
0x1fc1   : > { %v7515_v44 = vpop.f32.mrb[204].mxu0  ;;  %v7619_v45 = vpop.f32.mrb[204].mxu1 }
0x1fc2   : > { %v12488_v46 = vpop.f32.mrb[205].mxu0  ;;  %v12504_v40 = vpop.f32.mrb[205].mxu1  ;;  %v7701_v3 = vadd.f32 %v11135_v63, %v7515_v44  ;;  %v7703_v21 = vadd.f32 %v11137_v15, %v7619_v45 }
0x1fc3   : > { %v7518_v47 = vpop.f32.mrb[206].mxu0  ;;  %v7622_v41 = vpop.f32.mrb[206].mxu1 }
0x1fc4   : > { %v12489_v48 = vpop.f32.mrb[207].mxu0  ;;  %v12505_v49 = vpop.f32.mrb[207].mxu1  ;;  %v8177_v55 = vpack.c.bf16 %v7701_v3, %v7701_v3  ;;  %v8179_v25 = vpack.c.bf16 %v7703_v21, %v7703_v21 }
0x1fc9   : > { %v7567_v52 = vpop.f32.mrb[208].mxu0  ;;  %v7751_v39 = vpop.f32.mrb[208].mxu1 }
0x1fca   : > { %v7937_v54 = vadd.f32 %v11151_v50, %v7751_v39  ;;  %v12496_v57 = vpop.f32.mrb[209].mxu0  ;;  %v12520_v58 = vpop.f32.mrb[209].mxu1  ;;  %v7702_v35 = vadd.f32 %v11136_v30, %v7567_v52  ;;  %v11138_v50 = vld [vmem:[%s13303_s12 + $0xf] ss:$0 sm:$0xff]  ;;  %v11168_v39 = vld [vmem:[%s13303_s12 + $0x15] ss:$0 sm:$0xff] }
0x1fcb   : > { %v7570_v33 = vpop.f32.mrb[210].mxu0  ;;  %v7754_v59 = vpop.f32.mrb[210].mxu1 }
0x1fcc   : > { %v8181_v60 = vpack.c.bf16 %v7937_v54, %v7937_v54  ;;  %v12497_v61 = vpop.f32.mrb[211].mxu0  ;;  %v12521_v62 = vpop.f32.mrb[211].mxu1  ;;  %v8178_v47 = vpack.c.bf16 %v7702_v35, %v7702_v35 }
0x1fce   : > { %v8189_v0 = vsel %vm1822_vm2, %v8181_v60, 0 }
0x1fcf   : > { %12579 = vmatpush3.bf16.xpose.msra.mxu1 %v8189_v0 }
0x1fd0   : > { %12590 = vmatprep.subr.bf16.mxu1 %v13222_v1 }
0x1fd1   : > { %v7671_v4 = vpop.f32.mrb[212].mxu0  ;;  %v7855_v5 = vpop.f32.mrb[212].mxu1 }
0x1fd2   : > { %v7939_v6 = vadd.f32 %v11153_v56, %v7855_v5  ;;  %v12512_v7 = vpop.f32.mrb[213].mxu0  ;;  %v12536_v8 = vpop.f32.mrb[213].mxu1  ;;  %v7704_v54 = vadd.f32 %v11138_v50, %v7671_v4 }
0x1fd3   : > { %v7674_v9 = vpop.f32.mrb[214].mxu0  ;;  %v7858_v10 = vpop.f32.mrb[214].mxu1 }
0x1fd4   : > { %v8183_v11 = vpack.c.bf16 %v7939_v6, %v7939_v6  ;;  %v12513_v12 = vpop.f32.mrb[215].mxu0  ;;  %v12537_v13 = vpop.f32.mrb[215].mxu1  ;;  %v8180_v60 = vpack.c.bf16 %v7704_v54, %v7704_v54 }
0x1fd6   : > { %v8281_v18 = vsel %vm1822_vm2, %v8183_v11, 0  ;;  %12581 = vmatmul.mubr.msk.bf16.vlgmr.msra.gmra.mrb[224].mxu1 %vm1822_vm2, %v8177_v55 }
0x1fd7   : > { %12591 = vmatpush3.bf16.xpose.msra.mxu1 %v8281_v18  ;;  %12592 = vmatprep.mubr.msk.bf16.mxu1 %vm13223_vm0, %v13222_v1 }
0x1fd8   : > { %12602 = vmatprep.subr.bf16.mxu1 %v13222_v1 }
0x1fd9   : > { %v7803_v14 = vpop.f32.mrb[216].mxu0  ;;  %v7987_v22 = vpop.f32.mrb[216].mxu1 }
0x1fda   : > { %v7938_v23 = vadd.f32 %v11152_v19, %v7803_v14  ;;  %v8173_v2 = vadd.f32 %v11167_v20, %v7987_v22  ;;  %v12528_v17 = vpop.f32.mrb[217].mxu0  ;;  %v12552_v16 = vpop.f32.mrb[217].mxu1 }
0x1fdb   : > { %v7806_v37 = vpop.f32.mrb[218].mxu0  ;;  %v7990_v24 = vpop.f32.mrb[218].mxu1 }
0x1fdc   : > { %v8182_v26 = vpack.c.bf16 %v7938_v23, %v7938_v23  ;;  %v8425_v27 = vpack.c.bf16 %v8173_v2, %v8173_v2  ;;  %v12529_v29 = vpop.f32.mrb[219].mxu0  ;;  %v12553_v53 = vpop.f32.mrb[219].mxu1 }
0x1fde   : > { %v8235_v31 = vsel %vm1822_vm2, %v8182_v26, 0  ;;  %v8433_v32 = vsel %vm2066_vm3, %v8425_v27, 0  ;;  %12593 = vmatmul.mubr.msk.bf16.vlgmr.msra.gmra.mrb[228].mxu1 %vm1822_vm2, %v8179_v25 }
0x1fdf   : > { %12585 = vmatpush3.bf16.xpose.msra.mxu0 %v8235_v31  ;;  %12603 = vmatpush3.bf16.msra.mxu1 %v8433_v32 }
0x1fe0   : > { %12596 = vmatprep.subr.bf16.mxu0 %v13222_v1  ;;  %12604 = vmatprep.mubr.msk.bf16.mxu1 %vm13223_vm0, %v13222_v1 }
0x1fe1   : > { %v7907_v36 = vpop.f32.mrb[220].mxu0  ;;  %v14444_v42 = vpop.f32.mrb[220].mxu1  ;;  %12614 = vmatprep.subr.bf16.mxu1 %v13222_v1 }
0x1fe2   : > { %v7940_v43 = vadd.f32 %v11154_v34, %v7907_v36  ;;  %v12544_v44 = vpop.f32.mrb[221].mxu0  ;;  %v12568_v45 = vpop.f32.mrb[221].mxu1 }
0x1fe3   : > { %v7910_v46 = vpop.f32.mrb[222].mxu0  ;;  %v8094_v40 = vpop.f32.mrb[222].mxu1 }
0x1fe4   : > { %v8184_v41 = vpack.c.bf16 %v7940_v43, %v7940_v43  ;;  %v12545_v48 = vpop.f32.mrb[223].mxu0  ;;  %v12569_v49 = vpop.f32.mrb[223].mxu1 }
0x1fe6   : > { %v8327_v52 = vsel %vm1822_vm2, %v8184_v41, 0  ;;  %12587 = vmatmul.mubr.msk.bf16.vlgmr.msra.gmra.mrb[232].mxu0 %vm1822_vm2, %v8178_v47 }
0x1fe7   : > { %12597 = vmatpush3.bf16.xpose.msra.mxu0 %v8327_v52  ;;  %12598 = vmatprep.mubr.msk.bf16.mxu0 %vm13223_vm0, %v13222_v1 }
0x1fe8   : > { %12608 = vmatprep.subr.bf16.mxu0 %v13222_v1 }
0x1fe9   : > { %v8039_v57 = vpop.f32.mrb[224].mxu0 }
0x1fea   : > { %v8174_v58 = vadd.f32 %v11168_v39, %v8039_v57  ;;  %v12560_v33 = vpop.f32.mrb[225].mxu0 }
0x1feb   : > { %v8042_v59 = vpop.f32.mrb[226].mxu0 }
0x1fec   : > { %v8426_v61 = vpack.c.bf16 %v8174_v58, %v8174_v58  ;;  %v12561_v62 = vpop.f32.mrb[227].mxu0  ;;  %v11169_v58 = vld [vmem:[%s13303_s12 + $0x16] ss:$0 sm:$0xff] }
0x1fed   : > { %v8175_v33 = vadd.f32 %v11169_v58, %v14444_v42 }
0x1fee   : > { %v8479_v63 = vsel %vm2066_vm3, %v8426_v61, 0  ;;  %12599 = vmatmul.mubr.msk.bf16.vlgmr.msra.gmra.mrb[236].mxu0 %vm1822_vm2, %v8180_v60 }
0x1fef   : > { %12609 = vmatpush3.bf16.msra.mxu0 %v8479_v63  ;;  %12610 = vmatprep.mubr.msk.bf16.mxu0 %vm13223_vm0, %v13222_v1  ;;  %v8427_v61 = vpack.c.bf16 %v8175_v33, %v8175_v33 }
0x1ff0   : > { %12620 = vmatprep.subr.bf16.mxu0 %v13222_v1 }
0x1ff1   : > { %v14459_v0 = vpop.f32.mrb[228].mxu0 }
0x1ff2   : > { %v12576_v56 = vpop.f32.mrb[229].mxu0 }
0x1ff3   : > { %v8146_v3 = vpop.f32.mrb[230].mxu0  ;;  %v8525_v56 = vsel %vm2066_vm3, %v8427_v61, 0 }
0x1ff4   : > { %v12577_v4 = vpop.f32.mrb[231].mxu0 }
0x20a9   : > { %v8225_v5 = vpop.f32.mrb[224].mxu1 }
0x20aa   : > { %v8369_v6 = vmul.f32 0.35355338, %v8225_v5  ;;  %v12582_v7 = vpop.f32.mrb[225].mxu1  ;;  %v11170_v5 = vld [vmem:[%s13303_s12 + $0x17] ss:$0 sm:$0xff] }
0x20ab   : > { %v8228_v8 = vpop.f32.mrb[226].mxu1  ;;  %v8176_v7 = vadd.f32 %v11170_v5, %v14459_v0 }
0x20ac   : > { %v12583_v9 = vpop.f32.mrb[227].mxu1  ;;  %v8373_v10 = vadd.f32 %v8369_v6, %v14008_v28 }
0x20ae   : > { %v8377_v55 = vsel %vm1822_vm2, %v8373_v10, -inf }
0x20af   : > { %8378 = vmax.xlane.f32.xlu0 %v8377_v55 }
0x20b1   : > { %v8317_v11 = vpop.f32.mrb[228].mxu1 }
0x20b2   : > { %v8371_v12 = vmul.f32 0.35355338, %v8317_v11  ;;  %v12594_v13 = vpop.f32.mrb[229].mxu1 }
0x20b3   : > { %v8320_v15 = vpop.f32.mrb[230].mxu1 }
0x20b4   : > { %v12595_v18 = vpop.f32.mrb[231].mxu1  ;;  %v8375_v19 = vadd.f32 %v8371_v12, %v14008_v28 }
0x20b5   : > { %v11118_v18 = vld [vmem:[%s14805_s16 + $0x10] sm:$0xf] }
0x20b6   : > { %v8383_v20 = vsel %vm1822_vm2, %v8375_v19, -inf }
0x20b7   : > { %8384 = vmax.xlane.f32.xlu0 %v8383_v20  ;;  %v11119_v20 = vld [vmem:[%s14805_s16 + $0x14] sm:$0xf] }
0x20b9   : > { %v8271_v21 = vpop.f32.mrb[232].mxu0 }
0x20ba   : > { %v8370_v14 = vmul.f32 0.35355338, %v8271_v21  ;;  %v12588_v22 = vpop.f32.mrb[233].mxu0  ;;  %v8667_v21 = vsel %vm2066_vm3, %v11119_v20, 0  ;;  %v13031_v20 = vld [vmem:[%s14807_s22 + $0x58] sm:$0xff]  }
0x20bb   : > { %v8274_v23 = vpop.f32.mrb[234].mxu0 }
0x20bc   : > { %v12589_v2 = vpop.f32.mrb[235].mxu0  ;;  %v8374_v17 = vadd.f32 %v8370_v14, %v14008_v28  ;;  %v11120_v14 = vld [vmem:[%s14805_s16 + $0x18] sm:$0xf] }
0x20be   : > { %v8380_v16 = vsel %vm1822_vm2, %v8374_v17, -inf }
0x20bf   : > { %8381 = vmax.xlane.f32.xlu1 %v8380_v16 }
0x20c1   : > { %v8363_v37 = vpop.f32.mrb[236].mxu0 }
0x20c2   : > { %v8372_v24 = vmul.f32 0.35355338, %v8363_v37  ;;  %v12600_v25 = vpop.f32.mrb[237].mxu0 }
0x20c3   : > { %v8366_v26 = vpop.f32.mrb[238].mxu0 }
0x20c4   : > { %v12601_v27 = vpop.f32.mrb[239].mxu0  ;;  %v8376_v29 = vadd.f32 %v8372_v24, %v14008_v28 }
0x20c6   : > { %v8386_v53 = vsel %vm1822_vm2, %v8376_v29, -inf }
0x20c7   : > { %8387 = vmax.xlane.f32.xlu1 %v8386_v53  ;;  %v11121_v53 = vld [vmem:[%s14805_s16 + $0x1c] sm:$0xf] }
0x213c   : > { %v8379_v30 = vpop.xlane.xlu0 %8378 }
0x213d   : > { %v8389_v31 = vsub.f32 %v8373_v10, %v8379_v30  ;;  %v8428_v10 = vpack.c.bf16 %v8176_v7, %v8176_v7 }
0x213f   : > { %v8393_v32 = vmul.f32 1.442695, %v8389_v31  ;;  %v8571_v12 = vsel %vm2066_vm3, %v8428_v10, 0 }
0x2141   : > { %13140 = vpow2.f32 %v8393_v32 }
0x2144   : > { %v8385_v34 = vpop.xlane.xlu0 %8384 }
0x2145   : > { %v8391_v35 = vsub.f32 %v8375_v19, %v8385_v34  ;;  %v8621_v19 = vsel %vm2066_vm3, %v11118_v18, 0  ;;  %v8759_v34 = vsel %vm2066_vm3, %v11121_v53, 0  ;;  %v13029_v18 = vld [vmem:[%s14807_s22 + $0x50] sm:$0xff]   ;;  %v13036_v53 = vld [vmem:[%s14810_s28 + $0x80] sm:$0xff]  }
0x2147   : > { %v8397_v36 = vmul.f32 1.442695, %v8391_v35 }
0x2149   : > { %13142 = vpow2.f32 %v8397_v36 }
0x214b   : > { %v13141_v43 = vpop.eup %13140 }
0x214c   : > { %v8382_v44 = vpop.xlane.xlu1 %8381  ;;  %v8401_v45 = vsel %vm1822_vm2, %v13141_v43, 0.0 }
0x214d   : > { %v8390_v46 = vsub.f32 %v8374_v17, %v8382_v44  ;;  %8402 = vadd.xlane.f32.xlu0 %v8401_v45  ;;  %v8713_v17 = vsel %vm2066_vm3, %v11120_v14, 0 }
0x214f   : > { %v8395_v40 = vmul.f32 1.442695, %v8390_v46 }
0x2151   : > { %13144 = vpow2.f32 %v8395_v40 }
0x2153   : > { %v13143_v28 = vpop.eup %13142 }
0x2154   : > { %v8388_v47 = vpop.xlane.xlu1 %8387  ;;  %v8407_v41 = vsel %vm1822_vm2, %v13143_v28, 0.0 }
0x2155   : > { %v8392_v48 = vsub.f32 %v8376_v29, %v8388_v47  ;;  %8408 = vadd.xlane.f32.xlu0 %v8407_v41 }
0x2157   : > { %v8399_v49 = vmul.f32 1.442695, %v8392_v48 }
0x2159   : > { %13146 = vpow2.f32 %v8399_v49 }
0x215b   : > { %v13145_v50 = vpop.eup %13144 }
0x215c   : > { %v8404_v52 = vsel %vm1822_vm2, %v13145_v50, 0.0 }
0x215d   : > { %8405 = vadd.xlane.f32.xlu1 %v8404_v52 }
0x2163   : > { %v13147_v39 = vpop.eup %13146 }
0x2164   : > { %v8410_v54 = vsel %vm1822_vm2, %v13147_v39, 0.0 }
0x2165   : > { %8411 = vadd.xlane.f32.xlu1 %v8410_v54 }
0x21da   : > { %v8403_v57 = vpop.xlane.xlu0 %8402 }
0x21db   : > { %13148 = vrcp.f32 %v8403_v57 }
0x21e2   : > { %v8409_v59 = vpop.xlane.xlu0 %8408 }
0x21e3   : > { %13150 = vrcp.f32 %v8409_v59 }
0x21e5   : > { %v13149_v60 = vpop.eup %13148 }
0x21e6   : > { %v8417_v62 = vmul.f32 %v13149_v60, %v13141_v43 }
0x21e8   : > { %v8421_v63 = vpack.c.bf16 %v8417_v62, %v8417_v62 }
0x21ea   : > { %12605 = vmatmul.mubr.msk.bf16.vlgmr.msra.gmra.mrb[232].mxu1 %vm1822_vm2, %v8421_v63  ;;  %v8406_v3 = vpop.xlane.xlu1 %8405 }
0x21eb   : > { %12615 = vmatpush3.bf16.msra.mxu1 %v8525_v56  ;;  %13152 = vrcp.f32 %v8406_v3  ;;  %12616 = vmatprep.mubr.msk.bf16.mxu1 %vm13223_vm0, %v13222_v1  ;;  %v11183_v3 = vld [vmem:[%s14806_s18 + $0x1] ss:$0 sm:$0xff] }
0x21ec   : > { %12626 = vmatprep.subr.bf16.mxu1 %v13222_v1 }
0x21ed   : > { %v13151_v42 = vpop.eup %13150 }
0x21ee   : > { %v8419_v4 = vmul.f32 %v13151_v42, %v13143_v28 }
0x21f0   : > { %v8423_v6 = vpack.c.bf16 %v8419_v4, %v8419_v4 }
0x21f2   : > { %12617 = vmatmul.mubr.msk.bf16.vlgmr.msra.gmra.mrb[236].mxu1 %vm1822_vm2, %v8423_v6  ;;  %v8412_v8 = vpop.xlane.xlu1 %8411 }
0x21f3   : > { %13154 = vrcp.f32 %v8412_v8  ;;  %12628 = vmatprep.mubr.msk.bf16.mxu1 %vm13223_vm0, %v13222_v1  ;;  %12627 = vmatpush3.bf16.msra.mxu1 %v8621_v19  ;;  %v13030_v19 = vld [vmem:[%s14807_s22 + $0x48] sm:$0xff]  }
0x21f4   : > { %12638 = vmatprep.subr.bf16.mxu1 %v13222_v1 }
0x21f5   : > { %v13153_v9 = vpop.eup %13152 }
0x21f6   : > { %v8418_v55 = vmul.f32 %v13153_v9, %v13145_v50 }
0x21f8   : > { %v8422_v11 = vpack.c.bf16 %v8418_v55, %v8418_v55 }
0x21fa   : > { %12611 = vmatmul.mubr.msk.bf16.vlgmr.msra.gmra.mrb[240].mxu0 %vm1822_vm2, %v8422_v11 }
0x21fb   : > { %12621 = vmatpush3.bf16.msra.mxu0 %v8571_v12  ;;  %12622 = vmatprep.mubr.msk.bf16.mxu0 %vm13223_vm0, %v13222_v1 }
0x21fc   : > { %12632 = vmatprep.subr.bf16.mxu0 %v13222_v1 }
0x21fd   : > { %v13155_v0 = vpop.eup %13154 }
0x21fe   : > { %v8420_v13 = vmul.f32 %v13155_v0, %v13147_v39 }
0x2200   : > { %v8424_v15 = vpack.c.bf16 %v8420_v13, %v8420_v13 }
0x2202   : > { %12623 = vmatmul.mubr.msk.bf16.vlgmr.msra.gmra.mrb[244].mxu0 %vm1822_vm2, %v8424_v15  ;;  %v13028_v15 = vld [vmem:[%s14807_s22 + $0x40] sm:$0xff]  }
0x2203   : > { %12634 = vmatprep.mubr.msk.bf16.mxu0 %vm13223_vm0, %v13222_v1  ;;  %12633 = vmatpush3.bf16.msra.mxu0 %v8667_v21 }
0x2204   : > { %12644 = vmatprep.subr.bf16.mxu0 %v13222_v1 }
0x22bd   : > { %v8469_v22 = vpop.f32.mrb[232].mxu1 }
0x22be   : > { %v8613_v23 = vpack.c.bf16 %v8469_v22, %v8469_v22  ;;  %v12606_v2 = vpop.f32.mrb[233].mxu1 }
0x22bf   : > { %v8472_v16 = vpop.f32.mrb[234].mxu1 }
0x22c0   : > { %v12607_v37 = vpop.f32.mrb[235].mxu1  ;;  %12629 = vmatmul.mubr.msk.bf16.vlgmr.msra.gmra.mrb[240].mxu1 %vm1822_vm2, %v8613_v23  ;;  %v11186_v23 = vld [vmem:[%s14808_s23 + $0x2] ss:$0 sm:$0xff] }
0x22c1   : > { %12639 = vmatpush3.bf16.msra.mxu1 %v8713_v17  ;;  %12640 = vmatprep.mubr.msk.bf16.mxu1 %vm13223_vm0, %v13222_v1  ;;  %v11187_v17 = vld [vmem:[%s14808_s23 + $0x3] ss:$0 sm:$0xff] }
0x22c2   : > { %12650 = vmatprep.subr.bf16.mxu1 %v13222_v1 }
0x22c5   : > { %v8561_v24 = vpop.f32.mrb[236].mxu1 }
0x22c6   : > { %v8615_v25 = vpack.c.bf16 %v8561_v24, %v8561_v24  ;;  %v12618_v26 = vpop.f32.mrb[237].mxu1  ;;  %v13032_v24 = vld [vmem:[%s14807_s22 + $0x60] sm:$0xff]  }
0x22c7   : > { %v8564_v27 = vpop.f32.mrb[238].mxu1 }
0x22c8   : > { %v12619_v29 = vpop.f32.mrb[239].mxu1  ;;  %12641 = vmatmul.mubr.msk.bf16.vlgmr.msra.gmra.mrb[244].mxu1 %vm1822_vm2, %v8615_v25  ;;  %v13033_v25 = vld [vmem:[%s14807_s22 + $0x70] sm:$0xff]   ;;  %v13034_v27 = vld [vmem:[%s14807_s22 + $0x68] sm:$0xff]  }
0x22c9   : > { %12654 = vmatprep.mubr.msk.bf16.mxu1 %vm13223_vm0, %v13222_v1  ;;  %12651 = vmatpush3.bf16.msra.mxu1 %v13028_v15  ;;  %v13035_v29 = vld [vmem:[%s14807_s22 + $0x78] sm:$0xff]  }
0x22ca   : > { %12652 = vmatprep.subr.bf16.mxu1 %v13222_v1 }
0x22cd   : > { %v8515_v30 = vpop.f32.mrb[240].mxu0  ;;  %12653 = vmatpush3.bf16.msra.mxu1 %v13030_v19  ;;  %v11266_v19 = vld [vmem:[%s14812_s2 + $0x5] ss:$0 sm:$0xff] }
0x22ce   : > { %v8614_v31 = vpack.c.bf16 %v8515_v30, %v8515_v30  ;;  %v12612_v32 = vpop.f32.mrb[241].mxu0  ;;  %12666 = vmatprep.subr.bf16.mxu1 %v13222_v1  ;;  %v13037_v30 = vld [vmem:[%s14810_s28 + $0x90] sm:$0xff]  }
0x22cf   : > { %v8518_v35 = vpop.f32.mrb[242].mxu0  ;;  %v13039_v32 = vld [vmem:[%s14810_s28 + $0x98] sm:$0xff]  }
0x22d0   : > { %v12613_v36 = vpop.f32.mrb[243].mxu0  ;;  %12635 = vmatmul.mubr.msk.bf16.vlgmr.msra.gmra.mrb[248].mxu0 %vm1822_vm2, %v8614_v31  ;;  %v13038_v31 = vld [vmem:[%s14810_s28 + $0x88] sm:$0xff]   ;;  %v13041_v35 = vld [vmem:[%s14810_s28 + $0xb0] sm:$0xff]  }
0x22d1   : > { %12645 = vmatpush3.bf16.msra.mxu0 %v8759_v34  ;;  %12646 = vmatprep.mubr.msk.bf16.mxu0 %vm13223_vm0, %v13222_v1  ;;  %v13040_v34 = vld [vmem:[%s14810_s28 + $0xa0] sm:$0xff]   ;;  %v13042_v36 = vld [vmem:[%s14810_s28 + $0xa8] sm:$0xff]  }
0x22d2   : > { %12658 = vmatprep.subr.bf16.mxu0 %v13222_v1 }
0x22d5   : > { %v8607_v43 = vpop.f32.mrb[244].mxu0 }
0x22d6   : > { %v8616_v44 = vpack.c.bf16 %v8607_v43, %v8607_v43  ;;  %v12624_v45 = vpop.f32.mrb[245].mxu0  ;;  %v13043_v43 = vld [vmem:[%s14810_s28 + $0xb8] sm:$0xff]  }
0x22d7   : > { %v8610_v46 = vpop.f32.mrb[246].mxu0  ;;  %v13045_v45 = vld [vmem:[%s14810_s28 + $0xd0] sm:$0xff]  }
0x22d8   : > { %v12625_v40 = vpop.f32.mrb[247].mxu0  ;;  %12647 = vmatmul.mubr.msk.bf16.vlgmr.msra.gmra.mrb[252].mxu0 %vm1822_vm2, %v8616_v44  ;;  %v13044_v44 = vld [vmem:[%s14810_s28 + $0xc0] sm:$0xff]   ;;  %v13046_v46 = vld [vmem:[%s14810_s28 + $0xc8] sm:$0xff]  }
0x22d9   : > { %12662 = vmatprep.mubr.msk.bf16.mxu0 %vm13223_vm0, %v13222_v1  ;;  %12659 = vmatpush3.bf16.msra.mxu0 %v13029_v18  ;;  %v13047_v40 = vld [vmem:[%s14810_s28 + $0xd8] sm:$0xff]   ;;  %v11265_v18 = vld [vmem:[%s14812_s2 + $0x4] ss:$0 sm:$0xff] }
0x22da   : > { %12660 = vmatprep.subr.bf16.mxu0 %v13222_v1 }
0x22dd   : > { %12661 = vmatpush3.bf16.msra.mxu0 %v13031_v20 }
0x22de   : > { %12674 = vmatprep.subr.bf16.mxu0 %v13222_v1 }
0x2393   : > { %v8657_v28 = vpop.f32.mrb[240].mxu1 }
0x2394   : > { %v12630_v47 = vpop.f32.mrb[241].mxu1  ;;  %v8801_v57 = vsel %vm1114_vm1, %v8657_v28, 0.0  ;;  %v13048_v28 = vld [vmem:[%s14810_s28 + $0xe0] sm:$0xff]  }
0x2395   : > { %v8660_v41 = vpop.f32.mrb[242].mxu1  ;;  %v13049_v47 = vld [vmem:[%s14810_s28 + $0xf0] sm:$0xff]  }
0x2396   : > { %v12631_v48 = vpop.f32.mrb[243].mxu1  ;;  %v13050_v41 = vld [vmem:[%s14810_s28 + $0xe8] sm:$0xff]  }
0x2397   : > { %v13051_v48 = vld [vmem:[%s14810_s28 + $0xf8] sm:$0xff]  }
0x239b   : > { %v8749_v49 = vpop.f32.mrb[244].mxu1 }
0x239c   : > { %v12642_v50 = vpop.f32.mrb[245].mxu1  ;;  %v8804_v61 = vsel %vm1114_vm1, %v8749_v49, 0.0 }
0x239d   : > { %v8752_v52 = vpop.f32.mrb[246].mxu1 }
0x239e   : > { %v12643_v39 = vpop.f32.mrb[247].mxu1 }
0x23a3   : > { %v8703_v54 = vpop.f32.mrb[248].mxu0 }
0x23a4   : > { %v8802_v58 = vsel %vm1114_vm1, %v8703_v54, 0.0  ;;  %v12636_v33 = vpop.f32.mrb[249].mxu0 }
0x23a5   : > { %v8803_v59 = vadd.f32 %v8802_v58, %v8801_v57  ;;  %v8706_v60 = vpop.f32.mrb[250].mxu0 }
0x23a6   : > { %v12637_v62 = vpop.f32.mrb[251].mxu0 }
0x23a7   : > { %v8805_v63 = vadd.f32 %v8804_v61, %v8803_v59 }
0x23ab   : > { %v8795_v56 = vpop.f32.mrb[252].mxu0 }
0x23ac   : > { %v8806_v42 = vsel %vm1114_vm1, %v8795_v56, 0.0  ;;  %v12648_v4 = vpop.f32.mrb[253].mxu0 }
0x23ad   : > { %v8807_v5 = vadd.f32 %v8806_v42, %v8805_v63  ;;  %v8798_v6 = vpop.f32.mrb[254].mxu0  ;;  %v11281_v42 = vld [vmem:[%s14811_s1 + $0x8] ss:$0 sm:$0xff]  ;;  %v11282_v4 = vld [vmem:[%s14811_s1 + $0x9] ss:$0 sm:$0xff] }
0x23ae   : > { %v12649_v7 = vpop.f32.mrb[255].mxu0 }
0x23af   : > { %v8814_v8 = vadd.f32 %v11183_v3, %v8807_v5 }
0x23b1   : > { %v8818_v9 = vadd.f32 %v8814_v8, %v14329_v38 }
0x23b3   : > { %v8819_v10 = vsel %vm1114_vm1, %v8818_v9, 0.0 }
0x23b4   : > { %8820 = vadd.xlane.f32.xlu0 %v8819_v10 }
0x2441   : > { %v8821_v55 = vpop.xlane.xlu0 %8820 }
0x2442   : > { %v8822_v11 = vmul.f32 0.03125, %v8821_v55 }
0x2444   : > { %v8823_v12 = vsub.f32 %v8818_v9, %v8822_v11 }
0x2446   : > { %v8824_v0 = vmul.f32 %v8823_v12, %v8823_v12 }
0x2448   : > { %v8825_v13 = vsel %vm1114_vm1, %v8824_v0, 0.0 }
0x2449   : > { %8826 = vadd.xlane.f32.xlu1 %v8825_v13 }
0x24d6   : > { %v8827_v38 = vpop.xlane.xlu1 %8826 }
0x24d7   : > { %v8828_v21 = vmul.f32 0.03125, %v8827_v38 }
0x24d9   : > { %v8829_v14 = vadd.f32 1e-05, %v8828_v21  ;;  %v11283_v21 = vld [vmem:[%s14811_s1 + $0xa] ss:$0 sm:$0xff] }
0x24db   : > { %13156 = vrsqrt.f32 %v8829_v14  ;;  %v11284_v14 = vld [vmem:[%s14811_s1 + $0xb] ss:$0 sm:$0xff] }
0x24e5   : > { %v13157_v22 = vpop.eup %13156 }
0x24e6   : > { %v8831_v2 = vmul.f32 %v13157_v22, %v8823_v12 }
0x24e8   : > { %v8838_v16 = vmul.f32 %v11186_v23, %v8831_v2 }
0x24ea   : > { %v14535_v37 = vadd.f32 %v11187_v17, %v8838_v16 }
0x24ec   : > { %v8917_v26 = vpack.c.bf16 %v14535_v37, %v14535_v37 }
0x24ee   : > { %12655 = vmatmul.mubr.msk.bf16.vlgmr.msra.gmra.mrb[248].mxu1 %vm1114_vm1, %v8917_v26  ;;  %12663 = vmatmul.mubr.msk.bf16.vlgmr.msra.gmra.mrb[0].mxu0 %vm1114_vm1, %v8917_v26 }
0x24ef   : > { %12667 = vmatpush3.bf16.msra.mxu1 %v13032_v24  ;;  %12675 = vmatpush3.bf16.msra.mxu0 %v13033_v25 }
0x24f0   : > { %12668 = vmatprep.subr.bf16.mxu1 %v13222_v1  ;;  %12676 = vmatprep.subr.bf16.mxu0 %v13222_v1 }
0x24f1   : > { %12670 = vmatprep.mubr.msk.bf16.mxu1 %vm13223_vm0, %v13222_v1  ;;  %12678 = vmatprep.mubr.msk.bf16.mxu0 %vm13223_vm0, %v13222_v1 }
0x24f3   : > { %12669 = vmatpush3.bf16.msra.mxu1 %v13034_v27  ;;  %12677 = vmatpush3.bf16.msra.mxu0 %v13035_v29 }
0x24f4   : > { %12682 = vmatprep.subr.bf16.mxu1 %v13222_v1  ;;  %12690 = vmatprep.subr.bf16.mxu0 %v13222_v1 }
0x24f6   : > { %12671 = vmatmul.mubr.msk.bf16.vlgmr.msra.gmra.mrb[252].mxu1 %vm1114_vm1, %v8917_v26  ;;  %12679 = vmatmul.mubr.msk.bf16.vlgmr.msra.gmra.mrb[4].mxu0 %vm1114_vm1, %v8917_v26 }
0x24f7   : > { %12683 = vmatpush3.bf16.msra.mxu1 %v13036_v53  ;;  %12691 = vmatpush3.bf16.msra.mxu0 %v13037_v30 }
0x24f8   : > { %12684 = vmatprep.subr.bf16.mxu1 %v13222_v1  ;;  %12692 = vmatprep.subr.bf16.mxu0 %v13222_v1 }
0x24f9   : > { %12686 = vmatprep.mubr.msk.bf16.mxu1 %vm13223_vm0, %v13222_v1  ;;  %12694 = vmatprep.mubr.msk.bf16.mxu0 %vm13223_vm0, %v13222_v1 }
0x24fb   : > { %12685 = vmatpush3.bf16.msra.mxu1 %v13038_v31  ;;  %12693 = vmatpush3.bf16.msra.mxu0 %v13039_v32 }
0x24fc   : > { %12698 = vmatprep.subr.bf16.mxu1 %v13222_v1  ;;  %12706 = vmatprep.subr.bf16.mxu0 %v13222_v1 }
0x24fe   : > { %12687 = vmatmul.mubr.msk.bf16.vlgmr.msra.gmra.mrb[0].mxu1 %vm1114_vm1, %v14139_v51  ;;  %12695 = vmatmul.mubr.msk.bf16.vlgmr.msra.gmra.mrb[8].mxu0 %vm1114_vm1, %v14139_v51 }
0x24ff   : > { %12699 = vmatpush3.bf16.msra.mxu1 %v13040_v34  ;;  %12707 = vmatpush3.bf16.msra.mxu0 %v13041_v35 }
0x2500   : > { %12700 = vmatprep.subr.bf16.mxu1 %v13222_v1  ;;  %12708 = vmatprep.subr.bf16.mxu0 %v13222_v1 }
0x2501   : > { %12702 = vmatprep.mubr.msk.bf16.mxu1 %vm13223_vm0, %v13222_v1  ;;  %12710 = vmatprep.mubr.msk.bf16.mxu0 %vm13223_vm0, %v13222_v1 }
0x2503   : > { %12701 = vmatpush3.bf16.msra.mxu1 %v13042_v36  ;;  %12709 = vmatpush3.bf16.msra.mxu0 %v13043_v43  ;;  %v11267_v36 = vld [vmem:[%s14812_s2 + $0x6] ss:$0 sm:$0xff]  ;;  %v11268_v43 = vld [vmem:[%s14812_s2 + $0x7] ss:$0 sm:$0xff] }
0x2504   : > { %12714 = vmatprep.subr.bf16.mxu1 %v13222_v1  ;;  %12722 = vmatprep.subr.bf16.mxu0 %v13222_v1 }
0x2506   : > { %12703 = vmatmul.mubr.msk.bf16.vlgmr.msra.gmra.mrb[4].mxu1 %vm1114_vm1, %v14139_v51  ;;  %12711 = vmatmul.mubr.msk.bf16.vlgmr.msra.gmra.mrb[12].mxu0 %vm1114_vm1, %v14139_v51 }
0x2507   : > { %12715 = vmatpush3.bf16.msra.mxu1 %v13044_v44  ;;  %12723 = vmatpush3.bf16.msra.mxu0 %v13045_v45 }
0x2508   : > { %12716 = vmatprep.subr.bf16.mxu1 %v13222_v1  ;;  %12724 = vmatprep.subr.bf16.mxu0 %v13222_v1 }
0x2509   : > { %12718 = vmatprep.mubr.msk.bf16.mxu1 %vm13223_vm0, %v13222_v1  ;;  %12726 = vmatprep.mubr.msk.bf16.mxu0 %vm13223_vm0, %v13222_v1 }
0x250b   : > { %12717 = vmatpush3.bf16.msra.mxu1 %v13046_v46  ;;  %12725 = vmatpush3.bf16.msra.mxu0 %v13047_v40  ;;  %v11297_v46 = vld [vmem:[%s14811_s1 + $0xc] ss:$0 sm:$0xff]  ;;  %v11298_v40 = vld [vmem:[%s14811_s1 + $0xd] ss:$0 sm:$0xff] }
0x250c   : > { %12730 = vmatprep.subr.bf16.mxu1 %v13222_v1  ;;  %12738 = vmatprep.subr.bf16.mxu0 %v13222_v1 }
0x250e   : > { %12719 = vmatmul.mubr.msk.bf16.vlgmr.msra.gmra.mrb[8].mxu1 %vm1114_vm1, %v14139_v51  ;;  %12727 = vmatmul.mubr.msk.bf16.vlgmr.msra.gmra.mrb[16].mxu0 %vm1114_vm1, %v14139_v51 }
0x250f   : > { %12731 = vmatpush3.bf16.msra.mxu1 %v13048_v28  ;;  %12739 = vmatpush3.bf16.msra.mxu0 %v13049_v47 }
0x2510   : > { %12732 = vmatprep.subr.bf16.mxu1 %v13222_v1  ;;  %12740 = vmatprep.subr.bf16.mxu0 %v13222_v1 }
0x2511   : > { %12734 = vmatprep.mubr.msk.bf16.mxu1 %vm13223_vm0, %v13222_v1  ;;  %12742 = vmatprep.mubr.msk.bf16.mxu0 %vm13223_vm0, %v13222_v1 }
0x2513   : > { %12733 = vmatpush3.bf16.msra.mxu1 %v13050_v41  ;;  %12741 = vmatpush3.bf16.msra.mxu0 %v13051_v48 }
0x2514   : > { %12746 = vmatprep.subr.bf16.mxu1 %v13222_v1  ;;  %12752 = vmatprep.subr.bf16.mxu0 %v13222_v1 }
0x2516   : > { %12735 = vmatmul.mubr.msk.bf16.vlgmr.msra.gmra.mrb[12].mxu1 %vm1114_vm1, %v14139_v51  ;;  %12743 = vmatmul.mubr.msk.bf16.vlgmr.msra.gmra.mrb[20].mxu0 %vm1114_vm1, %v14139_v51 }
0x2517   : > { %12748 = vmatprep.mubr.msk.bf16.mxu1 %vm13223_vm0, %v13222_v1  ;;  %12754 = vmatprep.mubr.msk.bf16.mxu0 %vm13223_vm0, %v13222_v1 }
0x25c1   : > { %v8967_v49 = vpop.f32.mrb[248].mxu1  ;;  %v9019_v50 = vpop.f32.mrb[0].mxu0 }
0x25c2   : > { %v12656_v52 = vpop.f32.mrb[249].mxu1  ;;  %v12664_v39 = vpop.f32.mrb[1].mxu0  ;;  %v9153_v22 = vadd.f32 %v11265_v18, %v8967_v49  ;;  %v9154_v23 = vadd.f32 %v11266_v19, %v9019_v50 }
0x25c3   : > { %v8970_v54 = vpop.f32.mrb[250].mxu1  ;;  %v9022_v57 = vpop.f32.mrb[2].mxu0 }
0x25c4   : > { %v12657_v58 = vpop.f32.mrb[251].mxu1  ;;  %v12665_v33 = vpop.f32.mrb[3].mxu0  ;;  %v9629_v53 = vpack.c.bf16 %v9153_v22, %v9153_v22  ;;  %v9630_v30 = vpack.c.bf16 %v9154_v23, %v9154_v23 }
0x25c9   : > { %v9071_v59 = vpop.f32.mrb[252].mxu1  ;;  %v9123_v60 = vpop.f32.mrb[4].mxu0 }
0x25ca   : > { %v12672_v61 = vpop.f32.mrb[253].mxu1  ;;  %v12680_v51 = vpop.f32.mrb[5].mxu0  ;;  %v9155_v28 = vadd.f32 %v11267_v36, %v9071_v59  ;;  %v9156_v47 = vadd.f32 %v11268_v43, %v9123_v60 }
0x25cb   : > { %v9074_v62 = vpop.f32.mrb[254].mxu1  ;;  %v9126_v63 = vpop.f32.mrb[6].mxu0 }
0x25cc   : > { %v12673_v56 = vpop.f32.mrb[255].mxu1  ;;  %v12681_v3 = vpop.f32.mrb[7].mxu0  ;;  %v9631_v58 = vpack.c.bf16 %v9155_v28, %v9155_v28  ;;  %v9632_v33 = vpack.c.bf16 %v9156_v47, %v9156_v47 }
0x25d1   : > { %v9203_v5 = vpop.f32.mrb[0].mxu1  ;;  %v9255_v6 = vpop.f32.mrb[8].mxu0 }
0x25d2   : > { %v9389_v7 = vadd.f32 %v11281_v42, %v9203_v5  ;;  %v9390_v8 = vadd.f32 %v11282_v4, %v9255_v6  ;;  %v12688_v9 = vpop.f32.mrb[1].mxu1  ;;  %v12696_v10 = vpop.f32.mrb[9].mxu0 }
0x25d3   : > { %v9206_v55 = vpop.f32.mrb[2].mxu1  ;;  %v9258_v11 = vpop.f32.mrb[10].mxu0 }
0x25d4   : > { %v9633_v12 = vpack.c.bf16 %v9389_v7, %v9389_v7  ;;  %v9634_v0 = vpack.c.bf16 %v9390_v8, %v9390_v8  ;;  %v12689_v13 = vpop.f32.mrb[3].mxu1  ;;  %v12697_v15 = vpop.f32.mrb[11].mxu0 }
0x25d6   : > { %v9641_v20 = vsel %vm1822_vm2, %v9633_v12, 0  ;;  %v9687_v38 = vsel %vm1822_vm2, %v9634_v0, 0 }
0x25d7   : > { %12747 = vmatpush3.bf16.xpose.msra.mxu1 %v9641_v20  ;;  %12753 = vmatpush3.bf16.xpose.msra.mxu0 %v9687_v38 }
0x25d8   : > { %12758 = vmatprep.subr.bf16.mxu1 %v13222_v1  ;;  %12764 = vmatprep.subr.bf16.mxu0 %v13222_v1 }
0x25d9   : > { %v9307_v2 = vpop.f32.mrb[4].mxu1  ;;  %v9359_v17 = vpop.f32.mrb[12].mxu0 }
0x25da   : > { %v9391_v16 = vadd.f32 %v11283_v21, %v9307_v2  ;;  %v9392_v24 = vadd.f32 %v11284_v14, %v9359_v17  ;;  %v12704_v25 = vpop.f32.mrb[5].mxu1  ;;  %v12712_v26 = vpop.f32.mrb[13].mxu0 }
0x25db   : > { %v9310_v27 = vpop.f32.mrb[6].mxu1  ;;  %v9362_v29 = vpop.f32.mrb[14].mxu0 }
0x25dc   : > { %v9635_v31 = vpack.c.bf16 %v9391_v16, %v9391_v16  ;;  %v9636_v32 = vpack.c.bf16 %v9392_v24, %v9392_v24  ;;  %v12705_v34 = vpop.f32.mrb[7].mxu1  ;;  %v12713_v35 = vpop.f32.mrb[15].mxu0 }
0x25de   : > { %v9733_v44 = vsel %vm1822_vm2, %v9635_v31, 0  ;;  %v9779_v45 = vsel %vm1822_vm2, %v9636_v32, 0  ;;  %12749 = vmatmul.mubr.msk.bf16.vlgmr.msra.gmra.mrb[16].mxu1 %vm1822_vm2, %v9629_v53  ;;  %12755 = vmatmul.mubr.msk.bf16.vlgmr.msra.gmra.mrb[24].mxu0 %vm1822_vm2, %v9630_v30 }
0x25df   : > { %12759 = vmatpush3.bf16.xpose.msra.mxu1 %v9733_v44  ;;  %12765 = vmatpush3.bf16.xpose.msra.mxu0 %v9779_v45 }
0x25e0   : > { %12760 = vmatprep.mubr.msk.bf16.mxu1 %vm13223_vm0, %v13222_v1  ;;  %12766 = vmatprep.mubr.msk.bf16.mxu0 %vm13223_vm0, %v13222_v1 }
0x25e1   : > { %v9439_v41 = vpop.f32.mrb[8].mxu1  ;;  %v9491_v48 = vpop.f32.mrb[16].mxu0  ;;  %12770 = vmatprep.subr.bf16.mxu1 %v13222_v1  ;;  %12776 = vmatprep.subr.bf16.mxu0 %v13222_v1 }
0x25e2   : > { %v9625_v49 = vadd.f32 %v11297_v46, %v9439_v41  ;;  %v9626_v50 = vadd.f32 %v11298_v40, %v9491_v48  ;;  %v12720_v52 = vpop.f32.mrb[9].mxu1  ;;  %v12728_v39 = vpop.f32.mrb[17].mxu0 }
0x25e3   : > { %v9442_v54 = vpop.f32.mrb[10].mxu1  ;;  %v9494_v57 = vpop.f32.mrb[18].mxu0 }
0x25e4   : > { %v9873_v59 = vpack.c.bf16 %v9625_v49, %v9625_v49  ;;  %v9874_v60 = vpack.c.bf16 %v9626_v50, %v9626_v50  ;;  %v12721_v61 = vpop.f32.mrb[11].mxu1  ;;  %v12729_v51 = vpop.f32.mrb[19].mxu0 }
0x25e6   : > { %v9881_v62 = vsel %vm2066_vm3, %v9873_v59, 0  ;;  %v9927_v63 = vsel %vm2066_vm3, %v9874_v60, 0  ;;  %12761 = vmatmul.mubr.msk.bf16.vlgmr.msra.gmra.mrb[20].mxu1 %vm1822_vm2, %v9631_v58  ;;  %12767 = vmatmul.mubr.msk.bf16.vlgmr.msra.gmra.mrb[28].mxu0 %vm1822_vm2, %v9632_v33  ;;  %v11299_v58 = vld [vmem:[%s14811_s1 + $0xe] ss:$0 sm:$0xff]  ;;  %v11300_v33 = vld [vmem:[%s14811_s1 + $0xf] ss:$0 sm:$0xff]  ;;  %s1026_s1 = scalar_lea.vmem %s13398_s4, %s13420_s0 }
0x25e7   : > { %12771 = vmatpush3.bf16.msra.mxu1 %v9881_v62  ;;  %12777 = vmatpush3.bf16.msra.mxu0 %v9927_v63 }
0x25e8   : > { %12772 = vmatprep.mubr.msk.bf16.mxu1 %vm13223_vm0, %v13222_v1  ;;  %12778 = vmatprep.mubr.msk.bf16.mxu0 %vm13223_vm0, %v13222_v1 }
0x25e9   : > { %v14655_v56 = vpop.f32.mrb[12].mxu1  ;;  %v14657_v3 = vpop.f32.mrb[20].mxu0  ;;  %12782 = vmatprep.subr.bf16.mxu1 %v13222_v1  ;;  %12788 = vmatprep.subr.bf16.mxu0 %v13222_v1 }
0x25ea   : > { %v12736_v42 = vpop.f32.mrb[13].mxu1  ;;  %v12744_v4 = vpop.f32.mrb[21].mxu0  ;;  %v9627_v59 = vadd.f32 %v11299_v58, %v14655_v56  ;;  %v9628_v61 = vadd.f32 %v11300_v33, %v14657_v3 }
0x25eb   : > { %v9546_v5 = vpop.f32.mrb[14].mxu1  ;;  %v9598_v6 = vpop.f32.mrb[22].mxu0 }
0x25ec   : > { %v12737_v7 = vpop.f32.mrb[15].mxu1  ;;  %v12745_v8 = vpop.f32.mrb[23].mxu0  ;;  %v9875_v42 = vpack.c.bf16 %v9627_v59, %v9627_v59  ;;  %v9876_v5 = vpack.c.bf16 %v9628_v61, %v9628_v61 }
0x25ee   : > { %v10019_v56 = vsel %vm2066_vm3, %v9876_v5, 0 }
0x26b1   : > { %v9677_v9 = vpop.f32.mrb[16].mxu1  ;;  %v9723_v10 = vpop.f32.mrb[24].mxu0 }
0x26b2   : > { %v9821_v55 = vmul.f32 0.35355338, %v9677_v9  ;;  %v9822_v11 = vmul.f32 0.35355338, %v9723_v10  ;;  %v12750_v12 = vpop.f32.mrb[17].mxu1  ;;  %v12756_v0 = vpop.f32.mrb[25].mxu0 }
0x26b3   : > { %v9680_v13 = vpop.f32.mrb[18].mxu1  ;;  %v9726_v15 = vpop.f32.mrb[26].mxu0  ;;  %v9973_v9 = vsel %vm2066_vm3, %v9875_v42, 0  ;;  %v11248_v10 = vld [vmem:[%s14813_s10 + $0x10] sm:$0xf] }
0x26b4   : > { %v12751_v18 = vpop.f32.mrb[19].mxu1  ;;  %v12757_v19 = vpop.f32.mrb[27].mxu0  ;;  %v9825_v20 = vsel %vm1822_vm2, %v9821_v55, -inf  ;;  %v9828_v38 = vsel %vm1822_vm2, %v9822_v11, -inf  ;;  %v11249_v12 = vld [vmem:[%s14813_s10 + $0x14] sm:$0xf] }
0x26b5   : > { %9826 = vmax.xlane.f32.xlu0 %v9825_v20  ;;  %9829 = vmax.xlane.f32.xlu1 %v9828_v38  ;;  %v10069_v15 = vsel %vm2066_vm3, %v11248_v10, 0  ;;  %v10115_v19 = vsel %vm2066_vm3, %v11249_v12, 0  ;;  %v11250_v20 = vld [vmem:[%s14813_s10 + $0x18] sm:$0xf]  ;;  %v11251_v38 = vld [vmem:[%s14813_s10 + $0x1c] sm:$0xf] }
0x26b6   : > { %v13052_v12 = vld [vmem:[%s14815_s15 + $0x10] sm:$0xff]  }
0x26b9   : > { %v9769_v21 = vpop.f32.mrb[20].mxu1  ;;  %v9815_v14 = vpop.f32.mrb[28].mxu0 }
0x26ba   : > { %v9823_v22 = vmul.f32 0.35355338, %v9769_v21  ;;  %v9824_v23 = vmul.f32 0.35355338, %v9815_v14  ;;  %v12762_v2 = vpop.f32.mrb[21].mxu1  ;;  %v12768_v17 = vpop.f32.mrb[29].mxu0 }
0x26bb   : > { %v9772_v16 = vpop.f32.mrb[22].mxu1  ;;  %v9818_v24 = vpop.f32.mrb[30].mxu0  ;;  %v10161_v2 = vsel %vm2066_vm3, %v11250_v20, 0 }
0x26bc   : > { %v12763_v25 = vpop.f32.mrb[23].mxu1  ;;  %v12769_v26 = vpop.f32.mrb[31].mxu0  ;;  %v9831_v27 = vsel %vm1822_vm2, %v9823_v22, -inf  ;;  %v9834_v29 = vsel %vm1822_vm2, %v9824_v23, -inf }
0x26bd   : > { %9832 = vmax.xlane.f32.xlu0 %v9831_v27  ;;  %9835 = vmax.xlane.f32.xlu1 %v9834_v29  ;;  %v10207_v25 = vsel %vm2066_vm3, %v11251_v38, 0  ;;  %v11316_v38 = vld [vmem:[%s14817_s5 + $0x2] ss:$0 sm:$0xff] }
0x2742   : > { %v9827_v53 = vpop.xlane.xlu0 %9826  ;;  %v9830_v30 = vpop.xlane.xlu1 %9829 }
0x2743   : > { %v9837_v31 = vsub.f32 %v9821_v55, %v9827_v53  ;;  %v9838_v32 = vsub.f32 %v9822_v11, %v9830_v30 }
0x2745   : > { %v9841_v34 = vmul.f32 1.442695, %v9837_v31  ;;  %v9843_v35 = vmul.f32 1.442695, %v9838_v32 }
0x2747   : > { %13158 = vpow2.f32 %v9841_v34 }
0x2748   : > { %13160 = vpow2.f32 %v9843_v35 }
0x274a   : > { %v9833_v36 = vpop.xlane.xlu0 %9832  ;;  %v9836_v43 = vpop.xlane.xlu1 %9835 }
0x274b   : > { %v9839_v44 = vsub.f32 %v9823_v22, %v9833_v36  ;;  %v9840_v45 = vsub.f32 %v9824_v23, %v9836_v43 }
0x274d   : > { %v9845_v46 = vmul.f32 1.442695, %v9839_v44  ;;  %v9847_v40 = vmul.f32 1.442695, %v9840_v45 }
0x274f   : > { %13162 = vpow2.f32 %v9845_v46 }
0x2750   : > { %13164 = vpow2.f32 %v9847_v40 }
0x2751   : > { %v13159_v28 = vpop.eup %13158 }
0x2752   : > { %v13161_v47 = vpop.eup %13160  ;;  %v9849_v41 = vsel %vm1822_vm2, %v13159_v28, 0.0 }
0x2753   : > { %9850 = vadd.xlane.f32.xlu0 %v9849_v41  ;;  %v9852_v48 = vsel %vm1822_vm2, %v13161_v47, 0.0 }
0x2754   : > { %9853 = vadd.xlane.f32.xlu1 %v9852_v48 }
0x2759   : > { %v13163_v49 = vpop.eup %13162 }
0x275a   : > { %v13165_v50 = vpop.eup %13164  ;;  %v9855_v52 = vsel %vm1822_vm2, %v13163_v49, 0.0 }
0x275b   : > { %9856 = vadd.xlane.f32.xlu0 %v9855_v52  ;;  %v9858_v39 = vsel %vm1822_vm2, %v13165_v50, 0.0 }
0x275c   : > { %9859 = vadd.xlane.f32.xlu1 %v9858_v39 }
0x27e0   : > { %v9851_v54 = vpop.xlane.xlu0 %9850 }
0x27e1   : > { %13166 = vrcp.f32 %v9851_v54  ;;  %v9854_v57 = vpop.xlane.xlu1 %9853 }
0x27e2   : > { %13168 = vrcp.f32 %v9854_v57 }
0x27e8   : > { %v9857_v60 = vpop.xlane.xlu0 %9856 }
0x27e9   : > { %13170 = vrcp.f32 %v9857_v60  ;;  %v9860_v51 = vpop.xlane.xlu1 %9859 }
0x27ea   : > { %13172 = vrcp.f32 %v9860_v51 }
0x27eb   : > { %v13167_v62 = vpop.eup %13166 }
0x27ec   : > { %v13169_v63 = vpop.eup %13168  ;;  %v9865_v4 = vmul.f32 %v13167_v62, %v13159_v28  ;;  %v11313_v62 = vld [vmem:[%s14814_s11 + $0x1] ss:$0 sm:$0xff] }
0x27ed   : > { %v9866_v6 = vmul.f32 %v13169_v63, %v13161_v47 }
0x27ee   : > { %v9869_v7 = vpack.c.bf16 %v9865_v4, %v9865_v4 }
0x27ef   : > { %v9870_v8 = vpack.c.bf16 %v9866_v6, %v9866_v6 }
0x27f0   : > { %12773 = vmatmul.mubr.msk.bf16.vlgmr.msra.gmra.mrb[24].mxu1 %vm1822_vm2, %v9869_v7 }
0x27f1   : > { %12779 = vmatmul.mubr.msk.bf16.vlgmr.msra.gmra.mrb[32].mxu0 %vm1822_vm2, %v9870_v8  ;;  %12783 = vmatpush3.bf16.msra.mxu1 %v9973_v9 }
0x27f2   : > { %12789 = vmatpush3.bf16.msra.mxu0 %v10019_v56  ;;  %12784 = vmatprep.mubr.msk.bf16.mxu1 %vm13223_vm0, %v13222_v1 }
0x27f3   : > { %v13171_v3 = vpop.eup %13170  ;;  %12790 = vmatprep.mubr.msk.bf16.mxu0 %vm13223_vm0, %v13222_v1  ;;  %12794 = vmatprep.subr.bf16.mxu1 %v13222_v1 }
0x27f4   : > { %v13173_v55 = vpop.eup %13172  ;;  %v9867_v11 = vmul.f32 %v13171_v3, %v13163_v49  ;;  %12800 = vmatprep.subr.bf16.mxu0 %v13222_v1 }
0x27f5   : > { %v9868_v0 = vmul.f32 %v13173_v55, %v13165_v50 }
0x27f6   : > { %v9871_v13 = vpack.c.bf16 %v9867_v11, %v9867_v11 }
0x27f7   : > { %v9872_v18 = vpack.c.bf16 %v9868_v0, %v9868_v0  ;;  %v13053_v0 = vld [vmem:[%s14815_s15 + $0x18] sm:$0xff]  }
0x27f8   : > { %12785 = vmatmul.mubr.msk.bf16.vlgmr.msra.gmra.mrb[28].mxu1 %vm1822_vm2, %v9871_v13  ;;  %v13055_v13 = vld [vmem:[%s14816_s3 + $0x28] sm:$0xff]  }
0x27f9   : > { %12791 = vmatmul.mubr.msk.bf16.vlgmr.msra.gmra.mrb[36].mxu0 %vm1822_vm2, %v9872_v18  ;;  %12795 = vmatpush3.bf16.msra.mxu1 %v10069_v15 }
0x27fa   : > { %12801 = vmatpush3.bf16.msra.mxu0 %v10115_v19  ;;  %12796 = vmatprep.mubr.msk.bf16.mxu1 %vm13223_vm0, %v13222_v1 }
0x27fb   : > { %12802 = vmatprep.mubr.msk.bf16.mxu0 %vm13223_vm0, %v13222_v1  ;;  %12806 = vmatprep.subr.bf16.mxu1 %v13222_v1 }
0x27fc   : > { %12812 = vmatprep.subr.bf16.mxu0 %v13222_v1 }
0x28c3   : > { %v9917_v21 = vpop.f32.mrb[24].mxu1 }
0x28c4   : > { %v10061_v14 = vpack.c.bf16 %v9917_v21, %v9917_v21  ;;  %v9963_v22 = vpop.f32.mrb[32].mxu0  ;;  %v12774_v23 = vpop.f32.mrb[25].mxu1 }
0x28c5   : > { %v10062_v17 = vpack.c.bf16 %v9963_v22, %v9963_v22  ;;  %v12780_v16 = vpop.f32.mrb[33].mxu0  ;;  %v9920_v24 = vpop.f32.mrb[26].mxu1 }
0x28c6   : > { %v9966_v26 = vpop.f32.mrb[34].mxu0  ;;  %v12775_v27 = vpop.f32.mrb[27].mxu1  ;;  %12797 = vmatmul.mubr.msk.bf16.vlgmr.msra.gmra.mrb[32].mxu1 %vm1822_vm2, %v10061_v14  ;;  %v11317_v14 = vld [vmem:[%s14817_s5 + $0x3] ss:$0 sm:$0xff]  ;;  %v13057_v16 = vld [vmem:[%s14816_s3 + $0x38] sm:$0xff]  }
0x28c7   : > { %v12781_v29 = vpop.f32.mrb[35].mxu0  ;;  %12803 = vmatmul.mubr.msk.bf16.vlgmr.msra.gmra.mrb[40].mxu0 %vm1822_vm2, %v10062_v17  ;;  %12807 = vmatpush3.bf16.msra.mxu1 %v10161_v2  ;;  %v13056_v17 = vld [vmem:[%s14816_s3 + $0x30] sm:$0xff]   ;;  %v11323_v24 = vld [vmem:[%s14818_s8 + $0x1] ss:$0 sm:$0xff] }
0x28c8   : > { %12813 = vmatpush3.bf16.msra.mxu0 %v10207_v25  ;;  %12808 = vmatprep.mubr.msk.bf16.mxu1 %vm13223_vm0, %v13222_v1 }
0x28c9   : > { %12814 = vmatprep.mubr.msk.bf16.mxu0 %vm13223_vm0, %v13222_v1  ;;  %12818 = vmatprep.subr.bf16.mxu1 %v13222_v1 }
0x28ca   : > { %12826 = vmatprep.subr.bf16.mxu0 %v13222_v1 }
0x28cb   : > { %v10009_v53 = vpop.f32.mrb[28].mxu1 }
0x28cc   : > { %v10063_v30 = vpack.c.bf16 %v10009_v53, %v10009_v53  ;;  %v10055_v31 = vpop.f32.mrb[36].mxu0  ;;  %v12786_v32 = vpop.f32.mrb[29].mxu1 }
0x28cd   : > { %v10064_v34 = vpack.c.bf16 %v10055_v31, %v10055_v31  ;;  %v12792_v35 = vpop.f32.mrb[37].mxu0  ;;  %v10012_v36 = vpop.f32.mrb[30].mxu1  ;;  %v11336_v32 = vld [vmem:[%s14819_s9 + $0x1] ss:$0 sm:$0xff] }
0x28ce   : > { %v10058_v43 = vpop.f32.mrb[38].mxu0  ;;  %v12787_v44 = vpop.f32.mrb[31].mxu1  ;;  %12809 = vmatmul.mubr.msk.bf16.vlgmr.msra.gmra.mrb[36].mxu1 %vm1822_vm2, %v10063_v30 }
0x28cf   : > { %v12793_v45 = vpop.f32.mrb[39].mxu0  ;;  %12815 = vmatmul.mubr.msk.bf16.vlgmr.msra.gmra.mrb[44].mxu0 %vm1822_vm2, %v10064_v34  ;;  %12822 = vmatprep.mubr.msk.bf16.mxu1 %vm13223_vm0, %v13222_v1 }
0x28d0   : > { %12834 = vmatprep.mubr.msk.bf16.mxu0 %vm13223_vm0, %v13222_v1  ;;  %12819 = vmatpush3.bf16.msra.mxu1 %v13052_v12 }
0x28d1   : > { %12820 = vmatprep.subr.bf16.mxu1 %v13222_v1 }
0x28d4   : > { %12821 = vmatpush3.bf16.msra.mxu1 %v13053_v0  ;;  %v11349_v0 = vld [vmem:[%s13393_s27] ss:$0 sm:$0xff] }
0x28d5   : > { %12838 = vmatprep.subr.bf16.mxu1 %v13222_v1 }
0x2999   : > { %v10105_v46 = vpop.f32.mrb[32].mxu1 }
0x299a   : > { %v10249_v40 = vsel %vm1114_vm1, %v10105_v46, 0.0  ;;  %v10151_v28 = vpop.f32.mrb[40].mxu0  ;;  %v12798_v47 = vpop.f32.mrb[33].mxu1 }
0x299b   : > { %v10250_v41 = vsel %vm1114_vm1, %v10151_v28, 0.0  ;;  %v12804_v48 = vpop.f32.mrb[41].mxu0  ;;  %v10108_v49 = vpop.f32.mrb[34].mxu1 }
0x299c   : > { %v10251_v50 = vadd.f32 %v10250_v41, %v10249_v40  ;;  %v10154_v52 = vpop.f32.mrb[42].mxu0  ;;  %v12799_v39 = vpop.f32.mrb[35].mxu1 }
0x299d   : > { %v12805_v54 = vpop.f32.mrb[43].mxu0 }
0x299e   : > { %v11344_v54 = vld [vmem:[%s14820_s13 + $0x2] ss:$0 sm:$0xff] }
0x29a1   : > { %v10197_v57 = vpop.f32.mrb[36].mxu1 }
0x29a2   : > { %v10252_v58 = vsel %vm1114_vm1, %v10197_v57, 0.0  ;;  %v10243_v33 = vpop.f32.mrb[44].mxu0  ;;  %v12810_v59 = vpop.f32.mrb[37].mxu1 }
0x29a3   : > { %v10253_v60 = vadd.f32 %v10252_v58, %v10251_v50  ;;  %v12816_v61 = vpop.f32.mrb[45].mxu0  ;;  %v10200_v51 = vpop.f32.mrb[38].mxu1  ;;  %v10254_v63 = vsel %vm1114_vm1, %v10243_v33, 0.0  ;;  %v11345_v58 = vld [vmem:[%s14820_s13 + $0x3] ss:$0 sm:$0xff] }
0x29a4   : > { %v10246_v42 = vpop.f32.mrb[46].mxu0  ;;  %v12811_v4 = vpop.f32.mrb[39].mxu1 }
0x29a5   : > { %v10255_v5 = vadd.f32 %v10254_v63, %v10253_v60  ;;  %v12817_v6 = vpop.f32.mrb[47].mxu0  ;;  %v13058_v4 = vld [vmem:[%s13388_s20] sm:$0xff]  }
0x29a7   : > { %v10262_v7 = vadd.f32 %v11313_v62, %v10255_v5  ;;  %v13059_v5 = vld [vmem:[%s13388_s20 + $0x8] sm:$0xff]  }
0x29a9   : > { %v10266_v8 = vadd.f32 %v10262_v7, %v14535_v37  ;;  %v13054_v37 = vld [vmem:[%s14816_s3 + $0x20] sm:$0xff]  }
0x29aa   : > { %12827 = vmatpush3.bf16.msra.mxu0 %v13054_v37 }
0x29ab   : > { %v10267_v9 = vsel %vm1114_vm1, %v10266_v8, 0.0  ;;  %12828 = vmatprep.subr.bf16.mxu0 %v13222_v1 }
0x29ac   : > { %10268 = vadd.xlane.f32.xlu0 %v10267_v9 }
0x29ae   : > { %12829 = vmatpush3.bf16.msra.mxu0 %v13055_v13 }
0x29af   : > { %12830 = vmatprep.subr.bf16.mxu0 %v13222_v1 }
0x29b2   : > { %12831 = vmatpush3.bf16.msra.mxu0 %v13056_v17 }
0x29b3   : > { %12832 = vmatprep.subr.bf16.mxu0 %v13222_v1 }
0x29b6   : > { %12833 = vmatpush3.bf16.msra.mxu0 %v13057_v16 }
0x2a39   : > { %v10269_v56 = vpop.xlane.xlu0 %10268 }
0x2a3a   : > { %v10270_v3 = vmul.f32 0.03125, %v10269_v56  ;;  %v11347_v56 = vld [vmem:[%s13383_s30] ss:$0 sm:$0xff] }
0x2a3c   : > { %v10271_v10 = vsub.f32 %v10266_v8, %v10270_v3 }
0x2a3e   : > { %v10272_v55 = vmul.f32 %v10271_v10, %v10271_v10 }
0x2a40   : > { %v10273_v11 = vsel %vm1114_vm1, %v10272_v55, 0.0 }
0x2a41   : > { %10274 = vadd.xlane.f32.xlu1 %v10273_v11 }
0x2ace   : > { %v10275_v15 = vpop.xlane.xlu1 %10274 }
0x2acf   : > { %v10276_v18 = vmul.f32 0.03125, %v10275_v15 }
0x2ad1   : > { %v10277_v19 = vadd.f32 1e-05, %v10276_v18 }
0x2ad3   : > { %13174 = vrsqrt.f32 %v10277_v19 }
0x2add   : > { %v13175_v20 = vpop.eup %13174 }
0x2ade   : > { %v10279_v21 = vmul.f32 %v13175_v20, %v10271_v10  ;;  %v11348_v10 = vld [vmem:[%s13383_s30 + $0x1] ss:$0 sm:$0xff] }
0x2ae0   : > { %v10286_v22 = vmul.f32 %v11316_v38, %v10279_v21 }
0x2ae2   : > { %v10293_v23 = vadd.f32 %v11317_v14, %v10286_v22 }
0x2ae4   : > { %v10301_v2 = vpack.c.bf16 %v10293_v23, %v10293_v23 }
0x2ae6   : > { %12823 = vmatmul.mubr.msk.bf16.vlgmr.msra.gmra.mrb[40].mxu1 %vm1114_vm1, %v10301_v2 }
0x2ae7   : > { %12842 = vmatprep.mubr.msk.bf16.mxu1 %vm13223_vm0, %v13222_v1  ;;  %12839 = vmatpush3.bf16.msra.mxu1 %v13058_v4 }
0x2ae8   : > { %12840 = vmatprep.subr.bf16.mxu1 %v13222_v1 }
0x2aeb   : > { %12841 = vmatpush3.bf16.msra.mxu1 %v13059_v5 }
0x2bb9   : > { %v10357_v25 = vpop.f32.mrb[40].mxu1 }
0x2bba   : > { %v10358_v26 = vadd.f32 %v11323_v24, %v10357_v25  ;;  %v12824_v27 = vpop.f32.mrb[41].mxu1 }
0x2bbb   : > { %v10360_v29 = vpop.f32.mrb[42].mxu1 }
0x2bbc   : > { %v10363_v53 = vmax.f32 %v10358_v26, 0.0  ;;  %v12825_v30 = vpop.f32.mrb[43].mxu1 }
0x2bbe   : > { %v10375_v31 = vpack.c.bf16 %v10363_v53, %v10363_v53 }
0x2bc0   : > { %12835 = vmatmul.mubr.msk.bf16.vlgmr.msra.gmra.mrb[48].mxu0 %vm2589_vm4, %v10375_v31 }
0x2c93   : > { %v10443_v34 = vpop.f32.mrb[48].mxu0 }
0x2c94   : > { %v10444_v35 = vadd.f32 %v11336_v32, %v10443_v34  ;;  %v12836_v36 = vpop.f32.mrb[49].mxu0 }
0x2c95   : > { %v10446_v43 = vpop.f32.mrb[50].mxu0 }
0x2c96   : > { %v12837_v44 = vpop.f32.mrb[51].mxu0  ;;  %v10452_v45 = vadd.f32 %v10444_v35, %v10293_v23 }
0x2c98   : > { %v10453_v46 = vsel %vm1114_vm1, %v10452_v45, 0.0 }
0x2c99   : > { %10454 = vadd.xlane.f32.xlu0 %v10453_v46 }
0x2d26   : > { %v10455_v40 = vpop.xlane.xlu0 %10454 }
0x2d27   : > { %v10456_v28 = vmul.f32 0.03125, %v10455_v40 }
0x2d29   : > { %v10457_v47 = vsub.f32 %v10452_v45, %v10456_v28 }
0x2d2b   : > { %v10458_v41 = vmul.f32 %v10457_v47, %v10457_v47 }
0x2d2d   : > { %v10459_v48 = vsel %vm1114_vm1, %v10458_v41, 0.0 }
0x2d2e   : > { %10460 = vadd.xlane.f32.xlu1 %v10459_v48 }
0x2dbb   : > { %v10461_v49 = vpop.xlane.xlu1 %10460 }
0x2dbc   : > { %v10462_v50 = vmul.f32 0.03125, %v10461_v49 }
0x2dbe   : > { %v10463_v52 = vadd.f32 1e-05, %v10462_v50 }
0x2dc0   : > { %13176 = vrsqrt.f32 %v10463_v52 }
0x2dca   : > { %v13177_v39 = vpop.eup %13176 }
0x2dcb   : > { %v10465_v57 = vmul.f32 %v13177_v39, %v10457_v47 }
0x2dcd   : > { %v10472_v33 = vmul.f32 %v11344_v54, %v10465_v57 }
0x2dcf   : > { %v10479_v59 = vadd.f32 %v11345_v58, %v10472_v33 }
0x2dd1   : > { %v10483_v60 = vsel %vm1114_vm1, %v10479_v59, 0.0 }
0x2dd2   : > { %10484 = vadd.xlane.f32.xlu0 %v10483_v60 }
0x2e5f   : > { %v10485_v61 = vpop.xlane.xlu0 %10484 }
0x2e60   : > { %v10486_v51 = vmul.f32 0.03125, %v10485_v61 }
0x2e62   : > { %v10487_v62 = vsub.f32 %v10479_v59, %v10486_v51 }
0x2e64   : > { %v10488_v63 = vmul.f32 %v10487_v62, %v10487_v62 }
0x2e66   : > { %v10489_v42 = vsel %vm1114_vm1, %v10488_v63, 0.0 }
0x2e67   : > { %10490 = vadd.xlane.f32.xlu1 %v10489_v42 }
0x2ef4   : > { %v10491_v6 = vpop.xlane.xlu1 %10490 }
0x2ef5   : > { %v10492_v7 = vmul.f32 0.03125, %v10491_v6 }
0x2ef7   : > { %v10493_v8 = vadd.f32 1e-05, %v10492_v7 }
0x2ef9   : > { %13178 = vrsqrt.f32 %v10493_v8 }
0x2f03   : > { %v13179_v9 = vpop.eup %13178 }
0x2f04   : > { %v10495_v3 = vmul.f32 %v13179_v9, %v10487_v62 }
0x2f06   : > { %v10502_v55 = vmul.f32 %v11347_v56, %v10495_v3 }
0x2f08   : > { %v10509_v11 = vadd.f32 %v11348_v10, %v10502_v55 }
0x2f0a   : > { %v10515_v12 = vpack.c.bf16 %v10509_v11, %v10509_v11 }
0x2f0c   : > { %12843 = vmatmul.mubr.msk.bf16.vlgmr.msra.gmra.mrb[44].mxu1 %vm1114_vm1, %v10515_v12 }
0x2fdf   : > { %v10571_v1 = vpop.f32.mrb[44].mxu1 }
0x2fe0   : > { %v10572_v37 = vadd.f32 %v11349_v0, %v10571_v1  ;;  %v12844_v13 = vpop.f32.mrb[45].mxu1 }
0x2fe1   : > { %v10574_v15 = vpop.f32.mrb[46].mxu1 }
0x2fe2   : > { %10577 = vst [vmem:[%s1026_s1] sm:$0xff] %v10572_v37  ;;  %v12845_v18 = vpop.f32.mrb[47].mxu1 }
0x2fe3 PF: > { %s77_s7 = sadd.s32 1, %s13187_s7  }
0x2fe4   : > { %p74_p4 = scmp.ge.s32.totalorder %s77_s7, 4  }
0x2fe6   :  { %76 = sbr.rel (!%p74_p4) target bundleno = 60 (0x3c), region = 247 }

</bundles_post_ra>
